<compile_context>
chip_gen: v6e
topology: v6e:2x2x1
jax: 0.10.0
libtpu: 0.0.40
codegen_flags: <defaults>
</compile_context>

<pallas_src>
import functools
import math

import jax
import jax.numpy as jnp
from jax import lax
from jax.experimental import pallas as pl
from jax.experimental.pallas import tpu as pltpu


# ---------------------------------------------------------------------------
# Path A: single-tile fused kernel for small problems (no grid, exact softmax).
# ---------------------------------------------------------------------------
def _fused_small_kernel(x_ref, wq_ref, bq_ref, wk_ref, bk_ref, wv_ref, bv_ref,
                        o_ref, *, scale):
    x = x_ref[...]
    q = (jnp.dot(x, wq_ref[...], preferred_element_type=jnp.float32)
         + bq_ref[...]) * scale
    k = jnp.dot(x, wk_ref[...], preferred_element_type=jnp.float32) + bk_ref[...]
    v = jnp.dot(x, wv_ref[...], preferred_element_type=jnp.float32) + bv_ref[...]

    # scores = (Q * 1/sqrt(d)) @ K^T, contracting feature dims (no explicit transpose).
    s = lax.dot_general(q.astype(jnp.bfloat16), k.astype(jnp.bfloat16),
                        (((1,), (1,)), ((), ())),
                        preferred_element_type=jnp.float32)

    m = jnp.max(s, axis=-1, keepdims=True)
    p = jnp.exp(s - m)
    denom = jnp.sum(p, axis=-1, keepdims=True)
    p = p * pl.reciprocal(denom, approx=True)
    # TODO(synk): dropout on attention probabilities skipped (training=False semantics).
    o_ref[...] = jnp.dot(p.astype(jnp.bfloat16), v.astype(jnp.bfloat16),
                         preferred_element_type=jnp.float32).astype(o_ref.dtype)


# ---------------------------------------------------------------------------
# Path B, phase 1: Q/K/V projection prologue (runs once over N; Q pre-scaled).
# ---------------------------------------------------------------------------
def _proj_kernel(x_ref, wq_ref, bq_ref, wk_ref, bk_ref, wv_ref, bv_ref,
                 q_ref, k_ref, v_ref, *, scale):
    x = x_ref[...]
    q = (jnp.dot(x, wq_ref[...], preferred_element_type=jnp.float32)
         + bq_ref[...]) * scale
    q_ref[...] = q.astype(q_ref.dtype)
    k = jnp.dot(x, wk_ref[...], preferred_element_type=jnp.float32) + bk_ref[...]
    k_ref[...] = k.astype(k_ref.dtype)
    v = jnp.dot(x, wv_ref[...], preferred_element_type=jnp.float32) + bv_ref[...]
    v_ref[...] = v.astype(v_ref.dtype)


# ---------------------------------------------------------------------------
# Path B, phase 2: flash-style attention over precomputed bf16 Q/K/V.
# ---------------------------------------------------------------------------
def _flash_attn_kernel(q_ref, k_ref, v_ref, o_ref, m_sc, l_sc, acc_sc):
    ki = pl.program_id(1)

    @pl.when(ki == 0)
    def _init():
        m_sc[...] = jnp.full(m_sc.shape, -jnp.inf, dtype=m_sc.dtype)
        l_sc[...] = jnp.zeros(l_sc.shape, l_sc.dtype)
        acc_sc[...] = jnp.zeros(acc_sc.shape, acc_sc.dtype)

    # scores[tq, tk]: Q is already scaled; contract feature dims (no explicit K^T).
    s = lax.dot_general(q_ref[...], k_ref[...], (((1,), (1,)), ((), ())),
                        preferred_element_type=jnp.float32)

    # Online softmax update (f32 exp; safe on all TPU generations).
    m_prev = m_sc[...]
    m_new = jnp.maximum(m_prev, jnp.max(s, axis=-1, keepdims=True))
    alpha = jnp.exp(m_prev - m_new)
    p = jnp.exp(s - m_new)
    l_sc[...] = alpha * l_sc[...] + jnp.sum(p, axis=-1, keepdims=True)
    acc_sc[...] = alpha * acc_sc[...] + jnp.dot(
        p.astype(jnp.bfloat16), v_ref[...], preferred_element_type=jnp.float32)
    m_sc[...] = m_new

    # TODO(synk): dropout on attention probs skipped (inference / training=False).

    @pl.when(ki == pl.num_programs(1) - 1)
    def _finalize():
        o_ref[...] = (acc_sc[...]
                      * pl.reciprocal(l_sc[...], approx=True)).astype(o_ref.dtype)


def _tile(n, target):
    t = min(target, n)
    if n % t == 0:
        return t
    if n % 128 == 0:
        return 128
    return n


def self_attention(x, wq, bq, wk, bk, wv, bv, *, tq=256, tk=256,
                   force_flash=False):
    """x: [N, in_features]; wq/wk/wv: [in_features, out_features] (pre-transposed);
    bq/bk/bv: [1, out_features]. Returns [N, out_features] float32."""
    n, d_in = x.shape
    d_out = wq.shape[1]
    scale = 1.0 / math.sqrt(d_out)

    # bf16 MXU inputs (f32 accumulation inside kernels); biases stay f32.
    x_bf = x.astype(jnp.bfloat16)
    wq_bf = wq.astype(jnp.bfloat16)
    wk_bf = wk.astype(jnp.bfloat16)
    wv_bf = wv.astype(jnp.bfloat16)
    bq_f = bq.astype(jnp.float32)
    bk_f = bk.astype(jnp.float32)
    bv_f = bv.astype(jnp.float32)

    # ---- Path A: overhead-free single-tile kernel when everything fits VMEM. ----
    approx_bytes = (n * n * 4                     # full scores
                    + n * (d_in + 4 * d_out) * 4  # x + q/k/v/out
                    + 3 * d_in * d_out * 2)       # weights
    if not force_flash and approx_bytes <= 8 * 1024 * 1024:
        kern = functools.partial(_fused_small_kernel, scale=scale)
        return pl.pallas_call(
            kern,
            out_shape=jax.ShapeDtypeStruct((n, d_out), jnp.float32),
        )(x_bf, wq_bf, bq_f, wk_bf, bk_f, wv_bf, bv_f)

    # ---- Path B: projection prologue + flash attention. ----
    tp = _tile(n, 256)
    tq = _tile(n, tq)
    tk = _tile(n, tk)

    proj = pl.pallas_call(
        functools.partial(_proj_kernel, scale=scale),
        grid_spec=pltpu.PrefetchScalarGridSpec(
            num_scalar_prefetch=0,
            grid=(n // tp,),
            in_specs=[
                pl.BlockSpec((tp, d_in), lambda i: (i, 0)),
                # Weights / biases: constant block -> VMEM-resident across the grid.
                pl.BlockSpec((d_in, d_out), lambda i: (0, 0)),
                pl.BlockSpec((1, d_out), lambda i: (0, 0)),
                pl.BlockSpec((d_in, d_out), lambda i: (0, 0)),
                pl.BlockSpec((1, d_out), lambda i: (0, 0)),
                pl.BlockSpec((d_in, d_out), lambda i: (0, 0)),
                pl.BlockSpec((1, d_out), lambda i: (0, 0)),
            ],
            out_specs=[
                pl.BlockSpec((tp, d_out), lambda i: (i, 0)),
                pl.BlockSpec((tp, d_out), lambda i: (i, 0)),
                pl.BlockSpec((tp, d_out), lambda i: (i, 0)),
            ],
        ),
        out_shape=(
            jax.ShapeDtypeStruct((n, d_out), jnp.bfloat16),  # Q (pre-scaled)
            jax.ShapeDtypeStruct((n, d_out), jnp.bfloat16),  # K
            jax.ShapeDtypeStruct((n, d_out), jnp.bfloat16),  # V
        ),
        compiler_params=pltpu.CompilerParams(
            dimension_semantics=("parallel",)),
    )
    q_bf, k_bf, v_bf = proj(x_bf, wq_bf, bq_f, wk_bf, bk_f, wv_bf, bv_f)

    attn = pl.pallas_call(
        _flash_attn_kernel,
        grid_spec=pltpu.PrefetchScalarGridSpec(
            num_scalar_prefetch=0,
            grid=(n // tq, n // tk),
            in_specs=[
                pl.BlockSpec((tq, d_out), lambda qi, ki: (qi, 0)),
                pl.BlockSpec((tk, d_out), lambda qi, ki: (ki, 0)),
                pl.BlockSpec((tk, d_out), lambda qi, ki: (ki, 0)),
            ],
            out_specs=pl.BlockSpec((tq, d_out), lambda qi, ki: (qi, 0)),
            scratch_shapes=[
                pltpu.VMEM((tq, 1), jnp.float32),      # running max
                pltpu.VMEM((tq, 1), jnp.float32),      # running softmax denom
                pltpu.VMEM((tq, d_out), jnp.float32),  # running numerator
            ],
        ),
        out_shape=jax.ShapeDtypeStruct((n, d_out), jnp.float32),
        compiler_params=pltpu.CompilerParams(
            dimension_semantics=("parallel", "arbitrary")),
    )
    return attn(q_bf, k_bf, v_bf)


def _ref(x, wq, bq, wk, bk, wv, bv):
    q = x @ wq + bq
    k = x @ wk + bk
    v = x @ wv + bv
    s = (q @ k.T) / math.sqrt(q.shape[-1])
    p = jax.nn.softmax(s, axis=-1)
    return p @ v


if __name__ == "__main__":
    key = jax.random.PRNGKey(0)
    # Lane-dense small shapes: 512 "assets" x 128 features, 128 output features.
    n, in_features, out_features = 512, 128, 128

    kx, kwq, kbq, kwk, kbk, kwv, kbv = jax.random.split(key, 7)
    bound = 1.0 / math.sqrt(in_features)   # PyTorch nn.Linear default init range

    x = jax.random.normal(kx, (n, in_features), dtype=jnp.float32)
    wq = jax.random.uniform(kwq, (in_features, out_features), jnp.float32, -bound, bound)
    wk = jax.random.uniform(kwk, (in_features, out_features), jnp.float32, -bound, bound)
    wv = jax.random.uniform(kwv, (in_features, out_features), jnp.float32, -bound, bound)
    bq = jax.random.uniform(kbq, (1, out_features), jnp.float32, -bound, bound)
    bk = jax.random.uniform(kbk, (1, out_features), jnp.float32, -bound, bound)
    bv = jax.random.uniform(kbv, (1, out_features), jnp.float32, -bound, bound)

    ref = _ref(x, wq, bq, wk, bk, wv, bv)

    # Path A (single-tile fused kernel; auto-selected at this size).
    out_small = jax.block_until_ready(self_attention(x, wq, bq, wk, bk, wv, bv))
    assert out_small.shape == (n, out_features)
    assert jnp.allclose(out_small, ref, atol=2e-2, rtol=2e-2), "small-path mismatch"

    # Path B (projection prologue + flash attention, grid (2, 2) with tq=tk=256).
    out_flash = jax.block_until_ready(
        self_attention(x, wq, bq, wk, bk, wv, bv, force_flash=True))
    assert out_flash.shape == (n, out_features)
    assert jnp.allclose(out_flash, ref, atol=2e-2, rtol=2e-2), "flash-path mismatch"

    print("KERNEL_OK")
</pallas_src>

<mosaic_0001>
module attributes {stable_mosaic.version = 11 : i64} {
  func.func @_fused_small_kernel(%arg0: memref<512x128xbf16, #tpu.memory_space<vmem>>, %arg1: memref<128x128xbf16, #tpu.memory_space<vmem>>, %arg2: memref<1x128xf32, #tpu.memory_space<vmem>>, %arg3: memref<128x128xbf16, #tpu.memory_space<vmem>>, %arg4: memref<1x128xf32, #tpu.memory_space<vmem>>, %arg5: memref<128x128xbf16, #tpu.memory_space<vmem>>, %arg6: memref<1x128xf32, #tpu.memory_space<vmem>>, %arg7: memref<512x128xf32, #tpu.memory_space<vmem>>) attributes {dimension_semantics = [], scalar_prefetch = 0 : i64, scratch_operands = 0 : i64, tpu.core_type = #tpu.core_type<tc>} {
    %c0 = arith.constant 0 : index
    %c0_0 = arith.constant 0 : index
    %0 = vector.load %arg0[%c0, %c0_0] : memref<512x128xbf16, #tpu.memory_space<vmem>>, vector<512x128xbf16>
    %c0_1 = arith.constant 0 : index
    %c0_2 = arith.constant 0 : index
    %1 = vector.load %arg1[%c0_1, %c0_2] : memref<128x128xbf16, #tpu.memory_space<vmem>>, vector<128x128xbf16>
    %cst = arith.constant dense<0.000000e+00> : vector<512x128xf32>
    %2 = tpu.matmul %0, %1, %cst {dimension_numbers = #tpu.dot_dimension_numbers<[1], [0], [0], [1], [0, 0, 1, 1], [], []>} : vector<512x128xbf16>, vector<128x128xbf16>, vector<512x128xf32> -> vector<512x128xf32>
    %c0_3 = arith.constant 0 : index
    %c0_4 = arith.constant 0 : index
    %3 = vector.load %arg2[%c0_3, %c0_4] : memref<1x128xf32, #tpu.memory_space<vmem>>, vector<1x128xf32>
    %4 = vector.broadcast %3 : vector<1x128xf32> to vector<512x128xf32>
    %5 = arith.addf %2, %4 : vector<512x128xf32>
    %cst_5 = arith.constant 0.0883883461 : f32
    %6 = vector.broadcast %cst_5 : f32 to vector<512x128xf32>
    %7 = arith.mulf %5, %6 : vector<512x128xf32>
    %c0_6 = arith.constant 0 : index
    %c0_7 = arith.constant 0 : index
    %8 = vector.load %arg3[%c0_6, %c0_7] : memref<128x128xbf16, #tpu.memory_space<vmem>>, vector<128x128xbf16>
    %cst_8 = arith.constant dense<0.000000e+00> : vector<512x128xf32>
    %9 = tpu.matmul %0, %8, %cst_8 {dimension_numbers = #tpu.dot_dimension_numbers<[1], [0], [0], [1], [0, 0, 1, 1], [], []>} : vector<512x128xbf16>, vector<128x128xbf16>, vector<512x128xf32> -> vector<512x128xf32>
    %c0_9 = arith.constant 0 : index
    %c0_10 = arith.constant 0 : index
    %10 = vector.load %arg4[%c0_9, %c0_10] : memref<1x128xf32, #tpu.memory_space<vmem>>, vector<1x128xf32>
    %11 = vector.broadcast %10 : vector<1x128xf32> to vector<512x128xf32>
    %12 = arith.addf %9, %11 : vector<512x128xf32>
    %c0_11 = arith.constant 0 : index
    %c0_12 = arith.constant 0 : index
    %13 = vector.load %arg5[%c0_11, %c0_12] : memref<128x128xbf16, #tpu.memory_space<vmem>>, vector<128x128xbf16>
    %cst_13 = arith.constant dense<0.000000e+00> : vector<512x128xf32>
    %14 = tpu.matmul %0, %13, %cst_13 {dimension_numbers = #tpu.dot_dimension_numbers<[1], [0], [0], [1], [0, 0, 1, 1], [], []>} : vector<512x128xbf16>, vector<128x128xbf16>, vector<512x128xf32> -> vector<512x128xf32>
    %c0_14 = arith.constant 0 : index
    %c0_15 = arith.constant 0 : index
    %15 = vector.load %arg6[%c0_14, %c0_15] : memref<1x128xf32, #tpu.memory_space<vmem>>, vector<1x128xf32>
    %16 = vector.broadcast %15 : vector<1x128xf32> to vector<512x128xf32>
    %17 = arith.addf %14, %16 : vector<512x128xf32>
    %18 = arith.truncf %7 : vector<512x128xf32> to vector<512x128xbf16>
    %19 = arith.truncf %12 : vector<512x128xf32> to vector<512x128xbf16>
    %cst_16 = arith.constant dense<0.000000e+00> : vector<512x512xf32>
    %20 = tpu.matmul %18, %19, %cst_16 {dimension_numbers = #tpu.dot_dimension_numbers<[1], [1], [0], [0], [0, 0, 1, 0], [], []>} : vector<512x128xbf16>, vector<512x128xbf16>, vector<512x512xf32> -> vector<512x512xf32>
    %cst_17 = arith.constant dense<0xFF800000> : vector<512xf32>
    %21 = vector.multi_reduction <maximumf>, %20, %cst_17 [1] : vector<512x512xf32> to vector<512xf32>
    %22 = vector.shape_cast %21 : vector<512xf32> to vector<512x1xf32>
    %23 = vector.broadcast %22 : vector<512x1xf32> to vector<512x512xf32>
    %24 = arith.subf %20, %23 : vector<512x512xf32>
    %25 = math.exp %24 : vector<512x512xf32>
    %cst_18 = arith.constant dense<0.000000e+00> : vector<512xf32>
    %26 = vector.multi_reduction <add>, %25, %cst_18 [1] : vector<512x512xf32> to vector<512xf32>
    %27 = vector.shape_cast %26 : vector<512xf32> to vector<512x1xf32>
    %28 = tpu.reciprocal %27 {approx = true} : vector<512x1xf32> -> vector<512x1xf32>
    %29 = vector.broadcast %28 : vector<512x1xf32> to vector<512x512xf32>
    %30 = arith.mulf %25, %29 : vector<512x512xf32>
    %31 = arith.truncf %30 : vector<512x512xf32> to vector<512x512xbf16>
    %32 = arith.truncf %17 : vector<512x128xf32> to vector<512x128xbf16>
    %cst_19 = arith.constant dense<0.000000e+00> : vector<512x128xf32>
    %33 = tpu.matmul %31, %32, %cst_19 {dimension_numbers = #tpu.dot_dimension_numbers<[1], [0], [0], [1], [0, 0, 1, 1], [], []>} : vector<512x512xbf16>, vector<512x128xbf16>, vector<512x128xf32> -> vector<512x128xf32>
    %c0_20 = arith.constant 0 : index
    %c0_21 = arith.constant 0 : index
    %34 = vector.load %arg7[%c0_20, %c0_21] : memref<512x128xf32, #tpu.memory_space<vmem>>, vector<512x128xf32>
    tpu.vector_store %arg7[%c0_20, %c0_21], %33 {strides = array<i32>} : memref<512x128xf32, #tpu.memory_space<vmem>>, vector<512x128xf32>,
    return
  }
}

</mosaic_0001>

<bundles_post_ra>
// kernel: tpu_custom_call.1
= control target key start
LH: loop header
LB: loop body
LE: loop exit
PB: predicated region body
PF: predicated region fallthrough
CT: control target
= control target key end

     0   :  { %12 = vsyncpa [#allocation3], 0  ;;  %s9779_s0 = inlined_call_operand.hbm [shape: bf16[512,128], index: 0, kind: input, shape index: {}]   ;;  %s9780_s1 = inlined_call_operand.hbm [shape: bf16[128,128], index: 1, kind: input, shape index: {}]   ;;  %s9781_s2 = inlined_call_operand.vmem [shape: f32[1,128], index: 2, kind: input, shape index: {}]   ;;  %s9782_s3 = inlined_call_operand.hbm [shape: bf16[128,128], index: 3, kind: input, shape index: {}]   ;;  %s9783_s4 = inlined_call_operand.vmem [shape: f32[1,128], index: 4, kind: input, shape index: {}]   ;;  %s9784_s5 = inlined_call_operand.hbm [shape: bf16[128,128], index: 5, kind: input, shape index: {}]   ;;  %s9785_s6 = inlined_call_operand.vmem [shape: f32[1,128], index: 6, kind: input, shape index: {}]   ;;  %s9786_s7 = inlined_call_operand.hbm [shape: f32[512,128], index: 7, kind: output, shape index: {}]  }
   0x1   :  { %13 = vsyncpa [#allocation6], 0 }
   0x2   :  { %14 = vsyncpa [#allocation9], 0 }
   0x3   :  { %15 = vsyncpa [#allocation4], 0  ;;  %s6212_s24 = smov [#allocation5]   ;;  %s6213_s26 = smov [#allocation2]  }
   0x4   :  { %s33_s25 = sshll.u32 %s6212_s24, 4  ;;  %s21_s27 = sshll.u32 %s6213_s26, 4  ;;  %s34_s25 = int_to_ptr.vmem [resolvable:$true] %s33_s25  ;;  %s22_s27 = int_to_ptr.vmem [resolvable:$true] %s21_s27 }
   0x5   :  { %s6112_s28 = scalar_lea.vmem %s34_s25, 1024  ;;  %p6117_p1 = scmp.lt.s32.totalorder %s34_s25, %s34_s25 }
   0x6   :  { %p6113_p0 = scmp.ne.s32.totalorder %s34_s25, %s6112_s28  ;;  %p6118_p2 = scmp.lt.s32.totalorder %s6112_s28, %s6112_s28 }
   0x8   :  { %p6119_p3 = por %p6118_p2, %p6117_p1 }
   0xa   :  { %p6120_p4 = pnand %p6119_p3, %p6113_p0 }
   0xc   :  { %6123 = shalt.err (!%p6120_p4)
}
   0xd   :  { %s6214_s29 = smov 64   ;;  %s6215_s30 = smov 4  }
   0xe   :  { %39 = dma.hbm_to_vmem [thread:$0]  %s9780_s1, 1024, %s34_s25, [#allocation6], %s6214_s29, %s6214_s29, %s6215_s30  }
   0xf   :  { %s6132_s10 = scalar_lea.vmem %s22_s27, 4096  ;;  %p6137_p6 = scmp.lt.s32.totalorder %s22_s27, %s22_s27 }
  0x10   :  { %p6133_p5 = scmp.ne.s32.totalorder %s22_s27, %s6132_s10  ;;  %p6138_p7 = scmp.lt.s32.totalorder %s6132_s10, %s6132_s10 }
  0x12   :  { %p6139_p8 = por %p6138_p7, %p6137_p6 }
  0x14   :  { %p6140_p9 = pnand %p6139_p8, %p6133_p5 }
  0x16   :  { %6143 = shalt.err (!%p6140_p9)
}
  0x17   :  { %27 = dma.hbm_to_vmem [thread:$0]  %s9779_s0, 4096, %s22_s27, [#allocation3], %s6214_s29, %s6214_s29, %s6215_s30  }
  0x18   :  { %s6216_s13 = smov [#allocation7]   ;;  %s6217_s15 = smov [#allocation8]  }
  0x19   :  { %s47_s14 = sshll.u32 %s6216_s13, 4  ;;  %s61_s16 = sshll.u32 %s6217_s15, 4  ;;  %s48_s14 = int_to_ptr.vmem [resolvable:$true] %s47_s14  ;;  %s62_s16 = int_to_ptr.vmem [resolvable:$true] %s61_s16 }
  0x1a   :  { %s6152_s1 = scalar_lea.vmem %s48_s14, 1024  ;;  %p6157_p11 = scmp.lt.s32.totalorder %s48_s14, %s48_s14 }
  0x1b   :  { %p6153_p10 = scmp.ne.s32.totalorder %s48_s14, %s6152_s1  ;;  %p6158_p12 = scmp.lt.s32.totalorder %s6152_s1, %s6152_s1 }
  0x1d   :  { %p6159_p13 = por %p6158_p12, %p6157_p11 }
  0x1f   :  { %p6160_p0 = pnand %p6159_p13, %p6153_p10 }
  0x21   :  { %6163 = shalt.err (!%p6160_p0)
}
  0x22   :  { %53 = dma.hbm_to_vmem [thread:$0]  %s9782_s3, 1024, %s48_s14, [#allocation6], %s6214_s29, %s6214_s29, %s6215_s30  }
  0x23   :  { %s6172_s0 = scalar_lea.vmem %s62_s16, 1024  ;;  %p6177_p2 = scmp.lt.s32.totalorder %s62_s16, %s62_s16 }
  0x24   :  { %p6173_p1 = scmp.ne.s32.totalorder %s62_s16, %s6172_s0  ;;  %p6178_p3 = scmp.lt.s32.totalorder %s6172_s0, %s6172_s0 }
  0x26   :  { %p6179_p4 = por %p6178_p3, %p6177_p2 }
  0x28   :  { %p6180_p5 = pnand %p6179_p4, %p6173_p1 }
  0x2a   :  { %6183 = shalt.err (!%p6180_p5)
}
  0x2b   :  { %67 = dma.hbm_to_vmem [thread:$0]  %s9784_s5, 1024, %s62_s16, [#allocation9], %s6214_s29, %s6214_s29, %s6215_s30  }
  0x2c   :  { %6204 = dma.done.wait [#allocation3], 4096  }
  0x2d   :  { %6205 = vsyncadd [#allocation3], 4294963200 }
  0x2e   :  { %6206 = dma.done.wait [#allocation6], 2048  }
  0x2f   :  { %6207 = vsyncadd [#allocation6], 4294965248 }
  0x30   :  { %6208 = dma.done.wait [#allocation9], 1024  }
  0x31   :  { %6209 = vsyncadd [#allocation9], 4294966272  ;;  %v5407_v0 = vld [vmem:[#allocation5 + $0x38] sm:$0xff]   ;;  %v5408_v1 = vld [vmem:[#allocation5 + $0x30] sm:$0xff]  }
  0x32   :  { %5381 = vmatprep.subr.bf16.mxu1 %v5407_v0  ;;  %5141 = vmatprep.subr.bf16.mxu0 %v5407_v0  ;;  %v5409_v2 = vld [vmem:[#allocation5 + $0x28] sm:$0xff]   ;;  %v5410_v3 = vld [vmem:[#allocation5 + $0x20] sm:$0xff]   ;;  %v5411_v5 = vld [vmem:[#allocation5 + $0x18] sm:$0xff]  }
  0x33   :  { %5389 = vmatpush3.bf16.msra.mxu1 %v5407_v0  ;;  %5142 = vmatpush3.bf16.msra.mxu0 %v5407_v0  ;;  %v6286_v4 = vld [vmem:[#allocation2 + $0x80] sm:$0xff]   ;;  %v5412_v6 = vld [vmem:[#allocation5 + $0x10] sm:$0xff]   ;;  %v5413_v7 = vld [vmem:[#allocation5 + $0x8] sm:$0xff]  }
  0x34   :  { %5382 = vmatprep.subr.bf16.mxu1 %v5408_v1  ;;  %5143 = vmatprep.subr.bf16.mxu0 %v5408_v1  ;;  %v5414_v8 = vld [vmem:[#allocation5] sm:$0xff]   ;;  %v5425_v9 = vld [vmem:[#allocation7 + $0x38] sm:$0xff]   ;;  %v6289_v10 = vld [vmem:[#allocation2 + $0x88] sm:$0xff]  }
  0x35   :  { %5189 = vmatprep.mubr.bf16.mxu1 %v6286_v4  ;;  %v6291_v11 = vld [vmem:[#allocation2 + $0x90] sm:$0xff]   ;;  %v6293_v13 = vld [vmem:[#allocation2] sm:$0xff]   ;;  %v6296_v14 = vld [vmem:[#allocation2 + $0x8] sm:$0xff]  }
  0x36   :  { %v5426_v12 = vld [vmem:[#allocation7 + $0x30] sm:$0xff]   ;;  %5157 = vmatprep.mubr.bf16.mxu0 %v6293_v13  ;;  %v5429_v16 = vld [vmem:[#allocation7 + $0x28] sm:$0xff]   ;;  %v6304_v17 = vld [vmem:[#allocation2 + $0x98] sm:$0xff]  }
  0x37   :  { %5390 = vmatpush3.bf16.msra.mxu1 %v5408_v1  ;;  %5144 = vmatpush3.bf16.msra.mxu0 %v5408_v1  ;;  %v6300_v15 = vld [vmem:[#allocation2 + $0x10] sm:$0xff]   ;;  %v6306_v18 = vld [vmem:[#allocation2 + $0xa0] sm:$0xff]   ;;  %v6309_v20 = vld [vmem:[#allocation2 + $0x18] sm:$0xff]  }
  0x38   :  { %5383 = vmatprep.subr.bf16.mxu1 %v5409_v2  ;;  %5145 = vmatprep.subr.bf16.mxu0 %v5409_v2  ;;  %v5430_v19 = vld [vmem:[#allocation7 + $0x20] sm:$0xff]   ;;  %v5433_v22 = vld [vmem:[#allocation7 + $0x18] sm:$0xff]   ;;  %v6315_v23 = vld [vmem:[#allocation2 + $0xa8] sm:$0xff]  }
  0x39   :  { %v6312_v21 = vld [vmem:[#allocation2 + $0x20] sm:$0xff]   ;;  %v6318_v24 = vld [vmem:[#allocation2 + $0xb0] sm:$0xff]   ;;  %v6320_v26 = vld [vmem:[#allocation2 + $0x28] sm:$0xff]  }
  0x3a   :  { %v5434_v25 = vld [vmem:[#allocation7 + $0x10] sm:$0xff]   ;;  %v5437_v28 = vld [vmem:[#allocation7 + $0x8] sm:$0xff]   ;;  %v6328_v29 = vld [vmem:[#allocation2 + $0xb8] sm:$0xff]  }
  0x3b   :  { %5391 = vmatpush3.bf16.msra.mxu1 %v5409_v2  ;;  %5146 = vmatpush3.bf16.msra.mxu0 %v5409_v2  ;;  %v6322_v27 = vld [vmem:[#allocation2 + $0x30] sm:$0xff]   ;;  %v6330_v30 = vld [vmem:[#allocation2 + $0xc0] sm:$0xff]   ;;  %v6333_v32 = vld [vmem:[#allocation2 + $0x38] sm:$0xff]  }
  0x3c   :  { %5384 = vmatprep.subr.bf16.mxu1 %v5410_v3  ;;  %5147 = vmatprep.subr.bf16.mxu0 %v5410_v3  ;;  %v5438_v31 = vld [vmem:[#allocation7] sm:$0xff]   ;;  %v6340_v34 = vld [vmem:[#allocation2 + $0xc8] sm:$0xff]   ;;  %v6342_v35 = vld [vmem:[#allocation2 + $0xd0] sm:$0xff]  }
  0x3d   :  { %v6336_v33 = vld [vmem:[#allocation2 + $0x40] sm:$0xff]   ;;  %v6345_v36 = vld [vmem:[#allocation2 + $0x48] sm:$0xff]   ;;  %v6348_v37 = vld [vmem:[#allocation2 + $0x50] sm:$0xff]  }
  0x3e   :  { %v6352_v38 = vld [vmem:[#allocation2 + $0xd8] sm:$0xff]   ;;  %v6354_v39 = vld [vmem:[#allocation2 + $0xe0] sm:$0xff]   ;;  %v6364_v42 = vld [vmem:[#allocation2 + $0xe8] sm:$0xff]  }
  0x3f   :  { %5392 = vmatpush3.bf16.msra.mxu1 %v5410_v3  ;;  %5148 = vmatpush3.bf16.msra.mxu0 %v5410_v3  ;;  %v6357_v40 = vld [vmem:[#allocation2 + $0x58] sm:$0xff]   ;;  %v6360_v41 = vld [vmem:[#allocation2 + $0x60] sm:$0xff]   ;;  %v6366_v43 = vld [vmem:[#allocation2 + $0xf0] sm:$0xff]  }
  0x40   :  { %5385 = vmatprep.subr.bf16.mxu1 %v5411_v5  ;;  %5149 = vmatprep.subr.bf16.mxu0 %v5411_v5  ;;  %v6369_v44 = vld [vmem:[#allocation2 + $0x68] sm:$0xff]   ;;  %v6372_v45 = vld [vmem:[#allocation2 + $0x70] sm:$0xff]   ;;  %v6376_v46 = vld [vmem:[#allocation2 + $0xf8] sm:$0xff]  }
  0x41   :  { %v6379_v47 = vld [vmem:[#allocation2 + $0x78] sm:$0xff]   ;;  %v5456_v49 = vld [vmem:[#allocation8 + $0x30] sm:$0xff]   ;;  %v5457_v50 = vld [vmem:[#allocation8 + $0x28] sm:$0xff]  }
  0x42   :  { %v5455_v48 = vld [vmem:[#allocation8 + $0x38] sm:$0xff]   ;;  %v5458_v51 = vld [vmem:[#allocation8 + $0x20] sm:$0xff]   ;;  %v5460_v53 = vld [vmem:[#allocation8 + $0x10] sm:$0xff]  }
  0x43   :  { %5393 = vmatpush3.bf16.msra.mxu1 %v5411_v5  ;;  %5150 = vmatpush3.bf16.msra.mxu0 %v5411_v5  ;;  %v5459_v52 = vld [vmem:[#allocation8 + $0x18] sm:$0xff]   ;;  %v5461_v54 = vld [vmem:[#allocation8 + $0x8] sm:$0xff]   ;;  %v5462_v55 = vld [vmem:[#allocation8] sm:$0xff]  }
  0x44   :  { %5386 = vmatprep.subr.bf16.mxu1 %v5412_v6  ;;  %5151 = vmatprep.subr.bf16.mxu0 %v5412_v6  ;;  %v6432_v56 = vld [vmem:[%s9781_s2] ss:$0 sm:$0xff] }
  0x47   :  { %5394 = vmatpush3.bf16.msra.mxu1 %v5412_v6  ;;  %5152 = vmatpush3.bf16.msra.mxu0 %v5412_v6 }
  0x48   :  { %5387 = vmatprep.subr.bf16.mxu1 %v5413_v7  ;;  %5153 = vmatprep.subr.bf16.mxu0 %v5413_v7 }
  0x4b   :  { %5395 = vmatpush3.bf16.msra.mxu1 %v5413_v7  ;;  %5154 = vmatpush3.bf16.msra.mxu0 %v5413_v7 }
  0x4c   :  { %5388 = vmatprep.subr.bf16.mxu1 %v5414_v8  ;;  %5155 = vmatprep.subr.bf16.mxu0 %v5414_v8 }
  0x4f   :  { %5396 = vmatpush3.bf16.msra.mxu1 %v5414_v8  ;;  %5156 = vmatpush3.bf16.msra.mxu0 %v5414_v8 }
  0x50   :  { %5221 = vmatprep.subr.bf16.mxu1 %v5425_v9  ;;  %5301 = vmatprep.subr.bf16.mxu0 %v5455_v48 }
  0x52   :  { %5190 = vmatmul.mubr.bf16.vlgmr.msra.gmra.mxu1 %v6289_v10  ;;  %5158 = vmatmul.mubr.bf16.vlgmr.msra.gmra.mxu0 %v6296_v14 }
  0x53   :  { %5193 = vmatprep.mubr.bf16.mxu1 %v6291_v11  ;;  %5222 = vmatpush3.bf16.msra.mxu1 %v5425_v9 }
  0x54   :  { %5223 = vmatprep.subr.bf16.mxu1 %v5426_v12  ;;  %5161 = vmatprep.mubr.bf16.mxu0 %v6300_v15 }
  0x55   :  { %5302 = vmatpush3.bf16.msra.mxu0 %v5455_v48 }
  0x56   :  { %5303 = vmatprep.subr.bf16.mxu0 %v5456_v49 }
  0x57   :  { %5224 = vmatpush3.bf16.msra.mxu1 %v5426_v12 }
  0x58   :  { %5225 = vmatprep.subr.bf16.mxu1 %v5429_v16 }
  0x59   :  { %5304 = vmatpush3.bf16.msra.mxu0 %v5456_v49 }
  0x5a   :  { %5194 = vmatmul.mubr.bf16.gmra.mxu1 %v6304_v17  ;;  %5162 = vmatmul.mubr.bf16.gmra.mxu0 %v6309_v20 }
  0x5b   :  { %5197 = vmatprep.mubr.bf16.mxu1 %v6306_v18  ;;  %5226 = vmatpush3.bf16.msra.mxu1 %v5429_v16 }
  0x5c   :  { %5227 = vmatprep.subr.bf16.mxu1 %v5430_v19  ;;  %5165 = vmatprep.mubr.bf16.mxu0 %v6312_v21 }
  0x5d   :  { %5305 = vmatprep.subr.bf16.mxu0 %v5457_v50 }
  0x5e   :  { %5306 = vmatpush3.bf16.msra.mxu0 %v5457_v50 }
  0x5f   :  { %5228 = vmatpush3.bf16.msra.mxu1 %v5430_v19  ;;  %5307 = vmatprep.subr.bf16.mxu0 %v5458_v51 }
  0x60   :  { %5229 = vmatprep.subr.bf16.mxu1 %v5433_v22 }
  0x62   :  { %5198 = vmatmul.mubr.bf16.gmra.mxu1 %v6315_v23  ;;  %5166 = vmatmul.mubr.bf16.gmra.mxu0 %v6320_v26 }
  0x63   :  { %5201 = vmatprep.mubr.bf16.mxu1 %v6318_v24  ;;  %5230 = vmatpush3.bf16.msra.mxu1 %v5433_v22 }
  0x64   :  { %5231 = vmatprep.subr.bf16.mxu1 %v5434_v25  ;;  %5169 = vmatprep.mubr.bf16.mxu0 %v6322_v27 }
  0x65   :  { %5308 = vmatpush3.bf16.msra.mxu0 %v5458_v51 }
  0x66   :  { %5309 = vmatprep.subr.bf16.mxu0 %v5459_v52 }
  0x67   :  { %5232 = vmatpush3.bf16.msra.mxu1 %v5434_v25 }
  0x68   :  { %5233 = vmatprep.subr.bf16.mxu1 %v5437_v28 }
  0x69   :  { %5310 = vmatpush3.bf16.msra.mxu0 %v5459_v52 }
  0x6a   :  { %5202 = vmatmul.mubr.bf16.gmra.mxu1 %v6328_v29  ;;  %5170 = vmatmul.mubr.bf16.gmra.mxu0 %v6333_v32 }
  0x6b   :  { %5205 = vmatprep.mubr.bf16.mxu1 %v6330_v30  ;;  %5234 = vmatpush3.bf16.msra.mxu1 %v5437_v28 }
  0x6c   :  { %5235 = vmatprep.subr.bf16.mxu1 %v5438_v31  ;;  %5173 = vmatprep.mubr.bf16.mxu0 %v6336_v33 }
  0x6d   :  { %5311 = vmatprep.subr.bf16.mxu0 %v5460_v53 }
  0x6e   :  { %5312 = vmatpush3.bf16.msra.mxu0 %v5460_v53 }
  0x6f   :  { %5236 = vmatpush3.bf16.msra.mxu1 %v5438_v31  ;;  %5313 = vmatprep.subr.bf16.mxu0 %v5461_v54 }
  0x72   :  { %5206 = vmatmul.mubr.bf16.gmra.mxu1 %v6340_v34  ;;  %5174 = vmatmul.mubr.bf16.gmra.mxu0 %v6345_v36 }
  0x73   :  { %5209 = vmatprep.mubr.bf16.mxu1 %v6342_v35  ;;  %5177 = vmatprep.mubr.bf16.mxu0 %v6348_v37 }
  0x74   :  { %5314 = vmatpush3.bf16.msra.mxu0 %v5461_v54 }
  0x75   :  { %5315 = vmatprep.subr.bf16.mxu0 %v5462_v55 }
  0x78   :  { %5316 = vmatpush3.bf16.msra.mxu0 %v5462_v55 }
  0x7a   :  { %5210 = vmatmul.mubr.bf16.gmra.mxu1 %v6352_v38  ;;  %5178 = vmatmul.mubr.bf16.gmra.mxu0 %v6357_v40 }
  0x7b   :  { %5213 = vmatprep.mubr.bf16.mxu1 %v6354_v39  ;;  %5181 = vmatprep.mubr.bf16.mxu0 %v6360_v41 }
  0x82   :  { %5214 = vmatmul.mubr.bf16.gmra.mxu1 %v6364_v42  ;;  %5182 = vmatmul.mubr.bf16.gmra.mxu0 %v6369_v44 }
  0x83   :  { %5217 = vmatprep.mubr.bf16.mxu1 %v6366_v43  ;;  %5185 = vmatprep.mubr.bf16.mxu0 %v6372_v45 }
  0x8a   :  { %5218 = vmatmul.mubr.bf16.gmra.mxu1 %v6376_v46  ;;  %5186 = vmatmul.mubr.bf16.gmra.mxu0 %v6379_v47 }
  0x8b   :  { %5237 = vmatprep.mubr.bf16.mxu1 %v6293_v13  ;;  %5317 = vmatprep.mubr.bf16.mxu0 %v6293_v13 }
  0x92   :  { %5238 = vmatmul.mubr.bf16.vlgmr.msra.gmra.mxu1 %v6296_v14  ;;  %5318 = vmatmul.mubr.bf16.vlgmr.msra.gmra.mxu0 %v6296_v14 }
  0x93   :  { %5241 = vmatprep.mubr.bf16.mxu1 %v6300_v15  ;;  %5321 = vmatprep.mubr.bf16.mxu0 %v6300_v15 }
  0x9a   :  { %5242 = vmatmul.mubr.bf16.gmra.mxu1 %v6309_v20  ;;  %5322 = vmatmul.mubr.bf16.gmra.mxu0 %v6309_v20 }
  0x9b   :  { %5245 = vmatprep.mubr.bf16.mxu1 %v6312_v21  ;;  %5325 = vmatprep.mubr.bf16.mxu0 %v6312_v21 }
  0xa2   :  { %5246 = vmatmul.mubr.bf16.gmra.mxu1 %v6320_v26  ;;  %5326 = vmatmul.mubr.bf16.gmra.mxu0 %v6320_v26 }
  0xa3   :  { %5249 = vmatprep.mubr.bf16.mxu1 %v6322_v27  ;;  %5329 = vmatprep.mubr.bf16.mxu0 %v6322_v27 }
  0xaa   :  { %5250 = vmatmul.mubr.bf16.gmra.mxu1 %v6333_v32  ;;  %5330 = vmatmul.mubr.bf16.gmra.mxu0 %v6333_v32 }
  0xab   :  { %5253 = vmatprep.mubr.bf16.mxu1 %v6336_v33  ;;  %5333 = vmatprep.mubr.bf16.mxu0 %v6336_v33 }
  0xb2   :  { %5254 = vmatmul.mubr.bf16.gmra.mxu1 %v6345_v36  ;;  %5334 = vmatmul.mubr.bf16.gmra.mxu0 %v6345_v36 }
  0xb3   :  { %5257 = vmatprep.mubr.bf16.mxu1 %v6348_v37  ;;  %5337 = vmatprep.mubr.bf16.mxu0 %v6348_v37 }
  0xba   :  { %5258 = vmatmul.mubr.bf16.gmra.mxu1 %v6357_v40  ;;  %5338 = vmatmul.mubr.bf16.gmra.mxu0 %v6357_v40 }
  0xbb   :  { %5261 = vmatprep.mubr.bf16.mxu1 %v6360_v41  ;;  %5341 = vmatprep.mubr.bf16.mxu0 %v6360_v41 }
  0xc2   :  { %5262 = vmatmul.mubr.bf16.gmra.mxu1 %v6369_v44  ;;  %5342 = vmatmul.mubr.bf16.gmra.mxu0 %v6369_v44 }
  0xc3   :  { %5265 = vmatprep.mubr.bf16.mxu1 %v6372_v45  ;;  %5345 = vmatprep.mubr.bf16.mxu0 %v6372_v45 }
  0xca   :  { %5266 = vmatmul.mubr.bf16.gmra.mxu1 %v6379_v47  ;;  %5346 = vmatmul.mubr.bf16.gmra.mxu0 %v6379_v47 }
  0xcb   :  { %5269 = vmatprep.mubr.bf16.mxu1 %v6286_v4  ;;  %5349 = vmatprep.mubr.bf16.mxu0 %v6286_v4 }
  0xd2   :  { %5270 = vmatmul.mubr.bf16.gmra.mxu1 %v6289_v10  ;;  %5350 = vmatmul.mubr.bf16.gmra.mxu0 %v6289_v10 }
  0xd3   :  { %5273 = vmatprep.mubr.bf16.mxu1 %v6291_v11  ;;  %5353 = vmatprep.mubr.bf16.mxu0 %v6291_v11 }
  0xda   :  { %5274 = vmatmul.mubr.bf16.gmra.mxu1 %v6304_v17  ;;  %5354 = vmatmul.mubr.bf16.gmra.mxu0 %v6304_v17 }
  0xdb   :  { %5277 = vmatprep.mubr.bf16.mxu1 %v6306_v18  ;;  %5357 = vmatprep.mubr.bf16.mxu0 %v6306_v18 }
  0xe2   :  { %5278 = vmatmul.mubr.bf16.gmra.mxu1 %v6315_v23  ;;  %5358 = vmatmul.mubr.bf16.gmra.mxu0 %v6315_v23 }
  0xe3   :  { %5281 = vmatprep.mubr.bf16.mxu1 %v6318_v24  ;;  %5361 = vmatprep.mubr.bf16.mxu0 %v6318_v24 }
  0xea   :  { %5282 = vmatmul.mubr.bf16.gmra.mxu1 %v6328_v29  ;;  %5362 = vmatmul.mubr.bf16.gmra.mxu0 %v6328_v29 }
  0xeb   :  { %5285 = vmatprep.mubr.bf16.mxu1 %v6330_v30  ;;  %5365 = vmatprep.mubr.bf16.mxu0 %v6330_v30 }
  0xf2   :  { %5286 = vmatmul.mubr.bf16.gmra.mxu1 %v6340_v34  ;;  %5366 = vmatmul.mubr.bf16.gmra.mxu0 %v6340_v34 }
  0xf3   :  { %5289 = vmatprep.mubr.bf16.mxu1 %v6342_v35  ;;  %5369 = vmatprep.mubr.bf16.mxu0 %v6342_v35 }
  0xfa   :  { %5290 = vmatmul.mubr.bf16.gmra.mxu1 %v6352_v38  ;;  %5370 = vmatmul.mubr.bf16.gmra.mxu0 %v6352_v38 }
  0xfb   :  { %5293 = vmatprep.mubr.bf16.mxu1 %v6354_v39  ;;  %5373 = vmatprep.mubr.bf16.mxu0 %v6354_v39 }
 0x102   :  { %5294 = vmatmul.mubr.bf16.gmra.mxu1 %v6364_v42  ;;  %5374 = vmatmul.mubr.bf16.gmra.mxu0 %v6364_v42 }
 0x103   :  { %5297 = vmatprep.mubr.bf16.mxu1 %v6366_v43  ;;  %5377 = vmatprep.mubr.bf16.mxu0 %v6366_v43  ;;  %v6527_v43 = vld [vmem:[%s9783_s4] ss:$0 sm:$0xff] }
 0x10a   :  { %5298 = vmatmul.mubr.bf16.gmra.mxu1 %v6376_v46  ;;  %5378 = vmatmul.mubr.bf16.gmra.mxu0 %v6376_v46 }
 0x112   :  { %v5191_v57 = vpop.f32.mrf.mxu1  ;;  %v5159_v35 = vpop.f32.mrf.mxu0 }
 0x113   :  { %v581_v59 = vadd.f32 %v5191_v57, %v6432_v56 }
 0x114   :  { %v6435_v58 = vpop.f32.mrf.mxu1 }
 0x115   :  { %10248 = vst [vmem:[#allocation15_spill] sm:$0xff] %v6435_v58  ;;  %v733_v63 = vmul.f32 0.088388346, %v581_v59 }
 0x116   :  { %v5192_v60 = vpop.f32.mrf.mxu1 }
 0x117   :  { %v584_v61 = vadd.f32 %v5192_v60, %v6432_v56  ;;  %v444_v60 = vpop.f32.mrf.mxu0 }
 0x118   :  { %v6440_v62 = vpop.f32.mrf.mxu1 }
 0x119   :  { %10249 = vst [vmem:[#allocation16_spill] sm:$0xff] %v6440_v62  ;;  %v734_v0 = vmul.f32 0.088388346, %v584_v61  ;;  %v5160_v38 = vpop.f32.mrf.mxu0 }
 0x11a   :  { %v5195_v1 = vpop.f32.mrf.mxu1 }
 0x11b   :  { %v6442_v2 = vpack.c.bf16 %v734_v0, %v733_v63  ;;  %v597_v4 = vadd.f32 %v5195_v1, %v6432_v56  ;;  %v453_v63 = vadd.f32 %v5159_v35, %v6432_v56  ;;  %v447_v39 = vpop.f32.mrf.mxu0 }
 0x11c   :  { %v6445_v3 = vpop.f32.mrf.mxu1 }
 0x11d   :  { %10250 = vst [vmem:[#allocation17_spill] sm:$0xff] %v6442_v2  ;;  %10251 = vst [vmem:[#allocation18_spill] sm:$0xff] %v6445_v3  ;;  %v737_v8 = vmul.f32 0.088388346, %v597_v4  ;;  %v445_v4 = vadd.f32 %v6432_v56, %v444_v60 }
 0x11e   :  { %v5196_v5 = vpop.f32.mrf.mxu1 }
 0x11f   :  { %v600_v6 = vadd.f32 %v5196_v5, %v6432_v56 }
 0x120   :  { %v6450_v7 = vpop.f32.mrf.mxu1 }
 0x121   :  { %10252 = vst [vmem:[#allocation19_spill] sm:$0xff] %v6450_v7  ;;  %v738_v9 = vmul.f32 0.088388346, %v600_v6 }
 0x122   :  { %v5199_v12 = vpop.f32.mrf.mxu1 }
 0x123   :  { %v6452_v13 = vpack.c.bf16 %v738_v9, %v737_v8  ;;  %v613_v10 = vadd.f32 %v5199_v12, %v6432_v56  ;;  %v701_v9 = vmul.f32 0.088388346, %v453_v63  ;;  %v699_v12 = vmul.f32 0.088388346, %v445_v4 }
 0x124   :  { %v6455_v14 = vpop.f32.mrf.mxu1 }
 0x125   :  { %10253 = vst [vmem:[#allocation20_spill] sm:$0xff] %v6452_v13  ;;  %10254 = vst [vmem:[#allocation21_spill] sm:$0xff] %v6455_v14  ;;  %v741_v19 = vmul.f32 0.088388346, %v613_v10  ;;  %v456_v10 = vadd.f32 %v5160_v38, %v6432_v56 }
 0x126   :  { %v5200_v11 = vpop.f32.mrf.mxu1 }
 0x127   :  { %v616_v15 = vadd.f32 %v5200_v11, %v6432_v56  ;;  %v448_v11 = vadd.f32 %v6432_v56, %v447_v39 }
 0x128   :  { %v6460_v16 = vpop.f32.mrf.mxu1 }
 0x129   :  { %10255 = vst [vmem:[#allocation22_spill] sm:$0xff] %v6460_v16  ;;  %v742_v20 = vmul.f32 0.088388346, %v616_v15 }
 0x12a   :  { %v5203_v21 = vpop.f32.mrf.mxu1 }
 0x12b   :  { %v6462_v22 = vpack.c.bf16 %v742_v20, %v741_v19  ;;  %v629_v17 = vadd.f32 %v5203_v21, %v6432_v56  ;;  %v702_v20 = vmul.f32 0.088388346, %v456_v10  ;;  %v700_v21 = vmul.f32 0.088388346, %v448_v11 }
 0x12c   :  { %v6465_v25 = vpop.f32.mrf.mxu1 }
 0x12d   :  { %10256 = vst [vmem:[#allocation23_spill] sm:$0xff] %v6462_v22  ;;  %10257 = vst [vmem:[#allocation24_spill] sm:$0xff] %v6465_v25  ;;  %v745_v28 = vmul.f32 0.088388346, %v629_v17  ;;  %v6516_v42 = vpack.c.bf16 %v702_v20, %v701_v9 }
 0x12e   :  { %v5204_v18 = vpop.f32.mrf.mxu1 }
 0x12f   :  { %v632_v26 = vadd.f32 %v5204_v18, %v6432_v56 }
 0x130   :  { %v6470_v27 = vpop.f32.mrf.mxu1 }
 0x131   :  { %10258 = vst [vmem:[#allocation25_spill] sm:$0xff] %v6470_v27  ;;  %v746_v31 = vmul.f32 0.088388346, %v632_v26  ;;  %v6518_v26 = vpack.c.bf16 %v700_v21, %v699_v12 }
 0x132   :  { %v5207_v32 = vpop.f32.mrf.mxu1 }
 0x133   :  { %v6472_v33 = vpack.c.bf16 %v746_v31, %v745_v28  ;;  %v645_v23 = vadd.f32 %v5207_v32, %v6432_v56  ;;  %4997 = vmatprep.mubr.bf16.mxu1 %v6518_v26  ;;  %5077 = vmatprep.mubr.bf16.mxu0 %v6518_v26 }
 0x134   :  { %v6475_v36 = vpop.f32.mrf.mxu1 }
 0x135   :  { %10259 = vst [vmem:[#allocation26_spill] sm:$0xff] %v6472_v33  ;;  %10260 = vst [vmem:[#allocation27_spill] sm:$0xff] %v6475_v36  ;;  %v749_v41 = vmul.f32 0.088388346, %v645_v23 }
 0x136   :  { %v5208_v24 = vpop.f32.mrf.mxu1 }
 0x137   :  { %v648_v37 = vadd.f32 %v5208_v24, %v6432_v56 }
 0x138   :  { %v6480_v40 = vpop.f32.mrf.mxu1 }
 0x139   :  { %10261 = vst [vmem:[#allocation28_spill] sm:$0xff] %v6480_v40  ;;  %v750_v44 = vmul.f32 0.088388346, %v648_v37  ;;  %v5163_v37 = vpop.f32.mrf.mxu0 }
 0x13a   :  { %v5211_v45 = vpop.f32.mrf.mxu1 }
 0x13b   :  { %v6482_v47 = vpack.c.bf16 %v750_v44, %v749_v41  ;;  %v661_v29 = vadd.f32 %v5211_v45, %v6432_v56  ;;  %v469_v41 = vadd.f32 %v5163_v37, %v6432_v56  ;;  %v6533_v45 = vpop.f32.mrf.mxu0 }
 0x13c   :  { %v6485_v48 = vpop.f32.mrf.mxu1 }
 0x13d   :  { %10262 = vst [vmem:[#allocation29_spill] sm:$0xff] %v6482_v47  ;;  %10263 = vst [vmem:[#allocation30_spill] sm:$0xff] %v6485_v48  ;;  %v753_v51 = vmul.f32 0.088388346, %v661_v29 }
 0x13e   :  { %v5212_v30 = vpop.f32.mrf.mxu1 }
 0x13f   :  { %v664_v49 = vadd.f32 %v5212_v30, %v6432_v56 }
 0x140   :  { %v6490_v50 = vpop.f32.mrf.mxu1 }
 0x141   :  { %10264 = vst [vmem:[#allocation31_spill] sm:$0xff] %v6490_v50  ;;  %v754_v52 = vmul.f32 0.088388346, %v664_v49  ;;  %v5164_v49 = vpop.f32.mrf.mxu0 }
 0x142   :  { %v5215_v53 = vpop.f32.mrf.mxu1 }
 0x143   :  { %v6492_v54 = vpack.c.bf16 %v754_v52, %v753_v51  ;;  %v677_v34 = vadd.f32 %v5215_v53, %v6432_v56  ;;  %v705_v52 = vmul.f32 0.088388346, %v469_v41  ;;  %v472_v53 = vadd.f32 %v5164_v49, %v6432_v56 }
 0x144   :  { %v6495_v55 = vpop.f32.mrf.mxu1 }
 0x145   :  { %10265 = vst [vmem:[#allocation32_spill] sm:$0xff] %v6492_v54  ;;  %10266 = vst [vmem:[#allocation33_spill] sm:$0xff] %v6495_v55  ;;  %v757_v0 = vmul.f32 0.088388346, %v677_v34  ;;  %v706_v35 = vmul.f32 0.088388346, %v472_v53 }
 0x146   :  { %v5216_v57 = vpop.f32.mrf.mxu1 }
 0x147   :  { %v680_v59 = vadd.f32 %v5216_v57, %v6432_v56 }
 0x148   :  { %v6500_v61 = vpop.f32.mrf.mxu1 }
 0x149   :  { %10267 = vst [vmem:[#allocation34_spill] sm:$0xff] %v6500_v61  ;;  %v758_v1 = vmul.f32 0.088388346, %v680_v59  ;;  %v6548_v59 = vpack.c.bf16 %v706_v35, %v705_v52 }
 0x14a   :  { %v5219_v5 = vpop.f32.mrf.mxu1 }
 0x14b   :  { %v6504_v6 = vpack.c.bf16 %v758_v1, %v757_v0  ;;  %v693_v15 = vadd.f32 %v5219_v5, %v6432_v56  ;;  %v6562_v5 = vpop.f32.mrf.mxu0 }
 0x14c   :  { %v6507_v8 = vpop.f32.mrf.mxu1 }
 0x14d   :  { %10268 = vst [vmem:[#allocation35_spill] sm:$0xff] %v6504_v6  ;;  %10269 = vst [vmem:[#allocation36_spill] sm:$0xff] %v6507_v8  ;;  %v761_v28 = vmul.f32 0.088388346, %v693_v15  ;;  %v5167_v9 = vpop.f32.mrf.mxu0 }
 0x14e   :  { %v5220_v19 = vpop.f32.mrf.mxu1  ;;  %v485_v12 = vadd.f32 %v5167_v9, %v6432_v56 }
 0x14f   :  { %v696_v17 = vadd.f32 %v5220_v19, %v6432_v56  ;;  %v6569_v11 = vpop.f32.mrf.mxu0 }
 0x150   :  { %v6514_v18 = vpop.f32.mrf.mxu1  ;;  %v709_v20 = vmul.f32 0.088388346, %v485_v12 }
 0x151   :  { %10270 = vst [vmem:[#allocation37_spill] sm:$0xff] %v6514_v18  ;;  %v762_v31 = vmul.f32 0.088388346, %v696_v17  ;;  %v5168_v19 = vpop.f32.mrf.mxu0 }
 0x152   :  { %v5239_v32 = vpop.f32.mrf.mxu1  ;;  %v488_v21 = vadd.f32 %v5168_v19, %v6432_v56 }
 0x153   :  { %v6521_v23 = vpack.c.bf16 %v762_v31, %v761_v28  ;;  %v6536_v29 = vadd.f32 %v5239_v32, %v6527_v43 }
 0x154   :  { %v6529_v24 = vpop.f32.mrf.mxu1  ;;  %v710_v28 = vmul.f32 0.088388346, %v488_v21 }
 0x155   :  { %10271 = vst [vmem:[#allocation38_spill] sm:$0xff] %v6521_v23 }
 0x156   :  { %v5240_v44 = vpop.f32.mrf.mxu1  ;;  %v6576_v32 = vpack.c.bf16 %v710_v28, %v709_v20 }
 0x157   :  { %v6539_v46 = vadd.f32 %v5240_v44, %v6527_v43  ;;  %v6580_v44 = vpop.f32.mrf.mxu0 }
 0x158   :  { %v6541_v30 = vpop.f32.mrf.mxu1 }
 0x159   :  { %v5171_v52 = vpop.f32.mrf.mxu0 }
 0x15a   :  { %v5243_v34 = vpop.f32.mrf.mxu1 }
 0x15b   :  { %v6551_v63 = vadd.f32 %v5243_v34, %v6527_v43  ;;  %v501_v34 = vadd.f32 %v5171_v52, %v6432_v56  ;;  %v6585_v35 = vpop.f32.mrf.mxu0 }
 0x15c   :  { %v6546_v57 = vpop.f32.mrf.mxu1 }
 0x15d   :  { %v5172_v19 = vpop.f32.mrf.mxu0  ;;  %v713_v21 = vmul.f32 0.088388346, %v501_v34 }
 0x15e   :  { %v5244_v60 = vpop.f32.mrf.mxu1  ;;  %v504_v28 = vadd.f32 %v5172_v19, %v6432_v56 }
 0x15f   :  { %v6554_v0 = vadd.f32 %v5244_v60, %v6527_v43  ;;  %v6598_v4 = vpop.f32.mrf.mxu0 }
 0x160   :  { %v6556_v1 = vpop.f32.mrf.mxu1  ;;  %v714_v23 = vmul.f32 0.088388346, %v504_v28 }
 0x161   :  { %v5175_v6 = vpop.f32.mrf.mxu0 }
 0x162   :  { %v6560_v38 = vpop.f32.mrf.mxu1  ;;  %v6604_v8 = vpack.c.bf16 %v714_v23, %v713_v21  ;;  %v517_v28 = vadd.f32 %v5175_v6, %v6432_v56 }
 0x164   :  { %v6564_v39 = vpop.f32.mrf.mxu1  ;;  %10272 = vst [vmem:[#allocation39_spill] sm:$0xff] %v6604_v8  ;;  %v717_v21 = vmul.f32 0.088388346, %v517_v28 }
 0x166   :  { %v6567_v10 = vpop.f32.mrf.mxu1 }
 0x168   :  { %v6571_v15 = vpop.f32.mrf.mxu1 }
 0x16a   :  { %v5251_v17 = vpop.f32.mrf.mxu1 }
 0x16c   :  { %v6574_v31 = vpop.f32.mrf.mxu1 }
 0x16e   :  { %v5252_v37 = vpop.f32.mrf.mxu1 }
 0x16f   :  { %v928_v6 = vadd.f32 %v5252_v37, %v6527_v43 }
 0x170   :  { %v6578_v41 = vpop.f32.mrf.mxu1 }
 0x172   :  { %v5255_v49 = vpop.f32.mrf.mxu1 }
 0x173   :  { %v6588_v9 = vadd.f32 %v5255_v49, %v6527_v43 }
 0x174   :  { %v6582_v53 = vpop.f32.mrf.mxu1 }
 0x176   :  { %v5256_v60 = vpop.f32.mrf.mxu1 }
 0x177   :  { %v6591_v12 = vadd.f32 %v5256_v60, %v6527_v43  ;;  %v6606_v60 = vpop.f32.mrf.mxu0 }
 0x178   :  { %v6593_v20 = vpop.f32.mrf.mxu1  ;;  %10273 = vst [vmem:[#allocation40_spill] sm:$0xff] %v6606_v60 }
 0x179   :  { %v5176_v34 = vpop.f32.mrf.mxu0 }
 0x17a   :  { %v6600_v52 = vpop.f32.mrf.mxu1  ;;  %v520_v47 = vadd.f32 %v5176_v34, %v6432_v56 }
 0x17b   :  { %v6612_v19 = vpop.f32.mrf.mxu0 }
 0x17c   :  { %v6602_v49 = vpop.f32.mrf.mxu1  ;;  %10274 = vst [vmem:[#allocation41_spill] sm:$0xff] %v6612_v19  ;;  %v718_v50 = vmul.f32 0.088388346, %v520_v47  ;;  %v925_v47 = vadd.f32 %v5251_v17, %v6527_v43 }
 0x17d   :  { %v5179_v55 = vpop.f32.mrf.mxu0 }
 0x17e   :  { %v6608_v18 = vpop.f32.mrf.mxu1  ;;  %v6620_v40 = vpack.c.bf16 %v718_v50, %v717_v21  ;;  %v1522_v62 = vpack.c.bf16 %v928_v6, %v925_v47  ;;  %v533_v37 = vadd.f32 %v5179_v55, %v6432_v56 }
 0x17f   :  { %v6618_v48 = vpop.f32.mrf.mxu0 }
 0x180   :  { %v6610_v54 = vpop.f32.mrf.mxu1  ;;  %10275 = vst [vmem:[#allocation42_spill] sm:$0xff] %v6618_v48  ;;  %10276 = vst [vmem:[#allocation43_spill] sm:$0xff] %v6620_v40 }
 0x181   :  { %v5180_v33 = vpop.f32.mrf.mxu0 }
 0x182   :  { %v5263_v51 = vpop.f32.mrf.mxu1  ;;  %v536_v17 = vadd.f32 %v5180_v33, %v6432_v56  ;;  %v917_v33 = vadd.f32 %v6527_v43, %v6574_v31 }
 0x183   :  { %v6622_v22 = vpop.f32.mrf.mxu0 }
 0x184   :  { %v6614_v61 = vpop.f32.mrf.mxu1  ;;  %10277 = vst [vmem:[#allocation44_spill] sm:$0xff] %v6622_v22 }
 0x185   :  { %v5183_v27 = vpop.f32.mrf.mxu0 }
 0x186   :  { %v5264_v23 = vpop.f32.mrf.mxu1 }
 0x187   :  { %v6624_v14 = vpop.f32.mrf.mxu0 }
 0x188   :  { %v967_v36 = vpop.f32.mrf.mxu1  ;;  %10278 = vst [vmem:[#allocation45_spill] sm:$0xff] %v6624_v14 }
 0x189   :  { %v5184_v28 = vpop.f32.mrf.mxu0 }
 0x18a   :  { %v5267_v25 = vpop.f32.mrf.mxu1 }
 0x18b   :  { %v989_v34 = vadd.f32 %v5267_v25, %v6527_v43  ;;  %v6632_v58 = vpop.f32.mrf.mxu0 }
 0x18c   :  { %v980_v13 = vpop.f32.mrf.mxu1  ;;  %10279 = vst [vmem:[#allocation46_spill] sm:$0xff] %v6632_v58 }
 0x18d   :  { %v981_v50 = vadd.f32 %v6527_v43, %v980_v13  ;;  %v6635_v25 = vpop.f32.mrf.mxu0  ;;  %v721_v13 = vmul.f32 0.088388346, %v533_v37 }
 0x18e   :  { %v5268_v16 = vpop.f32.mrf.mxu1 }
 0x18f   :  { %v992_v2 = vadd.f32 %v5268_v16, %v6527_v43 }
 0x190   :  { %v983_v3 = vpop.f32.mrf.mxu1 }
 0x191   :  { %v1530_v21 = vpack.c.bf16 %v992_v2, %v989_v34  ;;  %v984_v7 = vadd.f32 %v6527_v43, %v983_v3  ;;  %v6640_v2 = vpop.f32.mrf.mxu0  ;;  %v920_v3 = vadd.f32 %v6527_v43, %v6578_v41  ;;  %v722_v34 = vmul.f32 0.088388346, %v536_v17 }
 0x192   :  { %v5271_v14 = vpop.f32.mrf.mxu1  ;;  %10281 = vst [vmem:[#allocation48_spill] sm:$0xff] %v6640_v2  ;;  %v973_v41 = vadd.f32 %v5263_v51, %v6527_v43 }
 0x193   :  { %v1529_v40 = vpack.c.bf16 %v984_v7, %v981_v50  ;;  %4981 = vmatprep.subr.bf16.mxu1 %v1530_v21  ;;  %v976_v7 = vadd.f32 %v5264_v23, %v6527_v43  ;;  %v6646_v55 = vadd.f32 %v5271_v14, %v6527_v43  ;;  %v6657_v50 = vpack.c.bf16 %v722_v34, %v721_v13 }
 0x194   :  { %v6637_v16 = vpop.f32.mrf.mxu1  ;;  %4982 = vmatpush3.bf16.xpose.msra.mxu1 %v1522_v62  ;;  %v6651_v62 = vpop.f32.mrf.mxu0  ;;  %v1521_v14 = vpack.c.bf16 %v920_v3, %v917_v33  ;;  %v912_v13 = vadd.f32 %v6567_v10, %v6527_v43  ;;  %v968_v34 = vadd.f32 %v6527_v43, %v967_v36  ;;  %v909_v33 = vadd.f32 %v6560_v38, %v6527_v43 }
 0x195   :  { %10280 = vst [vmem:[#allocation47_spill] sm:$0xff] %v6637_v16  ;;  %4983 = vmatprep.subr.bf16.mxu1 %v1529_v40  ;;  %10282 = vst [vmem:[#allocation49_spill] sm:$0xff] %v6646_v55  ;;  %v1528_v17 = vpack.c.bf16 %v976_v7, %v973_v41  ;;  %v552_v38 = vadd.f32 %v5184_v28, %v6432_v56  ;;  %v904_v10 = vadd.f32 %v6527_v43, %v6571_v15 }
 0x196   :  { %v5272_v6 = vpop.f32.mrf.mxu1  ;;  %10285 = vst [vmem:[#allocation52_spill] sm:$0xff] %v6657_v50  ;;  %v6662_v21 = vpop.f32.mrf.mxu0  ;;  %v568_v8 = vadd.f32 %v6651_v62, %v6432_v56 }
 0x197   :  { %v6649_v47 = vadd.f32 %v5272_v6, %v6527_v43  ;;  %10286 = vst [vmem:[#allocation53_spill] sm:$0xff] %v6662_v21  ;;  %v549_v21 = vadd.f32 %v5183_v27, %v6432_v56  ;;  %v960_v27 = vadd.f32 %v6608_v18, %v6527_v43 }
 0x198   :  { %v6655_v40 = vpop.f32.mrf.mxu1  ;;  %v6664_v6 = vpop.f32.mrf.mxu0 }
 0x199   :  { %10283 = vst [vmem:[#allocation50_spill] sm:$0xff] %v6649_v47  ;;  %10284 = vst [vmem:[#allocation51_spill] sm:$0xff] %v6655_v40  ;;  %v888_v47 = vadd.f32 %v6527_v43, %v6556_v1 }
 0x19a   :  { %v5275_v37 = vpop.f32.mrf.mxu1  ;;  %v6668_v31 = vpop.f32.mrf.mxu0 }
 0x19b   :  { %v6674_v23 = vadd.f32 %v5275_v37, %v6527_v43  ;;  %v1520_v37 = vpack.c.bf16 %v912_v13, %v909_v33  ;;  %v726_v33 = vmul.f32 0.088388346, %v552_v38 }
 0x19c   :  { %v6666_v2 = vpop.f32.mrf.mxu1  ;;  %4984 = vmatpush3.bf16.xpose.msra.mxu1 %v1521_v14  ;;  %v6679_v7 = vpop.f32.mrf.mxu0  ;;  %v965_v14 = vadd.f32 %v6527_v43, %v6614_v61  ;;  %v725_v61 = vmul.f32 0.088388346, %v549_v21  ;;  %v957_v21 = vadd.f32 %v6600_v52, %v6527_v43 }
 0x19d   :  { %10287 = vst [vmem:[#allocation54_spill] sm:$0xff] %v6666_v2  ;;  %4985 = vmatprep.subr.bf16.mxu1 %v1528_v17 }
 0x19e   :  { %v5276_v51 = vpop.f32.mrf.mxu1  ;;  %v6689_v36 = vpop.f32.mrf.mxu0  ;;  %v6713_v28 = vpack.c.bf16 %v726_v33, %v725_v61  ;;  %v1526_v38 = vpack.c.bf16 %v960_v27, %v957_v21  ;;  %v952_v61 = vadd.f32 %v6527_v43, %v6610_v54  ;;  %v10291_v54 = vpack.c.bf16 %v6554_v0, %v6551_v63 }
 0x19f   :  { %v6677_v3 = vadd.f32 %v5276_v51, %v6527_v43  ;;  %v1527_v51 = vpack.c.bf16 %v968_v34, %v965_v14  ;;  %v901_v14 = vadd.f32 %v6527_v43, %v6564_v39  ;;  %v885_v63 = vadd.f32 %v6527_v43, %v6546_v57 }
 0x1a0   :  { %v6683_v41 = vpop.f32.mrf.mxu1  ;;  %v6694_v50 = vpop.f32.mrf.mxu0  ;;  %10289 = vst [vmem:[#allocation56_spill] sm:$0xff] %v6713_v28 }
 0x1a1   :  { %10288 = vst [vmem:[#allocation55_spill] sm:$0xff] %v6683_v41  ;;  %v1519_v15 = vpack.c.bf16 %v904_v10, %v901_v14  ;;  %v949_v10 = vadd.f32 %v6527_v43, %v6602_v49 }
 0x1a2   :  { %v6691_v17 = vpop.f32.mrf.mxu1  ;;  %v6699_v22 = vpop.f32.mrf.mxu0 }
 0x1a3   :  { %v1525_v21 = vpack.c.bf16 %v952_v61, %v949_v10  ;;  %v730_v10 = vmul.f32 0.088388346, %v568_v8 }
 0x1a4   :  { %v6696_v58 = vpop.f32.mrf.mxu1  ;;  %4986 = vmatpush3.bf16.xpose.msra.mxu1 %v1520_v37  ;;  %v6707_v34 = vpop.f32.mrf.mxu0 }
 0x1a5   :  { %4987 = vmatprep.subr.bf16.mxu1 %v1527_v51 }
 0x1a6   :  { %v6703_v13 = vpop.f32.mrf.mxu1  ;;  %v6717_v51 = vpop.f32.mrf.mxu0 }
 0x1a8   :  { %v6711_v37 = vpop.f32.mrf.mxu1  ;;  %v6721_v16 = vpop.f32.mrf.mxu0 }
 0x1aa   :  { %v6719_v48 = vpop.f32.mrf.mxu1  ;;  %v6725_v39 = vpop.f32.mrf.mxu0 }
 0x1ac   :  { %v6723_v18 = vpop.f32.mrf.mxu1  ;;  %4988 = vmatpush3.bf16.xpose.msra.mxu1 %v1519_v15  ;;  %v6731_v52 = vpop.f32.mrf.mxu0  ;;  %v565_v15 = vadd.f32 %v6635_v25, %v6432_v56 }
 0x1ad   :  { %4989 = vmatprep.subr.bf16.mxu1 %v1526_v38 }
 0x1ae   :  { %v6727_v40 = vpop.f32.mrf.mxu1  ;;  %v6737_v27 = vpop.f32.mrf.mxu0  ;;  %v729_v55 = vmul.f32 0.088388346, %v565_v15  ;;  %v1517_v15 = vpack.c.bf16 %v888_v47, %v885_v63  ;;  %v933_v63 = vadd.f32 %v6527_v43, %v6582_v53 }
 0x1b0   :  { %v6733_v33 = vpop.f32.mrf.mxu1  ;;  %v5331_v38 = vpop.f32.mrf.mxu0  ;;  %v6760_v62 = vpack.c.bf16 %v730_v10, %v729_v55  ;;  %v936_v10 = vadd.f32 %v6527_v43, %v6593_v20 }
 0x1b2   :  { %v5287_v14 = vpop.f32.mrf.mxu1  ;;  %v1276_v49 = vpop.f32.mrf.mxu0  ;;  %10295 = vst [vmem:[#allocation61_spill] sm:$0xff] %v6760_v62 }
 0x1b3   :  { %v6751_v25 = vadd.f32 %v5287_v14, %v6527_v43 }
 0x1b4   :  { %v6741_v28 = vpop.f32.mrf.mxu1  ;;  %4990 = vmatpush3.bf16.xpose.msra.mxu1 %v10291_v54  ;;  %v5332_v19 = vpop.f32.mrf.mxu0 }
 0x1b5   :  { %10290 = vst [vmem:[#allocation57_spill] sm:$0xff] %v6741_v28  ;;  %4991 = vmatprep.subr.bf16.mxu1 %v1525_v21  ;;  %10292 = vst [vmem:[#allocation58_spill] sm:$0xff] %v6751_v25 }
 0x1b6   :  { %v5288_v61 = vpop.f32.mrf.mxu1  ;;  %v1279_v1 = vpop.f32.mrf.mxu0 }
 0x1b7   :  { %v6754_v28 = vadd.f32 %v5288_v61, %v6527_v43  ;;  %v10297_v61 = vpack.c.bf16 %v6591_v12, %v6588_v9 }
 0x1b8   :  { %v6758_v0 = vpop.f32.mrf.mxu1  ;;  %v6766_v14 = vpop.f32.mrf.mxu0 }
 0x1b9   :  { %10293 = vst [vmem:[#allocation59_spill] sm:$0xff] %v6754_v28  ;;  %10294 = vst [vmem:[#allocation60_spill] sm:$0xff] %v6758_v0 }
 0x1ba   :  { %v6764_v8 = vpop.f32.mrf.mxu1  ;;  %10296 = vst [vmem:[#allocation62_spill] sm:$0xff] %v6766_v14  ;;  %v6773_v57 = vpop.f32.mrf.mxu0  ;;  %v1523_v14 = vpack.c.bf16 %v936_v10, %v933_v63  ;;  %v869_v10 = vadd.f32 %v6527_v43, %v6529_v24  ;;  %v9802_v24 = vmov 0  }
 0x1bb   :  { %10298 = vst [vmem:[#allocation63_spill] sm:$0xff] %v6773_v57  ;;  %v872_v57 = vadd.f32 %v6527_v43, %v6541_v30 }
 0x1bc   :  { %v6768_v54 = vpop.f32.mrf.mxu1  ;;  %4992 = vmatpush3.bf16.xpose.msra.mxu1 %v1517_v15  ;;  %v6779_v21 = vpop.f32.mrf.mxu0 }
 0x1bd   :  { %4993 = vmatprep.subr.bf16.mxu1 %v10297_v61  ;;  %10299 = vst [vmem:[#allocation64_spill] sm:$0xff] %v6779_v21  ;;  %v10302_v61 = vpack.c.bf16 %v6539_v46, %v6536_v29  ;;  %v1515_v46 = vpack.c.bf16 %v872_v57, %v869_v10 }
 0x1be   :  { %v6775_v55 = vpop.f32.mrf.mxu1  ;;  %v6785_v62 = vpop.f32.mrf.mxu0 }
 0x1bf   :  { %10300 = vst [vmem:[#allocation65_spill] sm:$0xff] %v6785_v62  ;;  %v6807_v62 = vld [vmem:[%s9785_s6] ss:$0 sm:$0xff] }
 0x1c0   :  { %v6781_v47 = vpop.f32.mrf.mxu1  ;;  %v6787_v9 = vpop.f32.mrf.mxu0  ;;  %v1288_v60 = vadd.f32 %v5332_v19, %v6807_v62  ;;  %v1053_v19 = vadd.f32 %v6719_v48, %v6527_v43  ;;  %v1277_v25 = vadd.f32 %v6807_v62, %v1276_v49  ;;  %v1269_v49 = vadd.f32 %v6721_v16, %v6807_v62 }
 0x1c1   :  { %10301 = vst [vmem:[#allocation66_spill] sm:$0xff] %v6787_v9 }
 0x1c2   :  { %v5295_v15 = vpop.f32.mrf.mxu1  ;;  %v6794_v20 = vpop.f32.mrf.mxu0 }
 0x1c3   :  { %10303 = vst [vmem:[#allocation67_spill] sm:$0xff] %v6794_v20  ;;  %v1285_v20 = vadd.f32 %v5331_v38, %v6807_v62 }
 0x1c4   :  { %v6789_v12 = vpop.f32.mrf.mxu1  ;;  %4994 = vmatpush3.bf16.xpose.msra.mxu1 %v10302_v61  ;;  %v6798_v53 = vpop.f32.mrf.mxu0 }
 0x1c5   :  { %4995 = vmatprep.subr.bf16.mxu1 %v1523_v14  ;;  %10304 = vst [vmem:[#allocation68_spill] sm:$0xff] %v6798_v53  ;;  %v1056_v53 = vadd.f32 %v6727_v40, %v6527_v43  ;;  %v4116_v40 = vpack.c.bf16 %v1288_v60, %v1285_v20 }
 0x1c6   :  { %v5296_v21 = vpop.f32.mrf.mxu1  ;;  %v6809_v29 = vpop.f32.mrf.mxu0 }
 0x1c7   :  { %10305 = vst [vmem:[#allocation69_spill] sm:$0xff] %v6809_v29  ;;  %v1538_v2 = vpack.c.bf16 %v1056_v53, %v1053_v19  ;;  %v1048_v53 = vadd.f32 %v6527_v43, %v6733_v33  ;;  %v1264_v33 = vadd.f32 %v6807_v62, %v6737_v27  ;;  %v1256_v27 = vadd.f32 %v6707_v34, %v6807_v62 }
 0x1c8   :  { %v6802_v63 = vpop.f32.mrf.mxu1  ;;  %v6811_v61 = vpop.f32.mrf.mxu0  ;;  %v1040_v19 = vadd.f32 %v6703_v13, %v6527_v43  ;;  %v477_v34 = vadd.f32 %v6432_v56, %v6569_v11  ;;  %v1245_v13 = vadd.f32 %v6807_v62, %v6699_v22 }
 0x1ca   :  { %v5299_v14 = vpop.f32.mrf.mxu1  ;;  %v6816_v0 = vpop.f32.mrf.mxu0 }
 0x1cb   :  { %10306 = vst [vmem:[#allocation70_spill] sm:$0xff] %v6816_v0  ;;  %v1117_v57 = vadd.f32 %v5299_v14, %v6527_v43  ;;  %v1280_v0 = vadd.f32 %v6807_v62, %v1279_v1  ;;  %v1272_v1 = vadd.f32 %v6731_v52, %v6807_v62  ;;  %v1101_v52 = vadd.f32 %v5295_v15, %v6527_v43 }
 0x1cc   :  { %v1108_v30 = vpop.f32.mrf.mxu1  ;;  %4996 = vmatpush3.bf16.xpose.msra.mxu1 %v1515_v46  ;;  %v461_v46 = vadd.f32 %v6432_v56, %v6533_v45  ;;  %v6824_v29 = vpop.f32.mrf.mxu0 }
 0x1cd   :  { %4141 = vmatprep.subr.bf16.mxu1 %v9802_v24  ;;  %v464_v24 = vadd.f32 %v6432_v56, %v6562_v5  ;;  %v1109_v28 = vadd.f32 %v6527_v43, %v1108_v30  ;;  %v4115_v20 = vpack.c.bf16 %v1280_v0, %v1277_v25  ;;  %v10307_v30 = vmov 0  }
 0x1ce   :  { %v5300_v9 = vpop.f32.mrf.mxu1  ;;  %v6834_v45 = vpop.f32.mrf.mxu0  ;;  %v703_v5 = vmul.f32 0.088388346, %v461_v46  ;;  %v1261_v25 = vadd.f32 %v6807_v62, %v6725_v39  ;;  %v4114_v0 = vpack.c.bf16 %v1272_v1, %v1269_v49  ;;  %v1253_v39 = vadd.f32 %v6694_v50, %v6807_v62 }
 0x1cf   :  { %v1120_v10 = vadd.f32 %v5300_v9, %v6527_v43  ;;  %v704_v60 = vmul.f32 0.088388346, %v464_v24  ;;  %v1037_v50 = vadd.f32 %v6691_v17, %v6527_v43  ;;  %v1240_v49 = vadd.f32 %v6679_v7, %v6807_v62 }
 0x1d0   :  { %v1111_v38 = vpop.f32.mrf.mxu1  ;;  %v6837_v48 = vpop.f32.mrf.mxu0  ;;  %v4113_v15 = vpack.c.bf16 %v1264_v33, %v1261_v25  ;;  %v1085_v7 = vadd.f32 %v6764_v8, %v6527_v43  ;;  %v1229_v25 = vadd.f32 %v6807_v62, %v6668_v31 }
 0x1d1   :  { %v1546_v14 = vpack.c.bf16 %v1120_v10, %v1117_v57  ;;  %v1112_v9 = vadd.f32 %v6527_v43, %v1111_v38  ;;  %v6854_v16 = vpack.c.bf16 %v704_v60, %v703_v5  ;;  %v1096_v38 = vadd.f32 %v6527_v43, %v6802_v63 }
 0x1d2   :  { %v4112_v5 = vpack.c.bf16 %v1256_v27, %v1253_v39  ;;  %v1248_v63 = vadd.f32 %v6807_v62, %v6717_v51  ;;  %v1536_v17 = vpack.c.bf16 %v1040_v19, %v1037_v50  ;;  %v1237_v51 = vadd.f32 %v6664_v6, %v6807_v62 }
 0x1d3   :  { %v1545_v41 = vpack.c.bf16 %v1112_v9, %v1109_v28  ;;  %4998 = vmatmul.mubr.bf16.vlgmr.msra.gmra.mxu1 %v6518_v26  ;;  %5061 = vmatprep.subr.bf16.mxu0 %v1546_v14  ;;  %v6844_v28 = vpop.f32.mrf.mxu0  ;;  %v480_v14 = vadd.f32 %v6432_v56, %v6580_v44  ;;  %v1093_v9 = vadd.f32 %v6527_v43, %v6789_v12  ;;  %v707_v12 = vmul.f32 0.088388346, %v477_v34 }
 0x1d4   :  { %5062 = vmatpush3.bf16.xpose.msra.mxu0 %v1538_v2  ;;  %4999 = vmatprep.mubr.bf16.mxu1 %v6516_v42  ;;  %v1104_v2 = vadd.f32 %v5296_v21, %v6527_v43  ;;  %v4111_v1 = vpack.c.bf16 %v1248_v63, %v1245_v13  ;;  %v1029_v6 = vadd.f32 %v6527_v43, %v6696_v58 }
 0x1d5   :  { %5063 = vmatprep.subr.bf16.mxu0 %v1545_v41  ;;  %4142 = vmatpush1.bf16.msra.mxu1 %v4116_v40  ;;  %v6850_v57 = vpop.f32.mrf.mxu0  ;;  %v1045_v41 = vadd.f32 %v6527_v43, %v6723_v18  ;;  %v1543_v11 = vpack.c.bf16 %v1096_v38, %v1093_v9  ;;  %v708_v22 = vmul.f32 0.088388346, %v480_v14  ;;  %v1349_v8 = vadd.f32 %v6837_v48, %v6807_v62 }
 0x1d6   :  { %4143 = vmatprep.subr.bf16.mxu1 %v10307_v30  ;;  %v1544_v10 = vpack.c.bf16 %v1104_v2, %v1101_v52  ;;  %v1088_v2 = vadd.f32 %v6775_v55, %v6527_v43  ;;  %v1080_v39 = vadd.f32 %v6527_v43, %v6781_v47  ;;  %v496_v19 = vadd.f32 %v6432_v56, %v6598_v4 }
 0x1d7   :  { %v6861_v24 = vpop.f32.mrf.mxu0  ;;  %v1537_v21 = vpack.c.bf16 %v1048_v53, %v1045_v41  ;;  %v1032_v53 = vadd.f32 %v6527_v43, %v6711_v37  ;;  %v6915_v52 = vpack.c.bf16 %v708_v22, %v707_v12  ;;  %v1232_v37 = vadd.f32 %v6807_v62, %v6689_v36  ;;  %v10311_v12 = vld [vmem:[#allocation70_spill] sm:$0xff] }
 0x1d8   :  { %v1352_v36 = vadd.f32 %v6850_v57, %v6807_v62  ;;  %v1077_v48 = vadd.f32 %v6527_v43, %v6768_v54  ;;  %v1341_v57 = vadd.f32 %v6807_v62, %v6844_v28  ;;  %v1344_v50 = vadd.f32 %v6807_v62, %v6861_v24 }
 0x1d9   :  { %4144 = vmatpush1.bf16.msra.mxu1 %v4115_v20  ;;  %v6865_v18 = vpop.f32.mrf.mxu0  ;;  %v1535_v55 = vpack.c.bf16 %v1032_v53, %v1029_v6  ;;  %v4109_v31 = vpack.c.bf16 %v1232_v37, %v1229_v25  ;;  %v10308_v4 = vpack.c.bf16 %v6677_v3, %v6674_v23  ;;  %v712_v28 = vmul.f32 0.088388346, %v496_v19  ;;  %v10310_v3 = vld [vmem:[#allocation54_spill] sm:$0xff]  ;;  %v10312_v53 = vld [vmem:[#allocation59_spill] sm:$0xff]  ;;  %v10316_v25 = vld [vmem:[#allocation68_spill] sm:$0xff] }
 0x1da   :  { %4145 = vmatprep.subr.bf16.mxu1 %v10307_v30  ;;  %v4124_v38 = vpack.c.bf16 %v1352_v36, %v1349_v8  ;;  %v1541_v34 = vpack.c.bf16 %v1080_v39, %v1077_v48  ;;  %v1333_v24 = vadd.f32 %v6811_v61, %v6807_v62  ;;  %v1336_v14 = vadd.f32 %v6824_v29, %v6807_v62  ;;  %v10318_v36 = vld [vmem:[#allocation40_spill] sm:$0xff]  ;;  %v10320_v48 = vld [vmem:[#allocation57_spill] sm:$0xff] }
 0x1db   :  { %5000 = vmatmul.mubr.bf16.gmra.mxu1 %v6516_v42  ;;  %v6872_v46 = vpop.f32.mrf.mxu0  ;;  %v4123_v9 = vpack.c.bf16 %v1344_v50, %v1341_v57  ;;  %v1325_v61 = vadd.f32 %v6807_v62, %v10311_v12  ;;  %v1328_v29 = vadd.f32 %v6807_v62, %v6834_v45  ;;  %v509_v39 = vadd.f32 %v6432_v56, %v10318_v36  ;;  %v10327_v12 = vld [vmem:[#allocation62_spill] sm:$0xff] }
 0x1dc   :  { %5064 = vmatpush3.bf16.xpose.msra.mxu0 %v1537_v21  ;;  %5001 = vmatprep.mubr.bf16.mxu1 %v6854_v16  ;;  %v1542_v21 = vpack.c.bf16 %v1088_v2, %v1085_v7  ;;  %v4122_v22 = vpack.c.bf16 %v1336_v14, %v1333_v24  ;;  %v10313_v2 = vld [vmem:[#allocation58_spill] sm:$0xff]  ;;  %v1061_v57 = vadd.f32 %v6527_v43, %v10320_v48 }
 0x1dd   :  { %5065 = vmatprep.subr.bf16.mxu0 %v1544_v10  ;;  %4146 = vmatpush1.bf16.msra.mxu1 %v4114_v0  ;;  %v6879_v40 = vpop.f32.mrf.mxu0  ;;  %v4110_v0 = vpack.c.bf16 %v1240_v49, %v1237_v51  ;;  %v10314_v6 = vpack.c.bf16 %v10312_v53, %v10313_v2  ;;  %v10315_v7 = vld [vmem:[#allocation66_spill] sm:$0xff]  ;;  %v4121_v37 = vpack.c.bf16 %v1328_v29, %v1325_v61  ;;  %v10329_v53 = vld [vmem:[#allocation51_spill] sm:$0xff] }
 0x1de   :  { %4147 = vmatprep.subr.bf16.mxu1 %v10307_v30  ;;  %v1317_v45 = vadd.f32 %v10315_v7, %v6807_v62  ;;  %v1301_v61 = vadd.f32 %v10327_v12, %v6807_v62  ;;  %v1000_v2 = vadd.f32 %v6527_v43, %v10329_v53  ;;  %v10330_v7 = vld [vmem:[#allocation47_spill] sm:$0xff]  ;;  %v10336_v53 = vld [vmem:[#allocation45_spill] sm:$0xff] }
 0x1df   :  { %v6893_v60 = vpop.f32.mrf.mxu0 }
 0x1e1   :  { %4148 = vmatpush1.bf16.msra.mxu1 %v4113_v15  ;;  %v6897_v44 = vpop.f32.mrf.mxu0  ;;  %v493_v15 = vadd.f32 %v6432_v56, %v6585_v35 }
 0x1e2   :  { %4149 = vmatprep.subr.bf16.mxu1 %v10307_v30 }
 0x1e3   :  { %5002 = vmatmul.mubr.bf16.gmra.mxu1 %v6854_v16  ;;  %v6904_v20 = vpop.f32.mrf.mxu0  ;;  %v711_v54 = vmul.f32 0.088388346, %v493_v15  ;;  %v10319_v15 = vld [vmem:[#allocation41_spill] sm:$0xff] }
 0x1e4   :  { %5066 = vmatpush3.bf16.xpose.msra.mxu0 %v1536_v17  ;;  %5003 = vmatprep.mubr.bf16.mxu1 %v6548_v59  ;;  %v1013_v17 = vadd.f32 %v6527_v43, %v10310_v3  ;;  %v512_v19 = vadd.f32 %v6432_v56, %v10319_v15  ;;  %v10323_v56 = vld [vmem:[#allocation50_spill] sm:$0xff]  ;;  %v10326_v3 = vld [vmem:[#allocation39_spill] sm:$0xff] }
 0x1e5   :  { %5067 = vmatprep.subr.bf16.mxu0 %v1543_v11  ;;  %4150 = vmatpush1.bf16.msra.mxu1 %v4112_v5  ;;  %v6911_v41 = vpop.f32.mrf.mxu0  ;;  %v10309_v5 = vld [vmem:[#allocation55_spill] sm:$0xff]  ;;  %v6972_v11 = vpack.c.bf16 %v712_v28, %v711_v54 }
 0x1e6   :  { %4151 = vmatprep.subr.bf16.mxu1 %v10307_v30  ;;  %v1016_v63 = vadd.f32 %v6527_v43, %v10309_v5 }
 0x1e7   :  { %v6923_v33 = vpop.f32.mrf.mxu0 }
 0x1e8   :  { %v1533_v49 = vpack.c.bf16 %v1016_v63, %v1013_v17  ;;  %v715_v63 = vmul.f32 0.088388346, %v509_v39  ;;  %v716_v17 = vmul.f32 0.088388346, %v512_v19 }
 0x1e9   :  { %4152 = vmatpush1.bf16.msra.mxu1 %v4111_v1  ;;  %v6927_v58 = vpop.f32.mrf.mxu0 }
 0x1ea   :  { %4153 = vmatprep.subr.bf16.mxu1 %v10307_v30 }
 0x1eb   :  { %5004 = vmatmul.mubr.bf16.gmra.mxu1 %v6548_v59  ;;  %v6934_v10 = vpop.f32.mrf.mxu0 }
 0x1ec   :  { %5068 = vmatpush3.bf16.xpose.msra.mxu0 %v1535_v55  ;;  %5005 = vmatprep.mubr.bf16.mxu1 %v6915_v52 }
 0x1ed   :  { %5069 = vmatprep.subr.bf16.mxu0 %v1542_v21  ;;  %4154 = vmatpush1.bf16.msra.mxu1 %v4110_v0  ;;  %v6939_v27 = vpop.f32.mrf.mxu0  ;;  %v1320_v0 = vadd.f32 %v10316_v25, %v6807_v62  ;;  %v10317_v21 = vld [vmem:[#allocation60_spill] sm:$0xff]  ;;  %v7030_v25 = vpack.c.bf16 %v716_v17, %v715_v63 }
 0x1ee   :  { %4155 = vmatprep.subr.bf16.mxu1 %v10307_v30  ;;  %v1400_v17 = vadd.f32 %v6939_v27, %v6807_v62  ;;  %v1381_v27 = vadd.f32 %v6897_v44, %v6807_v62  ;;  %v1376_v44 = vadd.f32 %v6807_v62, %v6923_v33  ;;  %v1368_v33 = vadd.f32 %v6879_v40, %v6807_v62 }
 0x1ef   :  { %v6951_v47 = vpop.f32.mrf.mxu0 }
 0x1f1   :  { %4156 = vmatpush1.bf16.msra.mxu1 %v4109_v31  ;;  %v6955_v35 = vpop.f32.mrf.mxu0  ;;  %v1064_v31 = vadd.f32 %v6527_v43, %v10317_v21 }
 0x1f2   :  { %4157 = vmatprep.subr.bf16.mxu1 %v10307_v30  ;;  %v1413_v19 = vadd.f32 %v6955_v35, %v6807_v62 }
 0x1f3   :  { %5006 = vmatmul.mubr.bf16.gmra.mxu1 %v6915_v52  ;;  %v6965_v13 = vpop.f32.mrf.mxu0  ;;  %v1539_v24 = vpack.c.bf16 %v1064_v31, %v1061_v57  ;;  %v10332_v31 = vld [vmem:[#allocation65_spill] sm:$0xff] }
 0x1f4   :  { %5070 = vmatpush3.bf16.xpose.msra.mxu0 %v10308_v4  ;;  %5007 = vmatprep.mubr.bf16.mxu1 %v6576_v32  ;;  %v10322_v4 = vld [vmem:[#allocation69_spill] sm:$0xff]  ;;  %v1296_v36 = vadd.f32 %v6807_v62, %v10332_v31 }
 0x1f5   :  { %5071 = vmatprep.subr.bf16.mxu0 %v1541_v34  ;;  %4158 = vmatpush2.bf16.msra.mxu1 %v4124_v38  ;;  %v5364_v23 = vpop.f32.mrf.mxu0  ;;  %v10321_v38 = vld [vmem:[#allocation67_spill] sm:$0xff]  ;;  %v4120_v34 = vpack.c.bf16 %v1320_v0, %v1317_v45  ;;  %v1312_v54 = vadd.f32 %v6807_v62, %v10322_v4  ;;  %v997_v45 = vadd.f32 %v6527_v43, %v10330_v7  ;;  %v10334_v4 = vld [vmem:[#allocation44_spill] sm:$0xff]  ;;  %v10337_v7 = vld [vmem:[#allocation46_spill] sm:$0xff] }
 0x1f6   :  { %4159 = vmatprep.subr.bf16.mxu1 %v10307_v30  ;;  %v1309_v50 = vadd.f32 %v6807_v62, %v10321_v38  ;;  %v10331_v0 = vld [vmem:[#allocation63_spill] sm:$0xff]  ;;  %v1416_v48 = vadd.f32 %v5364_v23, %v6807_v62  ;;  %v1405_v23 = vadd.f32 %v6807_v62, %v6965_v13  ;;  %v1397_v13 = vadd.f32 %v6927_v58, %v6807_v62 }
 0x1f7   :  { %v6978_v51 = vpop.f32.mrf.mxu0  ;;  %v1531_v39 = vpack.c.bf16 %v1000_v2, %v997_v45  ;;  %v7051_v38 = vld [vmem:[%s9781_s2] ss:$0 sm:$0xff]  ;;  %v1373_v45 = vadd.f32 %v6807_v62, %v6904_v20  ;;  %v1365_v20 = vadd.f32 %v6865_v18, %v6807_v62  ;;  %s6219_s2 = smov [#allocation10]  }
 0x1f8   :  { %v528_v35 = vadd.f32 %v7051_v38, %v10334_v4  ;;  %v541_v2 = vadd.f32 %v7051_v38, %v10336_v53  ;;  %s4788_s25 = sshll.u32 %s6219_s2, 4  ;;  %s4789_s25 = int_to_ptr.vmem [resolvable:$true] %s4788_s25 }
 0x1f9   :  { %4160 = vmatpush2.bf16.msra.mxu1 %v4123_v9  ;;  %v6982_v1 = vpop.f32.mrf.mxu0  ;;  %v10324_v9 = vld [vmem:[#allocation49_spill] sm:$0xff]  ;;  %s6184_s26 = scalar_lea.vmem %s4789_s25, 8192  ;;  %p6189_p7 = scmp.lt.s32.totalorder %s4789_s25, %s4789_s25 }
 0x1fa   :  { %4161 = vmatprep.subr.bf16.mxu1 %v10307_v30  ;;  %v10325_v5 = vpack.c.bf16 %v10323_v56, %v10324_v9  ;;  %v720_v63 = vmul.f32 0.088388346, %v528_v35  ;;  %v10340_v35 = vld [vmem:[#allocation53_spill] sm:$0xff]  ;;  %p6185_p6 = scmp.ne.s32.totalorder %s4789_s25, %s6184_s26  ;;  %p6190_p8 = scmp.lt.s32.totalorder %s6184_s26, %s6184_s26 }
 0x1fb   :  { %5008 = vmatmul.mubr.bf16.gmra.mxu1 %v6576_v32  ;;  %v6992_v55 = vpop.f32.mrf.mxu0 }
 0x1fc   :  { %5072 = vmatpush3.bf16.xpose.msra.mxu0 %v1533_v49  ;;  %5009 = vmatprep.mubr.bf16.mxu1 %v6972_v11  ;;  %v4119_v49 = vpack.c.bf16 %v1312_v54, %v1309_v50  ;;  %v10333_v50 = vld [vmem:[#allocation42_spill] sm:$0xff]  ;;  %v4132_v54 = vpack.c.bf16 %v1416_v48, %v1413_v19  ;;  %v4126_v19 = vpack.c.bf16 %v1368_v33, %v1365_v20  ;;  %v10349_v33 = vld [vmem:[#allocation21_spill] sm:$0xff]  ;;  %p6191_p9 = por %p6190_p8, %p6189_p7 }
 0x1fd   :  { %5073 = vmatprep.subr.bf16.mxu0 %v10314_v6  ;;  %4162 = vmatpush2.bf16.msra.mxu1 %v4122_v22  ;;  %v6997_v8 = vpop.f32.mrf.mxu0  ;;  %v10328_v22 = vld [vmem:[#allocation64_spill] sm:$0xff]  ;;  %v1360_v48 = vadd.f32 %v6807_v62, %v6893_v60 }
 0x1fe   :  { %4163 = vmatprep.subr.bf16.mxu1 %v10307_v30  ;;  %v1304_v29 = vadd.f32 %v10328_v22, %v6807_v62  ;;  %v4130_v22 = vpack.c.bf16 %v1400_v17, %v1397_v13  ;;  %v10339_v60 = vld [vmem:[#allocation48_spill] sm:$0xff]  ;;  %p6192_p10 = pnand %p6191_p9, %p6185_p6 }
 0x1ff   :  { %v7009_v28 = vpop.f32.mrf.mxu0  ;;  %v557_v4 = vadd.f32 %v7051_v38, %v10339_v60 }
 0x200   :  { %v4118_v21 = vpack.c.bf16 %v1304_v29, %v1301_v61  ;;  %v1392_v29 = vadd.f32 %v6807_v62, %v6951_v47 }
 0x201   :  { %4164 = vmatpush2.bf16.msra.mxu1 %v4121_v37  ;;  %v7013_v14 = vpop.f32.mrf.mxu0  ;;  %v1293_v37 = vadd.f32 %v6807_v62, %v10331_v0 }
 0x202   :  { %4165 = vmatprep.subr.bf16.mxu1 %v10307_v30 }
 0x203   :  { %5010 = vmatmul.mubr.bf16.gmra.mxu1 %v6972_v11  ;;  %v7026_v6 = vpop.f32.mrf.mxu0  ;;  %v4117_v43 = vpack.c.bf16 %v1296_v36, %v1293_v37  ;;  %v723_v37 = vmul.f32 0.088388346, %v541_v2  ;;  %v4127_v36 = vpack.c.bf16 %v1376_v44, %v1373_v45  ;;  %v10344_v2 = vld [vmem:[#allocation61_spill] sm:$0xff]  ;;  %v1424_v44 = vadd.f32 %v6807_v62, %v7009_v28 }
 0x204   :  { %5074 = vmatpush3.bf16.xpose.msra.mxu0 %v10325_v5  ;;  %5011 = vmatprep.mubr.bf16.mxu1 %v10326_v3  ;;  %v10335_v5 = vld [vmem:[#allocation43_spill] sm:$0xff] }
 0x205   :  { %5075 = vmatprep.subr.bf16.mxu0 %v1539_v24  ;;  %4166 = vmatpush2.bf16.msra.mxu1 %v4120_v34  ;;  %v7037_v15 = vpop.f32.mrf.mxu0  ;;  %v525_v34 = vadd.f32 %v7051_v38, %v10333_v50  ;;  %v1408_v24 = vadd.f32 %v6807_v62, %v6978_v51 }
 0x206   :  { %4167 = vmatprep.subr.bf16.mxu1 %v10307_v30 }
 0x207   :  { %v7046_v57 = vpop.f32.mrf.mxu0  ;;  %v719_v9 = vmul.f32 0.088388346, %v525_v34  ;;  %v4131_v51 = vpack.c.bf16 %v1408_v24, %v1405_v23  ;;  %v560_v23 = vadd.f32 %v7051_v38, %v10340_v35 }
 0x209   :  { %4168 = vmatpush2.bf16.msra.mxu1 %v4119_v49  ;;  %v7061_v56 = vpop.f32.mrf.mxu0  ;;  %v7074_v61 = vpack.c.bf16 %v720_v63, %v719_v9  ;;  %v727_v9 = vmul.f32 0.088388346, %v557_v4  ;;  %v10341_v63 = vld [vmem:[#allocation56_spill] sm:$0xff]  ;;  %v728_v13 = vmul.f32 0.088388346, %v560_v23  ;;  %v10355_v4 = vld [vmem:[#allocation27_spill] sm:$0xff] }
 0x20a   :  { %4169 = vmatprep.subr.bf16.mxu1 %v10307_v30  ;;  %v1461_v17 = vadd.f32 %v7061_v56, %v6807_v62  ;;  %v1445_v56 = vadd.f32 %v7013_v14, %v6807_v62  ;;  %v10343_v14 = vld [vmem:[#allocation15_spill] sm:$0xff]  ;;  %v637_v35 = vadd.f32 %v7051_v38, %v10355_v4  ;;  %v10356_v23 = vld [vmem:[#allocation26_spill] sm:$0xff] }
 0x20b   :  { %5012 = vmatmul.mubr.bf16.gmra.mxu1 %v10326_v3  ;;  %v7072_v12 = vpop.f32.mrf.mxu0 }
 0x20c   :  { %5076 = vmatpush3.bf16.xpose.msra.mxu0 %v1531_v39  ;;  %5013 = vmatprep.mubr.bf16.mxu1 %v7030_v25 }
 0x20d   :  { %4170 = vmatpush2.bf16.msra.mxu1 %v4118_v21  ;;  %4430 = vmatprep.subr.bf16.mxu0 %v10307_v30  ;;  %v5376_v58 = vpop.f32.mrf.mxu0  ;;  %v10338_v21 = vld [vmem:[#allocation52_spill] sm:$0xff] }
 0x20e   :  { %4171 = vmatprep.subr.bf16.mxu1 %v10307_v30 }
 0x20f   :  { %v1455_v47 = vpop.f32.mrf.mxu0 }
 0x211   :  { %4172 = vmatpush2.bf16.msra.mxu1 %v4117_v43 }
 0x213   :  { %5014 = vmatmul.mubr.bf16.gmra.mxu1 %v7030_v25  ;;  %5078 = vmatmul.mubr.bf16.vlgmr.msra.gmra.mxu0 %v6518_v26  ;;  %v1389_v26 = vadd.f32 %v6807_v62, %v6934_v10  ;;  %v1384_v10 = vadd.f32 %v6911_v41, %v6807_v62  ;;  %v5379_v41 = vpop.f32.mrf.mxu0 }
 0x214   :  { %5015 = vmatprep.mubr.bf16.mxu1 %v10335_v5  ;;  %5079 = vmatprep.mubr.bf16.mxu0 %v6516_v42  ;;  %v1477_v40 = vadd.f32 %v5379_v41, %v6807_v62 }
 0x215   :  { %4431 = vmatpush1.bf16.msra.mxu0 %v4132_v54  ;;  %v4129_v49 = vpack.c.bf16 %v1392_v29, %v1389_v26  ;;  %v4128_v0 = vpack.c.bf16 %v1384_v10, %v1381_v27  ;;  %v1468_v39 = vpop.f32.mrf.mxu0  ;;  %v1456_v27 = vadd.f32 %v6807_v62, %v1455_v47  ;;  %v1437_v10 = vadd.f32 %v6807_v62, %v7026_v6  ;;  %v10342_v47 = vld [vmem:[#allocation16_spill] sm:$0xff] }
 0x216   :  { %4432 = vmatprep.subr.bf16.mxu0 %v10307_v30  ;;  %v576_v53 = vadd.f32 %v7051_v38, %v10342_v47  ;;  %v1429_v6 = vadd.f32 %v6982_v1, %v6807_v62  ;;  %v10360_v47 = vld [vmem:[#allocation34_spill] sm:$0xff] }
 0x217   :  { %v5380_v50 = vpop.f32.mrf.mxu0 }
 0x219   :  { %4433 = vmatpush1.bf16.msra.mxu0 %v4131_v51  ;;  %v1471_v34 = vpop.f32.mrf.mxu0  ;;  %v1464_v51 = vadd.f32 %v5376_v58, %v6807_v62 }
 0x21a   :  { %4434 = vmatprep.subr.bf16.mxu0 %v10307_v30  ;;  %v1472_v24 = vadd.f32 %v6807_v62, %v1471_v34 }
 0x21b   :  { %5016 = vmatmul.mubr.bf16.gmra.mxu1 %v10335_v5  ;;  %5080 = vmatmul.mubr.bf16.gmra.mxu0 %v6516_v42  ;;  %v544_v42 = vadd.f32 %v7051_v38, %v10337_v7  ;;  %v4138_v29 = vpack.c.bf16 %v1464_v51, %v1461_v17  ;;  %v10358_v17 = vld [vmem:[#allocation30_spill] sm:$0xff] }
 0x21c   :  { %5017 = vmatprep.mubr.bf16.mxu1 %v7074_v61  ;;  %5081 = vmatprep.mubr.bf16.mxu0 %v6854_v16  ;;  %v653_v51 = vadd.f32 %v7051_v38, %v10358_v17 }
 0x21d   :  { %4435 = vmatpush1.bf16.msra.mxu0 %v4130_v22  ;;  %v724_v31 = vmul.f32 0.088388346, %v544_v42  ;;  %v7137_v22 = vpack.c.bf16 %v728_v13, %v727_v9  ;;  %v732_v42 = vmul.f32 0.088388346, %v576_v53  ;;  %v10357_v9 = vld [vmem:[#allocation31_spill] sm:$0xff]  ;;  %v672_v53 = vadd.f32 %v7051_v38, %v10360_v47 }
 0x21e   :  { %4436 = vmatprep.subr.bf16.mxu0 %v10307_v30 }
 0x21f   :  { %v7108_v43 = vpack.c.bf16 %v724_v31, %v723_v37 }
 0x221   :  { %4437 = vmatpush1.bf16.msra.mxu0 %v4129_v49 }
 0x222   :  { %4438 = vmatprep.subr.bf16.mxu0 %v10307_v30 }
 0x223   :  { %5018 = vmatmul.mubr.bf16.gmra.mxu1 %v7074_v61  ;;  %5082 = vmatmul.mubr.bf16.gmra.mxu0 %v6854_v16  ;;  %v1357_v16 = vadd.f32 %v6807_v62, %v6872_v46  ;;  %v1480_v46 = vadd.f32 %v5380_v50, %v6807_v62  ;;  %v10352_v50 = vld [vmem:[#allocation24_spill] sm:$0xff] }
 0x224   :  { %5019 = vmatprep.mubr.bf16.mxu1 %v10338_v21  ;;  %5083 = vmatprep.mubr.bf16.mxu0 %v6548_v59 }
 0x225   :  { %4439 = vmatpush1.bf16.msra.mxu0 %v4128_v0  ;;  %v4125_v18 = vpack.c.bf16 %v1360_v48, %v1357_v16  ;;  %v4140_v54 = vpack.c.bf16 %v1480_v46, %v1477_v40  ;;  %v10353_v40 = vld [vmem:[#allocation23_spill] sm:$0xff] }
 0x226   :  { %4440 = vmatprep.subr.bf16.mxu0 %v10307_v30 }
 0x229   :  { %4441 = vmatpush1.bf16.msra.mxu0 %v4127_v36  ;;  %v605_v36 = vadd.f32 %v7051_v38, %v10349_v33 }
 0x22a   :  { %4442 = vmatprep.subr.bf16.mxu0 %v10307_v30 }
 0x22b   :  { %5020 = vmatmul.mubr.bf16.gmra.mxu1 %v10338_v21  ;;  %5084 = vmatmul.mubr.bf16.gmra.mxu0 %v6548_v59  ;;  %v1469_v59 = vadd.f32 %v6807_v62, %v1468_v39  ;;  %v10350_v39 = vld [vmem:[#allocation20_spill] sm:$0xff] }
 0x22c   :  { %5021 = vmatprep.mubr.bf16.mxu1 %v7108_v43  ;;  %5085 = vmatprep.mubr.bf16.mxu0 %v6915_v52 }
 0x22d   :  { %4443 = vmatpush1.bf16.msra.mxu0 %v4126_v19  ;;  %v4139_v26 = vpack.c.bf16 %v1472_v24, %v1469_v59 }
 0x22e   :  { %4444 = vmatprep.subr.bf16.mxu0 %v10307_v30 }
 0x231   :  { %4445 = vmatpush1.bf16.msra.mxu0 %v4125_v18  ;;  %v621_v18 = vadd.f32 %v7051_v38, %v10352_v50 }
 0x232   :  { %4446 = vmatprep.subr.bf16.mxu0 %v10307_v30 }
 0x233   :  { %5022 = vmatmul.mubr.bf16.gmra.mxu1 %v7108_v43  ;;  %5086 = vmatmul.mubr.bf16.gmra.mxu0 %v6915_v52  ;;  %v1453_v52 = vadd.f32 %v6807_v62, %v7072_v12  ;;  %v1448_v12 = vadd.f32 %v7037_v15, %v6807_v62  ;;  %v573_v15 = vadd.f32 %v7051_v38, %v10343_v14 }
 0x234   :  { %5023 = vmatprep.mubr.bf16.mxu1 %v10341_v63  ;;  %5087 = vmatprep.mubr.bf16.mxu0 %v6576_v32 }
 0x235   :  { %4447 = vmatpush2.bf16.msra.mxu0 %v4140_v54  ;;  %v4137_v58 = vpack.c.bf16 %v1456_v27, %v1453_v52  ;;  %v4136_v49 = vpack.c.bf16 %v1448_v12, %v1445_v56  ;;  %v731_v45 = vmul.f32 0.088388346, %v573_v15  ;;  %v747_v54 = vmul.f32 0.088388346, %v637_v35  ;;  %v10362_v15 = vld [vmem:[#allocation33_spill] sm:$0xff] }
 0x236   :  { %4448 = vmatprep.subr.bf16.mxu0 %v10307_v30  ;;  %v751_v27 = vmul.f32 0.088388346, %v653_v51 }
 0x237   :  { %v7174_v41 = vpack.c.bf16 %v732_v42, %v731_v45 }
 0x239   :  { %4449 = vmatpush2.bf16.msra.mxu0 %v4139_v26  ;;  %v10359_v26 = vld [vmem:[#allocation29_spill] sm:$0xff] }
 0x23a   :  { %4450 = vmatprep.subr.bf16.mxu0 %v10307_v30 }
 0x23b   :  { %5024 = vmatmul.mubr.bf16.gmra.mxu1 %v10341_v63  ;;  %5088 = vmatmul.mubr.bf16.gmra.mxu0 %v6576_v32  ;;  %v1440_v32 = vadd.f32 %v6807_v62, %v7046_v57  ;;  %v1432_v57 = vadd.f32 %v6997_v8, %v6807_v62  ;;  %v10346_v8 = vld [vmem:[#allocation18_spill] sm:$0xff] }
 0x23c   :  { %5025 = vmatprep.mubr.bf16.mxu1 %v7137_v22  ;;  %5089 = vmatprep.mubr.bf16.mxu0 %v6972_v11  ;;  %v589_v28 = vadd.f32 %v7051_v38, %v10346_v8 }
 0x23d   :  { %4451 = vmatpush2.bf16.msra.mxu0 %v4138_v29  ;;  %v4135_v7 = vpack.c.bf16 %v1440_v32, %v1437_v10  ;;  %v4134_v0 = vpack.c.bf16 %v1432_v57, %v1429_v6  ;;  %v10363_v6 = vld [vmem:[#allocation32_spill] sm:$0xff] }
 0x23e   :  { %4452 = vmatprep.subr.bf16.mxu0 %v10307_v30  ;;  %v735_v31 = vmul.f32 0.088388346, %v589_v28 }
 0x241   :  { %4453 = vmatpush2.bf16.msra.mxu0 %v4137_v58 }
 0x242   :  { %4454 = vmatprep.subr.bf16.mxu0 %v10307_v30 }
 0x243   :  { %5026 = vmatmul.mubr.bf16.gmra.mxu1 %v7137_v22  ;;  %5090 = vmatmul.mubr.bf16.gmra.mxu0 %v6972_v11  ;;  %v1421_v11 = vadd.f32 %v6807_v62, %v6992_v55  ;;  %v10345_v55 = vld [vmem:[#allocation19_spill] sm:$0xff] }
 0x244   :  { %5027 = vmatprep.mubr.bf16.mxu1 %v10344_v2  ;;  %5091 = vmatprep.mubr.bf16.mxu0 %v10326_v3  ;;  %v592_v62 = vadd.f32 %v7051_v38, %v10345_v55 }
 0x245   :  { %4455 = vmatpush2.bf16.msra.mxu0 %v4136_v49  ;;  %v4133_v1 = vpack.c.bf16 %v1424_v44, %v1421_v11 }
 0x246   :  { %4456 = vmatprep.subr.bf16.mxu0 %v10307_v30  ;;  %v736_v37 = vmul.f32 0.088388346, %v592_v62  ;;  %v10371_v62 = vld [vmem:[#allocation37_spill] sm:$0xff] }
 0x247   :  { %v688_v8 = vadd.f32 %v7051_v38, %v10371_v62 }
 0x248   :  { %v7190_v20 = vpack.c.bf16 %v736_v37, %v735_v31  ;;  %v10374_v31 = vld [vmem:[#allocation35_spill] sm:$0xff] }
 0x249   :  { %4457 = vmatpush2.bf16.msra.mxu0 %v4135_v7  ;;  %v756_v7 = vmul.f32 0.088388346, %v672_v53 }
 0x24a   :  { %4458 = vmatprep.subr.bf16.mxu0 %v10307_v30 }
 0x24b   :  { %5028 = vmatmul.mubr.bf16.gmra.mxu1 %v10344_v2  ;;  %5092 = vmatmul.mubr.bf16.gmra.mxu0 %v10326_v3  ;;  %v10347_v3 = vld [vmem:[#allocation17_spill] sm:$0xff] }
 0x24c   :  { %5029 = vmatprep.mubr.bf16.mxu1 %v7174_v41  ;;  %5093 = vmatprep.mubr.bf16.mxu0 %v7030_v25 }
 0x24d   :  { %4459 = vmatpush2.bf16.msra.mxu0 %v4134_v0 }
 0x24e   :  { %4460 = vmatprep.subr.bf16.mxu0 %v10307_v30  ;;  %v10348_v30 = vld [vmem:[#allocation22_spill] sm:$0xff] }
 0x251   :  { %4461 = vmatpush2.bf16.msra.mxu0 %v4133_v1 }
 0x253   :  { %5030 = vmatmul.mubr.bf16.gmra.mxu1 %v7174_v41  ;;  %5094 = vmatmul.mubr.bf16.gmra.mxu0 %v7030_v25  ;;  %v608_v25 = vadd.f32 %v7051_v38, %v10348_v30  ;;  %v760_v30 = vmul.f32 0.088388346, %v688_v8 }
 0x254   :  { %5031 = vmatprep.mubr.bf16.mxu1 %v10347_v3  ;;  %5095 = vmatprep.mubr.bf16.mxu0 %v10335_v5 }
 0x255   :  { %v740_v16 = vmul.f32 0.088388346, %v608_v25 }
 0x25b   :  { %5032 = vmatmul.mubr.bf16.gmra.mxu1 %v10347_v3  ;;  %5096 = vmatmul.mubr.bf16.gmra.mxu0 %v10335_v5  ;;  %v739_v5 = vmul.f32 0.088388346, %v605_v36 }
 0x25c   :  { %5033 = vmatprep.mubr.bf16.mxu1 %v7190_v20  ;;  %5097 = vmatprep.mubr.bf16.mxu0 %v7074_v61 }
 0x25d   :  { %v7204_v19 = vpack.c.bf16 %v740_v16, %v739_v5 }
 0x263   :  { %5034 = vmatmul.mubr.bf16.gmra.mxu1 %v7190_v20  ;;  %5098 = vmatmul.mubr.bf16.gmra.mxu0 %v7074_v61  ;;  %v10351_v61 = vld [vmem:[#allocation25_spill] sm:$0xff] }
 0x264   :  { %5035 = vmatprep.mubr.bf16.mxu1 %v10350_v39  ;;  %5099 = vmatprep.mubr.bf16.mxu0 %v10338_v21  ;;  %v624_v48 = vadd.f32 %v7051_v38, %v10351_v61 }
 0x266   :  { %v744_v46 = vmul.f32 0.088388346, %v624_v48  ;;  %v10383_v48 = vld [vmem:[#allocation38_spill] sm:$0xff] }
 0x26b   :  { %5036 = vmatmul.mubr.bf16.gmra.mxu1 %v10350_v39  ;;  %5100 = vmatmul.mubr.bf16.gmra.mxu0 %v10338_v21  ;;  %v743_v21 = vmul.f32 0.088388346, %v621_v18 }
 0x26c   :  { %5037 = vmatprep.mubr.bf16.mxu1 %v7204_v19  ;;  %5101 = vmatprep.mubr.bf16.mxu0 %v7108_v43 }
 0x26d   :  { %v7218_v34 = vpack.c.bf16 %v744_v46, %v743_v21 }
 0x273   :  { %5038 = vmatmul.mubr.bf16.gmra.mxu1 %v7204_v19  ;;  %5102 = vmatmul.mubr.bf16.gmra.mxu0 %v7108_v43  ;;  %v10354_v43 = vld [vmem:[#allocation28_spill] sm:$0xff] }
 0x274   :  { %5039 = vmatprep.mubr.bf16.mxu1 %v10353_v40  ;;  %5103 = vmatprep.mubr.bf16.mxu0 %v10341_v63  ;;  %v640_v60 = vadd.f32 %v7051_v38, %v10354_v43 }
 0x276   :  { %v748_v59 = vmul.f32 0.088388346, %v640_v60 }
 0x278   :  { %v7232_v24 = vpack.c.bf16 %v748_v59, %v747_v54 }
 0x27b   :  { %5040 = vmatmul.mubr.bf16.gmra.mxu1 %v10353_v40  ;;  %5104 = vmatmul.mubr.bf16.gmra.mxu0 %v10341_v63  ;;  %v656_v63 = vadd.f32 %v7051_v38, %v10357_v9 }
 0x27c   :  { %5041 = vmatprep.mubr.bf16.mxu1 %v7218_v34  ;;  %5105 = vmatprep.mubr.bf16.mxu0 %v7137_v22 }
 0x27d   :  { %v752_v52 = vmul.f32 0.088388346, %v656_v63 }
 0x27f   :  { %v7254_v12 = vpack.c.bf16 %v752_v52, %v751_v27 }
 0x283   :  { %5042 = vmatmul.mubr.bf16.gmra.mxu1 %v7218_v34  ;;  %5106 = vmatmul.mubr.bf16.gmra.mxu0 %v7137_v22 }
 0x284   :  { %5043 = vmatprep.mubr.bf16.mxu1 %v10356_v23  ;;  %5107 = vmatprep.mubr.bf16.mxu0 %v10344_v2 }
 0x28b   :  { %5044 = vmatmul.mubr.bf16.gmra.mxu1 %v10356_v23  ;;  %5108 = vmatmul.mubr.bf16.gmra.mxu0 %v10344_v2  ;;  %v669_v2 = vadd.f32 %v7051_v38, %v10362_v15 }
 0x28c   :  { %5045 = vmatprep.mubr.bf16.mxu1 %v7232_v24  ;;  %5109 = vmatprep.mubr.bf16.mxu0 %v7174_v41 }
 0x28d   :  { %v755_v45 = vmul.f32 0.088388346, %v669_v2 }
 0x28f   :  { %v7284_v0 = vpack.c.bf16 %v756_v7, %v755_v45 }
 0x293   :  { %v7240_v13 = vpop.f32.mrf.mxu1  ;;  %5046 = vmatmul.mubr.bf16.gmra.mxu1 %v7232_v24  ;;  %5110 = vmatmul.mubr.bf16.gmra.mxu0 %v7174_v41 }
 0x294   :  { %5047 = vmatprep.mubr.bf16.mxu1 %v10359_v26  ;;  %5111 = vmatprep.mubr.bf16.mxu0 %v10347_v3 }
 0x295   :  { %v7248_v22 = vpop.f32.mrf.mxu1 }
 0x296   :  { %v2253_v60 = vmax.f32 %v7240_v13, %v7248_v22 }
 0x297   :  { %v7250_v29 = vpop.f32.mrf.mxu1 }
 0x299   :  { %v7252_v56 = vpop.f32.mrf.mxu1 }
 0x29a   :  { %v2258_v9 = vmax.f32 %v7250_v29, %v7252_v56 }
 0x29b   :  { %v7256_v58 = vpop.f32.mrf.mxu1  ;;  %5048 = vmatmul.mubr.bf16.gmra.mxu1 %v10359_v26  ;;  %5112 = vmatmul.mubr.bf16.gmra.mxu0 %v10347_v3  ;;  %v10373_v3 = vld [vmem:[#allocation36_spill] sm:$0xff] }
 0x29c   :  { %5049 = vmatprep.mubr.bf16.mxu1 %v7254_v12  ;;  %5113 = vmatprep.mubr.bf16.mxu0 %v7190_v20  ;;  %v685_v37 = vadd.f32 %v7051_v38, %v10373_v3 }
 0x29d   :  { %v7262_v10 = vpop.f32.mrf.mxu1 }
 0x29e   :  { %v759_v33 = vmul.f32 0.088388346, %v685_v37  ;;  %v2263_v47 = vmax.f32 %v7256_v58, %v7262_v10 }
 0x29f   :  { %v7264_v49 = vpop.f32.mrf.mxu1 }
 0x2a1   :  { %v7266_v32 = vpop.f32.mrf.mxu1 }
 0x2a2   :  { %v2268_v8 = vmax.f32 %v7264_v49, %v7266_v32 }
 0x2a3   :  { %v7270_v14 = vpop.f32.mrf.mxu1  ;;  %5050 = vmatmul.mubr.bf16.gmra.mxu1 %v7254_v12  ;;  %5114 = vmatmul.mubr.bf16.gmra.mxu0 %v7190_v20 }
 0x2a4   :  { %10361 = vst [vmem:[#allocation55_spill] sm:$0xff] %v7270_v14  ;;  %5051 = vmatprep.mubr.bf16.mxu1 %v10363_v6  ;;  %5115 = vmatprep.mubr.bf16.mxu0 %v10350_v39 }
 0x2a5   :  { %v7278_v57 = vpop.f32.mrf.mxu1 }
 0x2a6   :  { %10364 = vst [vmem:[#allocation54_spill] sm:$0xff] %v7278_v57 }
 0x2a7   :  { %v7280_v42 = vpop.f32.mrf.mxu1 }
 0x2a8   :  { %10365 = vst [vmem:[#allocation70_spill] sm:$0xff] %v7280_v42 }
 0x2a9   :  { %v7282_v11 = vpop.f32.mrf.mxu1 }
 0x2aa   :  { %10366 = vst [vmem:[#allocation59_spill] sm:$0xff] %v7282_v11 }
 0x2ab   :  { %v7286_v44 = vpop.f32.mrf.mxu1  ;;  %5052 = vmatmul.mubr.bf16.gmra.mxu1 %v10363_v6  ;;  %5116 = vmatmul.mubr.bf16.gmra.mxu0 %v10350_v39  ;;  %v7314_v39 = vpack.c.bf16 %v760_v30, %v759_v33 }
 0x2ac   :  { %10367 = vst [vmem:[#allocation58_spill] sm:$0xff] %v7286_v44  ;;  %5053 = vmatprep.mubr.bf16.mxu1 %v7284_v0  ;;  %5117 = vmatprep.mubr.bf16.mxu0 %v7204_v19 }
 0x2ad   :  { %v7292_v41 = vpop.f32.mrf.mxu1 }
 0x2ae   :  { %10368 = vst [vmem:[#allocation66_spill] sm:$0xff] %v7292_v41 }
 0x2af   :  { %v7294_v1 = vpop.f32.mrf.mxu1 }
 0x2b0   :  { %10369 = vst [vmem:[#allocation68_spill] sm:$0xff] %v7294_v1 }
 0x2b1   :  { %v7296_v55 = vpop.f32.mrf.mxu1 }
 0x2b2   :  { %10370 = vst [vmem:[#allocation60_spill] sm:$0xff] %v7296_v55 }
 0x2b3   :  { %v7300_v28 = vpop.f32.mrf.mxu1  ;;  %5054 = vmatmul.mubr.bf16.gmra.mxu1 %v7284_v0  ;;  %5118 = vmatmul.mubr.bf16.gmra.mxu0 %v7204_v19 }
 0x2b4   :  { %10372 = vst [vmem:[#allocation40_spill] sm:$0xff] %v7300_v28  ;;  %5055 = vmatprep.mubr.bf16.mxu1 %v10374_v31  ;;  %5119 = vmatprep.mubr.bf16.mxu0 %v10353_v40 }
 0x2b5   :  { %v7308_v20 = vpop.f32.mrf.mxu1 }
 0x2b6   :  { %10375 = vst [vmem:[#allocation41_spill] sm:$0xff] %v7308_v20 }
 0x2b7   :  { %v7310_v25 = vpop.f32.mrf.mxu1 }
 0x2b8   :  { %10376 = vst [vmem:[#allocation57_spill] sm:$0xff] %v7310_v25 }
 0x2b9   :  { %v7312_v36 = vpop.f32.mrf.mxu1 }
 0x2ba   :  { %10377 = vst [vmem:[#allocation67_spill] sm:$0xff] %v7312_v36 }
 0x2bb   :  { %v7316_v16 = vpop.f32.mrf.mxu1  ;;  %5056 = vmatmul.mubr.bf16.gmra.mxu1 %v10374_v31  ;;  %5120 = vmatmul.mubr.bf16.gmra.mxu0 %v10353_v40 }
 0x2bc   :  { %10378 = vst [vmem:[#allocation69_spill] sm:$0xff] %v7316_v16  ;;  %5057 = vmatprep.mubr.bf16.mxu1 %v7314_v39  ;;  %5121 = vmatprep.mubr.bf16.mxu0 %v7218_v34 }
 0x2bd   :  { %v7322_v38 = vpop.f32.mrf.mxu1 }
 0x2be   :  { %10379 = vst [vmem:[#allocation50_spill] sm:$0xff] %v7322_v38 }
 0x2bf   :  { %v7324_v5 = vpop.f32.mrf.mxu1 }
 0x2c0   :  { %10380 = vst [vmem:[#allocation49_spill] sm:$0xff] %v7324_v5 }
 0x2c1   :  { %v7326_v19 = vpop.f32.mrf.mxu1 }
 0x2c2   :  { %10381 = vst [vmem:[#allocation39_spill] sm:$0xff] %v7326_v19 }
 0x2c3   :  { %v7328_v61 = vpop.f32.mrf.mxu1  ;;  %5058 = vmatmul.mubr.bf16.gmra.mxu1 %v7314_v39  ;;  %5122 = vmatmul.mubr.bf16.gmra.mxu0 %v7218_v34 }
 0x2c4   :  { %10382 = vst [vmem:[#allocation62_spill] sm:$0xff] %v7328_v61  ;;  %5059 = vmatprep.mubr.bf16.mxu1 %v10383_v48  ;;  %5123 = vmatprep.mubr.bf16.mxu0 %v10356_v23 }
 0x2c5   :  { %v7334_v50 = vpop.f32.mrf.mxu1 }
 0x2c6   :  { %10384 = vst [vmem:[#allocation64_spill] sm:$0xff] %v7334_v50 }
 0x2c7   :  { %v7336_v18 = vpop.f32.mrf.mxu1 }
 0x2c8   :  { %10385 = vst [vmem:[#allocation51_spill] sm:$0xff] %v7336_v18 }
 0x2c9   :  { %v7338_v40 = vpop.f32.mrf.mxu1 }
 0x2ca   :  { %10386 = vst [vmem:[#allocation47_spill] sm:$0xff] %v7338_v40 }
 0x2cb   :  { %v7340_v46 = vpop.f32.mrf.mxu1  ;;  %5060 = vmatmul.mubr.bf16.gmra.mxu1 %v10383_v48  ;;  %5124 = vmatmul.mubr.bf16.gmra.mxu0 %v10356_v23 }
 0x2cc   :  { %10387 = vst [vmem:[#allocation63_spill] sm:$0xff] %v7340_v46  ;;  %5125 = vmatprep.mubr.bf16.mxu0 %v7232_v24 }
 0x2cd   :  { %v7345_v21 = vpop.f32.mrf.mxu1 }
 0x2ce   :  { %10388 = vst [vmem:[#allocation65_spill] sm:$0xff] %v7345_v21 }
 0x2cf   :  { %v7347_v34 = vpop.f32.mrf.mxu1 }
 0x2d0   :  { %10389 = vst [vmem:[#allocation42_spill] sm:$0xff] %v7347_v34 }
 0x2d1   :  { %v7349_v43 = vpop.f32.mrf.mxu1 }
 0x2d2   :  { %10390 = vst [vmem:[#allocation44_spill] sm:$0xff] %v7349_v43 }
 0x2d3   :  { %v7353_v4 = vpop.f32.mrf.mxu1  ;;  %v7355_v35 = vpop.f32.mrf.mxu0  ;;  %5126 = vmatmul.mubr.bf16.gmra.mxu0 %v7232_v24 }
 0x2d4   :  { %10391 = vst [vmem:[#allocation43_spill] sm:$0xff] %v7353_v4  ;;  %v2254_v59 = vmax.f32 %v2253_v60, %v7355_v35  ;;  %5127 = vmatprep.mubr.bf16.mxu0 %v10359_v26 }
 0x2d5   :  { %v7360_v23 = vpop.f32.mrf.mxu1  ;;  %v7362_v54 = vpop.f32.mrf.mxu0 }
 0x2d6   :  { %10392 = vst [vmem:[#allocation45_spill] sm:$0xff] %v7360_v23  ;;  %v2255_v63 = vmax.f32 %v2254_v59, %v7362_v54  ;;  %v2273_v59 = vmax.f32 %v7270_v14, %v7278_v57 }
 0x2d7   :  { %v7367_v17 = vpop.f32.mrf.mxu1  ;;  %v7369_v51 = vpop.f32.mrf.mxu0 }
 0x2d8   :  { %10393 = vst [vmem:[#allocation46_spill] sm:$0xff] %v7367_v17  ;;  %v2259_v52 = vmax.f32 %v2258_v9, %v7369_v51  ;;  %2256 = vmax.xlane.f32.xlu0 %v2255_v63 }
 0x2d9   :  { %v7372_v24 = vpop.f32.mrf.mxu1  ;;  %v7374_v27 = vpop.f32.mrf.mxu0 }
 0x2da   :  { %10394 = vst [vmem:[#allocation52_spill] sm:$0xff] %v7372_v24  ;;  %v2260_v53 = vmax.f32 %v2259_v52, %v7374_v27 }
 0x2db   :  { %v7379_v15 = vpop.f32.mrf.mxu1  ;;  %v7381_v2 = vpop.f32.mrf.mxu0  ;;  %5128 = vmatmul.mubr.bf16.gmra.mxu0 %v10359_v26 }
 0x2dc   :  { %10395 = vst [vmem:[#allocation48_spill] sm:$0xff] %v7379_v15  ;;  %v2264_v7 = vmax.f32 %v2263_v47, %v7381_v2  ;;  %5129 = vmatprep.mubr.bf16.mxu0 %v7254_v12  ;;  %2261 = vmax.xlane.f32.xlu0 %v2260_v53 }
 0x2dd   :  { %v7386_v45 = vpop.f32.mrf.mxu1  ;;  %v7388_v62 = vpop.f32.mrf.mxu0 }
 0x2de   :  { %10396 = vst [vmem:[#allocation53_spill] sm:$0xff] %v7386_v45  ;;  %v2265_v3 = vmax.f32 %v2264_v7, %v7388_v62 }
 0x2df   :  { %v7393_v37 = vpop.f32.mrf.mxu1  ;;  %v7395_v30 = vpop.f32.mrf.mxu0 }
 0x2e0   :  { %10397 = vst [vmem:[#allocation56_spill] sm:$0xff] %v7393_v37  ;;  %v2269_v26 = vmax.f32 %v2268_v8, %v7395_v30  ;;  %2266 = vmax.xlane.f32.xlu1 %v2265_v3  ;;  %v2278_v8 = vmax.f32 %v7280_v42, %v7282_v11 }
 0x2e1   :  { %v7398_v33 = vpop.f32.mrf.mxu1  ;;  %v7400_v60 = vpop.f32.mrf.mxu0 }
 0x2e2   :  { %10398 = vst [vmem:[#allocation16_spill] sm:$0xff] %v7398_v33  ;;  %10399 = vst [vmem:[#allocation15_spill] sm:$0xff] %v7400_v60  ;;  %v2270_v9 = vmax.f32 %v2269_v26, %v7400_v60 }
 0x2e3   :  { %v7405_v63 = vpop.f32.mrf.mxu1  ;;  %v7407_v52 = vpop.f32.mrf.mxu0  ;;  %5130 = vmatmul.mubr.bf16.gmra.mxu0 %v7254_v12 }
 0x2e4   :  { %10400 = vst [vmem:[#allocation61_spill] sm:$0xff] %v7405_v63  ;;  %10401 = vst [vmem:[#allocation19_spill] sm:$0xff] %v7407_v52  ;;  %v2274_v47 = vmax.f32 %v2273_v59, %v7407_v52  ;;  %5131 = vmatprep.mubr.bf16.mxu0 %v10363_v6  ;;  %2271 = vmax.xlane.f32.xlu1 %v2270_v9  ;;  %v2283_v9 = vmax.f32 %v7286_v44, %v7292_v41 }
 0x2e5   :  { %v7412_v53 = vpop.f32.mrf.mxu1  ;;  %v7414_v7 = vpop.f32.mrf.mxu0  ;;  %v2288_v41 = vmax.f32 %v7294_v1, %v7296_v55 }
 0x2e6   :  { %10402 = vst [vmem:[#allocation18_spill] sm:$0xff] %v7412_v53  ;;  %v2275_v3 = vmax.f32 %v2274_v47, %v7414_v7 }
 0x2e7   :  { %v7419_v26 = vpop.f32.mrf.mxu1  ;;  %v7421_v57 = vpop.f32.mrf.mxu0 }
 0x2e8   :  { %10403 = vst [vmem:[#allocation17_spill] sm:$0xff] %v7419_v26  ;;  %10404 = vst [vmem:[#allocation22_spill] sm:$0xff] %v7421_v57  ;;  %v2279_v12 = vmax.f32 %v2278_v8, %v7421_v57  ;;  %2276 = vmax.xlane.f32.xlu0 %v2275_v3 }
 0x2e9   :  { %v7424_v59 = vpop.f32.mrf.mxu1  ;;  %v7426_v52 = vpop.f32.mrf.mxu0 }
 0x2ea   :  { %10405 = vst [vmem:[#allocation21_spill] sm:$0xff] %v7424_v59  ;;  %10406 = vst [vmem:[#allocation20_spill] sm:$0xff] %v7426_v52  ;;  %v2280_v14 = vmax.f32 %v2279_v12, %v7426_v52 }
 0x2eb   :  { %v7431_v60 = vpop.f32.mrf.mxu1  ;;  %v7433_v11 = vpop.f32.mrf.mxu0  ;;  %5132 = vmatmul.mubr.bf16.gmra.mxu0 %v10363_v6 }
 0x2ec   :  { %10407 = vst [vmem:[#allocation25_spill] sm:$0xff] %v7431_v60  ;;  %10408 = vst [vmem:[#allocation24_spill] sm:$0xff] %v7433_v11  ;;  %v2284_v47 = vmax.f32 %v2283_v9, %v7433_v11  ;;  %5133 = vmatprep.mubr.bf16.mxu0 %v7284_v0  ;;  %2281 = vmax.xlane.f32.xlu1 %v2280_v14  ;;  %v2293_v14 = vmax.f32 %v7300_v28, %v7308_v20 }
 0x2ed   :  { %v7438_v8 = vpop.f32.mrf.mxu1  ;;  %v7440_v3 = vpop.f32.mrf.mxu0  ;;  %v2298_v20 = vmax.f32 %v7310_v25, %v7312_v36 }
 0x2ee   :  { %10409 = vst [vmem:[#allocation23_spill] sm:$0xff] %v7438_v8  ;;  %10410 = vst [vmem:[#allocation28_spill] sm:$0xff] %v7440_v3  ;;  %v2285_v12 = vmax.f32 %v2284_v47, %v7440_v3 }
 0x2ef   :  { %v7445_v44 = vpop.f32.mrf.mxu1  ;;  %v7447_v52 = vpop.f32.mrf.mxu0 }
 0x2f0   :  { %10411 = vst [vmem:[#allocation27_spill] sm:$0xff] %v7445_v44  ;;  %10412 = vst [vmem:[#allocation26_spill] sm:$0xff] %v7447_v52  ;;  %v2289_v6 = vmax.f32 %v2288_v41, %v7447_v52  ;;  %2286 = vmax.xlane.f32.xlu0 %v2285_v12 }
 0x2f1   :  { %v7450_v9 = vpop.f32.mrf.mxu1  ;;  %v7452_v11 = vpop.f32.mrf.mxu0 }
 0x2f2   :  { %10413 = vst [vmem:[#allocation31_spill] sm:$0xff] %v7450_v9  ;;  %10414 = vst [vmem:[#allocation30_spill] sm:$0xff] %v7452_v11  ;;  %v2290_v57 = vmax.f32 %v2289_v6, %v7452_v11 }
 0x2f3   :  { %v7457_v42 = vpop.f32.mrf.mxu1  ;;  %v7459_v55 = vpop.f32.mrf.mxu0  ;;  %5134 = vmatmul.mubr.bf16.gmra.mxu0 %v7284_v0 }
 0x2f4   :  { %10415 = vst [vmem:[#allocation29_spill] sm:$0xff] %v7457_v42  ;;  %10416 = vst [vmem:[#allocation34_spill] sm:$0xff] %v7459_v55  ;;  %v2294_v47 = vmax.f32 %v2293_v14, %v7459_v55  ;;  %5135 = vmatprep.mubr.bf16.mxu0 %v10374_v31  ;;  %2291 = vmax.xlane.f32.xlu1 %v2290_v57  ;;  %v2303_v57 = vmax.f32 %v7316_v16, %v7322_v38 }
 0x2f5   :  { %v7464_v41 = vpop.f32.mrf.mxu1  ;;  %v7466_v12 = vpop.f32.mrf.mxu0  ;;  %v2308_v38 = vmax.f32 %v7324_v5, %v7326_v19 }
 0x2f6   :  { %10417 = vst [vmem:[#allocation33_spill] sm:$0xff] %v7464_v41  ;;  %10418 = vst [vmem:[#allocation32_spill] sm:$0xff] %v7466_v12  ;;  %v2295_v6 = vmax.f32 %v2294_v47, %v7466_v12 }
 0x2f7   :  { %v7471_v28 = vpop.f32.mrf.mxu1  ;;  %v7473_v11 = vpop.f32.mrf.mxu0 }
 0x2f8   :  { %10419 = vst [vmem:[#allocation37_spill] sm:$0xff] %v7471_v28  ;;  %10420 = vst [vmem:[#allocation36_spill] sm:$0xff] %v7473_v11  ;;  %v2299_v0 = vmax.f32 %v2298_v20, %v7473_v11  ;;  %2296 = vmax.xlane.f32.xlu0 %v2295_v6 }
 0x2f9   :  { %v7476_v14 = vpop.f32.mrf.mxu1  ;;  %v7478_v55 = vpop.f32.mrf.mxu0 }
 0x2fa   :  { %10421 = vst [vmem:[#allocation35_spill] sm:$0xff] %v7476_v14  ;;  %10422 = vst [vmem:[#allocation38_spill] sm:$0xff] %v7478_v55  ;;  %v2300_v52 = vmax.f32 %v2299_v0, %v7478_v55 }
 0x2fb   :  { %v7483_v1 = vpop.f32.mrf.mxu1  ;;  %v7485_v36 = vpop.f32.mrf.mxu0  ;;  %5136 = vmatmul.mubr.bf16.gmra.mxu0 %v10374_v31 }
 0x2fc   :  { %10423 = vst [vmem:[#allocation71_spill] sm:$0xff] %v7483_v1  ;;  %10424 = vst [vmem:[#allocation72_spill] sm:$0xff] %v7485_v36  ;;  %v2304_v47 = vmax.f32 %v2303_v57, %v7485_v36  ;;  %5137 = vmatprep.mubr.bf16.mxu0 %v7314_v39  ;;  %2301 = vmax.xlane.f32.xlu1 %v2300_v52  ;;  %v2313_v52 = vmax.f32 %v7328_v61, %v7334_v50 }
 0x2fd   :  { %v7490_v20 = vpop.f32.mrf.mxu1  ;;  %v7492_v6 = vpop.f32.mrf.mxu0  ;;  %v2318_v50 = vmax.f32 %v7336_v18, %v7338_v40 }
 0x2fe   :  { %10425 = vst [vmem:[#allocation73_spill] sm:$0xff] %v7490_v20  ;;  %10426 = vst [vmem:[#allocation74_spill] sm:$0xff] %v7492_v6  ;;  %v2305_v0 = vmax.f32 %v2304_v47, %v7492_v6 }
 0x2ff   :  { %v7497_v16 = vpop.f32.mrf.mxu1  ;;  %v7499_v55 = vpop.f32.mrf.mxu0 }
 0x300   :  { %10427 = vst [vmem:[#allocation75_spill] sm:$0xff] %v7497_v16  ;;  %10428 = vst [vmem:[#allocation76_spill] sm:$0xff] %v7499_v55  ;;  %v2309_v31 = vmax.f32 %v2308_v38, %v7499_v55  ;;  %2306 = vmax.xlane.f32.xlu0 %v2305_v0 }
 0x301   :  { %v7502_v57 = vpop.f32.mrf.mxu1  ;;  %v7504_v36 = vpop.f32.mrf.mxu0 }
 0x302   :  { %10429 = vst [vmem:[#allocation77_spill] sm:$0xff] %v7502_v57  ;;  %10430 = vst [vmem:[#allocation78_spill] sm:$0xff] %v7504_v36  ;;  %v2310_v11 = vmax.f32 %v2309_v31, %v7504_v36 }
 0x303   :  { %v7509_v25 = vpop.f32.mrf.mxu1  ;;  %v7511_v19 = vpop.f32.mrf.mxu0  ;;  %5138 = vmatmul.mubr.bf16.gmra.mxu0 %v7314_v39 }
 0x304   :  { %10431 = vst [vmem:[#allocation79_spill] sm:$0xff] %v7509_v25  ;;  %10432 = vst [vmem:[#allocation80_spill] sm:$0xff] %v7511_v19  ;;  %v2314_v47 = vmax.f32 %v2313_v52, %v7511_v19  ;;  %5139 = vmatprep.mubr.bf16.mxu0 %v10383_v48  ;;  %2311 = vmax.xlane.f32.xlu1 %v2310_v11  ;;  %v2323_v11 = vmax.f32 %v7340_v46, %v7345_v21 }
 0x305   :  { %v7516_v38 = vpop.f32.mrf.mxu1  ;;  %v7518_v0 = vpop.f32.mrf.mxu0 }
 0x306   :  { %10433 = vst [vmem:[#allocation81_spill] sm:$0xff] %v7516_v38  ;;  %10434 = vst [vmem:[#allocation82_spill] sm:$0xff] %v7518_v0  ;;  %v2315_v31 = vmax.f32 %v2314_v47, %v7518_v0 }
 0x307   :  { %v7523_v61 = vpop.f32.mrf.mxu1  ;;  %v7525_v36 = vpop.f32.mrf.mxu0 }
 0x308   :  { %10435 = vst [vmem:[#allocation83_spill] sm:$0xff] %v7523_v61  ;;  %10436 = vst [vmem:[#allocation84_spill] sm:$0xff] %v7525_v36  ;;  %v2319_v39 = vmax.f32 %v2318_v50, %v7525_v36  ;;  %2316 = vmax.xlane.f32.xlu0 %v2315_v31  ;;  %v2328_v36 = vmax.f32 %v7347_v34, %v7349_v43 }
 0x309   :  { %v7528_v52 = vpop.f32.mrf.mxu1  ;;  %v7530_v19 = vpop.f32.mrf.mxu0 }
 0x30a   :  { %10437 = vst [vmem:[#allocation85_spill] sm:$0xff] %v7528_v52  ;;  %10438 = vst [vmem:[#allocation86_spill] sm:$0xff] %v7530_v19  ;;  %v2320_v55 = vmax.f32 %v2319_v39, %v7530_v19 }
 0x30b   :  { %v7535_v5 = vpop.f32.mrf.mxu1  ;;  %v7537_v40 = vpop.f32.mrf.mxu0  ;;  %5140 = vmatmul.mubr.bf16.gmra.mxu0 %v10383_v48 }
 0x30c   :  { %10439 = vst [vmem:[#allocation87_spill] sm:$0xff] %v7535_v5  ;;  %10440 = vst [vmem:[#allocation88_spill] sm:$0xff] %v7537_v40  ;;  %v2324_v47 = vmax.f32 %v2323_v11, %v7537_v40  ;;  %2321 = vmax.xlane.f32.xlu1 %v2320_v55  ;;  %v2333_v55 = vmax.f32 %v7353_v4, %v7360_v23 }
 0x30d   :  { %v7541_v50 = vpop.f32.mrf.mxu1  ;;  %v7543_v31 = vpop.f32.mrf.mxu0 }
 0x30e   :  { %10441 = vst [vmem:[#allocation89_spill] sm:$0xff] %v7541_v50  ;;  %10442 = vst [vmem:[#allocation90_spill] sm:$0xff] %v7543_v31  ;;  %v2325_v21 = vmax.f32 %v2324_v47, %v7543_v31 }
 0x30f   :  { %v7548_v46 = vpop.f32.mrf.mxu1  ;;  %v7550_v39 = vpop.f32.mrf.mxu0 }
 0x310   :  { %10443 = vst [vmem:[#allocation91_spill] sm:$0xff] %v7548_v46  ;;  %10444 = vst [vmem:[#allocation92_spill] sm:$0xff] %v7550_v39  ;;  %v2329_v19 = vmax.f32 %v2328_v36, %v7550_v39  ;;  %2326 = vmax.xlane.f32.xlu0 %v2325_v21  ;;  %v2338_v21 = vmax.f32 %v7367_v17, %v7372_v24 }
 0x311   :  { %v7553_v48 = vpop.f32.mrf.mxu1  ;;  %v7555_v11 = vpop.f32.mrf.mxu0 }
 0x312   :  { %10445 = vst [vmem:[#allocation93_spill] sm:$0xff] %v7553_v48  ;;  %10446 = vst [vmem:[#allocation94_spill] sm:$0xff] %v7555_v11  ;;  %v2330_v40 = vmax.f32 %v2329_v19, %v7555_v11 }
 0x313   :  { %v7560_v18 = vpop.f32.mrf.mxu1  ;;  %v7562_v43 = vpop.f32.mrf.mxu0 }
 0x314   :  { %10447 = vst [vmem:[#allocation95_spill] sm:$0xff] %v7560_v18  ;;  %10448 = vst [vmem:[#allocation96_spill] sm:$0xff] %v7562_v43  ;;  %v2334_v47 = vmax.f32 %v2333_v55, %v7562_v43  ;;  %2331 = vmax.xlane.f32.xlu1 %v2330_v40  ;;  %v2343_v40 = vmax.f32 %v7379_v15, %v7386_v45 }
 0x315   :  { %v7565_v34 = vpop.f32.mrf.mxu1  ;;  %v7567_v36 = vpop.f32.mrf.mxu0 }
 0x316   :  { %10449 = vst [vmem:[#allocation97_spill] sm:$0xff] %v7565_v34  ;;  %10450 = vst [vmem:[#allocation98_spill] sm:$0xff] %v7567_v36  ;;  %v2335_v39 = vmax.f32 %v2334_v47, %v7567_v36 }
 0x317   :  { %v7572_v31 = vpop.f32.mrf.mxu1  ;;  %v7574_v23 = vpop.f32.mrf.mxu0 }
 0x318   :  { %10451 = vst [vmem:[#allocation99_spill] sm:$0xff] %v7572_v31  ;;  %10452 = vst [vmem:[#allocation100_spill] sm:$0xff] %v7574_v23  ;;  %v2339_v19 = vmax.f32 %v2338_v21, %v7574_v23  ;;  %2336 = vmax.xlane.f32.xlu0 %v2335_v39  ;;  %v2348_v39 = vmax.f32 %v7393_v37, %v7398_v33 }
 0x319   :  { %v7577_v4 = vpop.f32.mrf.mxu1  ;;  %v7579_v55 = vpop.f32.mrf.mxu0 }
 0x31a   :  { %10453 = vst [vmem:[#allocation101_spill] sm:$0xff] %v7577_v4  ;;  %10454 = vst [vmem:[#allocation102_spill] sm:$0xff] %v7579_v55  ;;  %v2340_v43 = vmax.f32 %v2339_v19, %v7579_v55 }
 0x31b   :  { %v7584_v11 = vpop.f32.mrf.mxu1  ;;  %v7586_v24 = vpop.f32.mrf.mxu0 }
 0x31c   :  { %10455 = vst [vmem:[#allocation103_spill] sm:$0xff] %v7584_v11  ;;  %10456 = vst [vmem:[#allocation104_spill] sm:$0xff] %v7586_v24  ;;  %v2344_v47 = vmax.f32 %v2343_v40, %v7586_v24  ;;  %2341 = vmax.xlane.f32.xlu1 %v2340_v43  ;;  %v2353_v43 = vmax.f32 %v7405_v63, %v7412_v53 }
 0x31d   :  { %v7589_v17 = vpop.f32.mrf.mxu1  ;;  %v7591_v21 = vpop.f32.mrf.mxu0 }
 0x31e   :  { %10457 = vst [vmem:[#allocation105_spill] sm:$0xff] %v7589_v17  ;;  %10458 = vst [vmem:[#allocation106_spill] sm:$0xff] %v7591_v21  ;;  %v2345_v23 = vmax.f32 %v2344_v47, %v7591_v21 }
 0x31f   :  { %v7596_v36 = vpop.f32.mrf.mxu0  ;;  %v7598_v45 = vpop.f32.mrf.mxu1 }
 0x320   :  { %10459 = vst [vmem:[#allocation107_spill] sm:$0xff] %v7596_v36  ;;  %10460 = vst [vmem:[#allocation108_spill] sm:$0xff] %v7598_v45  ;;  %v2349_v19 = vmax.f32 %v2348_v39, %v7596_v36  ;;  %2346 = vmax.xlane.f32.xlu0 %v2345_v23  ;;  %v2358_v39 = vmax.f32 %v7419_v26, %v7424_v59 }
 0x321   :  { %v7601_v55 = vpop.f32.mrf.mxu0  ;;  %v7608_v15 = vpop.f32.mrf.mxu1 }
 0x322   :  { %10461 = vst [vmem:[#allocation109_spill] sm:$0xff] %v7601_v55  ;;  %v2350_v40 = vmax.f32 %v2349_v19, %v7601_v55  ;;  %10463 = vst [vmem:[#allocation111_spill] sm:$0xff] %v7608_v15 }
 0x323   :  { %v7606_v24 = vpop.f32.mrf.mxu0  ;;  %v7618_v21 = vpop.f32.mrf.mxu1 }
 0x324   :  { %10462 = vst [vmem:[#allocation110_spill] sm:$0xff] %v7606_v24  ;;  %v2354_v47 = vmax.f32 %v2353_v43, %v7606_v24  ;;  %2351 = vmax.xlane.f32.xlu1 %v2350_v40  ;;  %10466 = vst [vmem:[#allocation114_spill] sm:$0xff] %v7618_v21  ;;  %v2363_v43 = vmax.f32 %v7431_v60, %v7438_v8 }
 0x325   :  { %v7611_v33 = vpop.f32.mrf.mxu0  ;;  %v7628_v53 = vpop.f32.mrf.mxu1 }
 0x326   :  { %10464 = vst [vmem:[#allocation112_spill] sm:$0xff] %v7611_v33  ;;  %v2355_v23 = vmax.f32 %v2354_v47, %v7611_v33  ;;  %10469 = vst [vmem:[#allocation117_spill] sm:$0xff] %v7628_v53 }
 0x327   :  { %v7616_v36 = vpop.f32.mrf.mxu0  ;;  %v7638_v33 = vpop.f32.mrf.mxu1 }
 0x328   :  { %10465 = vst [vmem:[#allocation113_spill] sm:$0xff] %v7616_v36  ;;  %v2359_v19 = vmax.f32 %v2358_v39, %v7616_v36  ;;  %2356 = vmax.xlane.f32.xlu0 %v2355_v23  ;;  %v2368_v39 = vmax.f32 %v7445_v44, %v7450_v9  ;;  %10472 = vst [vmem:[#allocation120_spill] sm:$0xff] %v7638_v33 }
 0x329   :  { %v7621_v55 = vpop.f32.mrf.mxu0 }
 0x32a   :  { %10467 = vst [vmem:[#allocation115_spill] sm:$0xff] %v7621_v55  ;;  %v2360_v40 = vmax.f32 %v2359_v19, %v7621_v55 }
 0x32b   :  { %v7626_v24 = vpop.f32.mrf.mxu0 }
 0x32c   :  { %10468 = vst [vmem:[#allocation116_spill] sm:$0xff] %v7626_v24  ;;  %v2364_v47 = vmax.f32 %v2363_v43, %v7626_v24  ;;  %2361 = vmax.xlane.f32.xlu1 %v2360_v40  ;;  %v7646_v40 = vpop.f32.mrf.mxu1 }
 0x32d   :  { %v7631_v59 = vpop.f32.mrf.mxu0  ;;  %10475 = vst [vmem:[#allocation123_spill] sm:$0xff] %v7646_v40 }
 0x32e   :  { %10470 = vst [vmem:[#allocation118_spill] sm:$0xff] %v7631_v59  ;;  %v2365_v23 = vmax.f32 %v2364_v47, %v7631_v59  ;;  %v7652_v47 = vpop.f32.mrf.mxu1 }
 0x32f   :  { %v7636_v36 = vpop.f32.mrf.mxu0  ;;  %10478 = vst [vmem:[#allocation126_spill] sm:$0xff] %v7652_v47 }
 0x330   :  { %10471 = vst [vmem:[#allocation119_spill] sm:$0xff] %v7636_v36  ;;  %v2369_v19 = vmax.f32 %v2368_v39, %v7636_v36  ;;  %2366 = vmax.xlane.f32.xlu0 %v2365_v23  ;;  %v7658_v39 = vpop.f32.mrf.mxu1 }
 0x331   :  { %v7641_v55 = vpop.f32.mrf.mxu0  ;;  %10481 = vst [vmem:[#allocation129_spill] sm:$0xff] %v7658_v39 }
 0x332   :  { %10473 = vst [vmem:[#allocation121_spill] sm:$0xff] %v7641_v55  ;;  %v2370_v8 = vmax.f32 %v2369_v19, %v7641_v55  ;;  %v7664_v55 = vpop.f32.mrf.mxu1 }
 0x333   :  { %v7644_v43 = vpop.f32.mrf.mxu0  ;;  %10484 = vst [vmem:[#allocation132_spill] sm:$0xff] %v7664_v55 }
 0x334   :  { %10474 = vst [vmem:[#allocation122_spill] sm:$0xff] %v7644_v43  ;;  %2371 = vmax.xlane.f32.xlu1 %v2370_v8  ;;  %v7670_v60 = vpop.f32.mrf.mxu1 }
 0x335   :  { %v7648_v24 = vpop.f32.mrf.mxu0  ;;  %10487 = vst [vmem:[#allocation135_spill] sm:$0xff] %v7670_v60 }
 0x336   :  { %10476 = vst [vmem:[#allocation124_spill] sm:$0xff] %v7648_v24  ;;  %v7676_v37 = vpop.f32.mrf.mxu1 }
 0x337   :  { %v7650_v9 = vpop.f32.mrf.mxu0  ;;  %10490 = vst [vmem:[#allocation138_spill] sm:$0xff] %v7676_v37 }
 0x338   :  { %10477 = vst [vmem:[#allocation125_spill] sm:$0xff] %v7650_v9 }
 0x339   :  { %v7654_v59 = vpop.f32.mrf.mxu0 }
 0x33a   :  { %10479 = vst [vmem:[#allocation127_spill] sm:$0xff] %v7654_v59 }
 0x33b   :  { %v7656_v44 = vpop.f32.mrf.mxu0 }
 0x33c   :  { %10480 = vst [vmem:[#allocation128_spill] sm:$0xff] %v7656_v44 }
 0x33d   :  { %v7660_v23 = vpop.f32.mrf.mxu0 }
 0x33e   :  { %10482 = vst [vmem:[#allocation130_spill] sm:$0xff] %v7660_v23  ;;  %v7682_v23 = vpop.f32.mrf.mxu1 }
 0x33f   :  { %v7662_v19 = vpop.f32.mrf.mxu0  ;;  %10493 = vst [vmem:[#allocation141_spill] sm:$0xff] %v7682_v23 }
 0x340   :  { %10483 = vst [vmem:[#allocation131_spill] sm:$0xff] %v7662_v19 }
 0x341   :  { %v7666_v36 = vpop.f32.mrf.mxu0 }
 0x342   :  { %10485 = vst [vmem:[#allocation133_spill] sm:$0xff] %v7666_v36  ;;  %v7688_v36 = vpop.f32.mrf.mxu1 }
 0x343   :  { %v7668_v8 = vpop.f32.mrf.mxu0  ;;  %10496 = vst [vmem:[#allocation144_spill] sm:$0xff] %v7688_v36  ;;  %v10570_v37 = vld [vmem:[#allocation128_spill] sm:$0xff] }
 0x344   :  { %10486 = vst [vmem:[#allocation134_spill] sm:$0xff] %v7668_v8 }
 0x345   :  { %v7672_v26 = vpop.f32.mrf.mxu0 }
 0x346   :  { %10488 = vst [vmem:[#allocation136_spill] sm:$0xff] %v7672_v26  ;;  %v7694_v26 = vpop.f32.mrf.mxu1 }
 0x347   :  { %v7674_v63 = vpop.f32.mrf.mxu0  ;;  %10499 = vst [vmem:[#allocation147_spill] sm:$0xff] %v7694_v26 }
 0x348   :  { %10489 = vst [vmem:[#allocation137_spill] sm:$0xff] %v7674_v63 }
 0x349   :  { %v7678_v0 = vpop.f32.mrf.mxu0 }
 0x34a   :  { %10491 = vst [vmem:[#allocation139_spill] sm:$0xff] %v7678_v0  ;;  %v7700_v0 = vpop.f32.mrf.mxu1 }
 0x34b   :  { %v7680_v6 = vpop.f32.mrf.mxu0  ;;  %10502 = vst [vmem:[#allocation150_spill] sm:$0xff] %v7700_v0 }
 0x34c   :  { %10492 = vst [vmem:[#allocation140_spill] sm:$0xff] %v7680_v6 }
 0x34d   :  { %v7684_v19 = vpop.f32.mrf.mxu0 }
 0x34e   :  { %10494 = vst [vmem:[#allocation142_spill] sm:$0xff] %v7684_v19  ;;  %v7706_v19 = vpop.f32.mrf.mxu1 }
 0x34f   :  { %v7686_v59 = vpop.f32.mrf.mxu0  ;;  %10505 = vst [vmem:[#allocation153_spill] sm:$0xff] %v7706_v19 }
 0x350   :  { %10495 = vst [vmem:[#allocation143_spill] sm:$0xff] %v7686_v59 }
 0x351   :  { %v7690_v8 = vpop.f32.mrf.mxu0 }
 0x352   :  { %10497 = vst [vmem:[#allocation145_spill] sm:$0xff] %v7690_v8  ;;  %v7712_v8 = vpop.f32.mrf.mxu1 }
 0x353   :  { %v7692_v12 = vpop.f32.mrf.mxu0  ;;  %10508 = vst [vmem:[#allocation156_spill] sm:$0xff] %v7712_v8 }
 0x354   :  { %10498 = vst [vmem:[#allocation146_spill] sm:$0xff] %v7692_v12  ;;  %v7722_v19 = vpop.f32.mrf.mxu1 }
 0x355   :  { %v7696_v63 = vpop.f32.mrf.mxu0  ;;  %10511 = vst [vmem:[#allocation159_spill] sm:$0xff] %v7722_v19 }
 0x356   :  { %10500 = vst [vmem:[#allocation148_spill] sm:$0xff] %v7696_v63 }
 0x357   :  { %v7698_v44 = vpop.f32.mrf.mxu0 }
 0x358   :  { %10501 = vst [vmem:[#allocation149_spill] sm:$0xff] %v7698_v44 }
 0x359   :  { %v7702_v6 = vpop.f32.mrf.mxu0 }
 0x35a   :  { %10503 = vst [vmem:[#allocation151_spill] sm:$0xff] %v7702_v6 }
 0x35b   :  { %v7704_v9 = vpop.f32.mrf.mxu0 }
 0x35c   :  { %10504 = vst [vmem:[#allocation152_spill] sm:$0xff] %v7704_v9 }
 0x35d   :  { %v7708_v59 = vpop.f32.mrf.mxu0 }
 0x35e   :  { %10506 = vst [vmem:[#allocation154_spill] sm:$0xff] %v7708_v59 }
 0x35f   :  { %v7710_v36 = vpop.f32.mrf.mxu0 }
 0x360   :  { %10507 = vst [vmem:[#allocation155_spill] sm:$0xff] %v7710_v36 }
 0x361   :  { %v7714_v12 = vpop.f32.mrf.mxu0  ;;  %v2257_v26 = vpop.xlane.xlu0 %2256 }
 0x362   :  { %10509 = vst [vmem:[#allocation157_spill] sm:$0xff] %v7714_v12  ;;  %v2573_v63 = vsub.f32 %v7240_v13, %v2257_v26  ;;  %v2574_v44 = vsub.f32 %v7248_v22, %v2257_v26  ;;  %v2575_v0 = vsub.f32 %v7355_v35, %v2257_v26  ;;  %v2576_v6 = vsub.f32 %v7362_v54, %v2257_v26 }
 0x363   :  { %v7720_v9 = vpop.f32.mrf.mxu0 }
 0x364   :  { %10510 = vst [vmem:[#allocation158_spill] sm:$0xff] %v7720_v9  ;;  %v2829_v59 = vmul.f32 1.442695, %v2573_v63  ;;  %v2831_v24 = vmul.f32 1.442695, %v2574_v44 }
 0x365   :  { %v2833_v36 = vmul.f32 1.442695, %v2575_v0  ;;  %v2835_v12 = vmul.f32 1.442695, %v2576_v6  ;;  %v7726_v3 = vpop.f32.mrf.mxu0  ;;  %v2262_v13 = vpop.xlane.xlu0 %2261 }
 0x366   :  { %10512 = vst [vmem:[#allocation160_spill] sm:$0xff] %v7726_v3  ;;  %5463 = vpow2.f32 %v2829_v59  ;;  %v2577_v22 = vsub.f32 %v7250_v29, %v2262_v13  ;;  %v2578_v35 = vsub.f32 %v7252_v56, %v2262_v13  ;;  %v2579_v54 = vsub.f32 %v7369_v51, %v2262_v13  ;;  %v7738_v0 = vpop.f32.mrf.mxu1  ;;  %v10524_v56 = vld [vmem:[#allocation54_spill] sm:$0xff] }
 0x367   :  { %5465 = vpow2.f32 %v2831_v24  ;;  %v2580_v63 = vsub.f32 %v7374_v27, %v2262_v13  ;;  %v7736_v6 = vpop.f32.mrf.mxu0  ;;  %10514 = vst [vmem:[#allocation162_spill] sm:$0xff] %v7738_v0 }
 0x368   :  { %10513 = vst [vmem:[#allocation161_spill] sm:$0xff] %v7736_v6  ;;  %5467 = vpow2.f32 %v2833_v36  ;;  %v2837_v59 = vmul.f32 1.442695, %v2577_v22  ;;  %v2839_v29 = vmul.f32 1.442695, %v2578_v35 }
 0x369   :  { %v2841_v8 = vmul.f32 1.442695, %v2579_v54  ;;  %5469 = vpow2.f32 %v2835_v12  ;;  %v2843_v26 = vmul.f32 1.442695, %v2580_v63  ;;  %v7744_v44 = vpop.f32.mrf.mxu0  ;;  %v2267_v24 = vpop.xlane.xlu1 %2266 }
 0x36a   :  { %10515 = vst [vmem:[#allocation163_spill] sm:$0xff] %v7744_v44  ;;  %5471 = vpow2.f32 %v2837_v59  ;;  %v2581_v27 = vsub.f32 %v7256_v58, %v2267_v24  ;;  %v2582_v13 = vsub.f32 %v7262_v10, %v2267_v24  ;;  %v2583_v36 = vsub.f32 %v7381_v2, %v2267_v24  ;;  %v7756_v63 = vpop.f32.mrf.mxu1 }
 0x36b   :  { %5473 = vpow2.f32 %v2839_v29  ;;  %v2584_v12 = vsub.f32 %v7388_v62, %v2267_v24  ;;  %v7754_v54 = vpop.f32.mrf.mxu0  ;;  %10517 = vst [vmem:[#allocation165_spill] sm:$0xff] %v7756_v63 }
 0x36c   :  { %10516 = vst [vmem:[#allocation164_spill] sm:$0xff] %v7754_v54  ;;  %5475 = vpow2.f32 %v2841_v8  ;;  %v2845_v59 = vmul.f32 1.442695, %v2581_v27  ;;  %v2847_v58 = vmul.f32 1.442695, %v2582_v13  ;;  %v7774_v2 = vpop.f32.mrf.mxu1 }
 0x36d   :  { %v2849_v51 = vmul.f32 1.442695, %v2583_v36  ;;  %5477 = vpow2.f32 %v2843_v26  ;;  %v2851_v22 = vmul.f32 1.442695, %v2584_v12  ;;  %v7762_v35 = vpop.f32.mrf.mxu0  ;;  %v2272_v29 = vpop.xlane.xlu1 %2271  ;;  %v10519_v36 = vld [vmem:[#allocation15_spill] sm:$0xff]  ;;  %10521 = vst [vmem:[#allocation167_spill] sm:$0xff] %v7774_v2 }
 0x36e   :  { %10518 = vst [vmem:[#allocation166_spill] sm:$0xff] %v7762_v35  ;;  %5479 = vpow2.f32 %v2845_v59  ;;  %v2585_v62 = vsub.f32 %v7264_v49, %v2272_v29  ;;  %v2586_v24 = vsub.f32 %v7266_v32, %v2272_v29  ;;  %v2587_v8 = vsub.f32 %v7395_v30, %v2272_v29 }
 0x36f   :  { %5481 = vpow2.f32 %v2847_v58  ;;  %v2588_v26 = vsub.f32 %v10519_v36, %v2272_v29  ;;  %v7772_v12 = vpop.f32.mrf.mxu0  ;;  %v10523_v29 = vld [vmem:[#allocation55_spill] sm:$0xff] }
 0x370   :  { %10520 = vst [vmem:[#allocation15_spill] sm:$0xff] %v7772_v12  ;;  %5483 = vpow2.f32 %v2849_v51  ;;  %v2853_v59 = vmul.f32 1.442695, %v2585_v62  ;;  %v2855_v49 = vmul.f32 1.442695, %v2586_v24  ;;  %v10525_v51 = vld [vmem:[#allocation19_spill] sm:$0xff] }
 0x371   :  { %v2857_v10 = vmul.f32 1.442695, %v2587_v8  ;;  %5485 = vpow2.f32 %v2851_v22  ;;  %v2859_v27 = vmul.f32 1.442695, %v2588_v26  ;;  %v7780_v13 = vpop.f32.mrf.mxu0  ;;  %v2277_v58 = vpop.xlane.xlu0 %2276  ;;  %v10538_v8 = vld [vmem:[#allocation20_spill] sm:$0xff] }
 0x372   :  { %10522 = vst [vmem:[#allocation168_spill] sm:$0xff] %v7780_v13  ;;  %5487 = vpow2.f32 %v2853_v59  ;;  %v2589_v36 = vsub.f32 %v10523_v29, %v2277_v58  ;;  %v2590_v2 = vsub.f32 %v10524_v56, %v2277_v58  ;;  %v2591_v62 = vsub.f32 %v10525_v51, %v2277_v58  ;;  %v7796_v29 = vpop.f32.mrf.mxu1 }
 0x373   :  { %v7785_v24 = vpop.eup %5463  ;;  %5489 = vpow2.f32 %v2855_v49  ;;  %v2592_v22 = vsub.f32 %v7414_v7, %v2277_v58  ;;  %v7792_v26 = vpop.f32.mrf.mxu0  ;;  %10529 = vst [vmem:[#allocation169_spill] sm:$0xff] %v7796_v29  ;;  %v10535_v29 = vld [vmem:[#allocation22_spill] sm:$0xff] }
 0x374   :  { %10526 = vst [vmem:[#allocation55_spill] sm:$0xff] %v7785_v24  ;;  %10527 = vst [vmem:[#allocation54_spill] sm:$0xff] %v7792_v26  ;;  %v7794_v59 = vpop.eup %5465  ;;  %5491 = vpow2.f32 %v2857_v10  ;;  %v2861_v56 = vmul.f32 1.442695, %v2589_v36  ;;  %v2863_v51 = vmul.f32 1.442695, %v2590_v2 }
 0x375   :  { %10528 = vst [vmem:[#allocation19_spill] sm:$0xff] %v7794_v59  ;;  %v2865_v32 = vmul.f32 1.442695, %v2591_v62  ;;  %v7798_v0 = vpop.eup %5467  ;;  %5493 = vpow2.f32 %v2859_v27  ;;  %v2867_v30 = vmul.f32 1.442695, %v2592_v22  ;;  %v7802_v49 = vpop.f32.mrf.mxu0  ;;  %v3341_v58 = vadd.f32 %v7794_v59, %v7785_v24  ;;  %v10533_v10 = vld [vmem:[#allocation70_spill] sm:$0xff] }
 0x376   :  { %10530 = vst [vmem:[#allocation170_spill] sm:$0xff] %v7798_v0  ;;  %10531 = vst [vmem:[#allocation171_spill] sm:$0xff] %v7802_v49  ;;  %v2282_v7 = vpop.xlane.xlu1 %2281  ;;  %v7806_v63 = vpop.eup %5469  ;;  %5495 = vpow2.f32 %v2861_v56  ;;  %v10534_v2 = vld [vmem:[#allocation59_spill] sm:$0xff]  ;;  %v10537_v27 = vmax.f32 %v7457_v42, %v7464_v41 }
 0x377   :  { %10532 = vst [vmem:[#allocation172_spill] sm:$0xff] %v7806_v63  ;;  %v2593_v36 = vsub.f32 %v10533_v10, %v2282_v7  ;;  %v2594_v62 = vsub.f32 %v10534_v2, %v2282_v7  ;;  %v2595_v19 = vsub.f32 %v10535_v29, %v2282_v7  ;;  %v7811_v13 = vpop.eup %5471  ;;  %5497 = vpow2.f32 %v2863_v51  ;;  %v7818_v24 = vpop.f32.mrf.mxu0 }
 0x378   :  { %10536 = vst [vmem:[#allocation70_spill] sm:$0xff] %v7811_v13  ;;  %v2374_v22 = vmax.f32 %v10537_v27, %v7644_v43  ;;  %v2596_v49 = vsub.f32 %v10538_v8, %v2282_v7  ;;  %10539 = vst [vmem:[#allocation59_spill] sm:$0xff] %v7818_v24  ;;  %v3342_v56 = vadd.f32 %v7798_v0, %v3341_v58  ;;  %v7821_v59 = vpop.eup %5473  ;;  %v7823_v10 = vpop.f32.mrf.mxu1  ;;  %5499 = vpow2.f32 %v2865_v32  ;;  %v10545_v43 = vld [vmem:[#allocation58_spill] sm:$0xff]  ;;  %v10549_v27 = vld [vmem:[#allocation28_spill] sm:$0xff] }
 0x379   :  { %10540 = vst [vmem:[#allocation22_spill] sm:$0xff] %v7821_v59  ;;  %10541 = vst [vmem:[#allocation20_spill] sm:$0xff] %v7823_v10  ;;  %v2869_v29 = vmul.f32 1.442695, %v2593_v36  ;;  %v2871_v2 = vmul.f32 1.442695, %v2594_v62  ;;  %v7825_v60 = vpop.eup %5475  ;;  %5501 = vpow2.f32 %v2867_v30  ;;  %v7829_v8 = vpop.f32.mrf.mxu0 }
 0x37a   :  { %v2873_v26 = vmul.f32 1.442695, %v2595_v19  ;;  %10542 = vst [vmem:[#allocation173_spill] sm:$0xff] %v7825_v60  ;;  %v2875_v51 = vmul.f32 1.442695, %v2596_v49  ;;  %10543 = vst [vmem:[#allocation174_spill] sm:$0xff] %v7829_v8  ;;  %v2287_v7 = vpop.xlane.xlu0 %2286  ;;  %v3343_v58 = vadd.f32 %v7806_v63, %v3342_v56  ;;  %v7832_v0 = vpop.eup %5477  ;;  %v3346_v56 = vadd.f32 %v7821_v59, %v7811_v13 }
 0x37b   :  { %10544 = vst [vmem:[#allocation175_spill] sm:$0xff] %v7832_v0  ;;  %5503 = vpow2.f32 %v2869_v29  ;;  %v2597_v32 = vsub.f32 %v10545_v43, %v2287_v7  ;;  %v10546_v36 = vld [vmem:[#allocation66_spill] sm:$0xff]  ;;  %v10547_v19 = vld [vmem:[#allocation24_spill] sm:$0xff]  ;;  %v7837_v42 = vpop.eup %5479  ;;  %v2600_v30 = vsub.f32 %v10549_v27, %v2287_v7  ;;  %v7840_v49 = vpop.f32.mrf.mxu0  ;;  %v10556_v27 = vmax.f32 %v7471_v28, %v7476_v14  ;;  %v10563_v14 = vld [vmem:[#allocation147_spill] sm:$0xff] }
 0x37c   :  { %v2598_v62 = vsub.f32 %v10546_v36, %v2287_v7  ;;  %v2599_v41 = vsub.f32 %v10547_v19, %v2287_v7  ;;  %10548 = vst [vmem:[#allocation58_spill] sm:$0xff] %v7837_v42  ;;  %5505 = vpow2.f32 %v2871_v2  ;;  %3344 = vadd.xlane.f32.xlu0 %v3343_v58  ;;  %10550 = vst [vmem:[#allocation66_spill] sm:$0xff] %v7840_v49  ;;  %v10551_v63 = vld [vmem:[#allocation124_spill] sm:$0xff]  ;;  %v7845_v29 = vpop.eup %5481  ;;  %v7847_v43 = vpop.f32.mrf.mxu1  ;;  %v10555_v2 = vld [vmem:[#allocation125_spill] sm:$0xff] }
 0x37d   :  { %v2375_v10 = vmax.f32 %v2374_v22, %v10551_v63  ;;  %10552 = vst [vmem:[#allocation24_spill] sm:$0xff] %v7845_v29  ;;  %10553 = vst [vmem:[#allocation28_spill] sm:$0xff] %v7847_v43  ;;  %5507 = vpow2.f32 %v2873_v26  ;;  %v2877_v36 = vmul.f32 1.442695, %v2597_v32  ;;  %v7849_v24 = vpop.eup %5483  ;;  %v2379_v7 = vmax.f32 %v10556_v27, %v10555_v2  ;;  %v7855_v13 = vpop.f32.mrf.mxu0  ;;  %v10559_v26 = vld [vmem:[#allocation68_spill] sm:$0xff]  ;;  %v10561_v43 = vld [vmem:[#allocation26_spill] sm:$0xff] }
 0x37e   :  { %v2879_v19 = vmul.f32 1.442695, %v2598_v62  ;;  %v2881_v8 = vmul.f32 1.442695, %v2599_v41  ;;  %10554 = vst [vmem:[#allocation176_spill] sm:$0xff] %v7849_v24  ;;  %5509 = vpow2.f32 %v2875_v51  ;;  %10557 = vst [vmem:[#allocation177_spill] sm:$0xff] %v7855_v13  ;;  %v2292_v22 = vpop.xlane.xlu1 %2291  ;;  %v3347_v59 = vadd.f32 %v7825_v60, %v3346_v56  ;;  %v7858_v63 = vpop.eup %5485 }
 0x37f   :  { %v2883_v58 = vmul.f32 1.442695, %v2600_v30  ;;  %10558 = vst [vmem:[#allocation178_spill] sm:$0xff] %v7858_v63  ;;  %5511 = vpow2.f32 %v2877_v36  ;;  %v2601_v32 = vsub.f32 %v10559_v26, %v2292_v22  ;;  %v10560_v41 = vld [vmem:[#allocation60_spill] sm:$0xff]  ;;  %v2603_v49 = vsub.f32 %v10561_v43, %v2292_v22  ;;  %v7863_v23 = vpop.eup %5487  ;;  %v10565_v30 = vld [vmem:[#allocation30_spill] sm:$0xff]  ;;  %v7869_v56 = vpop.f32.mrf.mxu0  ;;  %v10575_v51 = vld [vmem:[#allocation41_spill] sm:$0xff] }
 0x380   :  { %v2602_v62 = vsub.f32 %v10560_v41, %v2292_v22  ;;  %10562 = vst [vmem:[#allocation68_spill] sm:$0xff] %v7863_v23  ;;  %v10564_v27 = vld [vmem:[#allocation144_spill] sm:$0xff]  ;;  %5513 = vpow2.f32 %v2879_v19  ;;  %v2604_v2 = vsub.f32 %v10565_v30, %v2292_v22  ;;  %v3348_v28 = vadd.f32 %v7832_v0, %v3347_v59  ;;  %2376 = vmax.xlane.f32.xlu0 %v2375_v10  ;;  %v7871_v36 = vpop.eup %5489  ;;  %v7873_v26 = vpop.f32.mrf.mxu1 }
 0x381   :  { %10566 = vst [vmem:[#allocation60_spill] sm:$0xff] %v7869_v56  ;;  %10567 = vst [vmem:[#allocation26_spill] sm:$0xff] %v7871_v36  ;;  %5515 = vpow2.f32 %v2881_v8  ;;  %v2885_v41 = vmul.f32 1.442695, %v2601_v32  ;;  %v2889_v60 = vmul.f32 1.442695, %v2603_v49  ;;  %v7875_v13 = vpop.eup %5491  ;;  %v10571_v19 = vmax.f32 %v7483_v1, %v7490_v20  ;;  %v7883_v10 = vpop.f32.mrf.mxu0 }
 0x382   :  { %10568 = vst [vmem:[#allocation30_spill] sm:$0xff] %v7873_v26  ;;  %v2887_v43 = vmul.f32 1.442695, %v2602_v62  ;;  %10569 = vst [vmem:[#allocation179_spill] sm:$0xff] %v7875_v13  ;;  %5517 = vpow2.f32 %v2883_v58  ;;  %v2891_v59 = vmul.f32 1.442695, %v2604_v2  ;;  %3349 = vadd.xlane.f32.xlu1 %v3348_v28  ;;  %v2297_v30 = vpop.xlane.xlu0 %2296  ;;  %v3351_v8 = vadd.f32 %v7845_v29, %v7837_v42  ;;  %v7887_v32 = vpop.eup %5493 }
 0x383   :  { %v7881_v22 = vmax.f32 %v10571_v19, %v10570_v37  ;;  %10572 = vst [vmem:[#allocation180_spill] sm:$0xff] %v7883_v10  ;;  %10573 = vst [vmem:[#allocation181_spill] sm:$0xff] %v7887_v32  ;;  %5519 = vpow2.f32 %v2885_v41  ;;  %v10574_v49 = vld [vmem:[#allocation40_spill] sm:$0xff]  ;;  %v2606_v0 = vsub.f32 %v10575_v51, %v2297_v30  ;;  %v10576_v26 = vld [vmem:[#allocation34_spill] sm:$0xff]  ;;  %v7892_v19 = vpop.eup %5495  ;;  %v7897_v10 = vpop.f32.mrf.mxu0 }
 0x384   :  { %v2605_v62 = vsub.f32 %v10574_v49, %v2297_v30  ;;  %v2607_v20 = vsub.f32 %v10576_v26, %v2297_v30  ;;  %10577 = vst [vmem:[#allocation40_spill] sm:$0xff] %v7892_v19  ;;  %5521 = vpow2.f32 %v2887_v43  ;;  %v10578_v2 = vld [vmem:[#allocation32_spill] sm:$0xff]  ;;  %v3352_v58 = vadd.f32 %v7849_v24, %v3351_v8  ;;  %v10579_v37 = vld [vmem:[#allocation127_spill] sm:$0xff]  ;;  %10580 = vst [vmem:[#allocation41_spill] sm:$0xff] %v7897_v10  ;;  %v7899_v42 = vpop.eup %5497  ;;  %v7903_v26 = vpop.f32.mrf.mxu1 }
 0x385   :  { %v2608_v28 = vsub.f32 %v10578_v2, %v2297_v30  ;;  %v2380_v1 = vmax.f32 %v2379_v7, %v10579_v37  ;;  %10581 = vst [vmem:[#allocation34_spill] sm:$0xff] %v7899_v42  ;;  %5523 = vpow2.f32 %v2889_v60  ;;  %v2895_v49 = vmul.f32 1.442695, %v2606_v0  ;;  %v7901_v51 = vpop.eup %5499  ;;  %10583 = vst [vmem:[#allocation182_spill] sm:$0xff] %v7903_v26  ;;  %v2302_v8 = vpop.xlane.xlu1 %2301  ;;  %v10584_v2 = vld [vmem:[#allocation130_spill] sm:$0xff]  ;;  %v10586_v60 = vld [vmem:[#allocation57_spill] sm:$0xff] }
 0x386   :  { %v2893_v41 = vmul.f32 1.442695, %v2605_v62  ;;  %v2897_v29 = vmul.f32 1.442695, %v2607_v20  ;;  %10582 = vst [vmem:[#allocation32_spill] sm:$0xff] %v7901_v51  ;;  %5525 = vpow2.f32 %v2891_v59  ;;  %v3353_v30 = vadd.f32 %v7858_v63, %v3352_v58  ;;  %v7908_v24 = vpop.eup %5501  ;;  %v10587_v0 = vld [vmem:[#allocation67_spill] sm:$0xff] }
 0x387   :  { %v2899_v43 = vmul.f32 1.442695, %v2608_v28  ;;  %2381 = vmax.xlane.f32.xlu1 %v2380_v1  ;;  %v2385_v7 = vmax.f32 %v7881_v22, %v10584_v2  ;;  %10585 = vst [vmem:[#allocation183_spill] sm:$0xff] %v7908_v24  ;;  %v2609_v62 = vsub.f32 %v10586_v60, %v2302_v8  ;;  %v2610_v20 = vsub.f32 %v10587_v0, %v2302_v8  ;;  %v10588_v37 = vld [vmem:[#allocation36_spill] sm:$0xff]  ;;  %v10590_v59 = vld [vmem:[#allocation131_spill] sm:$0xff]  ;;  %v7921_v22 = vpop.f32.mrf.mxu0  ;;  %v10593_v58 = vld [vmem:[#allocation38_spill] sm:$0xff] }
 0x388   :  { %5527 = vpow2.f32 %v2893_v41  ;;  %v2611_v10 = vsub.f32 %v10588_v37, %v2302_v8  ;;  %v7913_v56 = vpop.eup %5503  ;;  %v10591_v28 = vmax.f32 %v7497_v16, %v7502_v57  ;;  %3354 = vadd.xlane.f32.xlu0 %v3353_v30  ;;  %10592 = vst [vmem:[#allocation67_spill] sm:$0xff] %v7921_v22  ;;  %v2612_v41 = vsub.f32 %v10593_v58, %v2302_v8  ;;  %v10596_v57 = vld [vmem:[#allocation134_spill] sm:$0xff] }
 0x389   :  { %10589 = vst [vmem:[#allocation57_spill] sm:$0xff] %v7913_v56  ;;  %5529 = vpow2.f32 %v2895_v49  ;;  %v3356_v60 = vadd.f32 %v7871_v36, %v7863_v23  ;;  %v7926_v0 = vpop.eup %5505  ;;  %v2901_v37 = vmul.f32 1.442695, %v2609_v62  ;;  %v2903_v63 = vmul.f32 1.442695, %v2610_v20  ;;  %v2307_v23 = vpop.xlane.xlu0 %2306  ;;  %v10601_v62 = vld [vmem:[#allocation50_spill] sm:$0xff] }
 0x38a   :  { %v7919_v1 = vmax.f32 %v10591_v28, %v10590_v59  ;;  %10594 = vst [vmem:[#allocation36_spill] sm:$0xff] %v7926_v0  ;;  %5531 = vpow2.f32 %v2897_v29  ;;  %v2905_v2 = vmul.f32 1.442695, %v2611_v10  ;;  %v7928_v26 = vpop.eup %5507  ;;  %v10597_v49 = vmax.f32 %v7509_v25, %v7516_v38  ;;  %v7936_v28 = vpop.f32.mrf.mxu1  ;;  %v10600_v29 = vld [vmem:[#allocation69_spill] sm:$0xff]  ;;  %v10602_v59 = vld [vmem:[#allocation72_spill] sm:$0xff] }
 0x38b   :  { %10595 = vst [vmem:[#allocation38_spill] sm:$0xff] %v7928_v26  ;;  %10598 = vst [vmem:[#allocation184_spill] sm:$0xff] %v7936_v28  ;;  %5533 = vpow2.f32 %v2899_v43  ;;  %v2907_v8 = vmul.f32 1.442695, %v2612_v41  ;;  %v3357_v58 = vadd.f32 %v7875_v13, %v3356_v60  ;;  %v7939_v36 = vpop.eup %5509  ;;  %v2613_v10 = vsub.f32 %v10600_v29, %v2307_v23  ;;  %v7953_v60 = vpop.f32.mrf.mxu0  ;;  %v10609_v38 = vld [vmem:[#allocation133_spill] sm:$0xff] }
 0x38c   :  { %v7934_v30 = vmax.f32 %v10597_v49, %v10596_v57  ;;  %10599 = vst [vmem:[#allocation185_spill] sm:$0xff] %v7939_v36  ;;  %5535 = vpow2.f32 %v2901_v37  ;;  %v2614_v20 = vsub.f32 %v10601_v62, %v2307_v23  ;;  %v2615_v16 = vsub.f32 %v10602_v59, %v2307_v23  ;;  %v7944_v22 = vpop.eup %5511  ;;  %v10604_v49 = vld [vmem:[#allocation137_spill] sm:$0xff]  ;;  %2386 = vmax.xlane.f32.xlu0 %v2385_v7  ;;  %v10607_v37 = vld [vmem:[#allocation74_spill] sm:$0xff] }
 0x38d   :  { %10603 = vst [vmem:[#allocation69_spill] sm:$0xff] %v7944_v22  ;;  %v10605_v57 = vmax.f32 %v7523_v61, %v7528_v52  ;;  %5537 = vpow2.f32 %v2903_v63  ;;  %v3358_v41 = vadd.f32 %v7887_v32, %v3357_v58  ;;  %10606 = vst [vmem:[#allocation50_spill] sm:$0xff] %v7953_v60  ;;  %v2616_v29 = vsub.f32 %v10607_v37, %v2307_v23  ;;  %v7956_v13 = vpop.eup %5513  ;;  %v2312_v58 = vpop.xlane.xlu1 %2311  ;;  %v10612_v23 = vld [vmem:[#allocation136_spill] sm:$0xff] }
 0x38e   :  { %10608 = vst [vmem:[#allocation72_spill] sm:$0xff] %v7956_v13  ;;  %5539 = vpow2.f32 %v2905_v2  ;;  %v2909_v59 = vmul.f32 1.442695, %v2613_v10  ;;  %v2911_v62 = vmul.f32 1.442695, %v2614_v20  ;;  %v2390_v25 = vmax.f32 %v7919_v1, %v10609_v38  ;;  %v7960_v28 = vpop.eup %5515  ;;  %v10614_v20 = vld [vmem:[#allocation49_spill] sm:$0xff] }
 0x38f   :  { %v7950_v43 = vmax.f32 %v10605_v57, %v10604_v49  ;;  %10610 = vst [vmem:[#allocation74_spill] sm:$0xff] %v7960_v28  ;;  %v7962_v57 = vpop.f32.mrf.mxu1  ;;  %5541 = vpow2.f32 %v2907_v8  ;;  %3359 = vadd.xlane.f32.xlu1 %v3358_v41  ;;  %v2913_v63 = vmul.f32 1.442695, %v2615_v16  ;;  %v3361_v7 = vadd.f32 %v7899_v42, %v7892_v19  ;;  %v7968_v2 = vpop.eup %5517  ;;  %v10615_v1 = vld [vmem:[#allocation39_spill] sm:$0xff]  ;;  %v10616_v52 = vld [vmem:[#allocation76_spill] sm:$0xff]  ;;  %v10619_v41 = vld [vmem:[#allocation78_spill] sm:$0xff] }
 0x390   :  { %10611 = vst [vmem:[#allocation186_spill] sm:$0xff] %v7962_v57  ;;  %v2395_v37 = vmax.f32 %v7934_v30, %v10612_v23  ;;  %10613 = vst [vmem:[#allocation187_spill] sm:$0xff] %v7968_v2  ;;  %v2915_v10 = vmul.f32 1.442695, %v2616_v29  ;;  %v2617_v32 = vsub.f32 %v10614_v20, %v2312_v58  ;;  %v2618_v49 = vsub.f32 %v10615_v1, %v2312_v58  ;;  %v7973_v38 = vpop.eup %5519  ;;  %v7975_v8 = vpop.f32.mrf.mxu0  ;;  %v10620_v42 = vld [vmem:[#allocation139_spill] sm:$0xff]  ;;  %v10622_v29 = vld [vmem:[#allocation140_spill] sm:$0xff] }
 0x391   :  { %v2619_v61 = vsub.f32 %v10616_v52, %v2312_v58  ;;  %10617 = vst [vmem:[#allocation49_spill] sm:$0xff] %v7973_v38  ;;  %10618 = vst [vmem:[#allocation39_spill] sm:$0xff] %v7975_v8  ;;  %5543 = vpow2.f32 %v2909_v59  ;;  %v3362_v16 = vadd.f32 %v7901_v51, %v3361_v7  ;;  %v2620_v19 = vsub.f32 %v10619_v41, %v2312_v58  ;;  %v7981_v23 = vpop.eup %5521  ;;  %v7991_v59 = vpop.f32.mrf.mxu1 }
 0x392   :  { %10621 = vst [vmem:[#allocation76_spill] sm:$0xff] %v7981_v23  ;;  %v10623_v20 = vmax.f32 %v7535_v5, %v7541_v50  ;;  %5545 = vpow2.f32 %v2911_v62  ;;  %v2917_v52 = vmul.f32 1.442695, %v2617_v32  ;;  %v2919_v57 = vmul.f32 1.442695, %v2618_v49  ;;  %v7989_v8 = vpop.eup %5523  ;;  %10625 = vst [vmem:[#allocation188_spill] sm:$0xff] %v7991_v59  ;;  %v2317_v30 = vpop.xlane.xlu0 %2316 }
 0x393   :  { %10624 = vst [vmem:[#allocation78_spill] sm:$0xff] %v7989_v8  ;;  %5547 = vpow2.f32 %v2913_v63  ;;  %v3363_v7 = vadd.f32 %v7908_v24, %v3362_v16  ;;  %2391 = vmax.xlane.f32.xlu1 %v2390_v25  ;;  %v2921_v58 = vmul.f32 1.442695, %v2619_v61  ;;  %v3366_v41 = vadd.f32 %v7926_v0, %v7913_v56  ;;  %v7996_v51 = vpop.eup %5525  ;;  %v10627_v62 = vld [vmem:[#allocation62_spill] sm:$0xff]  ;;  %v10628_v49 = vld [vmem:[#allocation64_spill] sm:$0xff]  ;;  %v8002_v63 = vpop.f32.mrf.mxu0 }
 0x394   :  { %v7987_v1 = vmax.f32 %v10623_v20, %v10622_v29  ;;  %10626 = vst [vmem:[#allocation189_spill] sm:$0xff] %v7996_v51  ;;  %5549 = vpow2.f32 %v2915_v10  ;;  %v2923_v20 = vmul.f32 1.442695, %v2620_v19  ;;  %v2621_v32 = vsub.f32 %v10627_v62, %v2317_v30  ;;  %10630 = vst [vmem:[#allocation64_spill] sm:$0xff] %v8002_v63  ;;  %v10631_v61 = vld [vmem:[#allocation80_spill] sm:$0xff]  ;;  %v10632_v56 = vld [vmem:[#allocation82_spill] sm:$0xff] }
 0x395   :  { %v2622_v29 = vsub.f32 %v10628_v49, %v2317_v30  ;;  %v8000_v50 = vpop.eup %5527  ;;  %3364 = vadd.xlane.f32.xlu0 %v3363_v7  ;;  %5551 = vpow2.f32 %v2917_v52  ;;  %v3367_v25 = vadd.f32 %v7928_v26, %v3366_v41  ;;  %v2623_v16 = vsub.f32 %v10631_v61, %v2317_v30  ;;  %v10634_v62 = vld [vmem:[#allocation142_spill] sm:$0xff]  ;;  %v10636_v7 = vld [vmem:[#allocation143_spill] sm:$0xff]  ;;  %v8019_v41 = vpop.f32.mrf.mxu1 }
 0x396   :  { %10629 = vst [vmem:[#allocation62_spill] sm:$0xff] %v8000_v50  ;;  %v2624_v24 = vsub.f32 %v10632_v56, %v2317_v30  ;;  %v8007_v0 = vpop.eup %5529  ;;  %5553 = vpow2.f32 %v2919_v57  ;;  %v2925_v19 = vmul.f32 1.442695, %v2621_v32  ;;  %v10637_v52 = vmax.f32 %v7548_v46, %v7553_v48  ;;  %10638 = vst [vmem:[#allocation190_spill] sm:$0xff] %v8019_v41  ;;  %v2322_v57 = vpop.xlane.xlu1 %2321  ;;  %v10640_v49 = vld [vmem:[#allocation51_spill] sm:$0xff] }
 0x397   :  { %10633 = vst [vmem:[#allocation80_spill] sm:$0xff] %v8007_v0  ;;  %v2927_v10 = vmul.f32 1.442695, %v2622_v29  ;;  %v8011_v5 = vpop.eup %5531  ;;  %5555 = vpow2.f32 %v2921_v58  ;;  %v3368_v56 = vadd.f32 %v7939_v36, %v3367_v25  ;;  %v2929_v30 = vmul.f32 1.442695, %v2623_v16  ;;  %v10643_v58 = vld [vmem:[#allocation47_spill] sm:$0xff] }
 0x398   :  { %10635 = vst [vmem:[#allocation82_spill] sm:$0xff] %v8011_v5  ;;  %v8017_v59 = vmax.f32 %v10637_v52, %v10636_v7  ;;  %v8022_v32 = vpop.eup %5533  ;;  %5557 = vpow2.f32 %v2923_v20  ;;  %v2931_v29 = vmul.f32 1.442695, %v2624_v24  ;;  %v3371_v61 = vadd.f32 %v7956_v13, %v7944_v22  ;;  %v8029_v52 = vpop.f32.mrf.mxu0  ;;  %v10644_v16 = vld [vmem:[#allocation84_spill] sm:$0xff]  ;;  %v10645_v7 = vld [vmem:[#allocation86_spill] sm:$0xff] }
 0x399   :  { %10639 = vst [vmem:[#allocation191_spill] sm:$0xff] %v8022_v32  ;;  %v2625_v26 = vsub.f32 %v10640_v49, %v2322_v57  ;;  %v8027_v63 = vpop.eup %5535  ;;  %10642 = vst [vmem:[#allocation192_spill] sm:$0xff] %v8029_v52  ;;  %3369 = vadd.xlane.f32.xlu1 %v3368_v56  ;;  %2396 = vmax.xlane.f32.xlu0 %v2395_v37  ;;  %5559 = vpow2.f32 %v2925_v19  ;;  %v2626_v25 = vsub.f32 %v10643_v58, %v2322_v57  ;;  %v10648_v56 = vld [vmem:[#allocation146_spill] sm:$0xff]  ;;  %v8047_v58 = vpop.f32.mrf.mxu1 }
 0x39a   :  { %10641 = vst [vmem:[#allocation51_spill] sm:$0xff] %v8027_v63  ;;  %v2627_v36 = vsub.f32 %v10644_v16, %v2322_v57  ;;  %v2628_v48 = vsub.f32 %v10645_v7, %v2322_v57  ;;  %v8034_v20 = vpop.eup %5537  ;;  %5561 = vpow2.f32 %v2927_v10  ;;  %v3372_v24 = vadd.f32 %v7960_v28, %v3371_v61  ;;  %10650 = vst [vmem:[#allocation86_spill] sm:$0xff] %v8047_v58  ;;  %v2327_v57 = vpop.xlane.xlu0 %2326  ;;  %v10651_v10 = vld [vmem:[#allocation145_spill] sm:$0xff] }
 0x39b   :  { %10646 = vst [vmem:[#allocation47_spill] sm:$0xff] %v8034_v20  ;;  %v2933_v22 = vmul.f32 1.442695, %v2625_v26  ;;  %v3376_v49 = vadd.f32 %v7981_v23, %v7973_v38  ;;  %v8039_v13 = vpop.eup %5539  ;;  %v10649_v37 = vmax.f32 %v7560_v18, %v7565_v34  ;;  %5563 = vpow2.f32 %v2929_v30  ;;  %v8055_v23 = vpop.f32.mrf.mxu0  ;;  %v10656_v34 = vld [vmem:[#allocation65_spill] sm:$0xff] }
 0x39c   :  { %10647 = vst [vmem:[#allocation84_spill] sm:$0xff] %v8039_v13  ;;  %v2935_v7 = vmul.f32 1.442695, %v2626_v25  ;;  %v2410_v61 = vmax.f32 %v8017_v59, %v10651_v10  ;;  %v8051_v26 = vpop.eup %5541  ;;  %5565 = vpow2.f32 %v2931_v29  ;;  %v3373_v16 = vadd.f32 %v7968_v2, %v3372_v24  ;;  %10653 = vst [vmem:[#allocation194_spill] sm:$0xff] %v8055_v23  ;;  %v10655_v25 = vld [vmem:[#allocation63_spill] sm:$0xff]  ;;  %v10657_v59 = vld [vmem:[#allocation88_spill] sm:$0xff] }
 0x39d   :  { %v8045_v19 = vmax.f32 %v10649_v37, %v10648_v56  ;;  %10652 = vst [vmem:[#allocation193_spill] sm:$0xff] %v8051_v26  ;;  %v2937_v28 = vmul.f32 1.442695, %v2627_v36  ;;  %v3377_v38 = vadd.f32 %v7989_v8, %v3376_v49  ;;  %v10654_v37 = vmax.f32 %v7950_v43, %v10620_v42  ;;  %v10659_v29 = vld [vmem:[#allocation90_spill] sm:$0xff]  ;;  %v10668_v2 = vld [vmem:[#allocation44_spill] sm:$0xff] }
 0x39e   :  { %v2939_v30 = vmul.f32 1.442695, %v2628_v48  ;;  %v2629_v56 = vsub.f32 %v10655_v25, %v2327_v57  ;;  %v2630_v18 = vsub.f32 %v10656_v34, %v2327_v57  ;;  %v2631_v10 = vsub.f32 %v10657_v59, %v2327_v57  ;;  %v8063_v46 = vpop.eup %5543  ;;  %3374 = vadd.xlane.f32.xlu0 %v3373_v16  ;;  %v10661_v48 = vld [vmem:[#allocation149_spill] sm:$0xff]  ;;  %v8077_v25 = vpop.f32.mrf.mxu1 }
 0x39f   :  { %2401 = vmax.xlane.f32.xlu1 %v10654_v37  ;;  %10658 = vst [vmem:[#allocation63_spill] sm:$0xff] %v8063_v46  ;;  %5567 = vpow2.f32 %v2933_v22  ;;  %v3378_v36 = vadd.f32 %v7996_v51, %v3377_v38  ;;  %v2632_v24 = vsub.f32 %v10659_v29, %v2327_v57  ;;  %v3381_v49 = vadd.f32 %v8007_v0, %v8000_v50  ;;  %v8069_v43 = vpop.eup %5545  ;;  %v2332_v59 = vpop.xlane.xlu1 %2331  ;;  %v10665_v50 = vld [vmem:[#allocation42_spill] sm:$0xff] }
 0x3a0   :  { %10660 = vst [vmem:[#allocation65_spill] sm:$0xff] %v8069_v43  ;;  %v10662_v37 = vmax.f32 %v7572_v31, %v7577_v4  ;;  %10663 = vst [vmem:[#allocation88_spill] sm:$0xff] %v8077_v25  ;;  %5569 = vpow2.f32 %v2935_v7  ;;  %v2941_v16 = vmul.f32 1.442695, %v2629_v56  ;;  %v2943_v22 = vmul.f32 1.442695, %v2630_v18  ;;  %v8079_v38 = vpop.eup %5547  ;;  %v8085_v51 = vpop.f32.mrf.mxu0 }
 0x3a1   :  { %10664 = vst [vmem:[#allocation90_spill] sm:$0xff] %v8079_v38  ;;  %5571 = vpow2.f32 %v2937_v28  ;;  %v2945_v57 = vmul.f32 1.442695, %v2631_v10  ;;  %v3382_v29 = vadd.f32 %v8011_v5, %v3381_v49  ;;  %v2633_v0 = vsub.f32 %v10665_v50, %v2332_v59  ;;  %v8083_v8 = vpop.eup %5549  ;;  %10667 = vst [vmem:[#allocation195_spill] sm:$0xff] %v8085_v51  ;;  %v10669_v56 = vld [vmem:[#allocation92_spill] sm:$0xff]  ;;  %v10672_v10 = vld [vmem:[#allocation94_spill] sm:$0xff]  ;;  %v2337_v4 = vpop.xlane.xlu0 %2336 }
 0x3a2   :  { %v8075_v34 = vmax.f32 %v10662_v37, %v10661_v48  ;;  %10666 = vst [vmem:[#allocation42_spill] sm:$0xff] %v8083_v8  ;;  %5573 = vpow2.f32 %v2939_v30  ;;  %v2947_v37 = vmul.f32 1.442695, %v2632_v24  ;;  %v2634_v7 = vsub.f32 %v10668_v2, %v2332_v59  ;;  %v8089_v48 = vpop.eup %5551  ;;  %v8100_v24 = vpop.f32.mrf.mxu1  ;;  %v10682_v31 = vld [vmem:[#allocation96_spill] sm:$0xff] }
 0x3a3   :  { %3379 = vadd.xlane.f32.xlu1 %v3378_v36  ;;  %v2635_v18 = vsub.f32 %v10669_v56, %v2332_v59  ;;  %10670 = vst [vmem:[#allocation44_spill] sm:$0xff] %v8089_v48  ;;  %v10671_v28 = vmax.f32 %v7987_v1, %v10634_v62  ;;  %5575 = vpow2.f32 %v2941_v16  ;;  %v3383_v50 = vadd.f32 %v8022_v32, %v3382_v29  ;;  %v8098_v36 = vpop.eup %5553  ;;  %v10675_v56 = vld [vmem:[#allocation148_spill] sm:$0xff]  ;;  %v10676_v1 = vld [vmem:[#allocation151_spill] sm:$0xff]  ;;  %v10683_v62 = vld [vmem:[#allocation98_spill] sm:$0xff] }
 0x3a4   :  { %v2636_v49 = vsub.f32 %v10672_v10, %v2332_v59  ;;  %v3386_v30 = vadd.f32 %v8034_v20, %v8027_v63  ;;  %10673 = vst [vmem:[#allocation92_spill] sm:$0xff] %v8098_v36  ;;  %10674 = vst [vmem:[#allocation94_spill] sm:$0xff] %v8100_v24  ;;  %5577 = vpow2.f32 %v2943_v22  ;;  %v2949_v2 = vmul.f32 1.442695, %v2633_v0  ;;  %v10678_v10 = vld [vmem:[#allocation43_spill] sm:$0xff]  ;;  %v8112_v20 = vpop.f32.mrf.mxu0  ;;  %v10681_v22 = vld [vmem:[#allocation45_spill] sm:$0xff] }
 0x3a5   :  { %2406 = vmax.xlane.f32.xlu0 %v10671_v28  ;;  %v2415_v5 = vmax.f32 %v8045_v19, %v10675_v56  ;;  %v2420_v16 = vmax.f32 %v8075_v34, %v10676_v1  ;;  %v8106_v28 = vpop.eup %5555  ;;  %5579 = vpow2.f32 %v2945_v57  ;;  %v2951_v59 = vmul.f32 1.442695, %v2634_v7  ;;  %10680 = vst [vmem:[#allocation197_spill] sm:$0xff] %v8112_v20 }
 0x3a6   :  { %10677 = vst [vmem:[#allocation196_spill] sm:$0xff] %v8106_v28  ;;  %v3387_v29 = vadd.f32 %v8039_v13, %v3386_v30  ;;  %v2637_v63 = vsub.f32 %v10678_v10, %v2337_v4  ;;  %v8110_v32 = vpop.eup %5557  ;;  %v2953_v0 = vmul.f32 1.442695, %v2635_v18  ;;  %v2638_v19 = vsub.f32 %v10681_v22, %v2337_v4 }
 0x3a7   :  { %10679 = vst [vmem:[#allocation43_spill] sm:$0xff] %v8110_v32  ;;  %2411 = vmax.xlane.f32.xlu1 %v2410_v61  ;;  %v2639_v56 = vsub.f32 %v10682_v31, %v2337_v4  ;;  %v2640_v34 = vsub.f32 %v10683_v62, %v2337_v4  ;;  %v8117_v1 = vpop.eup %5559  ;;  %5581 = vpow2.f32 %v2947_v37  ;;  %v2955_v57 = vmul.f32 1.442695, %v2636_v49  ;;  %v10686_v61 = vld [vmem:[#allocation152_spill] sm:$0xff]  ;;  %v10688_v31 = vld [vmem:[#allocation155_spill] sm:$0xff]  ;;  %v8136_v37 = vpop.f32.mrf.mxu1 }
 0x3a8   :  { %10684 = vst [vmem:[#allocation45_spill] sm:$0xff] %v8117_v1  ;;  %v3388_v7 = vadd.f32 %v8051_v26, %v3387_v29  ;;  %v3391_v30 = vadd.f32 %v8069_v43, %v8063_v46  ;;  %v8122_v10 = vpop.eup %5561  ;;  %v10687_v18 = vmax.f32 %v7584_v11, %v7589_v17  ;;  %v10689_v4 = vmax.f32 %v7598_v45, %v7608_v15  ;;  %v8138_v49 = vpop.xlane.xlu1 %2341 }
 0x3a9   :  { %3384 = vadd.xlane.f32.xlu0 %v3383_v50  ;;  %10685 = vst [vmem:[#allocation96_spill] sm:$0xff] %v8122_v10  ;;  %10690 = vst [vmem:[#allocation98_spill] sm:$0xff] %v8136_v37  ;;  %5583 = vpow2.f32 %v2949_v2  ;;  %v2957_v50 = vmul.f32 1.442695, %v2637_v63  ;;  %v8140_v29 = vpop.eup %5563  ;;  %v2959_v46 = vmul.f32 1.442695, %v2638_v19  ;;  %v8147_v15 = vpop.f32.mrf.mxu0 }
 0x3aa   :  { %v8128_v22 = vmax.f32 %v10687_v18, %v10686_v61  ;;  %v8134_v62 = vmax.f32 %v10689_v4, %v10688_v31  ;;  %10691 = vst [vmem:[#allocation198_spill] sm:$0xff] %v8140_v29  ;;  %5585 = vpow2.f32 %v2951_v59  ;;  %v3392_v43 = vadd.f32 %v8079_v38, %v3391_v30  ;;  %v10692_v18 = vld [vmem:[#allocation46_spill] sm:$0xff]  ;;  %v8145_v26 = vpop.eup %5565  ;;  %10694 = vst [vmem:[#allocation199_spill] sm:$0xff] %v8147_v15  ;;  %v10695_v63 = vld [vmem:[#allocation52_spill] sm:$0xff]  ;;  %v8158_v45 = vpop.f32.mrf.mxu1 }
 0x3ab   :  { %v2641_v13 = vsub.f32 %v10692_v18, %v8138_v49  ;;  %10693 = vst [vmem:[#allocation46_spill] sm:$0xff] %v8145_v26  ;;  %5587 = vpow2.f32 %v2953_v0  ;;  %3389 = vadd.xlane.f32.xlu1 %v3388_v7  ;;  %v2961_v4 = vmul.f32 1.442695, %v2639_v56  ;;  %v2963_v2 = vmul.f32 1.442695, %v2640_v34  ;;  %v10696_v19 = vld [vmem:[#allocation100_spill] sm:$0xff] }
 0x3ac   :  { %v2642_v31 = vsub.f32 %v10695_v63, %v8138_v49  ;;  %5589 = vpow2.f32 %v2955_v57  ;;  %v3393_v59 = vadd.f32 %v8083_v8, %v3392_v43  ;;  %v2643_v30 = vsub.f32 %v10696_v19, %v8138_v49  ;;  %v8156_v38 = vpop.eup %5567  ;;  %10698 = vst [vmem:[#allocation100_spill] sm:$0xff] %v8158_v45  ;;  %v10700_v34 = vld [vmem:[#allocation154_spill] sm:$0xff]  ;;  %v2347_v57 = vpop.xlane.xlu0 %2346  ;;  %v10702_v19 = vld [vmem:[#allocation48_spill] sm:$0xff]  ;;  %v10703_v8 = vld [vmem:[#allocation157_spill] sm:$0xff] }
 0x3ad   :  { %2416 = vmax.xlane.f32.xlu0 %v2415_v5  ;;  %v3396_v18 = vadd.f32 %v8098_v36, %v8089_v48  ;;  %10697 = vst [vmem:[#allocation52_spill] sm:$0xff] %v8156_v38  ;;  %v10699_v56 = vmax.f32 %v7618_v21, %v7628_v53  ;;  %5591 = vpow2.f32 %v2957_v50  ;;  %v2965_v5 = vmul.f32 1.442695, %v2641_v13  ;;  %v8168_v7 = vpop.eup %5569  ;;  %v10841_v53 = vld [vmem:[#allocation188_spill] sm:$0xff] }
 0x3ae   :  { %v2425_v43 = vmax.f32 %v8128_v22, %v10700_v34  ;;  %10701 = vst [vmem:[#allocation200_spill] sm:$0xff] %v8168_v7  ;;  %5593 = vpow2.f32 %v2959_v46  ;;  %v2645_v48 = vsub.f32 %v10702_v19, %v2347_v57  ;;  %v2430_v36 = vmax.f32 %v8134_v62, %v10703_v8  ;;  %v8174_v61 = vpop.eup %5571  ;;  %v8182_v22 = vpop.f32.mrf.mxu0 }
 0x3af   :  { %v8164_v0 = vmax.f32 %v10699_v56, %v7720_v9  ;;  %v3397_v63 = vadd.f32 %v8106_v28, %v3396_v18  ;;  %10704 = vst [vmem:[#allocation48_spill] sm:$0xff] %v8174_v61  ;;  %v10705_v13 = vmax.f32 %v7638_v33, %v7646_v40  ;;  %10706 = vst [vmem:[#allocation201_spill] sm:$0xff] %v8182_v22  ;;  %5595 = vpow2.f32 %v2961_v4  ;;  %v10707_v56 = vld [vmem:[#allocation53_spill] sm:$0xff]  ;;  %v8185_v28 = vpop.eup %5573  ;;  %v10711_v4 = vld [vmem:[#allocation102_spill] sm:$0xff] }
 0x3b0   :  { %2421 = vmax.xlane.f32.xlu1 %v2420_v16  ;;  %v2967_v46 = vmul.f32 1.442695, %v2642_v31  ;;  %v2646_v18 = vsub.f32 %v10707_v56, %v2347_v57  ;;  %10708 = vst [vmem:[#allocation53_spill] sm:$0xff] %v8185_v28  ;;  %5597 = vpow2.f32 %v2963_v2  ;;  %v2969_v62 = vmul.f32 1.442695, %v2643_v30  ;;  %v8190_v40 = vpop.eup %5575  ;;  %v8196_v56 = vpop.xlane.xlu1 %2351  ;;  %v10713_v30 = vld [vmem:[#allocation104_spill] sm:$0xff] }
 0x3b1   :  { %v8180_v50 = vmax.f32 %v10705_v13, %v7736_v6  ;;  %3394 = vadd.xlane.f32.xlu0 %v3393_v59  ;;  %v3398_v19 = vadd.f32 %v8110_v32, %v3397_v63  ;;  %v3401_v9 = vadd.f32 %v8122_v10, %v8117_v1  ;;  %10709 = vst [vmem:[#allocation202_spill] sm:$0xff] %v8190_v40  ;;  %v8192_v13 = vpop.f32.mrf.mxu1  ;;  %5599 = vpow2.f32 %v2965_v5  ;;  %v8200_v59 = vpop.eup %5577  ;;  %v10714_v10 = vld [vmem:[#allocation56_spill] sm:$0xff] }
 0x3b2   :  { %10710 = vst [vmem:[#allocation203_spill] sm:$0xff] %v8192_v13  ;;  %v2644_v16 = vsub.f32 %v10711_v4, %v8138_v49  ;;  %v2973_v31 = vmul.f32 1.442695, %v2645_v48  ;;  %v2435_v2 = vmax.f32 %v8164_v0, %v7726_v3  ;;  %10712 = vst [vmem:[#allocation102_spill] sm:$0xff] %v8200_v59  ;;  %v2647_v63 = vsub.f32 %v10713_v30, %v2347_v57  ;;  %v8206_v33 = vpop.eup %5579  ;;  %v8208_v49 = vpop.f32.mrf.mxu0  ;;  %v10717_v48 = vld [vmem:[#allocation106_spill] sm:$0xff]  ;;  %v10718_v0 = vld [vmem:[#allocation16_spill] sm:$0xff] }
 0x3b3   :  { %v2975_v32 = vmul.f32 1.442695, %v2646_v18  ;;  %v3402_v1 = vadd.f32 %v8140_v29, %v3401_v9  ;;  %v2649_v6 = vsub.f32 %v10714_v10, %v8196_v56  ;;  %10715 = vst [vmem:[#allocation104_spill] sm:$0xff] %v8206_v33  ;;  %10716 = vst [vmem:[#allocation56_spill] sm:$0xff] %v8208_v49  ;;  %5601 = vpow2.f32 %v2967_v46  ;;  %v8220_v46 = vpop.f32.mrf.mxu1  ;;  %v2357_v3 = vpop.xlane.xlu0 %2356 }
 0x3b4   :  { %3399 = vadd.xlane.f32.xlu1 %v3398_v19  ;;  %v2648_v5 = vsub.f32 %v10717_v48, %v2347_v57  ;;  %v2650_v4 = vsub.f32 %v10718_v0, %v8196_v56  ;;  %5603 = vpow2.f32 %v2969_v62  ;;  %v3406_v10 = vadd.f32 %v8168_v7, %v8156_v38  ;;  %v8218_v29 = vpop.eup %5581  ;;  %10720 = vst [vmem:[#allocation16_spill] sm:$0xff] %v8220_v46  ;;  %v10721_v57 = vld [vmem:[#allocation107_spill] sm:$0xff] }
 0x3b5   :  { %2426 = vmax.xlane.f32.xlu0 %v2425_v43  ;;  %v3403_v9 = vadd.f32 %v8145_v26, %v3402_v1  ;;  %v2981_v18 = vmul.f32 1.442695, %v2649_v6  ;;  %10719 = vst [vmem:[#allocation106_spill] sm:$0xff] %v8218_v29  ;;  %v2971_v19 = vmul.f32 1.442695, %v2644_v16  ;;  %5605 = vpow2.f32 %v2973_v31  ;;  %v10723_v1 = vld [vmem:[#allocation61_spill] sm:$0xff]  ;;  %v8236_v26 = vpop.f32.mrf.mxu0 }
 0x3b6   :  { %v2651_v48 = vsub.f32 %v10721_v57, %v8196_v56  ;;  %v2983_v0 = vmul.f32 1.442695, %v2650_v4  ;;  %v8224_v30 = vpop.eup %5583  ;;  %5607 = vpow2.f32 %v2975_v32  ;;  %v2977_v43 = vmul.f32 1.442695, %v2647_v63  ;;  %10726 = vst [vmem:[#allocation204_spill] sm:$0xff] %v8236_v26  ;;  %v10727_v57 = vld [vmem:[#allocation18_spill] sm:$0xff] }
 0x3b7   :  { %10722 = vst [vmem:[#allocation107_spill] sm:$0xff] %v8224_v30  ;;  %v3407_v6 = vadd.f32 %v8174_v61, %v3406_v10  ;;  %v2653_v62 = vsub.f32 %v10723_v1, %v2357_v3  ;;  %v8228_v38 = vpop.eup %5585  ;;  %v10725_v16 = vmax.f32 %v7652_v47, %v7658_v39  ;;  %v2979_v4 = vmul.f32 1.442695, %v2648_v5 }
 0x3b8   :  { %10724 = vst [vmem:[#allocation61_spill] sm:$0xff] %v8228_v38  ;;  %2431 = vmax.xlane.f32.xlu1 %v2430_v36  ;;  %5609 = vpow2.f32 %v2981_v18  ;;  %v2654_v32 = vsub.f32 %v10727_v57, %v2357_v3  ;;  %v8239_v63 = vpop.eup %5587  ;;  %v3411_v61 = vadd.f32 %v8200_v59, %v8190_v40  ;;  %v10731_v36 = vld [vmem:[#allocation109_spill] sm:$0xff]  ;;  %v2985_v18 = vmul.f32 1.442695, %v2651_v48 }
 0x3b9   :  { %v8234_v31 = vmax.f32 %v10725_v16, %v7754_v54  ;;  %10728 = vst [vmem:[#allocation18_spill] sm:$0xff] %v8239_v63  ;;  %3404 = vadd.xlane.f32.xlu0 %v3403_v9  ;;  %5611 = vpow2.f32 %v2983_v0  ;;  %v3408_v10 = vadd.f32 %v8185_v28, %v3407_v6  ;;  %v2989_v1 = vmul.f32 1.442695, %v2653_v62  ;;  %v8244_v7 = vpop.eup %5589  ;;  %v8246_v16 = vpop.f32.mrf.mxu1  ;;  %v10733_v0 = vld [vmem:[#allocation110_spill] sm:$0xff]  ;;  %v10734_v40 = vld [vmem:[#allocation17_spill] sm:$0xff] }
 0x3ba   :  { %10729 = vst [vmem:[#allocation205_spill] sm:$0xff] %v8244_v7  ;;  %10730 = vst [vmem:[#allocation206_spill] sm:$0xff] %v8246_v16  ;;  %5613 = vpow2.f32 %v2971_v19  ;;  %v2652_v5 = vsub.f32 %v10731_v36, %v8196_v56  ;;  %v2991_v57 = vmul.f32 1.442695, %v2654_v32  ;;  %v8250_v54 = vpop.xlane.xlu1 %2361  ;;  %v8252_v9 = vpop.eup %5591  ;;  %v2655_v6 = vsub.f32 %v10733_v0, %v2357_v3  ;;  %v10737_v56 = vld [vmem:[#allocation112_spill] sm:$0xff]  ;;  %v10738_v32 = vld [vmem:[#allocation21_spill] sm:$0xff] }
 0x3bb   :  { %10732 = vst [vmem:[#allocation109_spill] sm:$0xff] %v8252_v9  ;;  %5615 = vpow2.f32 %v2977_v43  ;;  %v3412_v62 = vadd.f32 %v8206_v33, %v3411_v61  ;;  %v2657_v59 = vsub.f32 %v10734_v40, %v8250_v54  ;;  %v8258_v28 = vpop.eup %5593  ;;  %v8260_v19 = vpop.f32.mrf.mxu0  ;;  %v2656_v48 = vsub.f32 %v10737_v56, %v2357_v3  ;;  %v10742_v56 = vld [vmem:[#allocation113_spill] sm:$0xff] }
 0x3bc   :  { %10735 = vst [vmem:[#allocation110_spill] sm:$0xff] %v8258_v28  ;;  %10736 = vst [vmem:[#allocation17_spill] sm:$0xff] %v8260_v19  ;;  %3409 = vadd.xlane.f32.xlu1 %v3408_v10  ;;  %5617 = vpow2.f32 %v2989_v1  ;;  %v2658_v36 = vsub.f32 %v10738_v32, %v8250_v54  ;;  %v2445_v43 = vmax.f32 %v8234_v31, %v7762_v35  ;;  %v8267_v0 = vpop.eup %5595  ;;  %v8274_v3 = vpop.f32.mrf.mxu1  ;;  %v2987_v1 = vmul.f32 1.442695, %v2652_v5 }
 0x3bd   :  { %10739 = vst [vmem:[#allocation112_spill] sm:$0xff] %v8267_v0  ;;  %2436 = vmax.xlane.f32.xlu0 %v2435_v2  ;;  %5619 = vpow2.f32 %v2991_v57  ;;  %v3413_v40 = vadd.f32 %v8218_v29, %v3412_v62  ;;  %v2997_v61 = vmul.f32 1.442695, %v2657_v59  ;;  %v3416_v33 = vadd.f32 %v8228_v38, %v8224_v30  ;;  %v8272_v10 = vpop.eup %5597  ;;  %10741 = vst [vmem:[#allocation207_spill] sm:$0xff] %v8274_v3  ;;  %v8278_v35 = vpop.xlane.xlu0 %2366  ;;  %v10744_v62 = vld [vmem:[#allocation25_spill] sm:$0xff]  ;;  %v10745_v29 = vld [vmem:[#allocation135_spill] sm:$0xff] }
 0x3be   :  { %10740 = vst [vmem:[#allocation21_spill] sm:$0xff] %v8272_v10  ;;  %5621 = vpow2.f32 %v2985_v18  ;;  %v2659_v32 = vsub.f32 %v10742_v56, %v8250_v54  ;;  %v2999_v31 = vmul.f32 1.442695, %v2658_v36  ;;  %v8280_v2 = vpop.eup %5599  ;;  %v2993_v57 = vmul.f32 1.442695, %v2655_v6  ;;  %v8289_v38 = vpop.f32.mrf.mxu0 }
 0x3bf   :  { %10743 = vst [vmem:[#allocation113_spill] sm:$0xff] %v8280_v2  ;;  %5623 = vpow2.f32 %v2979_v4  ;;  %v3417_v59 = vadd.f32 %v8239_v63, %v3416_v33  ;;  %v2661_v30 = vsub.f32 %v10744_v62, %v8278_v35  ;;  %v10746_v18 = vmax.f32 %v7664_v55, %v10745_v29  ;;  %10747 = vst [vmem:[#allocation25_spill] sm:$0xff] %v8289_v38  ;;  %v10749_v4 = vld [vmem:[#allocation23_spill] sm:$0xff]  ;;  %v8307_v29 = vpop.xlane.xlu1 %2371  ;;  %v10759_v55 = vld [vmem:[#allocation138_spill] sm:$0xff] }
 0x3c0   :  { %v2995_v56 = vmul.f32 1.442695, %v2656_v48  ;;  %v10748_v36 = vmax.f32 %v8180_v50, %v7744_v44  ;;  %5625 = vpow2.f32 %v2997_v61  ;;  %v2662_v6 = vsub.f32 %v10749_v4, %v8278_v35  ;;  %v8296_v33 = vpop.eup %5601  ;;  %v8303_v48 = vpop.f32.mrf.mxu1  ;;  %v10753_v50 = vld [vmem:[#allocation115_spill] sm:$0xff] }
 0x3c1   :  { %v2449_v5 = vmax.f32 %v10746_v18, %v7772_v12  ;;  %10750 = vst [vmem:[#allocation23_spill] sm:$0xff] %v8296_v33  ;;  %3414 = vadd.xlane.f32.xlu0 %v3413_v40  ;;  %5627 = vpow2.f32 %v2999_v31  ;;  %v3418_v62 = vadd.f32 %v8244_v7, %v3417_v59  ;;  %v3005_v63 = vmul.f32 1.442695, %v2661_v30  ;;  %v8301_v12 = vpop.eup %5603  ;;  %10752 = vst [vmem:[#allocation209_spill] sm:$0xff] %v8303_v48  ;;  %v10755_v30 = vld [vmem:[#allocation116_spill] sm:$0xff] }
 0x3c2   :  { %2441 = vmax.xlane.f32.xlu1 %v10748_v36  ;;  %v3421_v18 = vadd.f32 %v8258_v28, %v8252_v9  ;;  %10751 = vst [vmem:[#allocation208_spill] sm:$0xff] %v8301_v12  ;;  %5629 = vpow2.f32 %v2987_v1  ;;  %v2660_v61 = vsub.f32 %v10753_v50, %v8250_v54  ;;  %v3001_v36 = vmul.f32 1.442695, %v2659_v32  ;;  %v8309_v40 = vpop.eup %5605  ;;  %v10756_v9 = vld [vmem:[#allocation27_spill] sm:$0xff]  ;;  %v10758_v1 = vld [vmem:[#allocation54_spill] sm:$0xff]  ;;  %v10760_v54 = vld [vmem:[#allocation141_spill] sm:$0xff]  ;;  %v8322_v50 = vpop.f32.mrf.mxu0 }
 0x3c3   :  { %v3007_v4 = vmul.f32 1.442695, %v2662_v6  ;;  %10754 = vst [vmem:[#allocation115_spill] sm:$0xff] %v8309_v40  ;;  %5631 = vpow2.f32 %v2993_v57  ;;  %v2663_v31 = vsub.f32 %v10755_v30, %v8278_v35  ;;  %v2665_v28 = vsub.f32 %v10756_v9, %v8307_v29  ;;  %v8316_v7 = vpop.eup %5607  ;;  %v10762_v57 = vld [vmem:[#allocation168_spill] sm:$0xff]  ;;  %v10763_v30 = vld [vmem:[#allocation31_spill] sm:$0xff] }
 0x3c4   :  { %v3422_v59 = vadd.f32 %v8267_v0, %v3421_v18  ;;  %10757 = vst [vmem:[#allocation116_spill] sm:$0xff] %v8316_v7  ;;  %v10761_v32 = vmax.f32 %v10759_v55, %v10760_v54  ;;  %5633 = vpow2.f32 %v3005_v63  ;;  %v2450_v39 = vmax.f32 %v2449_v5, %v10762_v57  ;;  %v10767_v5 = vld [vmem:[#allocation119_spill] sm:$0xff] }
 0x3c5   :  { %v2666_v47 = vsub.f32 %v10763_v30, %v8307_v29  ;;  %v8327_v18 = vpop.eup %5609  ;;  %2446 = vmax.xlane.f32.xlu0 %v2445_v43  ;;  %5635 = vpow2.f32 %v3007_v4  ;;  %v3013_v0 = vmul.f32 1.442695, %v2665_v28  ;;  %v3426_v54 = vadd.f32 %v8296_v33, %v8280_v2  ;;  %v10769_v43 = vld [vmem:[#allocation118_spill] sm:$0xff] }
 0x3c6   :  { %v2454_v6 = vmax.f32 %v10761_v32, %v10758_v1  ;;  %3419 = vadd.xlane.f32.xlu1 %v3418_v62  ;;  %10764 = vst [vmem:[#allocation27_spill] sm:$0xff] %v8327_v18  ;;  %v3423_v9 = vadd.f32 %v8272_v10, %v3422_v59  ;;  %v8332_v32 = vpop.eup %5611  ;;  %v8334_v1 = vpop.f32.mrf.mxu1  ;;  %5637 = vpow2.f32 %v3001_v36  ;;  %v3003_v63 = vmul.f32 1.442695, %v2660_v61 }
 0x3c7   :  { %10765 = vst [vmem:[#allocation31_spill] sm:$0xff] %v8332_v32  ;;  %10766 = vst [vmem:[#allocation210_spill] sm:$0xff] %v8334_v1  ;;  %v2667_v62 = vsub.f32 %v10767_v5, %v8307_v29  ;;  %v3015_v30 = vmul.f32 1.442695, %v2666_v47  ;;  %v8338_v55 = vpop.eup %5613  ;;  %5639 = vpow2.f32 %v2995_v56  ;;  %v2664_v4 = vsub.f32 %v10769_v43, %v8278_v35  ;;  %v8345_v10 = vpop.f32.mrf.mxu0  ;;  %v10773_v56 = vld [vmem:[#allocation59_spill] sm:$0xff] }
 0x3c8   :  { %10768 = vst [vmem:[#allocation119_spill] sm:$0xff] %v8338_v55  ;;  %v3009_v28 = vmul.f32 1.442695, %v2663_v31  ;;  %v3427_v59 = vadd.f32 %v8301_v12, %v3426_v54  ;;  %v8343_v2 = vpop.eup %5615  ;;  %10771 = vst [vmem:[#allocation211_spill] sm:$0xff] %v8345_v10  ;;  %5641 = vpow2.f32 %v3013_v0  ;;  %v3431_v61 = vadd.f32 %v8316_v7, %v8309_v40  ;;  %v10777_v0 = vld [vmem:[#allocation121_spill] sm:$0xff] }
 0x3c9   :  { %10770 = vst [vmem:[#allocation118_spill] sm:$0xff] %v8343_v2  ;;  %v3436_v47 = vadd.f32 %v8332_v32, %v8327_v18  ;;  %v8351_v36 = vpop.eup %5617  ;;  %v10774_v35 = vmax.f32 %v10564_v27, %v10563_v14  ;;  %3424 = vadd.xlane.f32.xlu0 %v3423_v9  ;;  %5643 = vpow2.f32 %v3015_v30  ;;  %v2668_v43 = vsub.f32 %v10777_v0, %v8307_v29  ;;  %v10783_v29 = vld [vmem:[#allocation150_spill] sm:$0xff]  ;;  %v10809_v14 = vld [vmem:[#allocation169_spill] sm:$0xff] }
 0x3ca   :  { %2451 = vmax.xlane.f32.xlu1 %v2450_v39  ;;  %10772 = vst [vmem:[#allocation212_spill] sm:$0xff] %v8351_v36  ;;  %v3428_v54 = vadd.f32 %v8338_v55, %v3427_v59  ;;  %v8358_v5 = vpop.eup %5619  ;;  %v8360_v39 = vpop.f32.mrf.mxu1  ;;  %5645 = vpow2.f32 %v3003_v63  ;;  %v3017_v18 = vmul.f32 1.442695, %v2667_v62  ;;  %v3432_v40 = vadd.f32 %v8343_v2, %v3431_v61  ;;  %v10782_v55 = vld [vmem:[#allocation153_spill] sm:$0xff]  ;;  %v10823_v27 = vld [vmem:[#allocation30_spill] sm:$0xff] }
 0x3cb   :  { %v2459_v31 = vmax.f32 %v10774_v35, %v10773_v56  ;;  %10775 = vst [vmem:[#allocation213_spill] sm:$0xff] %v8358_v5  ;;  %10776 = vst [vmem:[#allocation214_spill] sm:$0xff] %v8360_v39  ;;  %v8365_v32 = vpop.eup %5621  ;;  %5647 = vpow2.f32 %v3009_v28  ;;  %v3011_v7 = vmul.f32 1.442695, %v2664_v4  ;;  %v10779_v35 = vld [vmem:[#allocation171_spill] sm:$0xff]  ;;  %v8370_v59 = vpop.f32.mrf.mxu0  ;;  %v2463_v62 = vmax.f32 %v10783_v29, %v10782_v55 }
 0x3cc   :  { %10778 = vst [vmem:[#allocation121_spill] sm:$0xff] %v8365_v32  ;;  %v2455_v9 = vmax.f32 %v2454_v6, %v10779_v35  ;;  %v8368_v30 = vpop.eup %5623  ;;  %v3437_v12 = vadd.f32 %v8365_v32, %v3436_v47  ;;  %v3441_v4 = vadd.f32 %v8358_v5, %v8351_v36  ;;  %v8382_v6 = vpop.f32.mrf.mxu1  ;;  %5649 = vpow2.f32 %v3017_v18  ;;  %v10788_v32 = vld [vmem:[#allocation66_spill] sm:$0xff]  ;;  %v10796_v5 = vld [vmem:[#allocation60_spill] sm:$0xff] }
 0x3cd   :  { %10780 = vst [vmem:[#allocation215_spill] sm:$0xff] %v8368_v30  ;;  %v8373_v63 = vpop.eup %5625  ;;  %v3433_v61 = vadd.f32 %v8368_v30, %v3432_v40  ;;  %10785 = vst [vmem:[#allocation218_spill] sm:$0xff] %v8382_v6  ;;  %v3019_v0 = vmul.f32 1.442695, %v2668_v43  ;;  %v2464_v33 = vmax.f32 %v2463_v62, %v10788_v32  ;;  %5651 = vpow2.f32 %v3011_v7  ;;  %v10791_v40 = vld [vmem:[#allocation156_spill] sm:$0xff]  ;;  %v8392_v29 = vpop.f32.mrf.mxu0 }
 0x3ce   :  { %3429 = vadd.xlane.f32.xlu1 %v3428_v54  ;;  %10781 = vst [vmem:[#allocation216_spill] sm:$0xff] %v8373_v63  ;;  %2456 = vmax.xlane.f32.xlu0 %v2455_v9  ;;  %v8380_v28 = vpop.eup %5627  ;;  %v10786_v54 = vld [vmem:[#allocation174_spill] sm:$0xff]  ;;  %v10790_v9 = vld [vmem:[#allocation159_spill] sm:$0xff]  ;;  %10792 = vst [vmem:[#allocation221_spill] sm:$0xff] %v8392_v29  ;;  %v8402_v7 = vpop.f32.mrf.mxu1  ;;  %v2498_v21 = vmax.f32 %v10841_v53, %v8019_v41  ;;  %v2503_v8 = vmax.f32 %v8047_v58, %v8077_v25 }
 0x3cf   :  { %10784 = vst [vmem:[#allocation217_spill] sm:$0xff] %v8380_v28  ;;  %v2460_v2 = vmax.f32 %v2459_v31, %v10786_v54  ;;  %v8385_v47 = vpop.eup %5629  ;;  %v2468_v30 = vmax.f32 %v10791_v40, %v10790_v9  ;;  %v3446_v18 = vadd.f32 %v8380_v28, %v8373_v63  ;;  %10795 = vst [vmem:[#allocation224_spill] sm:$0xff] %v8402_v7  ;;  %5653 = vpow2.f32 %v3019_v0 }
 0x3d0   :  { %10787 = vst [vmem:[#allocation219_spill] sm:$0xff] %v8385_v47  ;;  %v8388_v55 = vpop.eup %5631  ;;  %v3438_v36 = vadd.f32 %v8385_v47, %v3437_v12  ;;  %v8410_v47 = vpop.f32.mrf.mxu0  ;;  %v2508_v34 = vmax.f32 %v8100_v24, %v8136_v37  ;;  %v2513_v17 = vmax.f32 %v8158_v45, %v8192_v13  ;;  %v2518_v42 = vmax.f32 %v8220_v46, %v8246_v16 }
 0x3d1   :  { %10789 = vst [vmem:[#allocation220_spill] sm:$0xff] %v8388_v55  ;;  %v8397_v43 = vpop.eup %5633  ;;  %v3442_v31 = vadd.f32 %v8388_v55, %v3441_v4  ;;  %v2469_v32 = vmax.f32 %v2468_v30, %v10796_v5  ;;  %v10801_v4 = vld [vmem:[#allocation165_spill] sm:$0xff]  ;;  %v10802_v55 = vld [vmem:[#allocation162_spill] sm:$0xff]  ;;  %v2528_v41 = vmax.f32 %v8334_v1, %v8360_v39  ;;  %v2533_v25 = vmax.f32 %v8382_v6, %v8402_v7 }
 0x3d2   :  { %2461 = vmax.xlane.f32.xlu1 %v2460_v2  ;;  %10793 = vst [vmem:[#allocation222_spill] sm:$0xff] %v8397_v43  ;;  %3434 = vadd.xlane.f32.xlu0 %v3433_v61  ;;  %v8400_v62 = vpop.eup %5635  ;;  %v10798_v2 = vld [vmem:[#allocation177_spill] sm:$0xff]  ;;  %v2473_v28 = vmax.f32 %v10802_v55, %v10801_v4  ;;  %v10810_v4 = vld [vmem:[#allocation167_spill] sm:$0xff]  ;;  %v8432_v55 = vpop.f32.mrf.mxu0  ;;  %v8549_v1 = vmax.f32 %v2498_v21, %v8182_v22 }
 0x3d3   :  { %10794 = vst [vmem:[#allocation223_spill] sm:$0xff] %v8400_v62  ;;  %v8405_v9 = vpop.eup %5637  ;;  %v2465_v40 = vmax.f32 %v2464_v33, %v10798_v2  ;;  %v3451_v0 = vadd.f32 %v8400_v62, %v8397_v43  ;;  %v8422_v33 = vpop.f32.mrf.mxu1  ;;  %v10805_v2 = vld [vmem:[#allocation180_spill] sm:$0xff]  ;;  %10811 = vst [vmem:[#allocation232_spill] sm:$0xff] %v8432_v55  ;;  %v8555_v7 = vmax.f32 %v2508_v34, %v8289_v38 }
 0x3d4   :  { %10797 = vst [vmem:[#allocation225_spill] sm:$0xff] %v8405_v9  ;;  %v8408_v12 = vpop.eup %5639  ;;  %v3447_v61 = vadd.f32 %v8405_v9, %v3446_v18  ;;  %10804 = vst [vmem:[#allocation229_spill] sm:$0xff] %v8422_v33  ;;  %v2470_v54 = vmax.f32 %v2469_v32, %v10805_v2  ;;  %v10807_v18 = vld [vmem:[#allocation41_spill] sm:$0xff]  ;;  %v8564_v21 = vmax.f32 %v2518_v42, %v8392_v29  ;;  %v10866_v29 = vld [vmem:[#allocation170_spill] sm:$0xff] }
 0x3d5   :  { %10799 = vst [vmem:[#allocation226_spill] sm:$0xff] %v8408_v12  ;;  %v8413_v63 = vpop.eup %5641  ;;  %v3443_v30 = vadd.f32 %v8408_v12, %v3442_v31  ;;  %v2474_v9 = vmax.f32 %v2473_v28, %v10807_v18  ;;  %v8438_v62 = vpop.f32.mrf.mxu1  ;;  %v10814_v18 = vld [vmem:[#allocation67_spill] sm:$0xff] }
 0x3d6   :  { %3439 = vadd.xlane.f32.xlu1 %v3438_v36  ;;  %10800 = vst [vmem:[#allocation227_spill] sm:$0xff] %v8413_v63  ;;  %2466 = vmax.xlane.f32.xlu0 %v2465_v40  ;;  %v8420_v5 = vpop.eup %5643  ;;  %v2478_v40 = vmax.f32 %v10810_v4, %v10809_v14  ;;  %10812 = vst [vmem:[#allocation233_spill] sm:$0xff] %v8438_v62  ;;  %v8446_v4 = vpop.f32.mrf.mxu0  ;;  %v2538_v37 = vmax.f32 %v8422_v33, %v8438_v62  ;;  %v10846_v62 = vld [vmem:[#allocation124_spill] sm:$0xff] }
 0x3d7   :  { %10803 = vst [vmem:[#allocation228_spill] sm:$0xff] %v8420_v5  ;;  %v8425_v36 = vpop.eup %5645  ;;  %v3456_v43 = vadd.f32 %v8420_v5, %v8413_v63  ;;  %v2475_v2 = vmax.f32 %v2474_v9, %v10814_v18  ;;  %v10817_v63 = vld [vmem:[#allocation20_spill] sm:$0xff]  ;;  %v10822_v18 = vld [vmem:[#allocation182_spill] sm:$0xff] }
 0x3d8   :  { %10806 = vst [vmem:[#allocation230_spill] sm:$0xff] %v8425_v36  ;;  %v8428_v56 = vpop.eup %5647  ;;  %v3448_v31 = vadd.f32 %v8425_v36, %v3447_v61  ;;  %v2479_v28 = vmax.f32 %v2478_v40, %v7953_v60  ;;  %v10816_v61 = vld [vmem:[#allocation28_spill] sm:$0xff]  ;;  %v10819_v40 = vld [vmem:[#allocation39_spill] sm:$0xff]  ;;  %v2488_v35 = vmax.f32 %v10823_v27, %v10822_v18 }
 0x3d9   :  { %10808 = vst [vmem:[#allocation231_spill] sm:$0xff] %v8428_v56  ;;  %v3452_v32 = vadd.f32 %v8428_v56, %v3451_v0  ;;  %v8441_v12 = vpop.eup %5649  ;;  %v8452_v56 = vpop.f32.mrf.mxu1  ;;  %v10821_v9 = vld [vmem:[#allocation64_spill] sm:$0xff] }
 0x3da   :  { %2471 = vmax.xlane.f32.xlu1 %v2470_v54  ;;  %3444 = vadd.xlane.f32.xlu0 %v3443_v30  ;;  %10813 = vst [vmem:[#allocation234_spill] sm:$0xff] %v8441_v12  ;;  %v8444_v14 = vpop.eup %5651  ;;  %v3457_v54 = vadd.f32 %v8441_v12, %v3456_v43  ;;  %v2483_v30 = vmax.f32 %v10817_v63, %v10816_v61  ;;  %10818 = vst [vmem:[#allocation236_spill] sm:$0xff] %v8452_v56  ;;  %v10839_v63 = vld [vmem:[#allocation186_spill] sm:$0xff] }
 0x3db   :  { %10815 = vst [vmem:[#allocation235_spill] sm:$0xff] %v8444_v14  ;;  %v3453_v0 = vadd.f32 %v8444_v14, %v3452_v32  ;;  %v2480_v5 = vmax.f32 %v2479_v28, %v10819_v40  ;;  %v2489_v32 = vmax.f32 %v2488_v35, %v8055_v23  ;;  %v10840_v40 = vld [vmem:[#allocation184_spill] sm:$0xff] }
 0x3dc   :  { %v8455_v36 = vpop.eup %5653  ;;  %v2484_v60 = vmax.f32 %v2483_v30, %v10821_v9  ;;  %v2493_v57 = vmax.f32 %v10840_v40, %v10839_v63  ;;  %v2523_v63 = vmax.f32 %v8274_v3, %v8303_v48  ;;  %v10863_v3 = vld [vmem:[#allocation175_spill] sm:$0xff] }
 0x3dd   :  { %10820 = vst [vmem:[#allocation237_spill] sm:$0xff] %v8455_v36  ;;  %v3458_v43 = vadd.f32 %v8455_v36, %v3457_v54  ;;  %v2490_v14 = vmax.f32 %v2489_v32, %v8085_v51 }
 0x3de   :  { %3449 = vadd.xlane.f32.xlu1 %v3448_v31  ;;  %2476 = vmax.xlane.f32.xlu0 %v2475_v2  ;;  %v8460_v31 = vpop.f32.mrf.mxu0  ;;  %v8463_v2 = vpop.f32.mrf.mxu1  ;;  %v2485_v12 = vmax.f32 %v2484_v60, %v8029_v52 }
 0x3df   :  { %10824 = vst [vmem:[#allocation238_spill] sm:$0xff] %v8460_v31  ;;  %10825 = vst [vmem:[#allocation239_spill] sm:$0xff] %v8463_v2  ;;  %v2543_v13 = vmax.f32 %v8452_v56, %v8463_v2  ;;  %v8543_v2 = vmax.f32 %v2493_v57, %v8112_v20  ;;  %v10844_v56 = vld [vmem:[#allocation33_spill] sm:$0xff]  ;;  %v8559_v57 = vmax.f32 %v2513_v17, %v8345_v10 }
 0x3e0   :  { %v8467_v28 = vpop.f32.mrf.mxu0  ;;  %v8469_v30 = vpop.f32.mrf.mxu1  ;;  %v10867_v10 = vld [vmem:[#allocation173_spill] sm:$0xff] }
 0x3e1   :  { %10826 = vst [vmem:[#allocation240_spill] sm:$0xff] %v8469_v30 }
 0x3e2   :  { %2481 = vmax.xlane.f32.xlu1 %v2480_v5  ;;  %3454 = vadd.xlane.f32.xlu0 %v3453_v0  ;;  %v8472_v18 = vpop.f32.mrf.mxu0  ;;  %v8474_v5 = vpop.f32.mrf.mxu1 }
 0x3e3   :  { %10827 = vst [vmem:[#allocation241_spill] sm:$0xff] %v8472_v18  ;;  %10828 = vst [vmem:[#allocation242_spill] sm:$0xff] %v8474_v5  ;;  %v2548_v45 = vmax.f32 %v8469_v30, %v8474_v5  ;;  %v10843_v5 = vld [vmem:[#allocation29_spill] sm:$0xff]  ;;  %v8576_v17 = vmax.f32 %v2533_v25, %v8472_v18 }
 0x3e4   :  { %v8476_v54 = vpop.f32.mrf.mxu0  ;;  %v8478_v0 = vpop.f32.mrf.mxu1  ;;  %v10848_v25 = vld [vmem:[#allocation37_spill] sm:$0xff] }
 0x3e5   :  { %10829 = vst [vmem:[#allocation243_spill] sm:$0xff] %v8478_v0 }
 0x3e6   :  { %3459 = vadd.xlane.f32.xlu1 %v3458_v43  ;;  %2486 = vmax.xlane.f32.xlu0 %v2485_v12  ;;  %v8480_v35 = vpop.f32.mrf.mxu0  ;;  %v8482_v60 = vpop.f32.mrf.mxu1 }
 0x3e7   :  { %10830 = vst [vmem:[#allocation244_spill] sm:$0xff] %v8480_v35  ;;  %10831 = vst [vmem:[#allocation245_spill] sm:$0xff] %v8482_v60  ;;  %v2553_v16 = vmax.f32 %v8478_v0, %v8482_v60  ;;  %v10845_v0 = vld [vmem:[#allocation122_spill] sm:$0xff] }
 0x3e8   :  { %v8484_v36 = vpop.f32.mrf.mxu0  ;;  %v8486_v12 = vpop.f32.mrf.mxu1 }
 0x3e9   :  { %10832 = vst [vmem:[#allocation246_spill] sm:$0xff] %v8486_v12 }
 0x3ea   :  { %2491 = vmax.xlane.f32.xlu1 %v2490_v14  ;;  %v8488_v43 = vpop.f32.mrf.mxu0  ;;  %v8490_v32 = vpop.f32.mrf.mxu1 }
 0x3eb   :  { %10833 = vst [vmem:[#allocation247_spill] sm:$0xff] %v8488_v43  ;;  %10834 = vst [vmem:[#allocation248_spill] sm:$0xff] %v8490_v32  ;;  %v2558_v39 = vmax.f32 %v8486_v12, %v8490_v32  ;;  %v8552_v32 = vmax.f32 %v2503_v8, %v8236_v26  ;;  %v8567_v8 = vmax.f32 %v2523_v63, %v8432_v55  ;;  %v10873_v26 = vld [vmem:[#allocation133_spill] sm:$0xff] }
 0x3ec   :  { %v8492_v51 = vpop.f32.mrf.mxu0  ;;  %v8494_v14 = vpop.f32.mrf.mxu1  ;;  %v8582_v42 = vmax.f32 %v2543_v13, %v8488_v43 }
 0x3ed   :  { %10835 = vst [vmem:[#allocation249_spill] sm:$0xff] %v8494_v14 }
 0x3ee   :  { %v8496_v23 = vpop.f32.mrf.mxu0  ;;  %v8498_v27 = vpop.f32.mrf.mxu1 }
 0x3ef   :  { %10836 = vst [vmem:[#allocation250_spill] sm:$0xff] %v8496_v23  ;;  %10837 = vst [vmem:[#allocation251_spill] sm:$0xff] %v8498_v27  ;;  %v8585_v63 = vmax.f32 %v2548_v45, %v8496_v23 }
 0x3f0   :  { %v8500_v52 = vpop.f32.mrf.mxu0  ;;  %v8502_v9 = vpop.f32.mrf.mxu1 }
 0x3f2   :  { %v8504_v61 = vpop.f32.mrf.mxu0  ;;  %v8516_v11 = vpop.f32.mrf.mxu1 }
 0x3f3   :  { %10838 = vst [vmem:[#allocation252_spill] sm:$0xff] %v8504_v61  ;;  %10842 = vst [vmem:[#allocation253_spill] sm:$0xff] %v8516_v11  ;;  %v8570_v34 = vmax.f32 %v2553_v16, %v8504_v61  ;;  %v10850_v61 = vld [vmem:[#allocation125_spill] sm:$0xff] }
 0x3f4   :  { %v8534_v46 = vpop.f32.mrf.mxu0 }
 0x405   :  { %v3345_v44 = vpop.xlane.xlu0 %3344 }
 0x406   :  { %5655 = vrcp.f32 %v3345_v44 }
 0x409   :  { %v2377_v33 = vpop.xlane.xlu0 %2376 }
 0x40a   :  { %v2669_v30 = vsub.f32 %v10843_v5, %v2377_v33  ;;  %v2670_v60 = vsub.f32 %v10844_v56, %v2377_v33  ;;  %v2671_v6 = vsub.f32 %v10845_v0, %v2377_v33  ;;  %v2672_v12 = vsub.f32 %v10846_v62, %v2377_v33  ;;  %v8561_v5 = vpop.f32.mrf.mxu0 }
 0x40b   :  { %v3350_v44 = vpop.xlane.xlu1 %3349  ;;  %10847 = vst [vmem:[#allocation29_spill] sm:$0xff] %v8561_v5  ;;  %v8573_v62 = vmax.f32 %v2528_v41, %v8460_v31  ;;  %v8579_v33 = vmax.f32 %v2538_v37, %v8480_v35  ;;  %v10859_v31 = vld [vmem:[#allocation19_spill] sm:$0xff] }
 0x40c   :  { %5657 = vrcp.f32 %v3350_v44  ;;  %v3021_v56 = vmul.f32 1.442695, %v2669_v30  ;;  %v3023_v0 = vmul.f32 1.442695, %v2670_v60  ;;  %v3025_v48 = vmul.f32 1.442695, %v2671_v6  ;;  %v8590_v41 = vpop.f32.mrf.mxu0 }
 0x40d   :  { %v3027_v16 = vmul.f32 1.442695, %v2672_v12  ;;  %v8588_v6 = vmax.f32 %v2558_v39, %v8561_v5  ;;  %v10849_v44 = vld [vmem:[#allocation35_spill] sm:$0xff]  ;;  %v10855_v39 = vld [vmem:[#allocation128_spill] sm:$0xff] }
 0x40e   :  { %5659 = vpow2.f32 %v3021_v56  ;;  %v8608_v12 = vpop.f32.mrf.mxu0 }
 0x40f   :  { %5661 = vpow2.f32 %v3023_v0  ;;  %v10851_v0 = vld [vmem:[#allocation127_spill] sm:$0xff]  ;;  %10852 = vst [vmem:[#allocation33_spill] sm:$0xff] %v8608_v12 }
 0x410   :  { %v2382_v30 = vpop.xlane.xlu1 %2381  ;;  %5663 = vpow2.f32 %v3025_v48 }
 0x411   :  { %v2673_v60 = vsub.f32 %v10848_v25, %v2382_v30  ;;  %v2674_v37 = vsub.f32 %v10849_v44, %v2382_v30  ;;  %v2675_v56 = vsub.f32 %v10850_v61, %v2382_v30  ;;  %v3355_v45 = vpop.xlane.xlu0 %3354  ;;  %v2676_v5 = vsub.f32 %v10851_v0, %v2382_v30  ;;  %v10854_v61 = vld [vmem:[#allocation73_spill] sm:$0xff] }
 0x412   :  { %5665 = vrcp.f32 %v3355_v45 }
 0x413   :  { %v3029_v23 = vmul.f32 1.442695, %v2673_v60  ;;  %v3031_v25 = vmul.f32 1.442695, %v2674_v37  ;;  %5667 = vpow2.f32 %v3027_v16  ;;  %v3033_v44 = vmul.f32 1.442695, %v2675_v56  ;;  %v5656_v0 = vpop.eup %5655 }
 0x414   :  { %v3035_v13 = vmul.f32 1.442695, %v2676_v5  ;;  %v10858_v37 = vld [vmem:[#allocation130_spill] sm:$0xff]  ;;  %v3726_v55 = vmul.f32 %v5656_v0, %v10859_v31 }
 0x415   :  { %5669 = vpow2.f32 %v3029_v23  ;;  %v2387_v16 = vpop.xlane.xlu0 %2386  ;;  %v10853_v23 = vld [vmem:[#allocation71_spill] sm:$0xff] }
 0x416   :  { %5671 = vpow2.f32 %v3031_v25  ;;  %v2677_v48 = vsub.f32 %v10853_v23, %v2387_v16  ;;  %v2678_v45 = vsub.f32 %v10854_v61, %v2387_v16  ;;  %v2679_v43 = vsub.f32 %v10855_v39, %v2387_v16 }
 0x417   :  { %v10856_v25 = vmax.f32 %v8494_v14, %v8498_v27  ;;  %5673 = vpow2.f32 %v3033_v44  ;;  %v2680_v35 = vsub.f32 %v10858_v37, %v2387_v16  ;;  %v10860_v27 = vld [vmem:[#allocation172_spill] sm:$0xff]  ;;  %v10862_v16 = vld [vmem:[#allocation22_spill] sm:$0xff] }
 0x418   :  { %v3360_v60 = vpop.xlane.xlu1 %3359  ;;  %v3037_v5 = vmul.f32 1.442695, %v2677_v48  ;;  %v3039_v23 = vmul.f32 1.442695, %v2678_v45  ;;  %v3041_v18 = vmul.f32 1.442695, %v2679_v43  ;;  %v3727_v43 = vmul.f32 %v5656_v0, %v10866_v29 }
 0x419   :  { %v8627_v30 = vmax.f32 %v10856_v25, %v8608_v12  ;;  %5675 = vrcp.f32 %v3360_v60  ;;  %v5658_v39 = vpop.eup %5657  ;;  %v3728_v25 = vmul.f32 %v5656_v0, %v10860_v27  ;;  %v10861_v12 = vld [vmem:[#allocation55_spill] sm:$0xff]  ;;  %v3043_v14 = vmul.f32 1.442695, %v2680_v35  ;;  %v10865_v45 = vld [vmem:[#allocation70_spill] sm:$0xff]  ;;  %v10870_v35 = vld [vmem:[#allocation77_spill] sm:$0xff] }
 0x41a   :  { %v3725_v44 = vmul.f32 %v5656_v0, %v10861_v12  ;;  %5677 = vpow2.f32 %v3035_v13  ;;  %v3730_v37 = vmul.f32 %v5658_v39, %v10862_v16  ;;  %v3732_v56 = vmul.f32 %v5658_v39, %v10863_v3  ;;  %v10869_v27 = vld [vmem:[#allocation75_spill] sm:$0xff]  ;;  %v8649_v3 = vpop.f32.mrf.mxu0 }
 0x41b   :  { %10857 = vst [vmem:[#allocation122_spill] sm:$0xff] %v8627_v30  ;;  %v8639_v60 = vpop.eup %5659  ;;  %5679 = vpow2.f32 %v3037_v5  ;;  %v3729_v61 = vmul.f32 %v5658_v39, %v10865_v45  ;;  %v3731_v31 = vmul.f32 %v5658_v39, %v10867_v10  ;;  %v10871_v16 = vld [vmem:[#allocation131_spill] sm:$0xff]  ;;  %10872 = vst [vmem:[#allocation35_spill] sm:$0xff] %v8649_v3 }
 0x41c   :  { %10864 = vst [vmem:[#allocation124_spill] sm:$0xff] %v8639_v60  ;;  %v2392_v48 = vpop.xlane.xlu1 %2391  ;;  %v8644_v38 = vpop.eup %5661  ;;  %5681 = vpow2.f32 %v3039_v23  ;;  %v3982_v45 = vpack.c.bf16 %v3730_v37, %v3726_v55  ;;  %v3984_v22 = vpack.c.bf16 %v3732_v56, %v3728_v25  ;;  %v10876_v56 = vld [vmem:[#allocation24_spill] sm:$0xff]  ;;  %v10934_v3 = vld [vmem:[#allocation151_spill] sm:$0xff] }
 0x41d   :  { %10868 = vst [vmem:[#allocation37_spill] sm:$0xff] %v8644_v38  ;;  %v2681_v13 = vsub.f32 %v10869_v27, %v2392_v48  ;;  %v2682_v12 = vsub.f32 %v10870_v35, %v2392_v48  ;;  %v2683_v24 = vsub.f32 %v10871_v16, %v2392_v48  ;;  %5683 = vpow2.f32 %v3041_v18  ;;  %v8652_v29 = vpop.eup %5663  ;;  %v10884_v55 = vld [vmem:[#allocation136_spill] sm:$0xff] }
 0x41e   :  { %v3365_v5 = vpop.xlane.xlu0 %3364  ;;  %v2684_v58 = vsub.f32 %v10873_v26, %v2392_v48  ;;  %10874 = vst [vmem:[#allocation125_spill] sm:$0xff] %v8652_v29  ;;  %5685 = vpow2.f32 %v3043_v14  ;;  %4173 = vmatprep.mubr.bf16.mxu1 %v3982_v45  ;;  %4462 = vmatprep.mubr.bf16.mxu0 %v3984_v22  ;;  %v3981_v35 = vpack.c.bf16 %v3729_v61, %v3725_v44  ;;  %v10878_v44 = vld [vmem:[#allocation178_spill] sm:$0xff] }
 0x41f   :  { %v3045_v10 = vmul.f32 1.442695, %v2681_v13  ;;  %v3047_v0 = vmul.f32 1.442695, %v2682_v12  ;;  %v5666_v39 = vpop.eup %5665  ;;  %v3049_v27 = vmul.f32 1.442695, %v2683_v24  ;;  %v3983_v16 = vpack.c.bf16 %v3731_v31, %v3727_v43 }
 0x420   :  { %v3461_v18 = vadd.f32 %v8644_v38, %v8639_v60  ;;  %v8658_v26 = vpop.eup %5667  ;;  %5687 = vrcp.f32 %v3365_v5  ;;  %v3051_v14 = vmul.f32 1.442695, %v2684_v58  ;;  %v8663_v25 = vmul.f32 %v5666_v39, %v10876_v56  ;;  %4174 = vmatmul.mubr.bf16.vlgmr.msra.gmra.mxu1 %v3981_v35  ;;  %v10879_v43 = vld [vmem:[#allocation58_spill] sm:$0xff]  ;;  %v10881_v58 = vld [vmem:[#allocation79_spill] sm:$0xff]  ;;  %v10882_v5 = vld [vmem:[#allocation81_spill] sm:$0xff] }
 0x421   :  { %10875 = vst [vmem:[#allocation127_spill] sm:$0xff] %v8658_v26  ;;  %5689 = vpow2.f32 %v3045_v10  ;;  %4463 = vmatmul.mubr.bf16.vlgmr.msra.gmra.mxu0 %v3983_v16  ;;  %v3736_v48 = vmul.f32 %v5666_v39, %v10878_v44  ;;  %v8670_v31 = vmul.f32 %v5666_v39, %v10879_v43  ;;  %v10883_v56 = vld [vmem:[#allocation134_spill] sm:$0xff] }
 0x422   :  { %v8665_v37 = vpop.eup %5669  ;;  %v3370_v24 = vpop.xlane.xlu1 %3369  ;;  %v3462_v61 = vadd.f32 %v8652_v29, %v3461_v18  ;;  %5691 = vpow2.f32 %v3047_v0 }
 0x423   :  { %10877 = vst [vmem:[#allocation71_spill] sm:$0xff] %v8665_v37  ;;  %v2397_v22 = vpop.xlane.xlu0 %2396  ;;  %v8672_v13 = vpop.eup %5671  ;;  %5693 = vpow2.f32 %v3049_v27 }
 0x424   :  { %10880 = vst [vmem:[#allocation73_spill] sm:$0xff] %v8672_v13  ;;  %v2685_v12 = vsub.f32 %v10881_v58, %v2397_v22  ;;  %v2686_v45 = vsub.f32 %v10882_v5, %v2397_v22  ;;  %v2687_v10 = vsub.f32 %v10883_v56, %v2397_v22  ;;  %v2688_v35 = vsub.f32 %v10884_v55, %v2397_v22  ;;  %v8681_v44 = vpop.eup %5673  ;;  %v10886_v56 = vld [vmem:[#allocation176_spill] sm:$0xff] }
 0x425   :  { %v3463_v16 = vadd.f32 %v8658_v26, %v3462_v61  ;;  %v3466_v18 = vadd.f32 %v8672_v13, %v8665_v37  ;;  %10885 = vst [vmem:[#allocation128_spill] sm:$0xff] %v8681_v44  ;;  %5695 = vrcp.f32 %v3370_v24  ;;  %v3735_v27 = vmul.f32 %v5666_v39, %v10886_v56  ;;  %v10887_v61 = vld [vmem:[#allocation83_spill] sm:$0xff]  ;;  %v10888_v37 = vld [vmem:[#allocation85_spill] sm:$0xff] }
 0x426   :  { %v3053_v43 = vmul.f32 1.442695, %v2685_v12  ;;  %v3055_v23 = vmul.f32 1.442695, %v2686_v45  ;;  %v3057_v0 = vmul.f32 1.442695, %v2687_v10  ;;  %v5676_v29 = vpop.eup %5675  ;;  %5697 = vpow2.f32 %v3051_v14 }
 0x427   :  { %v3059_v58 = vmul.f32 1.442695, %v2688_v35  ;;  %3464 = vadd.xlane.f32.xlu0 %v3463_v16  ;;  %v3467_v55 = vadd.f32 %v8681_v44, %v3466_v18  ;;  %v3375_v22 = vpop.xlane.xlu0 %3374  ;;  %v10889_v26 = vld [vmem:[#allocation137_spill] sm:$0xff]  ;;  %v8688_v12 = vpop.eup %5677  ;;  %v10891_v45 = vld [vmem:[#allocation139_spill] sm:$0xff]  ;;  %v10892_v10 = vld [vmem:[#allocation26_spill] sm:$0xff] }
 0x428   :  { %v2402_v5 = vpop.xlane.xlu1 %2401  ;;  %5699 = vpow2.f32 %v3053_v43  ;;  %10890 = vst [vmem:[#allocation130_spill] sm:$0xff] %v8688_v12  ;;  %v3738_v35 = vmul.f32 %v5676_v29, %v10892_v10  ;;  %v10893_v16 = vld [vmem:[#allocation181_spill] sm:$0xff]  ;;  %v8693_v39 = vpop.eup %5679 }
 0x429   :  { %v2689_v60 = vsub.f32 %v10887_v61, %v2402_v5  ;;  %v2690_v13 = vsub.f32 %v10888_v37, %v2402_v5  ;;  %v2691_v24 = vsub.f32 %v10889_v26, %v2402_v5  ;;  %5701 = vpow2.f32 %v3055_v23  ;;  %10894 = vst [vmem:[#allocation19_spill] sm:$0xff] %v8693_v39  ;;  %v8695_v61 = vpop.eup %5681 }
 0x42a   :  { %v2692_v14 = vsub.f32 %v10891_v45, %v2402_v5  ;;  %v3740_v38 = vmul.f32 %v5676_v29, %v10893_v16  ;;  %5703 = vpow2.f32 %v3057_v0  ;;  %10895 = vst [vmem:[#allocation172_spill] sm:$0xff] %v8695_v61  ;;  %v3986_v44 = vpack.c.bf16 %v3738_v35, %v8663_v25  ;;  %v8701_v45 = vpop.eup %5683  ;;  %v10898_v0 = vld [vmem:[#allocation68_spill] sm:$0xff] }
 0x42b   :  { %v3061_v18 = vmul.f32 1.442695, %v2689_v60  ;;  %v3063_v43 = vmul.f32 1.442695, %v2690_v13  ;;  %v3065_v56 = vmul.f32 1.442695, %v2691_v24  ;;  %5705 = vpow2.f32 %v3059_v58  ;;  %v8706_v58 = vpop.eup %5685 }
 0x42c   :  { %v3067_v37 = vmul.f32 1.442695, %v2692_v14  ;;  %v3380_v26 = vpop.xlane.xlu1 %3379  ;;  %v3988_v23 = vpack.c.bf16 %v3740_v38, %v3736_v48  ;;  %v10896_v5 = vmax.f32 %v8543_v2, %v8147_v15  ;;  %10897 = vst [vmem:[#allocation55_spill] sm:$0xff] %v8701_v45  ;;  %5707 = vrcp.f32 %v3375_v22  ;;  %v10899_v13 = vld [vmem:[#allocation179_spill] sm:$0xff]  ;;  %10900 = vst [vmem:[#allocation22_spill] sm:$0xff] %v8706_v58  ;;  %v10902_v38 = vld [vmem:[#allocation89_spill] sm:$0xff]  ;;  %4181 = vmatprep.mubr.bf16.mxu1 %v3986_v44 }
 0x42d   :  { %v3737_v60 = vmul.f32 %v5676_v29, %v10898_v0  ;;  %v3739_v24 = vmul.f32 %v5676_v29, %v10899_v13  ;;  %v3468_v16 = vadd.f32 %v8688_v12, %v3467_v55  ;;  %5709 = vpow2.f32 %v3061_v18  ;;  %v10901_v14 = vld [vmem:[#allocation87_spill] sm:$0xff]  ;;  %v10903_v35 = vld [vmem:[#allocation140_spill] sm:$0xff]  ;;  %v10904_v22 = vld [vmem:[#allocation142_spill] sm:$0xff]  ;;  %v8713_v29 = vpop.eup %5687 }
 0x42e   :  { %2496 = vmax.xlane.f32.xlu0 %v10896_v5  ;;  %v2407_v10 = vpop.xlane.xlu0 %2406  ;;  %4470 = vmatprep.mubr.bf16.mxu0 %v3988_v23  ;;  %5711 = vpow2.f32 %v3063_v43  ;;  %v8715_v12 = vpop.eup %5689  ;;  %v10906_v43 = vld [vmem:[#allocation91_spill] sm:$0xff] }
 0x42f   :  { %v2693_v25 = vsub.f32 %v10901_v14, %v2407_v10  ;;  %v2694_v48 = vsub.f32 %v10902_v38, %v2407_v10  ;;  %v2695_v2 = vsub.f32 %v10903_v35, %v2407_v10  ;;  %v2696_v5 = vsub.f32 %v10904_v22, %v2407_v10  ;;  %3469 = vadd.xlane.f32.xlu1 %v3468_v16  ;;  %v10907_v10 = vld [vmem:[#allocation93_spill] sm:$0xff] }
 0x430   :  { %v3985_v0 = vpack.c.bf16 %v3737_v60, %v8670_v31  ;;  %v3987_v53 = vpack.c.bf16 %v3739_v24, %v3735_v27  ;;  %5713 = vpow2.f32 %v3065_v56  ;;  %v2412_v14 = vpop.xlane.xlu1 %2411  ;;  %10905 = vst [vmem:[#allocation175_spill] sm:$0xff] %v8715_v12  ;;  %v8719_v27 = vpop.eup %5691  ;;  %v10909_v60 = vld [vmem:[#allocation143_spill] sm:$0xff]  ;;  %v10910_v24 = vld [vmem:[#allocation145_spill] sm:$0xff]  ;;  %v10912_v35 = vmax.f32 %v8549_v1, %v8208_v49 }
 0x431   :  { %v3069_v55 = vmul.f32 1.442695, %v2693_v25  ;;  %v3071_v18 = vmul.f32 1.442695, %v2694_v48  ;;  %v3073_v13 = vmul.f32 1.442695, %v2695_v2  ;;  %5715 = vpow2.f32 %v3067_v37  ;;  %v8725_v48 = vpop.eup %5693 }
 0x432   :  { %v3075_v38 = vmul.f32 1.442695, %v2696_v5  ;;  %4182 = vmatmul.mubr.bf16.gmra.mxu1 %v3985_v0  ;;  %4471 = vmatmul.mubr.bf16.gmra.mxu0 %v3987_v53  ;;  %v3385_v44 = vpop.xlane.xlu0 %3384  ;;  %v2697_v23 = vsub.f32 %v10906_v43, %v2412_v14  ;;  %v2698_v31 = vsub.f32 %v10907_v10, %v2412_v14  ;;  %10908 = vst [vmem:[#allocation70_spill] sm:$0xff] %v8719_v27  ;;  %5717 = vrcp.f32 %v3380_v26  ;;  %v10913_v2 = vld [vmem:[#allocation34_spill] sm:$0xff]  ;;  %v5696_v26 = vpop.eup %5695 }
 0x433   :  { %v2699_v56 = vsub.f32 %v10909_v60, %v2412_v14  ;;  %v2700_v16 = vsub.f32 %v10910_v24, %v2412_v14  ;;  %v3471_v25 = vadd.f32 %v8695_v61, %v8693_v39  ;;  %10911 = vst [vmem:[#allocation170_spill] sm:$0xff] %v8725_v48  ;;  %5719 = vpow2.f32 %v3069_v55  ;;  %2501 = vmax.xlane.f32.xlu1 %v10912_v35  ;;  %v8733_v10 = vpop.eup %5697  ;;  %v10916_v60 = vld [vmem:[#allocation183_spill] sm:$0xff]  ;;  %v10917_v24 = vld [vmem:[#allocation185_spill] sm:$0xff]  ;;  %v10921_v61 = vld [vmem:[#allocation146_spill] sm:$0xff] }
 0x434   :  { %v3077_v37 = vmul.f32 1.442695, %v2697_v23  ;;  %v3079_v53 = vmul.f32 1.442695, %v2698_v31  ;;  %v3742_v22 = vmul.f32 %v8713_v29, %v10913_v2  ;;  %5721 = vpow2.f32 %v3071_v18  ;;  %v3390_v14 = vpop.xlane.xlu1 %3389  ;;  %10914 = vst [vmem:[#allocation173_spill] sm:$0xff] %v8733_v10  ;;  %v10915_v23 = vld [vmem:[#allocation36_spill] sm:$0xff] }
 0x435   :  { %v3081_v5 = vmul.f32 1.442695, %v2699_v56  ;;  %v3083_v0 = vmul.f32 1.442695, %v2700_v16  ;;  %v3472_v43 = vadd.f32 %v8701_v45, %v3471_v25  ;;  %5723 = vpow2.f32 %v3073_v13  ;;  %v8739_v39 = vpop.eup %5699  ;;  %v10919_v18 = vld [vmem:[#allocation95_spill] sm:$0xff]  ;;  %v10920_v16 = vld [vmem:[#allocation97_spill] sm:$0xff] }
 0x436   :  { %v2417_v55 = vpop.xlane.xlu0 %2416  ;;  %v3746_v31 = vmul.f32 %v5696_v26, %v10915_v23  ;;  %v3744_v1 = vmul.f32 %v8713_v29, %v10916_v60  ;;  %v3748_v35 = vmul.f32 %v5696_v26, %v10917_v24  ;;  %10918 = vst [vmem:[#allocation75_spill] sm:$0xff] %v8739_v39  ;;  %5725 = vpow2.f32 %v3075_v38  ;;  %v8744_v45 = vpop.eup %5701  ;;  %v10923_v13 = vld [vmem:[#allocation148_spill] sm:$0xff] }
 0x437   :  { %v2701_v56 = vsub.f32 %v10919_v18, %v2417_v55  ;;  %v2702_v2 = vsub.f32 %v10920_v16, %v2417_v55  ;;  %v2703_v25 = vsub.f32 %v10921_v61, %v2417_v55  ;;  %10922 = vst [vmem:[#allocation77_spill] sm:$0xff] %v8744_v45  ;;  %5727 = vrcp.f32 %v3385_v44  ;;  %v8748_v60 = vpop.eup %5703  ;;  %v10926_v44 = vld [vmem:[#allocation40_spill] sm:$0xff] }
 0x438   :  { %v2704_v49 = vsub.f32 %v10923_v13, %v2417_v55  ;;  %v3473_v23 = vadd.f32 %v8706_v58, %v3472_v43  ;;  %v3990_v15 = vpack.c.bf16 %v3746_v31, %v3742_v22  ;;  %10924 = vst [vmem:[#allocation131_spill] sm:$0xff] %v8748_v60  ;;  %5729 = vpow2.f32 %v3077_v37  ;;  %v8750_v18 = vpop.eup %5705  ;;  %v10927_v22 = vld [vmem:[#allocation57_spill] sm:$0xff]  ;;  %v10928_v31 = vld [vmem:[#allocation32_spill] sm:$0xff] }
 0x439   :  { %v3085_v24 = vmul.f32 1.442695, %v2701_v56  ;;  %v3087_v20 = vmul.f32 1.442695, %v2702_v2  ;;  %v3089_v38 = vmul.f32 1.442695, %v2703_v25  ;;  %v2422_v40 = vpop.xlane.xlu1 %2421  ;;  %5731 = vpow2.f32 %v3079_v53  ;;  %v8754_v43 = vpop.eup %5707 }
 0x43a   :  { %10925 = vst [vmem:[#allocation133_spill] sm:$0xff] %v8750_v18  ;;  %v3091_v16 = vmul.f32 1.442695, %v2704_v49  ;;  %3474 = vadd.xlane.f32.xlu0 %v3473_v23  ;;  %4189 = vmatprep.mubr.bf16.mxu1 %v3990_v15  ;;  %v3992_v61 = vpack.c.bf16 %v3748_v35, %v3744_v1  ;;  %v3741_v55 = vmul.f32 %v8713_v29, %v10926_v44  ;;  %v3395_v13 = vpop.xlane.xlu0 %3394  ;;  %5733 = vpow2.f32 %v3081_v5  ;;  %v10929_v2 = vld [vmem:[#allocation38_spill] sm:$0xff]  ;;  %v8760_v58 = vpop.eup %5709  ;;  %v10931_v15 = vld [vmem:[#allocation99_spill] sm:$0xff]  ;;  %v10932_v53 = vld [vmem:[#allocation101_spill] sm:$0xff] }
 0x43b   :  { %v3745_v37 = vmul.f32 %v5696_v26, %v10927_v22  ;;  %v3743_v56 = vmul.f32 %v8713_v29, %v10928_v31  ;;  %v3747_v25 = vmul.f32 %v5696_v26, %v10929_v2  ;;  %10930 = vst [vmem:[#allocation24_spill] sm:$0xff] %v8760_v58  ;;  %5735 = vpow2.f32 %v3083_v0  ;;  %v10933_v35 = vld [vmem:[#allocation149_spill] sm:$0xff]  ;;  %v8765_v44 = vpop.eup %5711 }
 0x43c   :  { %4478 = vmatprep.mubr.bf16.mxu0 %v3992_v61  ;;  %v2705_v49 = vsub.f32 %v10931_v15, %v2422_v40  ;;  %v2706_v1 = vsub.f32 %v10932_v53, %v2422_v40  ;;  %v2707_v23 = vsub.f32 %v10933_v35, %v2422_v40  ;;  %5737 = vrcp.f32 %v3390_v14 }
 0x43d   :  { %v3989_v5 = vpack.c.bf16 %v3745_v37, %v3741_v55  ;;  %v3991_v22 = vpack.c.bf16 %v3747_v25, %v3743_v56  ;;  %v2708_v30 = vsub.f32 %v10934_v3, %v2422_v40  ;;  %v3400_v29 = vpop.xlane.xlu1 %3399  ;;  %v8768_v31 = vpop.eup %5713  ;;  %5739 = vpow2.f32 %v3085_v24  ;;  %v10937_v3 = vld [vmem:[#allocation103_spill] sm:$0xff]  ;;  %v10938_v37 = vld [vmem:[#allocation105_spill] sm:$0xff]  ;;  %v10939_v25 = vld [vmem:[#allocation152_spill] sm:$0xff] }
 0x43e   :  { %10935 = vst [vmem:[#allocation178_spill] sm:$0xff] %v8768_v31  ;;  %v3093_v26 = vmul.f32 1.442695, %v2705_v49  ;;  %v3095_v0 = vmul.f32 1.442695, %v2706_v1  ;;  %v10936_v2 = vmax.f32 %v8552_v32, %v8260_v19  ;;  %v2427_v15 = vpop.xlane.xlu0 %2426  ;;  %v8773_v53 = vpop.eup %5715  ;;  %5741 = vpow2.f32 %v3087_v20  ;;  %v10940_v32 = vld [vmem:[#allocation154_spill] sm:$0xff] }
 0x43f   :  { %v3097_v61 = vmul.f32 1.442695, %v2707_v23  ;;  %4190 = vmatmul.mubr.bf16.gmra.mxu1 %v3989_v5  ;;  %4479 = vmatmul.mubr.bf16.gmra.mxu0 %v3991_v22  ;;  %v3099_v14 = vmul.f32 1.442695, %v2708_v30  ;;  %v3476_v40 = vadd.f32 %v8719_v27, %v8715_v12  ;;  %v2709_v55 = vsub.f32 %v10937_v3, %v2427_v15  ;;  %v5718_v24 = vpop.eup %5717 }
 0x440   :  { %2506 = vmax.xlane.f32.xlu0 %v10936_v2  ;;  %5743 = vpow2.f32 %v3089_v38  ;;  %v2710_v56 = vsub.f32 %v10938_v37, %v2427_v15  ;;  %v2711_v49 = vsub.f32 %v10939_v25, %v2427_v15  ;;  %v2712_v1 = vsub.f32 %v10940_v32, %v2427_v15  ;;  %v8781_v35 = vpop.eup %5719 }
 0x441   :  { %10941 = vst [vmem:[#allocation58_spill] sm:$0xff] %v8781_v35  ;;  %5745 = vpow2.f32 %v3091_v16  ;;  %v3477_v20 = vadd.f32 %v8725_v48, %v3476_v40  ;;  %v3101_v23 = vmul.f32 1.442695, %v2709_v55  ;;  %v3481_v30 = vadd.f32 %v8744_v45, %v8739_v39  ;;  %v2432_v5 = vpop.xlane.xlu1 %2431  ;;  %v8786_v22 = vpop.eup %5721  ;;  %v10944_v40 = vld [vmem:[#allocation72_spill] sm:$0xff] }
 0x442   :  { %10942 = vst [vmem:[#allocation79_spill] sm:$0xff] %v8786_v22  ;;  %5747 = vrcp.f32 %v3395_v13  ;;  %v3103_v38 = vmul.f32 1.442695, %v2710_v56  ;;  %v3105_v2 = vmul.f32 1.442695, %v2711_v49  ;;  %v3405_v37 = vpop.xlane.xlu0 %3404  ;;  %v8788_v25 = vpop.eup %5723  ;;  %v3750_v55 = vmul.f32 %v8754_v43, %v10944_v40  ;;  %v10946_v39 = vld [vmem:[#allocation76_spill] sm:$0xff] }
 0x443   :  { %v3107_v3 = vmul.f32 1.442695, %v2712_v1  ;;  %10943 = vst [vmem:[#allocation81_spill] sm:$0xff] %v8788_v25  ;;  %5749 = vpow2.f32 %v3093_v26  ;;  %v3478_v15 = vadd.f32 %v8733_v10, %v3477_v20  ;;  %v3482_v16 = vadd.f32 %v8748_v60, %v3481_v30  ;;  %v8794_v32 = vpop.eup %5725  ;;  %v10947_v13 = vld [vmem:[#allocation187_spill] sm:$0xff]  ;;  %v10948_v49 = vld [vmem:[#allocation189_spill] sm:$0xff]  ;;  %v10952_v10 = vld [vmem:[#allocation74_spill] sm:$0xff] }
 0x444   :  { %10945 = vst [vmem:[#allocation134_spill] sm:$0xff] %v8794_v32  ;;  %5751 = vpow2.f32 %v3095_v0  ;;  %v3754_v45 = vmul.f32 %v5718_v24, %v10946_v39  ;;  %v3752_v56 = vmul.f32 %v8754_v43, %v10947_v13  ;;  %v3756_v1 = vmul.f32 %v5718_v24, %v10948_v49  ;;  %v8800_v48 = vpop.eup %5727  ;;  %v10949_v20 = vld [vmem:[#allocation69_spill] sm:$0xff] }
 0x445   :  { %5753 = vpow2.f32 %v3097_v61  ;;  %3479 = vadd.xlane.f32.xlu1 %v3478_v15  ;;  %v3483_v26 = vadd.f32 %v8750_v18, %v3482_v16  ;;  %v3749_v30 = vmul.f32 %v8754_v43, %v10949_v20  ;;  %v10950_v40 = vld [vmem:[#allocation49_spill] sm:$0xff]  ;;  %v8806_v12 = vpop.xlane.xlu1 %3409  ;;  %v8808_v0 = vpop.eup %5729  ;;  %v3751_v49 = vmul.f32 %v8754_v43, %v10952_v10  ;;  %v10953_v16 = vld [vmem:[#allocation78_spill] sm:$0xff]  ;;  %v10954_v18 = vld [vmem:[#allocation108_spill] sm:$0xff] }
 0x446   :  { %v3753_v60 = vmul.f32 %v5718_v24, %v10950_v40  ;;  %10951 = vst [vmem:[#allocation136_spill] sm:$0xff] %v8808_v0  ;;  %5755 = vpow2.f32 %v3099_v14  ;;  %v3994_v39 = vpack.c.bf16 %v3754_v45, %v3750_v55  ;;  %v3996_v13 = vpack.c.bf16 %v3756_v1, %v3752_v56  ;;  %v2437_v27 = vpop.xlane.xlu0 %2436  ;;  %v8812_v61 = vpop.eup %5731  ;;  %v10956_v45 = vld [vmem:[#allocation111_spill] sm:$0xff]  ;;  %v10958_v10 = vld [vmem:[#allocation157_spill] sm:$0xff] }
 0x447   :  { %5757 = vrcp.f32 %v3400_v29  ;;  %3484 = vadd.xlane.f32.xlu0 %v3483_v26  ;;  %v3755_v20 = vmul.f32 %v5718_v24, %v10953_v16  ;;  %v2713_v40 = vsub.f32 %v10954_v18, %v2432_v5  ;;  %v8816_v19 = vpop.eup %5733  ;;  %v2714_v14 = vsub.f32 %v10956_v45, %v2432_v5  ;;  %v10957_v55 = vld [vmem:[#allocation155_spill] sm:$0xff]  ;;  %v10965_v45 = vld [vmem:[#allocation158_spill] sm:$0xff] }
 0x448   :  { %v3993_v15 = vpack.c.bf16 %v3753_v60, %v3749_v30  ;;  %10955 = vst [vmem:[#allocation176_spill] sm:$0xff] %v8816_v19  ;;  %5759 = vpow2.f32 %v3101_v23  ;;  %4197 = vmatprep.mubr.bf16.mxu1 %v3994_v39  ;;  %4486 = vmatprep.mubr.bf16.mxu0 %v3996_v13  ;;  %v2715_v56 = vsub.f32 %v10957_v55, %v2432_v5  ;;  %v8821_v1 = vpop.eup %5735  ;;  %v10966_v55 = vld [vmem:[#allocation160_spill] sm:$0xff] }
 0x449   :  { %v2716_v43 = vsub.f32 %v10958_v10, %v2432_v5  ;;  %5761 = vpow2.f32 %v3103_v38  ;;  %v10959_v60 = vmax.f32 %v8555_v7, %v8322_v50  ;;  %v3995_v18 = vpack.c.bf16 %v3755_v20, %v3751_v49  ;;  %v5738_v26 = vpop.eup %5737  ;;  %v10963_v20 = vld [vmem:[#allocation117_spill] sm:$0xff] }
 0x44a   :  { %4198 = vmatmul.mubr.bf16.gmra.mxu1 %v3993_v15  ;;  %v3109_v29 = vmul.f32 1.442695, %v2713_v40  ;;  %v3486_v24 = vadd.f32 %v8765_v44, %v8760_v58  ;;  %5763 = vpow2.f32 %v3105_v2  ;;  %v3111_v30 = vmul.f32 1.442695, %v2714_v14  ;;  %v8830_v13 = vpop.xlane.xlu0 %3414  ;;  %v8832_v38 = vpop.eup %5739  ;;  %v10962_v15 = vld [vmem:[#allocation114_spill] sm:$0xff] }
 0x44b   :  { %2511 = vmax.xlane.f32.xlu1 %v10959_v60  ;;  %v8828_v23 = vpop.xlane.xlu1 %2441  ;;  %v3113_v39 = vmul.f32 1.442695, %v2715_v56  ;;  %v3115_v5 = vmul.f32 1.442695, %v2716_v43  ;;  %10960 = vst [vmem:[#allocation83_spill] sm:$0xff] %v8832_v38  ;;  %5765 = vpow2.f32 %v3107_v3  ;;  %4487 = vmatmul.mubr.bf16.gmra.mxu0 %v3995_v18  ;;  %v10961_v49 = vmax.f32 %v8559_v57, %v8370_v59  ;;  %v8840_v2 = vpop.eup %5741 }
 0x44c   :  { %v3487_v7 = vadd.f32 %v8768_v31, %v3486_v24  ;;  %v2717_v16 = vsub.f32 %v10962_v15, %v2437_v27  ;;  %v2718_v40 = vsub.f32 %v10963_v20, %v2437_v27  ;;  %10964 = vst [vmem:[#allocation85_spill] sm:$0xff] %v8840_v2  ;;  %5767 = vrcp.f32 %v3405_v37 }
 0x44d   :  { %2516 = vmax.xlane.f32.xlu0 %v10961_v49  ;;  %v2719_v14 = vsub.f32 %v10965_v45, %v2437_v27  ;;  %v2720_v56 = vsub.f32 %v10966_v55, %v2437_v27  ;;  %v3491_v3 = vadd.f32 %v8786_v22, %v8781_v35  ;;  %v8846_v10 = vpop.eup %5743  ;;  %5769 = vpow2.f32 %v3109_v29  ;;  %v10969_v27 = vld [vmem:[#allocation80_spill] sm:$0xff]  ;;  %v10970_v45 = vld [vmem:[#allocation47_spill] sm:$0xff]  ;;  %v10976_v35 = vld [vmem:[#allocation82_spill] sm:$0xff] }
 0x44e   :  { %10967 = vst [vmem:[#allocation137_spill] sm:$0xff] %v8846_v10  ;;  %v3488_v57 = vadd.f32 %v8773_v53, %v3487_v7  ;;  %v3117_v43 = vmul.f32 1.442695, %v2717_v16  ;;  %v3119_v60 = vmul.f32 1.442695, %v2718_v40  ;;  %v8849_v18 = vpop.eup %5745  ;;  %5771 = vpow2.f32 %v3111_v30  ;;  %v10971_v55 = vld [vmem:[#allocation191_spill] sm:$0xff]  ;;  %v2447_v40 = vpop.xlane.xlu0 %2446 }
 0x44f   :  { %10968 = vst [vmem:[#allocation139_spill] sm:$0xff] %v8849_v18  ;;  %v3121_v24 = vmul.f32 1.442695, %v2719_v14  ;;  %v3123_v49 = vmul.f32 1.442695, %v2720_v56  ;;  %v3492_v37 = vadd.f32 %v8788_v25, %v3491_v3  ;;  %v8852_v15 = vpop.eup %5747  ;;  %5773 = vpow2.f32 %v3113_v39  ;;  %v8859_v16 = vpop.xlane.xlu1 %3419  ;;  %v10973_v56 = vld [vmem:[#allocation193_spill] sm:$0xff] }
 0x450   :  { %3489 = vadd.xlane.f32.xlu1 %v3488_v57  ;;  %v3758_v20 = vmul.f32 %v8800_v48, %v10969_v27  ;;  %v3762_v29 = vmul.f32 %v5738_v26, %v10970_v45  ;;  %v3760_v7 = vmul.f32 %v8800_v48, %v10971_v55  ;;  %v8861_v30 = vpop.eup %5749  ;;  %5775 = vpow2.f32 %v3115_v5  ;;  %v10974_v39 = vld [vmem:[#allocation62_spill] sm:$0xff]  ;;  %v10975_v45 = vld [vmem:[#allocation51_spill] sm:$0xff] }
 0x451   :  { %10972 = vst [vmem:[#allocation26_spill] sm:$0xff] %v8861_v30  ;;  %v3493_v14 = vadd.f32 %v8794_v32, %v3492_v37  ;;  %v3764_v3 = vmul.f32 %v5738_v26, %v10973_v56  ;;  %v3757_v57 = vmul.f32 %v8800_v48, %v10974_v39  ;;  %v8867_v25 = vpop.eup %5751  ;;  %5777 = vrcp.f32 %v8806_v12  ;;  %v10978_v37 = vld [vmem:[#allocation84_spill] sm:$0xff] }
 0x452   :  { %v3998_v27 = vpack.c.bf16 %v3762_v29, %v3758_v20  ;;  %v3761_v55 = vmul.f32 %v5738_v26, %v10975_v45  ;;  %v3759_v22 = vmul.f32 %v8800_v48, %v10976_v35  ;;  %v8873_v31 = vpop.eup %5753  ;;  %5779 = vpow2.f32 %v3117_v43  ;;  %v10979_v32 = vld [vmem:[#allocation120_spill] sm:$0xff]  ;;  %v10981_v48 = vld [vmem:[#allocation123_spill] sm:$0xff]  ;;  %v10982_v43 = vld [vmem:[#allocation161_spill] sm:$0xff]  ;;  %v3425_v45 = vpop.xlane.xlu0 %3424 }
 0x453   :  { %10977 = vst [vmem:[#allocation181_spill] sm:$0xff] %v8873_v31  ;;  %3494 = vadd.xlane.f32.xlu0 %v3493_v14  ;;  %v4000_v5 = vpack.c.bf16 %v3764_v3, %v3760_v7  ;;  %v3763_v56 = vmul.f32 %v5738_v26, %v10978_v37  ;;  %v2721_v39 = vsub.f32 %v10979_v32, %v8828_v23  ;;  %v8878_v58 = vpop.eup %5755  ;;  %5781 = vpow2.f32 %v3119_v60  ;;  %v10983_v32 = vld [vmem:[#allocation163_spill] sm:$0xff] }
 0x454   :  { %v10980_v12 = vmax.f32 %v8564_v21, %v8410_v47  ;;  %4205 = vmatprep.mubr.bf16.mxu1 %v3998_v27  ;;  %v3997_v20 = vpack.c.bf16 %v3761_v55, %v3757_v57  ;;  %v2722_v35 = vsub.f32 %v10981_v48, %v8828_v23  ;;  %v2723_v29 = vsub.f32 %v10982_v43, %v8828_v23  ;;  %v5758_v7 = vpop.eup %5757  ;;  %v8893_v55 = vpop.xlane.xlu1 %2451 }
 0x455   :  { %5783 = vpow2.f32 %v3121_v24  ;;  %4494 = vmatprep.mubr.bf16.mxu0 %v4000_v5  ;;  %v3999_v26 = vpack.c.bf16 %v3763_v56, %v3759_v22  ;;  %v2724_v14 = vsub.f32 %v10983_v32, %v8828_v23  ;;  %v3125_v60 = vmul.f32 1.442695, %v2721_v39  ;;  %v8889_v3 = vpop.eup %5759  ;;  %v10987_v24 = vld [vmem:[#allocation126_spill] sm:$0xff]  ;;  %v10988_v5 = vld [vmem:[#allocation129_spill] sm:$0xff] }
 0x456   :  { %2521 = vmax.xlane.f32.xlu1 %v10980_v12  ;;  %10984 = vst [vmem:[#allocation68_spill] sm:$0xff] %v8889_v3  ;;  %5785 = vpow2.f32 %v3123_v49  ;;  %4206 = vmatmul.mubr.bf16.gmra.mxu1 %v3997_v20  ;;  %v3127_v21 = vmul.f32 1.442695, %v2722_v35  ;;  %v3129_v57 = vmul.f32 1.442695, %v2723_v29  ;;  %v3496_v27 = vadd.f32 %v8812_v61, %v8808_v0  ;;  %v8895_v37 = vpop.eup %5761  ;;  %v10990_v20 = vld [vmem:[#allocation164_spill] sm:$0xff] }
 0x457   :  { %10985 = vst [vmem:[#allocation179_spill] sm:$0xff] %v8895_v37  ;;  %4495 = vmatmul.mubr.bf16.gmra.mxu0 %v3999_v26  ;;  %5787 = vrcp.f32 %v8830_v13  ;;  %v3131_v22 = vmul.f32 1.442695, %v2724_v14  ;;  %v10986_v23 = vmax.f32 %v8567_v8, %v8446_v4  ;;  %v2725_v49 = vsub.f32 %v10987_v24, %v2447_v40  ;;  %v8903_v39 = vpop.eup %5763  ;;  %v10991_v35 = vld [vmem:[#allocation166_spill] sm:$0xff]  ;;  %v10994_v24 = vld [vmem:[#allocation65_spill] sm:$0xff] }
 0x458   :  { %v2726_v56 = vsub.f32 %v10988_v5, %v2447_v40  ;;  %10989 = vst [vmem:[#allocation87_spill] sm:$0xff] %v8903_v39  ;;  %5789 = vpow2.f32 %v3125_v60  ;;  %v3497_v12 = vadd.f32 %v8816_v19, %v3496_v27  ;;  %v2727_v48 = vsub.f32 %v10990_v20, %v2447_v40  ;;  %v8908_v29 = vpop.eup %5765  ;;  %v10997_v20 = vld [vmem:[#allocation43_spill] sm:$0xff]  ;;  %v11003_v19 = vld [vmem:[#allocation196_spill] sm:$0xff] }
 0x459   :  { %2526 = vmax.xlane.f32.xlu0 %v10986_v23  ;;  %v2728_v43 = vsub.f32 %v10991_v35, %v2447_v40  ;;  %10992 = vst [vmem:[#allocation89_spill] sm:$0xff] %v8908_v29  ;;  %5791 = vpow2.f32 %v3127_v21  ;;  %v3133_v13 = vmul.f32 1.442695, %v2725_v49  ;;  %v3501_v8 = vadd.f32 %v8840_v2, %v8832_v38  ;;  %v8912_v32 = vpop.eup %5767  ;;  %v10995_v49 = vld [vmem:[#allocation92_spill] sm:$0xff]  ;;  %v10998_v35 = vld [vmem:[#allocation63_spill] sm:$0xff] }
 0x45a   :  { %v3135_v26 = vmul.f32 1.442695, %v2726_v56  ;;  %5793 = vpow2.f32 %v3129_v57  ;;  %v3498_v14 = vadd.f32 %v8821_v1, %v3497_v12  ;;  %v3137_v60 = vmul.f32 1.442695, %v2727_v48  ;;  %v8915_v27 = vpop.eup %5769  ;;  %v10996_v57 = vld [vmem:[#allocation42_spill] sm:$0xff]  ;;  %v11000_v38 = vld [vmem:[#allocation44_spill] sm:$0xff] }
 0x45b   :  { %v3139_v23 = vmul.f32 1.442695, %v2728_v43  ;;  %10993 = vst [vmem:[#allocation140_spill] sm:$0xff] %v8915_v27  ;;  %5795 = vpow2.f32 %v3131_v22  ;;  %v3502_v40 = vadd.f32 %v8846_v10, %v3501_v8  ;;  %v3766_v21 = vmul.f32 %v8852_v15, %v10994_v24  ;;  %v8921_v56 = vpop.eup %5771  ;;  %v3430_v43 = vpop.xlane.xlu1 %3429 }
 0x45c   :  { %v3770_v5 = vmul.f32 %v5758_v7, %v10995_v49  ;;  %3499 = vadd.xlane.f32.xlu1 %v3498_v14  ;;  %5797 = vrcp.f32 %v8859_v16  ;;  %v3768_v12 = vmul.f32 %v8852_v15, %v10996_v57  ;;  %v3772_v48 = vmul.f32 %v5758_v7, %v10997_v20  ;;  %v2457_v8 = vpop.xlane.xlu0 %2456  ;;  %v8929_v10 = vpop.eup %5773  ;;  %v11002_v57 = vld [vmem:[#allocation90_spill] sm:$0xff] }
 0x45d   :  { %v3765_v22 = vmul.f32 %v8852_v15, %v10998_v35  ;;  %10999 = vst [vmem:[#allocation142_spill] sm:$0xff] %v8929_v10  ;;  %5799 = vpow2.f32 %v3133_v13  ;;  %v3503_v24 = vadd.f32 %v8849_v18, %v3502_v40  ;;  %v3769_v14 = vmul.f32 %v5758_v7, %v11000_v38  ;;  %v8933_v2 = vpop.eup %5775  ;;  %v11004_v40 = vld [vmem:[#allocation132_spill] sm:$0xff]  ;;  %v11005_v38 = vld [vmem:[#allocation135_spill] sm:$0xff] }
 0x45e   :  { %v4002_v49 = vpack.c.bf16 %v3770_v5, %v3766_v21  ;;  %11001 = vst [vmem:[#allocation91_spill] sm:$0xff] %v8933_v2  ;;  %5801 = vpow2.f32 %v3135_v26  ;;  %v4004_v16 = vpack.c.bf16 %v3772_v48, %v3768_v12  ;;  %v3767_v20 = vmul.f32 %v8852_v15, %v11002_v57  ;;  %v8938_v35 = vpop.eup %5777 }
 0x45f   :  { %v3771_v0 = vmul.f32 %v5758_v7, %v11003_v19  ;;  %5803 = vpow2.f32 %v3137_v60  ;;  %3504 = vadd.xlane.f32.xlu0 %v3503_v24  ;;  %v4001_v13 = vpack.c.bf16 %v3769_v14, %v3765_v22  ;;  %v2729_v21 = vsub.f32 %v11004_v40, %v8893_v55  ;;  %v8944_v18 = vpop.eup %5779  ;;  %v11008_v7 = vld [vmem:[#allocation15_spill] sm:$0xff]  ;;  %v11009_v60 = vld [vmem:[#allocation168_spill] sm:$0xff]  ;;  %v11012_v14 = vld [vmem:[#allocation138_spill] sm:$0xff] }
 0x460   :  { %4213 = vmatprep.mubr.bf16.mxu1 %v4002_v49  ;;  %v2730_v5 = vsub.f32 %v11005_v38, %v8893_v55  ;;  %11006 = vst [vmem:[#allocation93_spill] sm:$0xff] %v8944_v18  ;;  %5805 = vpow2.f32 %v3139_v23  ;;  %v11007_v15 = vmax.f32 %v8573_v62, %v8467_v28  ;;  %4502 = vmatprep.mubr.bf16.mxu0 %v4004_v16  ;;  %v8953_v48 = vpop.eup %5781  ;;  %v3435_v57 = vpop.xlane.xlu0 %3434  ;;  %v11015_v40 = vld [vmem:[#allocation141_spill] sm:$0xff]  ;;  %v11016_v38 = vld [vmem:[#allocation54_spill] sm:$0xff] }
 0x461   :  { %v4003_v19 = vpack.c.bf16 %v3771_v0, %v3767_v20  ;;  %v2731_v26 = vsub.f32 %v11008_v7, %v8893_v55  ;;  %v2732_v12 = vsub.f32 %v11009_v60, %v8893_v55  ;;  %11010 = vst [vmem:[#allocation143_spill] sm:$0xff] %v8953_v48  ;;  %4214 = vmatmul.mubr.bf16.gmra.mxu1 %v4001_v13  ;;  %5807 = vrcp.f32 %v3425_v45  ;;  %v8960_v20 = vpop.xlane.xlu1 %2461 }
 0x462   :  { %2531 = vmax.xlane.f32.xlu1 %v11007_v15  ;;  %v3141_v22 = vmul.f32 1.442695, %v2729_v21  ;;  %v3143_v24 = vmul.f32 1.442695, %v2730_v5  ;;  %v3506_v23 = vadd.f32 %v8867_v25, %v8861_v30  ;;  %v8957_v49 = vpop.eup %5783  ;;  %5809 = vrcp.f32 %v3430_v43  ;;  %v11017_v43 = vld [vmem:[#allocation171_spill] sm:$0xff] }
 0x463   :  { %11011 = vst [vmem:[#allocation145_spill] sm:$0xff] %v8957_v49  ;;  %4503 = vmatmul.mubr.bf16.gmra.mxu0 %v4003_v19  ;;  %v3145_v62 = vmul.f32 1.442695, %v2731_v26  ;;  %v3147_v0 = vmul.f32 1.442695, %v2732_v12  ;;  %v2733_v16 = vsub.f32 %v11012_v14, %v2457_v8  ;;  %v8962_v55 = vpop.eup %5785  ;;  %v11014_v13 = vmax.f32 %v8576_v17, %v8476_v54 }
 0x464   :  { %11013 = vst [vmem:[#allocation34_spill] sm:$0xff] %v8962_v55  ;;  %5811 = vpow2.f32 %v3141_v22  ;;  %v3507_v45 = vadd.f32 %v8873_v31, %v3506_v23  ;;  %v2734_v21 = vsub.f32 %v11015_v40, %v2457_v8  ;;  %v2735_v5 = vsub.f32 %v11016_v38, %v2457_v8  ;;  %v8970_v15 = vpop.eup %5787  ;;  %v11022_v40 = vld [vmem:[#allocation200_spill] sm:$0xff]  ;;  %v11023_v38 = vld [vmem:[#allocation46_spill] sm:$0xff] }
 0x465   :  { %2536 = vmax.xlane.f32.xlu0 %v11014_v13  ;;  %5813 = vpow2.f32 %v3143_v24  ;;  %v2736_v19 = vsub.f32 %v11017_v43, %v2457_v8  ;;  %v3149_v7 = vmul.f32 1.442695, %v2733_v16  ;;  %v3511_v26 = vadd.f32 %v8895_v37, %v8889_v3  ;;  %v8975_v60 = vpop.eup %5789  ;;  %v11020_v24 = vld [vmem:[#allocation96_spill] sm:$0xff]  ;;  %v11028_v37 = vld [vmem:[#allocation198_spill] sm:$0xff] }
 0x466   :  { %11018 = vst [vmem:[#allocation36_spill] sm:$0xff] %v8975_v60  ;;  %5815 = vpow2.f32 %v3145_v62  ;;  %v3508_v12 = vadd.f32 %v8878_v58, %v3507_v45  ;;  %v3151_v17 = vmul.f32 1.442695, %v2734_v21  ;;  %v3153_v22 = vmul.f32 1.442695, %v2735_v5  ;;  %v8978_v23 = vpop.eup %5791  ;;  %v11024_v21 = vld [vmem:[#allocation53_spill] sm:$0xff] }
 0x467   :  { %11019 = vst [vmem:[#allocation183_spill] sm:$0xff] %v8978_v23  ;;  %5817 = vpow2.f32 %v3147_v0  ;;  %v3155_v14 = vmul.f32 1.442695, %v2736_v19  ;;  %v3512_v13 = vadd.f32 %v8903_v39, %v3511_v26  ;;  %v3774_v8 = vmul.f32 %v8912_v32, %v11020_v24  ;;  %v8983_v16 = vpop.eup %5793  ;;  %v11026_v19 = vld [vmem:[#allocation45_spill] sm:$0xff]  ;;  %v11027_v24 = vld [vmem:[#allocation52_spill] sm:$0xff]  ;;  %v2467_v39 = vpop.xlane.xlu0 %2466 }
 0x468   :  { %11021 = vst [vmem:[#allocation185_spill] sm:$0xff] %v8983_v16  ;;  %3509 = vadd.xlane.f32.xlu1 %v3508_v12  ;;  %5819 = vpow2.f32 %v3149_v7  ;;  %v3778_v62 = vmul.f32 %v8938_v35, %v11022_v40  ;;  %v3776_v45 = vmul.f32 %v8912_v32, %v11023_v38  ;;  %v3780_v5 = vmul.f32 %v8938_v35, %v11024_v21  ;;  %v8991_v0 = vpop.eup %5795  ;;  %v3440_v12 = vpop.xlane.xlu1 %3439 }
 0x469   :  { %11025 = vst [vmem:[#allocation95_spill] sm:$0xff] %v8991_v0  ;;  %5821 = vpow2.f32 %v3151_v17  ;;  %v3513_v43 = vadd.f32 %v8908_v29, %v3512_v13  ;;  %v3773_v26 = vmul.f32 %v8912_v32, %v11026_v19  ;;  %v3777_v7 = vmul.f32 %v8938_v35, %v11027_v24  ;;  %v8998_v40 = vpop.eup %5797  ;;  %v11030_v13 = vld [vmem:[#allocation48_spill] sm:$0xff] }
 0x46a   :  { %5823 = vpow2.f32 %v3153_v22  ;;  %v4006_v38 = vpack.c.bf16 %v3778_v62, %v3774_v8  ;;  %v4008_v3 = vpack.c.bf16 %v3780_v5, %v3776_v45  ;;  %v3775_v21 = vmul.f32 %v8912_v32, %v11028_v37  ;;  %v9002_v31 = vpop.eup %5799  ;;  %v11031_v24 = vld [vmem:[#allocation144_spill] sm:$0xff]  ;;  %v11034_v37 = vld [vmem:[#allocation147_spill] sm:$0xff]  ;;  %v11036_v62 = vld [vmem:[#allocation174_spill] sm:$0xff] }
 0x46b   :  { %11029 = vst [vmem:[#allocation97_spill] sm:$0xff] %v9002_v31  ;;  %5825 = vpow2.f32 %v3155_v14  ;;  %3514 = vadd.xlane.f32.xlu0 %v3513_v43  ;;  %v4005_v17 = vpack.c.bf16 %v3777_v7, %v3773_v26  ;;  %v3779_v19 = vmul.f32 %v8938_v35, %v11030_v13  ;;  %v2737_v29 = vsub.f32 %v11031_v24, %v8960_v20  ;;  %v9008_v30 = vpop.eup %5801  ;;  %v11035_v14 = vld [vmem:[#allocation59_spill] sm:$0xff]  ;;  %v11039_v13 = vld [vmem:[#allocation150_spill] sm:$0xff] }
 0x46c   :  { %11032 = vst [vmem:[#allocation146_spill] sm:$0xff] %v9008_v30  ;;  %v11033_v22 = vmax.f32 %v8579_v33, %v8484_v36  ;;  %4221 = vmatprep.mubr.bf16.mxu1 %v4006_v38  ;;  %5827 = vrcp.f32 %v3435_v57  ;;  %v2738_v32 = vsub.f32 %v11034_v37, %v8960_v20  ;;  %v2739_v8 = vsub.f32 %v11035_v14, %v8960_v20  ;;  %v9019_v45 = vpop.eup %5803  ;;  %v2472_v37 = vpop.xlane.xlu1 %2471  ;;  %v11043_v14 = vld [vmem:[#allocation177_spill] sm:$0xff] }
 0x46d   :  { %v2740_v35 = vsub.f32 %v11036_v62, %v8960_v20  ;;  %11037 = vst [vmem:[#allocation148_spill] sm:$0xff] %v9019_v45  ;;  %4510 = vmatprep.mubr.bf16.mxu0 %v4008_v3  ;;  %4222 = vmatmul.mubr.bf16.gmra.mxu1 %v4005_v17  ;;  %v4007_v5 = vpack.c.bf16 %v3779_v19, %v3775_v21  ;;  %v3157_v43 = vmul.f32 1.442695, %v2737_v29  ;;  %5829 = vrcp.f32 %v3440_v12  ;;  %v9023_v57 = vpop.eup %5805  ;;  %v11041_v20 = vld [vmem:[#allocation153_spill] sm:$0xff]  ;;  %v11042_v12 = vld [vmem:[#allocation66_spill] sm:$0xff]  ;;  %v3445_v19 = vpop.xlane.xlu0 %3444 }
 0x46e   :  { %2541 = vmax.xlane.f32.xlu1 %v11033_v22  ;;  %v3516_v33 = vadd.f32 %v8921_v56, %v8915_v27  ;;  %11038 = vst [vmem:[#allocation40_spill] sm:$0xff] %v9023_v57  ;;  %v3159_v26 = vmul.f32 1.442695, %v2738_v32  ;;  %v3161_v7 = vmul.f32 1.442695, %v2739_v8  ;;  %v2741_v24 = vsub.f32 %v11039_v13, %v2467_v39  ;;  %v9026_v22 = vpop.eup %5807 }
 0x46f   :  { %v3163_v38 = vmul.f32 1.442695, %v2740_v35  ;;  %4511 = vmatmul.mubr.bf16.gmra.mxu0 %v4007_v5  ;;  %5831 = vpow2.f32 %v3157_v43  ;;  %v11040_v29 = vmax.f32 %v8582_v42, %v8492_v51  ;;  %v2742_v21 = vsub.f32 %v11041_v20, %v2467_v39  ;;  %v9034_v32 = vpop.eup %5809 }
 0x470   :  { %v3517_v3 = vadd.f32 %v8929_v10, %v3516_v33  ;;  %v2743_v17 = vsub.f32 %v11042_v12, %v2467_v39  ;;  %5833 = vpow2.f32 %v3159_v26  ;;  %v2744_v8 = vsub.f32 %v11043_v14, %v2467_v39  ;;  %v11045_v26 = vld [vmem:[#allocation102_spill] sm:$0xff]  ;;  %v11047_v12 = vld [vmem:[#allocation61_spill] sm:$0xff] }
 0x471   :  { %2546 = vmax.xlane.f32.xlu0 %v11040_v29  ;;  %v3165_v62 = vmul.f32 1.442695, %v2741_v24  ;;  %v3521_v35 = vadd.f32 %v8953_v48, %v8944_v18  ;;  %v9039_v5 = vpop.eup %5811  ;;  %5835 = vpow2.f32 %v3161_v7  ;;  %v3167_v43 = vmul.f32 1.442695, %v2742_v21  ;;  %v11048_v14 = vld [vmem:[#allocation106_spill] sm:$0xff]  ;;  %v11049_v21 = vld [vmem:[#allocation205_spill] sm:$0xff]  ;;  %v2477_v10 = vpop.xlane.xlu0 %2476 }
 0x472   :  { %11044 = vst [vmem:[#allocation57_spill] sm:$0xff] %v9039_v5  ;;  %v3518_v42 = vadd.f32 %v8933_v2, %v3517_v3  ;;  %v3169_v33 = vmul.f32 1.442695, %v2743_v17  ;;  %v9042_v13 = vpop.eup %5813  ;;  %5837 = vpow2.f32 %v3163_v38  ;;  %v3171_v29 = vmul.f32 1.442695, %v2744_v8 }
 0x473   :  { %v3522_v20 = vadd.f32 %v8957_v49, %v3521_v35  ;;  %v3782_v39 = vmul.f32 %v8970_v15, %v11045_v26  ;;  %v9047_v24 = vpop.eup %5815  ;;  %5839 = vpow2.f32 %v3165_v62  ;;  %v3786_v7 = vmul.f32 %v8998_v40, %v11047_v12  ;;  %v11050_v35 = vld [vmem:[#allocation202_spill] sm:$0xff]  ;;  %v11051_v49 = vld [vmem:[#allocation107_spill] sm:$0xff] }
 0x474   :  { %11046 = vst [vmem:[#allocation32_spill] sm:$0xff] %v9047_v24  ;;  %3519 = vadd.xlane.f32.xlu1 %v3518_v42  ;;  %v3784_v3 = vmul.f32 %v8970_v15, %v11048_v14  ;;  %v3788_v17 = vmul.f32 %v8998_v40, %v11049_v21  ;;  %v9055_v38 = vpop.eup %5817  ;;  %5841 = vpow2.f32 %v3167_v43  ;;  %v3781_v26 = vmul.f32 %v8970_v15, %v11050_v35  ;;  %v11053_v14 = vld [vmem:[#allocation104_spill] sm:$0xff]  ;;  %v3450_v21 = vpop.xlane.xlu1 %3449 }
 0x475   :  { %v3523_v8 = vadd.f32 %v8962_v55, %v3522_v20  ;;  %v3785_v62 = vmul.f32 %v8998_v40, %v11051_v49  ;;  %v9062_v42 = vpop.eup %5819  ;;  %5843 = vpow2.f32 %v3169_v33  ;;  %v4010_v12 = vpack.c.bf16 %v3786_v7, %v3782_v39  ;;  %v11055_v20 = vld [vmem:[#allocation18_spill] sm:$0xff]  ;;  %v11056_v55 = vld [vmem:[#allocation156_spill] sm:$0xff] }
 0x476   :  { %11052 = vst [vmem:[#allocation38_spill] sm:$0xff] %v9062_v42  ;;  %v4012_v18 = vpack.c.bf16 %v3788_v17, %v3784_v3  ;;  %v3783_v48 = vmul.f32 %v8970_v15, %v11053_v14  ;;  %v9066_v27 = vpop.eup %5821  ;;  %5845 = vpow2.f32 %v3171_v29  ;;  %v3787_v35 = vmul.f32 %v8998_v40, %v11055_v20  ;;  %v11059_v15 = vld [vmem:[#allocation159_spill] sm:$0xff]  ;;  %v11060_v7 = vld [vmem:[#allocation60_spill] sm:$0xff]  ;;  %v11064_v20 = vld [vmem:[#allocation162_spill] sm:$0xff] }
 0x477   :  { %11054 = vst [vmem:[#allocation99_spill] sm:$0xff] %v9066_v27  ;;  %3524 = vadd.xlane.f32.xlu0 %v3523_v8  ;;  %v4009_v43 = vpack.c.bf16 %v3785_v62, %v3781_v26  ;;  %v2745_v49 = vsub.f32 %v11056_v55, %v2472_v37  ;;  %v9071_v2 = vpop.eup %5823  ;;  %v11058_v33 = vmax.f32 %v8585_v63, %v8500_v52  ;;  %5847 = vrcp.f32 %v3445_v19  ;;  %v11061_v29 = vld [vmem:[#allocation180_spill] sm:$0xff]  ;;  %v9085_v62 = vpop.f32.mrf.mxu0 }
 0x478   :  { %11057 = vst [vmem:[#allocation101_spill] sm:$0xff] %v9071_v2  ;;  %4229 = vmatprep.mubr.bf16.mxu1 %v4010_v12  ;;  %v2746_v39 = vsub.f32 %v11059_v15, %v2472_v37  ;;  %v2747_v3 = vsub.f32 %v11060_v7, %v2472_v37  ;;  %v2748_v17 = vsub.f32 %v11061_v29, %v2472_v37  ;;  %v9079_v8 = vpop.eup %5825  ;;  %5849 = vrcp.f32 %v3450_v21  ;;  %v11066_v21 = vld [vmem:[#allocation165_spill] sm:$0xff]  ;;  %v11068_v15 = vld [vmem:[#allocation67_spill] sm:$0xff]  ;;  %v3455_v29 = vpop.xlane.xlu0 %3454 }
 0x479   :  { %2551 = vmax.xlane.f32.xlu1 %v11058_v33  ;;  %11062 = vst [vmem:[#allocation149_spill] sm:$0xff] %v9079_v8  ;;  %4518 = vmatprep.mubr.bf16.mxu0 %v4012_v18  ;;  %v4011_v40 = vpack.c.bf16 %v3787_v35, %v3783_v48  ;;  %v3173_v55 = vmul.f32 1.442695, %v2745_v49  ;;  %v3526_v26 = vadd.f32 %v8978_v23, %v8975_v60  ;;  %v9083_v63 = vpop.eup %5827  ;;  %11063 = vst [vmem:[#allocation151_spill] sm:$0xff] %v9085_v62  ;;  %v11067_v35 = vld [vmem:[#allocation41_spill] sm:$0xff]  ;;  %v11079_v23 = vld [vmem:[#allocation167_spill] sm:$0xff] }
 0x47a   :  { %4230 = vmatmul.mubr.bf16.gmra.mxu1 %v4009_v43  ;;  %v3175_v19 = vmul.f32 1.442695, %v2746_v39  ;;  %v3177_v12 = vmul.f32 1.442695, %v2747_v3  ;;  %v3179_v14 = vmul.f32 1.442695, %v2748_v17  ;;  %v2749_v33 = vsub.f32 %v11064_v20, %v2477_v10  ;;  %v9088_v37 = vpop.eup %5829 }
 0x47b   :  { %4519 = vmatmul.mubr.bf16.gmra.mxu0 %v4011_v40  ;;  %5851 = vpow2.f32 %v3173_v55  ;;  %v3527_v18 = vadd.f32 %v8983_v16, %v3526_v26  ;;  %v11065_v48 = vmax.f32 %v8570_v34, %v8534_v46  ;;  %v2750_v43 = vsub.f32 %v11066_v21, %v2477_v10 }
 0x47c   :  { %v2751_v49 = vsub.f32 %v11067_v35, %v2477_v10  ;;  %5853 = vpow2.f32 %v3175_v19  ;;  %v2752_v39 = vsub.f32 %v11068_v15, %v2477_v10  ;;  %v3181_v7 = vmul.f32 1.442695, %v2749_v33  ;;  %v9099_v17 = vpop.eup %5831  ;;  %v2482_v19 = vpop.xlane.xlu1 %2481  ;;  %v11070_v15 = vld [vmem:[#allocation110_spill] sm:$0xff] }
 0x47d   :  { %2556 = vmax.xlane.f32.xlu0 %v11065_v48  ;;  %v3531_v3 = vadd.f32 %v9008_v30, %v9002_v31  ;;  %v11069_v40 = vmax.f32 %v8502_v9, %v8516_v11  ;;  %5855 = vpow2.f32 %v3177_v12  ;;  %v3528_v55 = vadd.f32 %v8991_v0, %v3527_v18  ;;  %v9108_v20 = vpop.eup %5833  ;;  %v9110_v10 = vpop.f32.mrf.mxu0  ;;  %v11071_v12 = vld [vmem:[#allocation23_spill] sm:$0xff]  ;;  %v11077_v0 = vld [vmem:[#allocation112_spill] sm:$0xff] }
 0x47e   :  { %v3183_v26 = vmul.f32 1.442695, %v2750_v43  ;;  %5857 = vpow2.f32 %v3179_v14  ;;  %v3185_v33 = vmul.f32 1.442695, %v2751_v49  ;;  %v3187_v48 = vmul.f32 1.442695, %v2752_v39  ;;  %v9113_v35 = vpop.eup %5835 }
 0x47f   :  { %v9105_v34 = vmax.f32 %v11069_v40, %v9085_v62  ;;  %v3532_v21 = vadd.f32 %v9019_v45, %v3531_v3  ;;  %3529 = vadd.xlane.f32.xlu1 %v3528_v55  ;;  %v3790_v40 = vmul.f32 %v9026_v22, %v11070_v15  ;;  %v3794_v18 = vmul.f32 %v9034_v32, %v11071_v12  ;;  %v11072_v43 = vld [vmem:[#allocation21_spill] sm:$0xff]  ;;  %v11073_v30 = vld [vmem:[#allocation119_spill] sm:$0xff]  ;;  %v9123_v14 = vpop.eup %5837  ;;  %v2487_v62 = vpop.xlane.xlu0 %2486 }
 0x480   :  { %v3792_v31 = vmul.f32 %v9026_v22, %v11072_v43  ;;  %v3796_v16 = vmul.f32 %v9034_v32, %v11073_v30  ;;  %5859 = vpow2.f32 %v3181_v7  ;;  %v11074_v39 = vld [vmem:[#allocation109_spill] sm:$0xff]  ;;  %v9130_v45 = vpop.eup %5839 }
 0x481   :  { %v3533_v49 = vadd.f32 %v9023_v57, %v3532_v21  ;;  %v3789_v3 = vmul.f32 %v9026_v22, %v11074_v39  ;;  %v11075_v55 = vld [vmem:[#allocation113_spill] sm:$0xff]  ;;  %11076 = vst [vmem:[#allocation103_spill] sm:$0xff] %v9130_v45  ;;  %5861 = vpow2.f32 %v3183_v26  ;;  %v4014_v43 = vpack.c.bf16 %v3794_v18, %v3790_v40  ;;  %v9134_v30 = vpop.eup %5841  ;;  %v11078_v57 = vld [vmem:[#allocation208_spill] sm:$0xff]  ;;  %v11083_v40 = vld [vmem:[#allocation50_spill] sm:$0xff] }
 0x482   :  { %v3793_v15 = vmul.f32 %v9034_v32, %v11075_v55  ;;  %v4016_v60 = vpack.c.bf16 %v3796_v16, %v3792_v31  ;;  %v3791_v21 = vmul.f32 %v9026_v22, %v11077_v0  ;;  %v3795_v39 = vmul.f32 %v9034_v32, %v11078_v57  ;;  %v9141_v11 = vpop.eup %5843  ;;  %v11082_v31 = vld [vmem:[#allocation169_spill] sm:$0xff]  ;;  %v3460_v22 = vpop.xlane.xlu1 %3459 }
 0x483   :  { %3534 = vadd.xlane.f32.xlu0 %v3533_v49  ;;  %v2753_v55 = vsub.f32 %v11079_v23, %v2482_v19  ;;  %11080 = vst [vmem:[#allocation105_spill] sm:$0xff] %v9141_v11  ;;  %5863 = vpow2.f32 %v3185_v33  ;;  %v11081_v26 = vmax.f32 %v8588_v6, %v8590_v41  ;;  %4237 = vmatprep.mubr.bf16.mxu1 %v4014_v43  ;;  %v11084_v49 = vld [vmem:[#allocation39_spill] sm:$0xff]  ;;  %v11085_v43 = vld [vmem:[#allocation20_spill] sm:$0xff] }
 0x484   :  { %v4013_v7 = vpack.c.bf16 %v3793_v15, %v3789_v3  ;;  %v2754_v16 = vsub.f32 %v11082_v31, %v2482_v19  ;;  %v2755_v18 = vsub.f32 %v11083_v40, %v2482_v19  ;;  %v2756_v0 = vsub.f32 %v11084_v49, %v2482_v19  ;;  %v9149_v3 = vpop.eup %5845  ;;  %4526 = vmatprep.mubr.bf16.mxu0 %v4016_v60  ;;  %v11087_v60 = vld [vmem:[#allocation35_spill] sm:$0xff] }
 0x485   :  { %2561 = vmax.xlane.f32.xlu1 %v11081_v26  ;;  %5865 = vpow2.f32 %v3187_v48  ;;  %v4015_v23 = vpack.c.bf16 %v3795_v39, %v3791_v21  ;;  %v3189_v57 = vmul.f32 1.442695, %v2753_v55  ;;  %v3536_v32 = vadd.f32 %v9042_v13, %v9039_v5  ;;  %v9153_v6 = vpop.eup %5847  ;;  %v11086_v48 = vld [vmem:[#allocation122_spill] sm:$0xff]  ;;  %v11089_v21 = vld [vmem:[#allocation28_spill] sm:$0xff] }
 0x486   :  { %4238 = vmatmul.mubr.bf16.gmra.mxu1 %v4013_v7  ;;  %5867 = vrcp.f32 %v3455_v29  ;;  %v3191_v33 = vmul.f32 1.442695, %v2754_v16  ;;  %v3193_v15 = vmul.f32 1.442695, %v2755_v18  ;;  %v2757_v26 = vsub.f32 %v11085_v43, %v2487_v62  ;;  %v9156_v31 = vpop.eup %5849  ;;  %v11090_v55 = vld [vmem:[#allocation64_spill] sm:$0xff] }
 0x487   :  { %4527 = vmatmul.mubr.bf16.gmra.mxu0 %v4015_v23  ;;  %v3537_v19 = vadd.f32 %v9047_v24, %v3536_v32  ;;  %v11088_v7 = vmax.f32 %v11086_v48, %v11087_v60  ;;  %5869 = vrcp.f32 %v3460_v22  ;;  %v2758_v39 = vsub.f32 %v11089_v21, %v2487_v62  ;;  %v11091_v32 = vld [vmem:[#allocation192_spill] sm:$0xff] }
 0x488   :  { %v2759_v40 = vsub.f32 %v11090_v55, %v2487_v62  ;;  %5871 = vpow2.f32 %v3189_v57  ;;  %v3195_v29 = vmul.f32 1.442695, %v2756_v0  ;;  %v3197_v16 = vmul.f32 1.442695, %v2757_v26  ;;  %v9166_v49 = vpop.eup %5851  ;;  %v11092_v57 = vld [vmem:[#allocation116_spill] sm:$0xff]  ;;  %v11094_v55 = vld [vmem:[#allocation31_spill] sm:$0xff] }
 0x489   :  { %2566 = vmax.xlane.f32.xlu0 %v11088_v7  ;;  %v3541_v18 = vadd.f32 %v9066_v27, %v9062_v42  ;;  %5873 = vpow2.f32 %v3191_v33  ;;  %v3538_v23 = vadd.f32 %v9055_v38, %v3537_v19  ;;  %v2760_v43 = vsub.f32 %v11091_v32, %v2487_v62  ;;  %v9170_v7 = vpop.eup %5853  ;;  %v11095_v19 = vld [vmem:[#allocation215_spill] sm:$0xff]  ;;  %v11100_v27 = vld [vmem:[#allocation118_spill] sm:$0xff] }
 0x48a   :  { %v3199_v48 = vmul.f32 1.442695, %v2758_v39  ;;  %5875 = vpow2.f32 %v3193_v15  ;;  %v3201_v22 = vmul.f32 1.442695, %v2759_v40  ;;  %v3798_v0 = vmul.f32 %v9083_v63, %v11092_v57  ;;  %v9175_v26 = vpop.eup %5855  ;;  %v11096_v39 = vld [vmem:[#allocation219_spill] sm:$0xff]  ;;  %v2492_v15 = vpop.xlane.xlu1 %2491 }
 0x48b   :  { %v3542_v21 = vadd.f32 %v9071_v2, %v3541_v18  ;;  %11093 = vst [vmem:[#allocation152_spill] sm:$0xff] %v9175_v26  ;;  %3539 = vadd.xlane.f32.xlu1 %v3538_v23  ;;  %5877 = vpow2.f32 %v3197_v16  ;;  %v3802_v33 = vmul.f32 %v9088_v37, %v11094_v55  ;;  %v3800_v62 = vmul.f32 %v9083_v63, %v11095_v19  ;;  %v9183_v40 = vpop.eup %5857  ;;  %v11097_v57 = vld [vmem:[#allocation115_spill] sm:$0xff] }
 0x48c   :  { %v3804_v32 = vmul.f32 %v9088_v37, %v11096_v39  ;;  %5879 = vpow2.f32 %v3199_v48  ;;  %v3797_v12 = vmul.f32 %v9083_v63, %v11097_v57  ;;  %v11098_v23 = vld [vmem:[#allocation27_spill] sm:$0xff]  ;;  %v3203_v55 = vmul.f32 1.442695, %v2760_v43  ;;  %v11101_v48 = vld [vmem:[#allocation121_spill] sm:$0xff]  ;;  %v11105_v43 = vld [vmem:[#allocation182_spill] sm:$0xff] }
 0x48d   :  { %v3543_v18 = vadd.f32 %v9079_v8, %v3542_v21  ;;  %v3801_v16 = vmul.f32 %v9088_v37, %v11098_v23  ;;  %5881 = vpow2.f32 %v3195_v29  ;;  %v4018_v2 = vpack.c.bf16 %v3802_v33, %v3798_v0  ;;  %v9190_v19 = vpop.eup %5859  ;;  %v11102_v8 = vld [vmem:[#allocation30_spill] sm:$0xff] }
 0x48e   :  { %v4020_v42 = vpack.c.bf16 %v3804_v32, %v3800_v62  ;;  %11099 = vst [vmem:[#allocation154_spill] sm:$0xff] %v9190_v19  ;;  %v3799_v24 = vmul.f32 %v9083_v63, %v11100_v27  ;;  %v3803_v21 = vmul.f32 %v9088_v37, %v11101_v48  ;;  %v2761_v5 = vsub.f32 %v11102_v8, %v2492_v15  ;;  %v9197_v57 = vpop.eup %5861  ;;  %v11106_v33 = vld [vmem:[#allocation194_spill] sm:$0xff]  ;;  %v11107_v62 = vld [vmem:[#allocation195_spill] sm:$0xff] }
 0x48f   :  { %3544 = vadd.xlane.f32.xlu0 %v3543_v18  ;;  %v4017_v39 = vpack.c.bf16 %v3801_v16, %v3797_v12  ;;  %11103 = vst [vmem:[#allocation72_spill] sm:$0xff] %v9197_v57  ;;  %5883 = vpow2.f32 %v3201_v22  ;;  %v11104_v29 = vmax.f32 %v9105_v34, %v9110_v10  ;;  %4245 = vmatprep.mubr.bf16.mxu1 %v4018_v2  ;;  %v11109_v18 = vld [vmem:[#allocation213_spill] sm:$0xff] }
 0x490   :  { %v2762_v0 = vsub.f32 %v11105_v43, %v2492_v15  ;;  %v2763_v12 = vsub.f32 %v11106_v33, %v2492_v15  ;;  %v2764_v32 = vsub.f32 %v11107_v62, %v2492_v15  ;;  %4534 = vmatprep.mubr.bf16.mxu0 %v4020_v42  ;;  %v4019_v27 = vpack.c.bf16 %v3803_v21, %v3799_v24  ;;  %v9209_v22 = vpop.eup %5863  ;;  %v11111_v42 = vld [vmem:[#allocation217_spill] sm:$0xff] }
 0x491   :  { %2571 = vmax.xlane.f32.xlu1 %v11104_v29  ;;  %4246 = vmatmul.mubr.bf16.gmra.mxu1 %v4017_v39  ;;  %v3205_v63 = vmul.f32 1.442695, %v2761_v5  ;;  %v3546_v8 = vadd.f32 %v9108_v20, %v9099_v17  ;;  %v3551_v37 = vadd.f32 %v9134_v30, %v9130_v45  ;;  %11108 = vst [vmem:[#allocation76_spill] sm:$0xff] %v9209_v22  ;;  %5885 = vpow2.f32 %v3203_v55  ;;  %v11112_v55 = vld [vmem:[#allocation226_spill] sm:$0xff] }
 0x492   :  { %v3207_v2 = vmul.f32 1.442695, %v2762_v0  ;;  %v3209_v34 = vmul.f32 1.442695, %v2763_v12  ;;  %v3806_v23 = vmul.f32 %v9153_v6, %v11109_v18  ;;  %v9213_v16 = vpop.eup %5865  ;;  %4535 = vmatmul.mubr.bf16.gmra.mxu0 %v4019_v27  ;;  %v3810_v15 = vmul.f32 %v9156_v31, %v11111_v42  ;;  %v11113_v29 = vld [vmem:[#allocation230_spill] sm:$0xff]  ;;  %v11114_v27 = vld [vmem:[#allocation212_spill] sm:$0xff] }
 0x493   :  { %11110 = vst [vmem:[#allocation187_spill] sm:$0xff] %v9213_v16  ;;  %5887 = vpow2.f32 %v3205_v63  ;;  %v3547_v5 = vadd.f32 %v9113_v35, %v3546_v8  ;;  %v3552_v24 = vadd.f32 %v9141_v11, %v3551_v37  ;;  %v5868_v39 = vpop.eup %5867  ;;  %v3211_v48 = vmul.f32 1.442695, %v2764_v32  ;;  %v11116_v32 = vld [vmem:[#allocation216_spill] sm:$0xff] }
 0x494   :  { %5889 = vpow2.f32 %v3207_v2  ;;  %v3808_v21 = vmul.f32 %v9153_v6, %v11112_v55  ;;  %v3812_v43 = vmul.f32 %v9156_v31, %v11113_v29  ;;  %v5870_v0 = vpop.eup %5869  ;;  %v4022_v62 = vpack.c.bf16 %v3810_v15, %v3806_v23  ;;  %v11117_v18 = vld [vmem:[#allocation220_spill] sm:$0xff] }
 0x495   :  { %v3548_v33 = vadd.f32 %v9123_v14, %v3547_v5  ;;  %v3553_v12 = vadd.f32 %v9149_v3, %v3552_v24  ;;  %v3805_v63 = vmul.f32 %v9153_v6, %v11114_v27  ;;  %v9227_v8 = vpop.eup %5871  ;;  %5891 = vpow2.f32 %v3209_v34  ;;  %v11119_v5 = vld [vmem:[#allocation225_spill] sm:$0xff] }
 0x496   :  { %11115 = vst [vmem:[#allocation189_spill] sm:$0xff] %v9227_v8  ;;  %v4024_v37 = vpack.c.bf16 %v3812_v43, %v3808_v21  ;;  %v3809_v2 = vmul.f32 %v9156_v31, %v11116_v32  ;;  %v3807_v42 = vmul.f32 %v9153_v6, %v11117_v18  ;;  %v9233_v55 = vpop.eup %5873  ;;  %v3811_v23 = vmul.f32 %v9156_v31, %v11119_v5  ;;  %v11121_v6 = vld [vmem:[#allocation223_spill] sm:$0xff]  ;;  %v11122_v43 = vld [vmem:[#allocation228_spill] sm:$0xff] }
 0x497   :  { %11118 = vst [vmem:[#allocation69_spill] sm:$0xff] %v9233_v55  ;;  %3549 = vadd.xlane.f32.xlu1 %v3548_v33  ;;  %3554 = vadd.xlane.f32.xlu0 %v3553_v12  ;;  %v3556_v24 = vadd.f32 %v9170_v7, %v9166_v49  ;;  %v3561_v34 = vadd.f32 %v9197_v57, %v9190_v19  ;;  %v9241_v15 = vpop.eup %5875  ;;  %5893 = vpow2.f32 %v3211_v48  ;;  %v11125_v19 = vld [vmem:[#allocation235_spill] sm:$0xff] }
 0x498   :  { %11120 = vst [vmem:[#allocation49_spill] sm:$0xff] %v9241_v15  ;;  %4253 = vmatprep.mubr.bf16.mxu1 %v4022_v62  ;;  %4542 = vmatprep.mubr.bf16.mxu0 %v4024_v37  ;;  %v4021_v21 = vpack.c.bf16 %v3809_v2, %v3805_v63  ;;  %v3814_v29 = vmul.f32 %v5868_v39, %v11121_v6  ;;  %v9245_v12 = vpop.eup %5877  ;;  %v11126_v62 = vld [vmem:[#allocation237_spill] sm:$0xff]  ;;  %v11127_v63 = vld [vmem:[#allocation227_spill] sm:$0xff] }
 0x499   :  { %v3818_v33 = vmul.f32 %v5870_v0, %v11122_v43  ;;  %11123 = vst [vmem:[#allocation74_spill] sm:$0xff] %v9245_v12  ;;  %v4023_v27 = vpack.c.bf16 %v3811_v23, %v3807_v42  ;;  %v3557_v31 = vadd.f32 %v9175_v26, %v3556_v24  ;;  %v3562_v32 = vadd.f32 %v9209_v22, %v3561_v34  ;;  %v9249_v18 = vpop.eup %5879  ;;  %v11129_v23 = vld [vmem:[#allocation234_spill] sm:$0xff] }
 0x49a   :  { %11124 = vst [vmem:[#allocation78_spill] sm:$0xff] %v9249_v18  ;;  %4254 = vmatmul.mubr.bf16.gmra.mxu1 %v4021_v21  ;;  %v3816_v48 = vmul.f32 %v5868_v39, %v11125_v19  ;;  %v3820_v37 = vmul.f32 %v5870_v0, %v11126_v62  ;;  %v3817_v2 = vmul.f32 %v5870_v0, %v11127_v63  ;;  %v9254_v6 = vpop.eup %5881  ;;  %v11130_v22 = vld [vmem:[#allocation222_spill] sm:$0xff] }
 0x49b   :  { %v4026_v5 = vpack.c.bf16 %v3818_v33, %v3814_v29  ;;  %11128 = vst [vmem:[#allocation108_spill] sm:$0xff] %v9254_v6  ;;  %4543 = vmatmul.mubr.bf16.gmra.mxu0 %v4023_v27  ;;  %v3558_v43 = vadd.f32 %v9183_v40, %v3557_v31  ;;  %v3563_v42 = vadd.f32 %v9213_v16, %v3562_v32  ;;  %v11132_v27 = vld [vmem:[#allocation231_spill] sm:$0xff] }
 0x49c   :  { %v3819_v24 = vmul.f32 %v5870_v0, %v11129_v23  ;;  %v4028_v34 = vpack.c.bf16 %v3820_v37, %v3816_v48  ;;  %v3813_v21 = vmul.f32 %v5868_v39, %v11130_v22  ;;  %v3566_v19 = vadd.f32 %v9233_v55, %v9227_v8  ;;  %v9264_v33 = vpop.eup %5883 }
 0x49d   :  { %4261 = vmatprep.mubr.bf16.mxu1 %v4026_v5  ;;  %v3571_v29 = vadd.f32 %v9249_v18, %v9245_v12  ;;  %11131 = vst [vmem:[#allocation111_spill] sm:$0xff] %v9264_v33  ;;  %3559 = vadd.xlane.f32.xlu1 %v3558_v43  ;;  %v3815_v31 = vmul.f32 %v5868_v39, %v11132_v27  ;;  %v11139_v27 = vld [vmem:[#allocation186_spill] sm:$0xff]  ;;  %v11142_v12 = vld [vmem:[#allocation188_spill] sm:$0xff] }
 0x49e   :  { %3564 = vadd.xlane.f32.xlu0 %v3563_v42  ;;  %4550 = vmatprep.mubr.bf16.mxu0 %v4028_v34  ;;  %v4025_v32 = vpack.c.bf16 %v3817_v2, %v3813_v21  ;;  %v3567_v0 = vadd.f32 %v9241_v15, %v3566_v19  ;;  %v9269_v48 = vpop.eup %5885  ;;  %v11138_v19 = vld [vmem:[#allocation184_spill] sm:$0xff] }
 0x49f   :  { %v3572_v5 = vadd.f32 %v9264_v33, %v3571_v29  ;;  %11133 = vst [vmem:[#allocation155_spill] sm:$0xff] %v9269_v48  ;;  %v4027_v22 = vpack.c.bf16 %v3819_v24, %v3815_v31 }
 0x4a0   :  { %v9271_v62 = vpop.eup %5887  ;;  %v3568_v37 = vadd.f32 %v9254_v6, %v3567_v0 }
 0x4a1   :  { %11134 = vst [vmem:[#allocation157_spill] sm:$0xff] %v9271_v62  ;;  %v3573_v63 = vadd.f32 %v9269_v48, %v3572_v5  ;;  %v9275_v23 = vpop.eup %5889  ;;  %v11141_v5 = vld [vmem:[#allocation199_spill] sm:$0xff]  ;;  %v11155_v48 = vld [vmem:[#allocation130_spill] sm:$0xff] }
 0x4a2   :  { %11135 = vst [vmem:[#allocation114_spill] sm:$0xff] %v9275_v23  ;;  %4262 = vmatmul.mubr.bf16.gmra.mxu1 %v4025_v32  ;;  %3569 = vadd.xlane.f32.xlu1 %v3568_v37  ;;  %v3576_v39 = vadd.f32 %v9275_v23, %v9271_v62  ;;  %v9279_v2 = vpop.eup %5891  ;;  %v11140_v32 = vld [vmem:[#allocation197_spill] sm:$0xff]  ;;  %v11148_v23 = vld [vmem:[#allocation124_spill] sm:$0xff] }
 0x4a3   :  { %11136 = vst [vmem:[#allocation117_spill] sm:$0xff] %v9279_v2  ;;  %4551 = vmatmul.mubr.bf16.gmra.mxu0 %v4027_v22  ;;  %3574 = vadd.xlane.f32.xlu0 %v3573_v63  ;;  %v11144_v62 = vld [vmem:[#allocation201_spill] sm:$0xff] }
 0x4a4   :  { %v3577_v43 = vadd.f32 %v9279_v2, %v3576_v39  ;;  %v9282_v42 = vpop.eup %5893  ;;  %v11143_v2 = vld [vmem:[#allocation190_spill] sm:$0xff] }
 0x4a5   :  { %11137 = vst [vmem:[#allocation158_spill] sm:$0xff] %v9282_v42 }
 0x4a6   :  { %v3578_v24 = vadd.f32 %v9282_v42, %v3577_v43 }
 0x4a8   :  { %3579 = vadd.xlane.f32.xlu1 %v3578_v24 }
 0x4b0   :  { %v3465_v34 = vpop.xlane.xlu0 %3464 }
 0x4b1   :  { %5895 = vrcp.f32 %v3465_v34 }
 0x4b7   :  { %v2497_v21 = vpop.xlane.xlu0 %2496 }
 0x4b8   :  { %v2765_v29 = vsub.f32 %v11138_v19, %v2497_v21  ;;  %v2766_v31 = vsub.f32 %v11139_v27, %v2497_v21  ;;  %v2767_v0 = vsub.f32 %v11140_v32, %v2497_v21  ;;  %v2768_v37 = vsub.f32 %v11141_v5, %v2497_v21  ;;  %v3470_v22 = vpop.xlane.xlu1 %3469  ;;  %v11145_v32 = vld [vmem:[#allocation56_spill] sm:$0xff] }
 0x4b9   :  { %5897 = vrcp.f32 %v3470_v22 }
 0x4ba   :  { %v3213_v63 = vmul.f32 1.442695, %v2765_v29  ;;  %v3215_v33 = vmul.f32 1.442695, %v2766_v31  ;;  %v3217_v39 = vmul.f32 1.442695, %v2767_v0 }
 0x4bb   :  { %v3219_v43 = vmul.f32 1.442695, %v2768_v37 }
 0x4bc   :  { %5899 = vpow2.f32 %v3213_v63  ;;  %v2502_v24 = vpop.xlane.xlu1 %2501  ;;  %v11146_v63 = vld [vmem:[#allocation37_spill] sm:$0xff] }
 0x4bd   :  { %5901 = vpow2.f32 %v3215_v33  ;;  %v2769_v34 = vsub.f32 %v11142_v12, %v2502_v24  ;;  %v2770_v19 = vsub.f32 %v11143_v2, %v2502_v24  ;;  %v2771_v27 = vsub.f32 %v11144_v62, %v2502_v24 }
 0x4be   :  { %5903 = vpow2.f32 %v3217_v39  ;;  %v2772_v42 = vsub.f32 %v11145_v32, %v2502_v24  ;;  %v5896_v0 = vpop.eup %5895  ;;  %v11147_v39 = vld [vmem:[#allocation127_spill] sm:$0xff]  ;;  %v11150_v24 = vld [vmem:[#allocation86_spill] sm:$0xff]  ;;  %v11152_v32 = vld [vmem:[#allocation125_spill] sm:$0xff] }
 0x4bf   :  { %5905 = vpow2.f32 %v3219_v43  ;;  %v3221_v21 = vmul.f32 1.442695, %v2769_v34  ;;  %v3223_v5 = vmul.f32 1.442695, %v2770_v19  ;;  %v3225_v29 = vmul.f32 1.442695, %v2771_v27 }
 0x4c0   :  { %v3227_v33 = vmul.f32 1.442695, %v2772_v42  ;;  %v3822_v12 = vmul.f32 %v5896_v0, %v11146_v63  ;;  %v3824_v2 = vmul.f32 %v5896_v0, %v11147_v39  ;;  %v3821_v62 = vmul.f32 %v5896_v0, %v11148_v23  ;;  %v11151_v19 = vld [vmem:[#allocation88_spill] sm:$0xff]  ;;  %v11154_v42 = vld [vmem:[#allocation73_spill] sm:$0xff]  ;;  %v11156_v63 = vld [vmem:[#allocation71_spill] sm:$0xff] }
 0x4c1   :  { %5907 = vpow2.f32 %v3221_v21  ;;  %v3823_v21 = vmul.f32 %v5896_v0, %v11152_v32  ;;  %v11157_v39 = vld [vmem:[#allocation128_spill] sm:$0xff] }
 0x4c2   :  { %5909 = vpow2.f32 %v3223_v5  ;;  %v11158_v23 = vld [vmem:[#allocation204_spill] sm:$0xff] }
 0x4c3   :  { %v3475_v31 = vpop.xlane.xlu0 %3474  ;;  %5911 = vpow2.f32 %v3225_v29 }
 0x4c4   :  { %5913 = vpow2.f32 %v3227_v33 }
 0x4c5   :  { %5915 = vrcp.f32 %v3475_v31 }
 0x4c6   :  { %v5898_v37 = vpop.eup %5897 }
 0x4c7   :  { %v3826_v29 = vmul.f32 %v5898_v37, %v11154_v42  ;;  %v3828_v18 = vmul.f32 %v5898_v37, %v11155_v48  ;;  %v3825_v15 = vmul.f32 %v5898_v37, %v11156_v63  ;;  %v3827_v8 = vmul.f32 %v5898_v37, %v11157_v39  ;;  %v11160_v42 = vld [vmem:[#allocation17_spill] sm:$0xff] }
 0x4c9   :  { %v2507_v22 = vpop.xlane.xlu0 %2506  ;;  %v9296_v43 = vpop.eup %5899  ;;  %v4030_v0 = vpack.c.bf16 %v3826_v29, %v3822_v12  ;;  %v4032_v32 = vpack.c.bf16 %v3828_v18, %v3824_v2  ;;  %v4029_v55 = vpack.c.bf16 %v3825_v15, %v3821_v62  ;;  %v4031_v48 = vpack.c.bf16 %v3827_v8, %v3823_v21  ;;  %v11166_v62 = vld [vmem:[#allocation98_spill] sm:$0xff]  ;;  %v11167_v29 = vld [vmem:[#allocation25_spill] sm:$0xff] }
 0x4ca   :  { %11149 = vst [vmem:[#allocation160_spill] sm:$0xff] %v9296_v43  ;;  %v2773_v34 = vsub.f32 %v11150_v24, %v2507_v22  ;;  %v2774_v27 = vsub.f32 %v11151_v19, %v2507_v22  ;;  %v9301_v5 = vpop.eup %5901  ;;  %v2775_v6 = vsub.f32 %v11158_v23, %v2507_v22  ;;  %v2776_v57 = vsub.f32 %v11160_v42, %v2507_v22 }
 0x4cb   :  { %11153 = vst [vmem:[#allocation80_spill] sm:$0xff] %v9301_v5  ;;  %v3581_v24 = vadd.f32 %v9301_v5, %v9296_v43  ;;  %v9310_v19 = vpop.eup %5903  ;;  %4269 = vmatprep.mubr.bf16.mxu1 %v4030_v0  ;;  %4558 = vmatprep.mubr.bf16.mxu0 %v4032_v32 }
 0x4cc   :  { %v3229_v16 = vmul.f32 1.442695, %v2773_v34  ;;  %v3231_v33 = vmul.f32 1.442695, %v2774_v27  ;;  %11159 = vst [vmem:[#allocation47_spill] sm:$0xff] %v9310_v19  ;;  %v9314_v37 = vpop.eup %5905  ;;  %4270 = vmatmul.mubr.bf16.gmra.mxu1 %v4029_v55  ;;  %4559 = vmatmul.mubr.bf16.gmra.mxu0 %v4031_v48  ;;  %v11169_v48 = vld [vmem:[#allocation100_spill] sm:$0xff] }
 0x4cd   :  { %v3582_v63 = vadd.f32 %v9310_v19, %v3581_v24  ;;  %11161 = vst [vmem:[#allocation191_spill] sm:$0xff] %v9314_v37  ;;  %v3233_v27 = vmul.f32 1.442695, %v2775_v6  ;;  %v11165_v6 = vld [vmem:[#allocation94_spill] sm:$0xff] }
 0x4ce   :  { %5917 = vpow2.f32 %v3229_v16  ;;  %v3480_v34 = vpop.xlane.xlu1 %3479  ;;  %v9317_v12 = vpop.eup %5907  ;;  %v3235_v16 = vmul.f32 1.442695, %v2776_v57 }
 0x4cf   :  { %5919 = vpow2.f32 %v3231_v33  ;;  %v3583_v31 = vadd.f32 %v9314_v37, %v3582_v63  ;;  %11162 = vst [vmem:[#allocation193_spill] sm:$0xff] %v9317_v12  ;;  %v9319_v15 = vpop.eup %5909 }
 0x4d0   :  { %5921 = vrcp.f32 %v3480_v34  ;;  %11163 = vst [vmem:[#allocation62_spill] sm:$0xff] %v9319_v15  ;;  %v3485_v8 = vpop.xlane.xlu0 %3484  ;;  %v3586_v18 = vadd.f32 %v9319_v15, %v9317_v12  ;;  %v9323_v2 = vpop.eup %5911  ;;  %v11183_v15 = vld [vmem:[#allocation209_spill] sm:$0xff] }
 0x4d1   :  { %3584 = vadd.xlane.f32.xlu0 %v3583_v31  ;;  %5923 = vpow2.f32 %v3233_v27  ;;  %11164 = vst [vmem:[#allocation51_spill] sm:$0xff] %v9323_v2  ;;  %v9330_v24 = vpop.eup %5913  ;;  %v11170_v27 = vld [vmem:[#allocation203_spill] sm:$0xff] }
 0x4d2   :  { %5925 = vpow2.f32 %v3235_v16  ;;  %v3587_v57 = vadd.f32 %v9323_v2, %v3586_v18  ;;  %11168 = vst [vmem:[#allocation82_spill] sm:$0xff] %v9330_v24  ;;  %v11180_v2 = vld [vmem:[#allocation173_spill] sm:$0xff] }
 0x4d3   :  { %5927 = vrcp.f32 %v3485_v8 }
 0x4d4   :  { %v2512_v22 = vpop.xlane.xlu1 %2511  ;;  %v3588_v16 = vadd.f32 %v9330_v24, %v3587_v57 }
 0x4d5   :  { %v2777_v55 = vsub.f32 %v11165_v6, %v2512_v22  ;;  %v2778_v21 = vsub.f32 %v11166_v62, %v2512_v22  ;;  %v2779_v39 = vsub.f32 %v11167_v29, %v2512_v22  ;;  %v2780_v23 = vsub.f32 %v8322_v50, %v2512_v22  ;;  %v11171_v6 = vld [vmem:[#allocation211_spill] sm:$0xff]  ;;  %v5916_v22 = vpop.eup %5915 }
 0x4d6   :  { %v2517_v33 = vpop.xlane.xlu0 %2516  ;;  %3589 = vadd.xlane.f32.xlu1 %v3588_v16 }
 0x4d7   :  { %v3237_v0 = vmul.f32 1.442695, %v2777_v55  ;;  %v3239_v32 = vmul.f32 1.442695, %v2778_v21  ;;  %v3241_v42 = vmul.f32 1.442695, %v2779_v39  ;;  %v2781_v63 = vsub.f32 %v11169_v48, %v2517_v33 }
 0x4d8   :  { %v3243_v34 = vmul.f32 1.442695, %v2780_v23  ;;  %v2782_v31 = vsub.f32 %v11170_v27, %v2517_v33  ;;  %v2783_v62 = vsub.f32 %v11171_v6, %v2517_v33  ;;  %v2784_v50 = vsub.f32 %v8370_v59, %v2517_v33  ;;  %v11174_v33 = vld [vmem:[#allocation172_spill] sm:$0xff]  ;;  %v11177_v6 = vld [vmem:[#allocation206_spill] sm:$0xff] }
 0x4d9   :  { %5929 = vpow2.f32 %v3237_v0  ;;  %v3490_v18 = vpop.xlane.xlu1 %3489  ;;  %v3245_v29 = vmul.f32 1.442695, %v2781_v63  ;;  %v3830_v57 = vmul.f32 %v5916_v22, %v11174_v33 }
 0x4da   :  { %5931 = vpow2.f32 %v3239_v32  ;;  %v3247_v21 = vmul.f32 1.442695, %v2782_v31  ;;  %v3249_v39 = vmul.f32 1.442695, %v2783_v62  ;;  %v3251_v23 = vmul.f32 1.442695, %v2784_v50 }
 0x4db   :  { %v9337_v55 = vpop.eup %5917  ;;  %5933 = vpow2.f32 %v3241_v42  ;;  %v11175_v32 = vld [vmem:[#allocation22_spill] sm:$0xff]  ;;  %v11176_v42 = vld [vmem:[#allocation16_spill] sm:$0xff] }
 0x4dc   :  { %11172 = vst [vmem:[#allocation84_spill] sm:$0xff] %v9337_v55  ;;  %v9339_v8 = vpop.eup %5919  ;;  %5935 = vpow2.f32 %v3243_v34  ;;  %v3495_v0 = vpop.xlane.xlu0 %3494  ;;  %v3832_v27 = vmul.f32 %v5916_v22, %v11175_v32  ;;  %v11178_v34 = vld [vmem:[#allocation221_spill] sm:$0xff] }
 0x4dd   :  { %11173 = vst [vmem:[#allocation120_spill] sm:$0xff] %v9339_v8  ;;  %5937 = vrcp.f32 %v3490_v18  ;;  %v5922_v48 = vpop.eup %5921  ;;  %v3591_v63 = vadd.f32 %v9339_v8, %v9337_v55  ;;  %v11179_v18 = vld [vmem:[#allocation70_spill] sm:$0xff]  ;;  %v11182_v8 = vld [vmem:[#allocation207_spill] sm:$0xff] }
 0x4de   :  { %5939 = vpow2.f32 %v3245_v29  ;;  %v3834_v29 = vmul.f32 %v5922_v48, %v11179_v18  ;;  %v3836_v12 = vmul.f32 %v5922_v48, %v11180_v2  ;;  %v9351_v33 = vpop.eup %5923 }
 0x4df   :  { %v2522_v59 = vpop.xlane.xlu1 %2521  ;;  %5941 = vpow2.f32 %v3247_v21  ;;  %11181 = vst [vmem:[#allocation123_spill] sm:$0xff] %v9351_v33 }
 0x4e0   :  { %v2785_v31 = vsub.f32 %v11176_v42, %v2522_v59  ;;  %v2786_v16 = vsub.f32 %v11177_v6, %v2522_v59  ;;  %v2787_v62 = vsub.f32 %v11178_v34, %v2522_v59  ;;  %5943 = vpow2.f32 %v3249_v39  ;;  %v9355_v39 = vpop.eup %5925 }
 0x4e1   :  { %v2788_v50 = vsub.f32 %v8410_v47, %v2522_v59  ;;  %5945 = vpow2.f32 %v3251_v23  ;;  %11184 = vst [vmem:[#allocation161_spill] sm:$0xff] %v9355_v39  ;;  %v11185_v47 = vld [vmem:[#allocation232_spill] sm:$0xff]  ;;  %v4034_v18 = vpack.c.bf16 %v3834_v29, %v3830_v57  ;;  %v5928_v19 = vpop.eup %5927  ;;  %v4175_v29 = vpop.f32.mrf.mxu1 }
 0x4e2   :  { %v3253_v32 = vmul.f32 1.442695, %v2785_v31  ;;  %v3255_v24 = vmul.f32 1.442695, %v2786_v16  ;;  %v3257_v55 = vmul.f32 1.442695, %v2787_v62  ;;  %v2527_v21 = vpop.xlane.xlu0 %2526  ;;  %5947 = vrcp.f32 %v3495_v0 }
 0x4e3   :  { %v3259_v42 = vmul.f32 1.442695, %v2788_v50  ;;  %v2789_v6 = vsub.f32 %v11182_v8, %v2527_v21  ;;  %v2790_v34 = vsub.f32 %v11183_v15, %v2527_v21  ;;  %v2791_v59 = vsub.f32 %v11185_v47, %v2527_v21  ;;  %v11186_v16 = vld [vmem:[#allocation19_spill] sm:$0xff]  ;;  %4277 = vmatprep.mubr.bf16.mxu1 %v4034_v18  ;;  %v11195_v18 = vld [vmem:[#allocation133_spill] sm:$0xff] }
 0x4e4   :  { %5949 = vpow2.f32 %v3253_v32  ;;  %v2792_v2 = vsub.f32 %v8446_v4, %v2527_v21  ;;  %v4036_v31 = vpack.c.bf16 %v3836_v12, %v3832_v27  ;;  %v3829_v62 = vmul.f32 %v5916_v22, %v11186_v16  ;;  %v11187_v8 = vld [vmem:[#allocation175_spill] sm:$0xff]  ;;  %v11190_v4 = vld [vmem:[#allocation170_spill] sm:$0xff]  ;;  %v4464_v21 = vpop.f32.mrf.mxu0 }
 0x4e5   :  { %5951 = vpow2.f32 %v3255_v24  ;;  %v3261_v23 = vmul.f32 1.442695, %v2789_v6  ;;  %v3263_v0 = vmul.f32 1.442695, %v2790_v34  ;;  %v3833_v50 = vmul.f32 %v5922_v48, %v11187_v8  ;;  %v11188_v15 = vld [vmem:[#allocation55_spill] sm:$0xff]  ;;  %v3500_v32 = vpop.xlane.xlu1 %3499 }
 0x4e6   :  { %5953 = vpow2.f32 %v3257_v55  ;;  %v3831_v43 = vmul.f32 %v5916_v22, %v11188_v15  ;;  %v9362_v37 = vpop.eup %5929  ;;  %v3265_v47 = vmul.f32 1.442695, %v2791_v59  ;;  %4566 = vmatprep.mubr.bf16.mxu0 %v4036_v31  ;;  %v3835_v24 = vmul.f32 %v5922_v48, %v11190_v4  ;;  %v11194_v59 = vld [vmem:[#allocation77_spill] sm:$0xff] }
 0x4e7   :  { %11189 = vst [vmem:[#allocation163_spill] sm:$0xff] %v9362_v37  ;;  %5955 = vpow2.f32 %v3259_v42  ;;  %v3592_v12 = vadd.f32 %v9351_v33, %v3591_v63  ;;  %v9366_v57 = vpop.eup %5931  ;;  %v3267_v55 = vmul.f32 1.442695, %v2792_v2  ;;  %v4033_v27 = vpack.c.bf16 %v3833_v50, %v3829_v62  ;;  %v4466_v2 = vpop.f32.mrf.mxu0  ;;  %v11197_v50 = vld [vmem:[#allocation131_spill] sm:$0xff] }
 0x4e8   :  { %11191 = vst [vmem:[#allocation126_spill] sm:$0xff] %v9366_v57  ;;  %5957 = vrcp.f32 %v3500_v32  ;;  %v9368_v6 = vpop.eup %5933  ;;  %v4035_v22 = vpack.c.bf16 %v3835_v24, %v3831_v43  ;;  %v3505_v48 = vpop.xlane.xlu0 %3504  ;;  %v3838_v63 = vmul.f32 %v5928_v19, %v11194_v59  ;;  %v3840_v31 = vmul.f32 %v5928_v19, %v11195_v18  ;;  %v11199_v24 = vld [vmem:[#allocation210_spill] sm:$0xff] }
 0x4e9   :  { %11192 = vst [vmem:[#allocation129_spill] sm:$0xff] %v9368_v6  ;;  %5959 = vpow2.f32 %v3261_v23  ;;  %v3593_v42 = vadd.f32 %v9355_v39, %v3592_v12  ;;  %v9371_v34 = vpop.eup %5935  ;;  %4278 = vmatmul.mubr.bf16.gmra.mxu1 %v4033_v27  ;;  %v4465_v16 = vadd.f32 %v4464_v21, %v4175_v29  ;;  %v11196_v23 = vld [vmem:[#allocation75_spill] sm:$0xff]  ;;  %v9377_v15 = vmul.f32 %v5928_v19, %v11197_v50  ;;  %v4177_v32 = vpop.f32.mrf.mxu1  ;;  %v11200_v27 = vld [vmem:[#allocation214_spill] sm:$0xff] }
 0x4ea   :  { %11193 = vst [vmem:[#allocation164_spill] sm:$0xff] %v9371_v34  ;;  %5961 = vpow2.f32 %v3263_v0  ;;  %v5938_v62 = vpop.eup %5937  ;;  %4567 = vmatmul.mubr.bf16.gmra.mxu0 %v4035_v22  ;;  %v3837_v43 = vmul.f32 %v5928_v19, %v11196_v23  ;;  %v3596_v0 = vadd.f32 %v9366_v57, %v9362_v37  ;;  %v9386_v22 = vpop.f32.mrf.mxu0  ;;  %v11205_v37 = vld [vmem:[#allocation218_spill] sm:$0xff]  ;;  %v11207_v57 = vld [vmem:[#allocation241_spill] sm:$0xff] }
 0x4eb   :  { %5963 = vpow2.f32 %v3265_v47  ;;  %v2532_v8 = vpop.xlane.xlu1 %2531  ;;  %3594 = vadd.xlane.f32.xlu0 %v3593_v42  ;;  %v9381_v4 = vpop.eup %5939  ;;  %v11201_v47 = vld [vmem:[#allocation238_spill] sm:$0xff]  ;;  %4719 = vst [vmem:[#allocation10] sm:$0xff] %v4465_v16  ;;  %v3842_v59 = vmul.f32 %v5938_v62, %v8765_v44  ;;  %v3844_v18 = vmul.f32 %v5938_v62, %v8773_v53  ;;  %v11204_v16 = vld [vmem:[#allocation24_spill] sm:$0xff] }
 0x4ec   :  { %11198 = vst [vmem:[#allocation166_spill] sm:$0xff] %v9381_v4  ;;  %5965 = vpow2.f32 %v3267_v55  ;;  %v2793_v12 = vsub.f32 %v11199_v24, %v2532_v8  ;;  %v2794_v29 = vsub.f32 %v11200_v27, %v2532_v8  ;;  %v2795_v21 = vsub.f32 %v11201_v47, %v2532_v8  ;;  %v9388_v42 = vpop.eup %5941  ;;  %v9393_v2 = vpop.f32.mrf.mxu1 }
 0x4ed   :  { %11202 = vst [vmem:[#allocation65_spill] sm:$0xff] %v9388_v42  ;;  %5967 = vrcp.f32 %v3505_v48  ;;  %v2796_v19 = vsub.f32 %v8467_v28, %v2532_v8  ;;  %v9395_v55 = vpop.eup %5943  ;;  %v3841_v27 = vmul.f32 %v5938_v62, %v11204_v16  ;;  %v4469_v47 = vpop.f32.mrf.mxu0  ;;  %v11206_v8 = vld [vmem:[#allocation224_spill] sm:$0xff] }
 0x4ee   :  { %11203 = vst [vmem:[#allocation92_spill] sm:$0xff] %v9395_v55  ;;  %v3269_v23 = vmul.f32 1.442695, %v2793_v12  ;;  %v3271_v50 = vmul.f32 1.442695, %v2794_v29  ;;  %v2537_v24 = vpop.xlane.xlu0 %2536  ;;  %v9398_v33 = vpop.eup %5945  ;;  %v4038_v29 = vpack.c.bf16 %v3842_v59, %v3838_v63  ;;  %v3601_v63 = vadd.f32 %v9388_v42, %v9381_v4 }
 0x4ef   :  { %v3273_v32 = vmul.f32 1.442695, %v2795_v21  ;;  %v3275_v48 = vmul.f32 1.442695, %v2796_v19  ;;  %v2797_v28 = vsub.f32 %v11205_v37, %v2537_v24  ;;  %v2798_v44 = vsub.f32 %v11206_v8, %v2537_v24  ;;  %v4180_v39 = vpop.f32.mrf.mxu1  ;;  %v5948_v5 = vpop.eup %5947 }
 0x4f0   :  { %v2799_v53 = vsub.f32 %v11207_v57, %v2537_v24  ;;  %5969 = vpow2.f32 %v3269_v23  ;;  %v2800_v12 = vsub.f32 %v8476_v54, %v2537_v24  ;;  %v4040_v21 = vpack.c.bf16 %v3844_v18, %v3840_v31  ;;  %4285 = vmatprep.mubr.bf16.mxu1 %v4038_v29  ;;  %v11208_v57 = vld [vmem:[#allocation178_spill] sm:$0xff]  ;;  %v11209_v31 = vld [vmem:[#allocation79_spill] sm:$0xff] }
 0x4f1   :  { %v9404_v11 = vpop.eup %5949  ;;  %5971 = vpow2.f32 %v3271_v50  ;;  %v3277_v16 = vmul.f32 1.442695, %v2797_v28  ;;  %v3279_v47 = vmul.f32 1.442695, %v2798_v44  ;;  %v3510_v37 = vpop.xlane.xlu1 %3509  ;;  %v4037_v39 = vpack.c.bf16 %v3841_v27, %v3837_v43  ;;  %v11211_v24 = vld [vmem:[#allocation58_spill] sm:$0xff]  ;;  %v11212_v44 = vld [vmem:[#allocation81_spill] sm:$0xff] }
 0x4f2   :  { %v3281_v26 = vmul.f32 1.442695, %v2799_v53  ;;  %v9406_v19 = vpop.eup %5951  ;;  %5973 = vpow2.f32 %v3273_v32  ;;  %v3283_v8 = vmul.f32 1.442695, %v2800_v12  ;;  %4574 = vmatprep.mubr.bf16.mxu0 %v4040_v21  ;;  %v3843_v23 = vmul.f32 %v5938_v62, %v11208_v57  ;;  %v11210_v32 = vld [vmem:[#allocation134_spill] sm:$0xff]  ;;  %v9425_v12 = vpop.f32.mrf.mxu1 }
 0x4f3   :  { %v9409_v45 = vpop.eup %5953  ;;  %5975 = vpow2.f32 %v3275_v48  ;;  %v3597_v54 = vadd.f32 %v9368_v6, %v3596_v0  ;;  %v3846_v59 = vmul.f32 %v5948_v5, %v11209_v31  ;;  %4286 = vmatmul.mubr.bf16.gmra.mxu1 %v4037_v39  ;;  %v3848_v43 = vmul.f32 %v5948_v5, %v11210_v32  ;;  %v9432_v57 = vpop.f32.mrf.mxu0  ;;  %v11217_v32 = vld [vmem:[#allocation244_spill] sm:$0xff] }
 0x4f4   :  { %v9415_v18 = vpop.eup %5955  ;;  %5977 = vrcp.f32 %v3510_v37  ;;  %v4039_v50 = vpack.c.bf16 %v3843_v23, %v9377_v15  ;;  %v3845_v62 = vmul.f32 %v5948_v5, %v11211_v24  ;;  %v3515_v48 = vpop.xlane.xlu0 %3514  ;;  %v3602_v28 = vadd.f32 %v9395_v55, %v3601_v63  ;;  %v11216_v63 = vld [vmem:[#allocation233_spill] sm:$0xff] }
 0x4f5   :  { %v5958_v27 = vpop.eup %5957  ;;  %5979 = vpow2.f32 %v3277_v16  ;;  %v3598_v0 = vadd.f32 %v9371_v34, %v3597_v54  ;;  %v9423_v53 = vmul.f32 %v5948_v5, %v11212_v44  ;;  %v11214_v16 = vld [vmem:[#allocation136_spill] sm:$0xff]  ;;  %v11215_v5 = vld [vmem:[#allocation229_spill] sm:$0xff] }
 0x4f6   :  { %v9427_v29 = vpop.eup %5959  ;;  %5981 = vpow2.f32 %v3279_v47  ;;  %4575 = vmatmul.mubr.bf16.gmra.mxu0 %v4039_v50  ;;  %v3850_v21 = vmul.f32 %v5958_v27, %v8812_v61  ;;  %v3852_v37 = vmul.f32 %v5958_v27, %v8821_v1  ;;  %v3849_v39 = vmul.f32 %v5958_v27, %v11214_v16  ;;  %v4185_v47 = vpop.f32.mrf.mxu1 }
 0x4f7   :  { %11213 = vst [vmem:[#allocation42_spill] sm:$0xff] %v9427_v29  ;;  %v2542_v15 = vpop.xlane.xlu1 %2541  ;;  %v9434_v23 = vpop.eup %5961  ;;  %5983 = vpow2.f32 %v3281_v26  ;;  %3599 = vadd.xlane.f32.xlu1 %v3598_v0  ;;  %v3603_v1 = vadd.f32 %v9398_v33, %v3602_v28  ;;  %v11220_v47 = vld [vmem:[#allocation236_spill] sm:$0xff] }
 0x4f8   :  { %v2801_v54 = vsub.f32 %v11215_v5, %v2542_v15  ;;  %v2802_v31 = vsub.f32 %v11216_v63, %v2542_v15  ;;  %v2803_v24 = vsub.f32 %v11217_v32, %v2542_v15  ;;  %v9439_v50 = vpop.eup %5963  ;;  %5985 = vpow2.f32 %v3283_v8  ;;  %v4474_v16 = vpop.f32.mrf.mxu0  ;;  %v11221_v8 = vld [vmem:[#allocation239_spill] sm:$0xff] }
 0x4f9   :  { %11218 = vst [vmem:[#allocation43_spill] sm:$0xff] %v9439_v50  ;;  %v2804_v61 = vsub.f32 %v8484_v36, %v2542_v15  ;;  %v4042_v44 = vpack.c.bf16 %v3850_v21, %v3846_v59  ;;  %v9443_v55 = vpop.eup %5965  ;;  %5987 = vrcp.f32 %v3515_v48  ;;  %v9445_v42 = vpop.f32.mrf.mxu1  ;;  %v11222_v36 = vld [vmem:[#allocation247_spill] sm:$0xff]  ;;  %3604 = vadd.xlane.f32.xlu0 %v3603_v1  ;;  %v4044_v28 = vpack.c.bf16 %v3852_v37, %v3848_v43  ;;  %v11224_v1 = vld [vmem:[#allocation176_spill] sm:$0xff] }
 0x4fa   :  { %11219 = vst [vmem:[#allocation63_spill] sm:$0xff] %v9443_v55  ;;  %v3285_v26 = vmul.f32 1.442695, %v2801_v54  ;;  %v3287_v5 = vmul.f32 1.442695, %v2802_v31  ;;  %v2547_v63 = vpop.xlane.xlu0 %2546  ;;  %v5968_v0 = vpop.eup %5967  ;;  %v4041_v21 = vpack.c.bf16 %v3849_v39, %v3845_v62  ;;  %v11226_v62 = vld [vmem:[#allocation85_spill] sm:$0xff] }
 0x4fb   :  { %v3289_v4 = vmul.f32 1.442695, %v2803_v24  ;;  %v3291_v32 = vmul.f32 1.442695, %v2804_v61  ;;  %v2805_v6 = vsub.f32 %v11220_v47, %v2547_v63  ;;  %v2806_v34 = vsub.f32 %v11221_v8, %v2547_v63  ;;  %4293 = vmatprep.mubr.bf16.mxu1 %v4042_v44  ;;  %v9450_v59 = vpop.f32.mrf.mxu0  ;;  %v4188_v54 = vpop.f32.mrf.mxu1  ;;  %4582 = vmatprep.mubr.bf16.mxu0 %v4044_v28 }
 0x4fc   :  { %v2807_v15 = vsub.f32 %v11222_v36, %v2547_v63  ;;  %5989 = vpow2.f32 %v3285_v26  ;;  %v2808_v48 = vsub.f32 %v8492_v51, %v2547_v63  ;;  %4294 = vmatmul.mubr.bf16.gmra.mxu1 %v4041_v21  ;;  %v3851_v44 = vmul.f32 %v5958_v27, %v11224_v1  ;;  %v11228_v26 = vld [vmem:[#allocation139_spill] sm:$0xff]  ;;  %v11233_v1 = vld [vmem:[#allocation240_spill] sm:$0xff] }
 0x4fd   :  { %5991 = vpow2.f32 %v3287_v5  ;;  %v3293_v31 = vmul.f32 1.442695, %v2805_v6  ;;  %v3295_v24 = vmul.f32 1.442695, %v2806_v34  ;;  %v4477_v16 = vpop.f32.mrf.mxu0  ;;  %v9453_v47 = vpop.eup %5969  ;;  %v3606_v51 = vadd.f32 %v9406_v19, %v9404_v11 }
 0x4fe   :  { %v3297_v61 = vmul.f32 1.442695, %v2807_v15  ;;  %11223 = vst [vmem:[#allocation44_spill] sm:$0xff] %v9453_v47  ;;  %5993 = vpow2.f32 %v3289_v4  ;;  %v3520_v8 = vpop.xlane.xlu1 %3519  ;;  %v3299_v36 = vmul.f32 1.442695, %v2808_v48  ;;  %v9458_v43 = vpop.eup %5971  ;;  %v3611_v6 = vadd.f32 %v9434_v23, %v9427_v29  ;;  %v11231_v48 = vld [vmem:[#allocation137_spill] sm:$0xff] }
 0x4ff   :  { %11225 = vst [vmem:[#allocation90_spill] sm:$0xff] %v9458_v43  ;;  %5995 = vpow2.f32 %v3291_v32  ;;  %v4468_v34 = vadd.f32 %v9386_v22, %v9393_v2  ;;  %v9465_v4 = vmul.f32 %v5968_v0, %v11226_v62  ;;  %v9467_v37 = vpop.eup %5973  ;;  %v4043_v27 = vpack.c.bf16 %v3851_v44, %v9423_v53  ;;  %v11230_v22 = vld [vmem:[#allocation83_spill] sm:$0xff]  ;;  %v9495_v62 = vpop.f32.mrf.mxu0 }
 0x500   :  { %11227 = vst [vmem:[#allocation196_spill] sm:$0xff] %v9467_v37  ;;  %5997 = vrcp.f32 %v3520_v8  ;;  %v3607_v39 = vadd.f32 %v9409_v45, %v3606_v51  ;;  %v9472_v5 = vmul.f32 %v5968_v0, %v11228_v26  ;;  %v9474_v63 = vpop.eup %5975  ;;  %v3525_v32 = vpop.xlane.xlu0 %3524  ;;  %v3612_v15 = vadd.f32 %v9439_v50, %v3611_v6  ;;  %v11234_v51 = vld [vmem:[#allocation242_spill] sm:$0xff] }
 0x501   :  { %11229 = vst [vmem:[#allocation132_spill] sm:$0xff] %v9474_v63  ;;  %5999 = vpow2.f32 %v3293_v31  ;;  %4720 = vst [vmem:[#allocation10 + $0x8] sm:$0xff] %v4468_v34  ;;  %v9478_v2 = vmul.f32 %v5968_v0, %v11230_v22  ;;  %v9481_v28 = vmul.f32 %v5968_v0, %v11231_v48  ;;  %v5978_v21 = vpop.eup %5977  ;;  %4583 = vmatmul.mubr.bf16.gmra.mxu0 %v4043_v27  ;;  %v11235_v6 = vld [vmem:[#allocation250_spill] sm:$0xff] }
 0x502   :  { %6001 = vpow2.f32 %v3295_v24  ;;  %v2552_v53 = vpop.xlane.xlu1 %2551  ;;  %v3608_v54 = vadd.f32 %v9415_v18, %v3607_v39  ;;  %v3616_v16 = vadd.f32 %v9458_v43, %v9453_v47  ;;  %v4473_v31 = vadd.f32 %v9432_v57, %v9425_v12  ;;  %v9488_v8 = vpop.eup %5979 }
 0x503   :  { %11232 = vst [vmem:[#allocation135_spill] sm:$0xff] %v9488_v8  ;;  %6003 = vpow2.f32 %v3297_v61  ;;  %v2809_v44 = vsub.f32 %v11233_v1, %v2552_v53  ;;  %v2810_v0 = vsub.f32 %v11234_v51, %v2552_v53  ;;  %v2811_v34 = vsub.f32 %v11235_v6, %v2552_v53  ;;  %v9493_v24 = vpop.f32.mrf.mxu1  ;;  %v9497_v27 = vpop.eup %5981 }
 0x504   :  { %11236 = vst [vmem:[#allocation15_spill] sm:$0xff] %v9497_v27  ;;  %6005 = vpow2.f32 %v3299_v36  ;;  %v2812_v39 = vsub.f32 %v8500_v52, %v2552_v53  ;;  %3609 = vadd.xlane.f32.xlu1 %v3608_v54  ;;  %v3613_v12 = vadd.f32 %v9443_v55, %v3612_v15  ;;  %v3858_v57 = vmul.f32 %v5978_v21, %v8867_v25  ;;  %v9502_v61 = vpop.eup %5983  ;;  %v11239_v36 = vld [vmem:[#allocation243_spill] sm:$0xff]  ;;  %v11240_v52 = vld [vmem:[#allocation245_spill] sm:$0xff]  ;;  %v11241_v54 = vld [vmem:[#allocation252_spill] sm:$0xff]  ;;  %v4482_v25 = vpop.f32.mrf.mxu0 }
 0x505   :  { %4721 = vst [vmem:[#allocation10 + $0x10] sm:$0xff] %v4473_v31  ;;  %11237 = vst [vmem:[#allocation168_spill] sm:$0xff] %v9502_v61  ;;  %6007 = vrcp.f32 %v3525_v32  ;;  %v3301_v26 = vmul.f32 1.442695, %v2809_v44  ;;  %v3303_v22 = vmul.f32 1.442695, %v2810_v0  ;;  %v4193_v51 = vpop.f32.mrf.mxu1  ;;  %v9504_v6 = vpop.eup %5985  ;;  %v3860_v0 = vmul.f32 %v5978_v21, %v8878_v58 }
 0x506   :  { %v3305_v48 = vmul.f32 1.442695, %v2811_v34  ;;  %v2557_v1 = vpop.xlane.xlu0 %2556  ;;  %11238 = vst [vmem:[#allocation138_spill] sm:$0xff] %v9504_v6  ;;  %v3307_v50 = vmul.f32 1.442695, %v2812_v39  ;;  %3614 = vadd.xlane.f32.xlu0 %v3613_v12  ;;  %v5988_v31 = vpop.eup %5987  ;;  %v4046_v44 = vpack.c.bf16 %v3858_v57, %v9465_v4  ;;  %v4476_v25 = vadd.f32 %v9450_v59, %v9445_v42  ;;  %v11246_v42 = vld [vmem:[#allocation68_spill] sm:$0xff] }
 0x507   :  { %v2813_v47 = vsub.f32 %v11239_v36, %v2557_v1  ;;  %v2814_v53 = vsub.f32 %v11240_v52, %v2557_v1  ;;  %v2815_v15 = vsub.f32 %v11241_v54, %v2557_v1  ;;  %6009 = vpow2.f32 %v3301_v26  ;;  %v9512_v34 = vpop.f32.mrf.mxu1  ;;  %v9514_v43 = vpop.f32.mrf.mxu0  ;;  %v11242_v26 = vld [vmem:[#allocation26_spill] sm:$0xff] }
 0x508   :  { %v2816_v32 = vsub.f32 %v8534_v46, %v2557_v1  ;;  %6011 = vpow2.f32 %v3303_v22  ;;  %v3530_v12 = vpop.xlane.xlu1 %3529  ;;  %4301 = vmatprep.mubr.bf16.mxu1 %v4046_v44  ;;  %v4048_v46 = vpack.c.bf16 %v3860_v0, %v9472_v5  ;;  %v3857_v4 = vmul.f32 %v5978_v21, %v11242_v26  ;;  %v11243_v22 = vld [vmem:[#allocation181_spill] sm:$0xff]  ;;  %4722 = vst [vmem:[#allocation10 + $0x18] sm:$0xff] %v4476_v25 }
 0x509   :  { %v3309_v39 = vmul.f32 1.442695, %v2813_v47  ;;  %v3311_v51 = vmul.f32 1.442695, %v2814_v53  ;;  %v3313_v36 = vmul.f32 1.442695, %v2815_v15  ;;  %v9516_v52 = vpop.eup %5989  ;;  %6013 = vpow2.f32 %v3305_v48  ;;  %v4196_v57 = vpop.f32.mrf.mxu1 }
 0x50a   :  { %v3315_v54 = vmul.f32 1.442695, %v2816_v32  ;;  %v9520_v58 = vpop.eup %5991  ;;  %6015 = vpow2.f32 %v3307_v50  ;;  %v3859_v47 = vmul.f32 %v5978_v21, %v11243_v22  ;;  %v3617_v1 = vadd.f32 %v9467_v37, %v3616_v16  ;;  %v4485_v15 = vpop.f32.mrf.mxu0  ;;  %4590 = vmatprep.mubr.bf16.mxu0 %v4048_v46  ;;  %v11244_v32 = vld [vmem:[#allocation179_spill] sm:$0xff] }
 0x50b   :  { %v3621_v53 = vadd.f32 %v9497_v27, %v9488_v8  ;;  %v9526_v48 = vpop.eup %5993  ;;  %6017 = vrcp.f32 %v3530_v12  ;;  %v4045_v5 = vpack.c.bf16 %v3857_v4, %v9478_v2  ;;  %v3862_v44 = vmul.f32 %v5988_v31, %v11244_v32  ;;  %v11245_v2 = vld [vmem:[#allocation89_spill] sm:$0xff]  ;;  %v11247_v4 = vld [vmem:[#allocation87_spill] sm:$0xff] }
 0x50c   :  { %v9532_v50 = vpop.eup %5995  ;;  %6019 = vpow2.f32 %v3309_v39  ;;  %v4047_v21 = vpack.c.bf16 %v3859_v47, %v9481_v28  ;;  %v3535_v16 = vpop.xlane.xlu0 %3534  ;;  %v3618_v0 = vadd.f32 %v9474_v63, %v3617_v1  ;;  %v3864_v46 = vmul.f32 %v5988_v31, %v11245_v2  ;;  %v11249_v47 = vld [vmem:[#allocation246_spill] sm:$0xff]  ;;  %v11251_v15 = vld [vmem:[#allocation29_spill] sm:$0xff] }
 0x50d   :  { %v3622_v26 = vadd.f32 %v9502_v61, %v3621_v53  ;;  %v5998_v57 = vpop.eup %5997  ;;  %6021 = vpow2.f32 %v3311_v51  ;;  %4302 = vmatmul.mubr.bf16.gmra.mxu1 %v4045_v5  ;;  %v9539_v59 = vmul.f32 %v5988_v31, %v11246_v42  ;;  %v9542_v22 = vmul.f32 %v5988_v31, %v11247_v4  ;;  %v9544_v39 = vpop.f32.mrf.mxu1  ;;  %v11250_v51 = vld [vmem:[#allocation248_spill] sm:$0xff] }
 0x50e   :  { %v2562_v12 = vpop.xlane.xlu1 %2561  ;;  %v9546_v28 = vpop.eup %5999  ;;  %6023 = vpow2.f32 %v3313_v36  ;;  %4591 = vmatmul.mubr.bf16.gmra.mxu0 %v4047_v21  ;;  %3619 = vadd.xlane.f32.xlu1 %v3618_v0  ;;  %v3866_v2 = vmul.f32 %v5998_v57, %v8921_v56 }
 0x50f   :  { %11248 = vst [vmem:[#allocation141_spill] sm:$0xff] %v9546_v28  ;;  %v2817_v1 = vsub.f32 %v11249_v47, %v2562_v12  ;;  %v2818_v53 = vsub.f32 %v11250_v51, %v2562_v12  ;;  %v2819_v5 = vsub.f32 %v11251_v15, %v2562_v12  ;;  %v9551_v25 = vpop.eup %6001  ;;  %6025 = vpow2.f32 %v3315_v54  ;;  %v9556_v42 = vpop.f32.mrf.mxu0  ;;  %v11253_v54 = vld [vmem:[#allocation249_spill] sm:$0xff] }
 0x510   :  { %v2820_v32 = vsub.f32 %v8590_v41, %v2562_v12  ;;  %v3623_v31 = vadd.f32 %v9504_v6, %v3622_v26  ;;  %v4201_v36 = vpop.f32.mrf.mxu1  ;;  %v9558_v21 = vpop.eup %6003  ;;  %6027 = vrcp.f32 %v3535_v16  ;;  %v11254_v41 = vld [vmem:[#allocation251_spill] sm:$0xff]  ;;  %v11255_v26 = vld [vmem:[#allocation33_spill] sm:$0xff] }
 0x511   :  { %11252 = vst [vmem:[#allocation54_spill] sm:$0xff] %v9558_v21  ;;  %v3317_v4 = vmul.f32 1.442695, %v2817_v1  ;;  %v3319_v47 = vmul.f32 1.442695, %v2818_v53  ;;  %v9560_v0 = vpop.eup %6005  ;;  %v4490_v56 = vpop.f32.mrf.mxu0  ;;  %v4050_v1 = vpack.c.bf16 %v3866_v2, %v3862_v44  ;;  %v11256_v53 = vld [vmem:[#allocation91_spill] sm:$0xff] }
 0x512   :  { %v3321_v51 = vmul.f32 1.442695, %v2819_v5  ;;  %v2567_v15 = vpop.xlane.xlu0 %2566  ;;  %v3323_v61 = vmul.f32 1.442695, %v2820_v32  ;;  %3624 = vadd.xlane.f32.xlu0 %v3623_v31  ;;  %v9565_v27 = vpop.f32.mrf.mxu1  ;;  %v3868_v5 = vmul.f32 %v5998_v57, %v11256_v53  ;;  %v11258_v44 = vld [vmem:[#allocation142_spill] sm:$0xff]  ;;  %v11261_v53 = vld [vmem:[#allocation93_spill] sm:$0xff] }
 0x513   :  { %v2821_v8 = vsub.f32 %v11253_v54, %v2567_v15  ;;  %v2822_v12 = vsub.f32 %v11254_v41, %v2567_v15  ;;  %v2823_v6 = vsub.f32 %v11255_v26, %v2567_v15  ;;  %v9567_v36 = vpop.eup %6007  ;;  %6029 = vpow2.f32 %v3317_v4  ;;  %v9571_v63 = vpop.f32.mrf.mxu0  ;;  %4309 = vmatprep.mubr.bf16.mxu1 %v4050_v1  ;;  %v11257_v4 = vld [vmem:[#allocation140_spill] sm:$0xff] }
 0x514   :  { %v2824_v16 = vsub.f32 %v11087_v60, %v2567_v15  ;;  %6031 = vpow2.f32 %v3319_v47  ;;  %v4204_v41 = vpop.f32.mrf.mxu1  ;;  %v9573_v26 = vpop.eup %6009  ;;  %v4052_v29 = vpack.c.bf16 %v3868_v5, %v3864_v46  ;;  %v3865_v55 = vmul.f32 %v5998_v57, %v11257_v4 }
 0x515   :  { %v3325_v32 = vmul.f32 1.442695, %v2821_v8  ;;  %v3327_v37 = vmul.f32 1.442695, %v2822_v12  ;;  %v3329_v54 = vmul.f32 1.442695, %v2823_v6  ;;  %6033 = vpow2.f32 %v3321_v51  ;;  %v3540_v31 = vpop.xlane.xlu1 %3539  ;;  %v9576_v60 = vpop.eup %6011 }
 0x516   :  { %v3331_v56 = vmul.f32 1.442695, %v2824_v16  ;;  %6035 = vpow2.f32 %v3323_v61  ;;  %v3867_v2 = vmul.f32 %v5998_v57, %v11258_v44  ;;  %v3626_v8 = vadd.f32 %v9520_v58, %v9516_v52  ;;  %v4493_v47 = vpop.f32.mrf.mxu0  ;;  %v9583_v15 = vpop.eup %6013  ;;  %4598 = vmatprep.mubr.bf16.mxu0 %v4052_v29  ;;  %v11262_v41 = vld [vmem:[#allocation253_spill] sm:$0xff] }
 0x517   :  { %v4481_v6 = vadd.f32 %v9495_v62, %v9493_v24  ;;  %6037 = vrcp.f32 %v3540_v31  ;;  %v4049_v46 = vpack.c.bf16 %v3865_v55, %v9539_v59  ;;  %v3631_v51 = vadd.f32 %v9551_v25, %v9546_v28  ;;  %v9590_v57 = vpop.eup %6015  ;;  %v11259_v62 = vld [vmem:[#allocation143_spill] sm:$0xff]  ;;  %v9606_v44 = vpop.f32.mrf.mxu1 }
 0x518   :  { %v4484_v61 = vadd.f32 %v9514_v43, %v9512_v34  ;;  %6039 = vpow2.f32 %v3325_v32  ;;  %v4051_v12 = vpack.c.bf16 %v3867_v2, %v9542_v22  ;;  %v3627_v24 = vadd.f32 %v9526_v48, %v3626_v8  ;;  %v6018_v29 = vpop.eup %6017  ;;  %v3545_v55 = vpop.xlane.xlu0 %3544  ;;  %v11260_v43 = vld [vmem:[#allocation34_spill] sm:$0xff]  ;;  %v11263_v31 = vld [vmem:[#allocation151_spill] sm:$0xff] }
 0x519   :  { %4723 = vst [vmem:[#allocation10 + $0x20] sm:$0xff] %v4481_v6  ;;  %v3870_v16 = vmul.f32 %v9567_v36, %v11259_v62  ;;  %6041 = vpow2.f32 %v3327_v37  ;;  %4310 = vmatmul.mubr.bf16.gmra.mxu1 %v4049_v46  ;;  %v3632_v1 = vadd.f32 %v9558_v21, %v3631_v51  ;;  %v3872_v34 = vmul.f32 %v9567_v36, %v11260_v43  ;;  %v9601_v5 = vpop.eup %6019  ;;  %v4496_v46 = vpop.f32.mrf.mxu0  ;;  %v11267_v21 = vld [vmem:[#allocation145_spill] sm:$0xff] }
 0x51a   :  { %v2572_v59 = vpop.xlane.xlu1 %2571  ;;  %4724 = vst [vmem:[#allocation10 + $0x28] sm:$0xff] %v4484_v61  ;;  %v3869_v22 = vmul.f32 %v9567_v36, %v11261_v53  ;;  %6043 = vpow2.f32 %v3329_v54  ;;  %4599 = vmatmul.mubr.bf16.gmra.mxu0 %v4051_v12  ;;  %v9608_v2 = vpop.eup %6021  ;;  %v3628_v6 = vadd.f32 %v9532_v50, %v3627_v24  ;;  %v11266_v24 = vld [vmem:[#allocation36_spill] sm:$0xff] }
 0x51b   :  { %v2825_v32 = vsub.f32 %v8502_v9, %v2572_v59  ;;  %v2826_v37 = vsub.f32 %v11262_v41, %v2572_v59  ;;  %v2827_v4 = vsub.f32 %v11263_v31, %v2572_v59  ;;  %6045 = vpow2.f32 %v3331_v56  ;;  %v9613_v54 = vpop.eup %6023  ;;  %v4209_v12 = vpop.f32.mrf.mxu1  ;;  %v11264_v56 = vld [vmem:[#allocation183_spill] sm:$0xff] }
 0x51c   :  { %v2828_v8 = vsub.f32 %v9110_v10, %v2572_v59  ;;  %v3633_v47 = vadd.f32 %v9560_v0, %v3632_v1  ;;  %6047 = vrcp.f32 %v3545_v55  ;;  %v9615_v62 = vpop.eup %6025  ;;  %3629 = vadd.xlane.f32.xlu1 %v3628_v6  ;;  %v3874_v53 = vmul.f32 %v6018_v29, %v11264_v56  ;;  %v11265_v10 = vld [vmem:[#allocation95_spill] sm:$0xff]  ;;  %v4498_v1 = vpop.f32.mrf.mxu0 }
 0x51d   :  { %v3333_v9 = vmul.f32 1.442695, %v2825_v32  ;;  %v3335_v51 = vmul.f32 1.442695, %v2826_v37  ;;  %v3337_v61 = vmul.f32 1.442695, %v2827_v4  ;;  %v3876_v59 = vmul.f32 %v6018_v29, %v11265_v10  ;;  %v6028_v31 = vpop.eup %6027 }
 0x51e   :  { %v3339_v43 = vmul.f32 1.442695, %v2828_v8  ;;  %3634 = vadd.xlane.f32.xlu0 %v3633_v47  ;;  %v3873_v41 = vmul.f32 %v6018_v29, %v11266_v24  ;;  %v3871_v55 = vmul.f32 %v9567_v36, %v11267_v21  ;;  %v11268_v32 = vld [vmem:[#allocation185_spill] sm:$0xff]  ;;  %v3636_v4 = vadd.f32 %v9576_v60, %v9573_v26  ;;  %v4210_v8 = vpop.f32.mrf.mxu1  ;;  %v4499_v56 = vpop.f32.mrf.mxu0 }
 0x51f   :  { %6049 = vpow2.f32 %v3333_v9  ;;  %v3875_v37 = vmul.f32 %v6018_v29, %v11268_v32  ;;  %v4054_v6 = vpack.c.bf16 %v3874_v53, %v3870_v16  ;;  %v4056_v47 = vpack.c.bf16 %v3876_v59, %v3872_v34  ;;  %v11270_v59 = vld [vmem:[#allocation40_spill] sm:$0xff] }
 0x520   :  { %6051 = vpow2.f32 %v3335_v51  ;;  %v4053_v12 = vpack.c.bf16 %v3873_v41, %v3869_v22  ;;  %v9625_v10 = vpop.eup %6029  ;;  %v3550_v24 = vpop.xlane.xlu1 %3549  ;;  %v3637_v28 = vadd.f32 %v9583_v15, %v3636_v4  ;;  %v4489_v21 = vadd.f32 %v9556_v42, %v9544_v39 }
 0x521   :  { %6053 = vpow2.f32 %v3337_v61  ;;  %v4055_v1 = vpack.c.bf16 %v3875_v37, %v3871_v55  ;;  %v3555_v9 = vpop.xlane.xlu0 %3554  ;;  %v9630_v36 = vpop.eup %6031  ;;  %4317 = vmatprep.mubr.bf16.mxu1 %v4054_v6  ;;  %4606 = vmatprep.mubr.bf16.mxu0 %v4056_v47  ;;  %v3641_v16 = vadd.f32 %v9608_v2, %v9601_v5  ;;  %v4492_v29 = vadd.f32 %v9571_v63, %v9565_v27  ;;  %v11271_v55 = vld [vmem:[#allocation97_spill] sm:$0xff] }
 0x522   :  { %6055 = vpow2.f32 %v3339_v43  ;;  %v4501_v34 = vpop.f32.mrf.mxu0  ;;  %v4212_v22 = vpop.f32.mrf.mxu1  ;;  %4318 = vmatmul.mubr.bf16.gmra.mxu1 %v4053_v12  ;;  %v3638_v39 = vadd.f32 %v9590_v57, %v3637_v28  ;;  %4725 = vst [vmem:[#allocation10 + $0x30] sm:$0xff] %v4489_v21  ;;  %v11269_v43 = vld [vmem:[#allocation146_spill] sm:$0xff]  ;;  %v3880_v41 = vmul.f32 %v6028_v31, %v11270_v59  ;;  %v3646_v63 = vadd.f32 %v9630_v36, %v9625_v10 }
 0x523   :  { %v9636_v51 = vpop.eup %6033  ;;  %6057 = vrcp.f32 %v3550_v24  ;;  %4607 = vmatmul.mubr.bf16.gmra.mxu0 %v4055_v1  ;;  %v3642_v61 = vadd.f32 %v9613_v54, %v3641_v16  ;;  %4726 = vst [vmem:[#allocation10 + $0x38] sm:$0xff] %v4492_v29  ;;  %v3878_v53 = vmul.f32 %v6028_v31, %v11269_v43  ;;  %v3877_v32 = vmul.f32 %v6028_v31, %v11271_v55  ;;  %v11272_v24 = vld [vmem:[#allocation57_spill] sm:$0xff]  ;;  %v11273_v29 = vld [vmem:[#allocation148_spill] sm:$0xff] }
 0x524   :  { %v9639_v42 = vpop.eup %6035  ;;  %6059 = vrcp.f32 %v3555_v9  ;;  %3639 = vadd.xlane.f32.xlu1 %v3638_v39  ;;  %v4497_v28 = vadd.f32 %v4496_v46, %v9606_v44  ;;  %v4500_v37 = vadd.f32 %v4499_v56, %v4210_v8  ;;  %v4215_v21 = vpop.f32.mrf.mxu1  ;;  %v3879_v34 = vmul.f32 %v6028_v31, %v11273_v29  ;;  %v11274_v22 = vld [vmem:[#allocation32_spill] sm:$0xff] }
 0x525   :  { %v6038_v27 = vpop.eup %6037  ;;  %v3643_v6 = vadd.f32 %v9615_v62, %v3642_v61  ;;  %v3647_v46 = vadd.f32 %v9636_v51, %v3646_v63  ;;  %v4504_v61 = vpop.f32.mrf.mxu0 }
 0x526   :  { %v9648_v4 = vpop.eup %6039  ;;  %v3882_v47 = vmul.f32 %v6038_v27, %v9042_v13  ;;  %v3884_v12 = vmul.f32 %v6038_v27, %v9055_v38  ;;  %v3881_v1 = vmul.f32 %v6038_v27, %v11272_v24  ;;  %v3560_v9 = vpop.xlane.xlu1 %3559  ;;  %v3883_v39 = vmul.f32 %v6038_v27, %v11274_v22  ;;  %4727 = vst [vmem:[#allocation10 + $0x40] sm:$0xff] %v4497_v28 }
 0x527   :  { %v9654_v16 = vpop.eup %6041  ;;  %v3565_v44 = vpop.xlane.xlu0 %3564  ;;  %4728 = vst [vmem:[#allocation10 + $0x48] sm:$0xff] %v4500_v37  ;;  %6061 = vrcp.f32 %v3560_v9  ;;  %3644 = vadd.xlane.f32.xlu0 %v3643_v6  ;;  %v3648_v31 = vadd.f32 %v9639_v42, %v3647_v46  ;;  %v4505_v28 = vadd.f32 %v4504_v61, %v4215_v21  ;;  %v11277_v61 = vld [vmem:[#allocation38_spill] sm:$0xff] }
 0x528   :  { %v9659_v8 = vpop.eup %6043  ;;  %v4058_v13 = vpack.c.bf16 %v3882_v47, %v3878_v53  ;;  %v4060_v38 = vpack.c.bf16 %v3884_v12, %v3880_v41  ;;  %v4057_v56 = vpack.c.bf16 %v3881_v1, %v3877_v32  ;;  %v4217_v43 = vpop.f32.mrf.mxu1  ;;  %v4059_v55 = vpack.c.bf16 %v3883_v39, %v3879_v34 }
 0x529   :  { %v9661_v59 = vpop.eup %6045  ;;  %v3651_v27 = vadd.f32 %v9654_v16, %v9648_v4  ;;  %v4506_v37 = vpop.f32.mrf.mxu0  ;;  %6063 = vrcp.f32 %v3565_v44  ;;  %3649 = vadd.xlane.f32.xlu1 %v3648_v31  ;;  %4729 = vst [vmem:[#allocation10 + $0x50] sm:$0xff] %v4505_v28  ;;  %v11275_v44 = vld [vmem:[#allocation99_spill] sm:$0xff] }
 0x52a   :  { %v6048_v63 = vpop.eup %6047  ;;  %4325 = vmatprep.mubr.bf16.mxu1 %v4058_v13  ;;  %4614 = vmatprep.mubr.bf16.mxu0 %v4060_v38  ;;  %v4218_v24 = vpop.f32.mrf.mxu1  ;;  %v11276_v13 = vld [vmem:[#allocation149_spill] sm:$0xff] }
 0x52b   :  { %4326 = vmatmul.mubr.bf16.gmra.mxu1 %v4057_v56  ;;  %4615 = vmatmul.mubr.bf16.gmra.mxu0 %v4059_v55  ;;  %v3652_v53 = vadd.f32 %v9659_v8, %v3651_v27  ;;  %v3570_v32 = vpop.xlane.xlu1 %3569  ;;  %v4507_v6 = vpop.f32.mrf.mxu0  ;;  %v3886_v46 = vmul.f32 %v6048_v63, %v11275_v44  ;;  %v3888_v38 = vmul.f32 %v6048_v63, %v11276_v13  ;;  %v11278_v55 = vld [vmem:[#allocation101_spill] sm:$0xff] }
 0x52c   :  { %v9667_v41 = vpop.eup %6049  ;;  %6065 = vrcp.f32 %v3570_v32  ;;  %v3575_v1 = vpop.xlane.xlu0 %3574  ;;  %v4508_v21 = vadd.f32 %v4507_v6, %v4218_v24  ;;  %v3885_v43 = vmul.f32 %v6048_v63, %v11277_v61  ;;  %v3887_v31 = vmul.f32 %v6048_v63, %v11278_v55 }
 0x52d   :  { %v9669_v47 = vpop.eup %6051  ;;  %v3653_v12 = vadd.f32 %v9661_v59, %v3652_v53  ;;  %v4220_v9 = vpop.f32.mrf.mxu1  ;;  %6067 = vrcp.f32 %v3575_v1 }
 0x52e   :  { %v9672_v29 = vpop.eup %6053  ;;  %v3656_v34 = vadd.f32 %v9669_v47, %v9667_v41  ;;  %v4509_v22 = vpop.f32.mrf.mxu0  ;;  %4730 = vst [vmem:[#allocation10 + $0x58] sm:$0xff] %v4508_v21 }
 0x52f   :  { %v9676_v39 = vpop.eup %6055  ;;  %3654 = vadd.xlane.f32.xlu0 %v3653_v12  ;;  %v4223_v32 = vpop.f32.mrf.mxu1 }
 0x530   :  { %v6058_v56 = vpop.eup %6057  ;;  %v3657_v27 = vadd.f32 %v9672_v29, %v3656_v34  ;;  %v4512_v63 = vpop.f32.mrf.mxu0 }
 0x531   :  { %v3890_v28 = vmul.f32 %v6058_v56, %v9108_v20  ;;  %v3892_v37 = vmul.f32 %v6058_v56, %v9123_v14  ;;  %v3889_v24 = vmul.f32 %v6058_v56, %v9099_v17  ;;  %v3891_v53 = vmul.f32 %v6058_v56, %v9113_v35  ;;  %v6060_v6 = vpop.eup %6059  ;;  %v3580_v21 = vpop.xlane.xlu1 %3579 }
 0x532   :  { %v3658_v12 = vadd.f32 %v9676_v39, %v3657_v27  ;;  %v4225_v13 = vpop.f32.mrf.mxu1  ;;  %6069 = vrcp.f32 %v3580_v21  ;;  %v4513_v20 = vadd.f32 %v4512_v63, %v4223_v32  ;;  %v3894_v17 = vmul.f32 %v6060_v6, %v9134_v30  ;;  %v4514_v14 = vpop.f32.mrf.mxu0  ;;  %v11284_v63 = vld [vmem:[#allocation187_spill] sm:$0xff] }
 0x533   :  { %v4062_v1 = vpack.c.bf16 %v3890_v28, %v3886_v46  ;;  %v4064_v9 = vpack.c.bf16 %v3892_v37, %v3888_v38  ;;  %v4061_v22 = vpack.c.bf16 %v3889_v24, %v3885_v43  ;;  %v4063_v44 = vpack.c.bf16 %v3891_v53, %v3887_v31  ;;  %v11279_v43 = vld [vmem:[#allocation103_spill] sm:$0xff]  ;;  %v11280_v31 = vld [vmem:[#allocation152_spill] sm:$0xff]  ;;  %v11281_v53 = vld [vmem:[#allocation105_spill] sm:$0xff] }
 0x534   :  { %3659 = vadd.xlane.f32.xlu1 %v3658_v12  ;;  %v6062_v34 = vpop.eup %6061  ;;  %v3896_v35 = vmul.f32 %v6060_v6, %v9149_v3  ;;  %v4226_v56 = vpop.f32.mrf.mxu1  ;;  %4731 = vst [vmem:[#allocation10 + $0x60] sm:$0xff] %v4513_v20  ;;  %v3893_v55 = vmul.f32 %v6060_v6, %v11279_v43  ;;  %v3895_v32 = vmul.f32 %v6060_v6, %v11281_v53  ;;  %v11285_v20 = vld [vmem:[#allocation108_spill] sm:$0xff] }
 0x535   :  { %4333 = vmatprep.mubr.bf16.mxu1 %v4062_v1  ;;  %4622 = vmatprep.mubr.bf16.mxu0 %v4064_v9  ;;  %v3898_v46 = vmul.f32 %v6062_v34, %v9170_v7  ;;  %v3900_v38 = vmul.f32 %v6062_v34, %v9183_v40  ;;  %v3897_v61 = vmul.f32 %v6062_v34, %v9166_v49  ;;  %v4515_v28 = vpop.f32.mrf.mxu0  ;;  %v11282_v49 = vld [vmem:[#allocation72_spill] sm:$0xff] }
 0x536   :  { %4334 = vmatmul.mubr.bf16.gmra.mxu1 %v4061_v22  ;;  %4623 = vmatmul.mubr.bf16.gmra.mxu0 %v4063_v44  ;;  %v3899_v27 = vmul.f32 %v6062_v34, %v11280_v31  ;;  %v4228_v37 = vpop.f32.mrf.mxu1  ;;  %v6064_v30 = vpop.eup %6063  ;;  %v4516_v12 = vadd.f32 %v4515_v28, %v4226_v56  ;;  %v11283_v22 = vld [vmem:[#allocation69_spill] sm:$0xff] }
 0x537   :  { %v4066_v24 = vpack.c.bf16 %v3898_v46, %v3894_v17  ;;  %v4068_v3 = vpack.c.bf16 %v3900_v38, %v3896_v35  ;;  %v4517_v21 = vpop.f32.mrf.mxu0  ;;  %v4065_v7 = vpack.c.bf16 %v3897_v61, %v3893_v55  ;;  %v3902_v9 = vmul.f32 %v6064_v30, %v11282_v49  ;;  %v11286_v56 = vld [vmem:[#allocation189_spill] sm:$0xff]  ;;  %v11289_v37 = vld [vmem:[#allocation76_spill] sm:$0xff] }
 0x538   :  { %v4067_v40 = vpack.c.bf16 %v3899_v27, %v3895_v32  ;;  %4732 = vst [vmem:[#allocation10 + $0x68] sm:$0xff] %v4516_v12  ;;  %v3904_v13 = vmul.f32 %v6064_v30, %v11284_v63  ;;  %v11287_v38 = vld [vmem:[#allocation49_spill] sm:$0xff]  ;;  %v11288_v27 = vld [vmem:[#allocation154_spill] sm:$0xff] }
 0x539   :  { %v6066_v1 = vpop.eup %6065  ;;  %4341 = vmatprep.mubr.bf16.mxu1 %v4066_v24  ;;  %4630 = vmatprep.mubr.bf16.mxu0 %v4068_v3  ;;  %v3901_v28 = vmul.f32 %v6064_v30, %v11288_v27  ;;  %v3903_v24 = vmul.f32 %v6064_v30, %v11289_v37  ;;  %v11290_v12 = vld [vmem:[#allocation78_spill] sm:$0xff] }
 0x53a   :  { %v3906_v44 = vmul.f32 %v6066_v1, %v11283_v22  ;;  %v3908_v34 = vmul.f32 %v6066_v1, %v11285_v20  ;;  %v4231_v17 = vpop.f32.mrf.mxu1  ;;  %v6068_v35 = vpop.eup %6067  ;;  %v3905_v46 = vmul.f32 %v6066_v1, %v11286_v56  ;;  %v3907_v61 = vmul.f32 %v6066_v1, %v11287_v38  ;;  %v11292_v22 = vld [vmem:[#allocation114_spill] sm:$0xff]  ;;  %v11295_v38 = vld [vmem:[#allocation117_spill] sm:$0xff] }
 0x53b   :  { %v4520_v43 = vpop.f32.mrf.mxu0  ;;  %v3910_v21 = vmul.f32 %v6068_v35, %v11290_v12  ;;  %v11293_v63 = vld [vmem:[#allocation158_spill] sm:$0xff] }
 0x53c   :  { %v4070_v14 = vpack.c.bf16 %v3906_v44, %v3902_v9  ;;  %v4072_v6 = vpack.c.bf16 %v3908_v34, %v3904_v13  ;;  %v4233_v55 = vpop.f32.mrf.mxu1  ;;  %v4521_v31 = vadd.f32 %v4520_v43, %v4231_v17  ;;  %v4069_v49 = vpack.c.bf16 %v3905_v46, %v3901_v28 }
 0x53d   :  { %v4522_v3 = vpop.f32.mrf.mxu0  ;;  %v4071_v9 = vpack.c.bf16 %v3907_v61, %v3903_v24  ;;  %v11296_v61 = vld [vmem:[#allocation74_spill] sm:$0xff] }
 0x53e   :  { %4342 = vmatmul.mubr.bf16.gmra.mxu1 %v4065_v7  ;;  %4631 = vmatmul.mubr.bf16.gmra.mxu0 %v4067_v40  ;;  %v4234_v53 = vpop.f32.mrf.mxu1  ;;  %4733 = vst [vmem:[#allocation10 + $0x70] sm:$0xff] %v4521_v31  ;;  %v11291_v7 = vld [vmem:[#allocation155_spill] sm:$0xff]  ;;  %v3909_v55 = vmul.f32 %v6068_v35, %v11296_v61 }
 0x53f   :  { %4349 = vmatprep.mubr.bf16.mxu1 %v4070_v14  ;;  %4638 = vmatprep.mubr.bf16.mxu0 %v4072_v6  ;;  %v6070_v32 = vpop.eup %6069  ;;  %v3912_v40 = vmul.f32 %v6068_v35, %v11291_v7  ;;  %v4523_v1 = vpop.f32.mrf.mxu0  ;;  %v11294_v6 = vld [vmem:[#allocation157_spill] sm:$0xff]  ;;  %v11297_v31 = vld [vmem:[#allocation111_spill] sm:$0xff] }
 0x540   :  { %v3914_v44 = vmul.f32 %v6070_v32, %v11292_v22  ;;  %v3916_v13 = vmul.f32 %v6070_v32, %v11293_v63  ;;  %v4236_v20 = vpop.f32.mrf.mxu1  ;;  %v4524_v34 = vadd.f32 %v4523_v1, %v4234_v53  ;;  %v3913_v56 = vmul.f32 %v6070_v32, %v11294_v6 }
 0x541   :  { %v4525_v30 = vpop.f32.mrf.mxu0  ;;  %v3915_v43 = vmul.f32 %v6070_v32, %v11295_v38  ;;  %v3911_v27 = vmul.f32 %v6068_v35, %v11297_v31 }
 0x542   :  { %v4074_v17 = vpack.c.bf16 %v3914_v44, %v3910_v21  ;;  %v4076_v14 = vpack.c.bf16 %v3916_v13, %v3912_v40  ;;  %4734 = vst [vmem:[#allocation10 + $0x78] sm:$0xff] %v4524_v34  ;;  %v4073_v24 = vpack.c.bf16 %v3913_v56, %v3909_v55 }
 0x543   :  { %v4075_v3 = vpack.c.bf16 %v3915_v43, %v3911_v27 }
 0x546   :  { %4350 = vmatmul.mubr.bf16.gmra.mxu1 %v4069_v49  ;;  %4639 = vmatmul.mubr.bf16.gmra.mxu0 %v4071_v9  ;;  %v4239_v46 = vpop.f32.mrf.mxu1 }
 0x547   :  { %4357 = vmatprep.mubr.bf16.mxu1 %v4074_v17  ;;  %4646 = vmatprep.mubr.bf16.mxu0 %v4076_v14  ;;  %v4528_v28 = vpop.f32.mrf.mxu0 }
 0x548   :  { %v4241_v37 = vpop.f32.mrf.mxu1  ;;  %v4529_v53 = vadd.f32 %v4528_v28, %v4239_v46 }
 0x549   :  { %v4530_v12 = vpop.f32.mrf.mxu0 }
 0x54a   :  { %v4242_v21 = vpop.f32.mrf.mxu1  ;;  %4735 = vst [vmem:[#allocation10 + $0x80] sm:$0xff] %v4529_v53 }
 0x54b   :  { %v4531_v7 = vpop.f32.mrf.mxu0 }
 0x54c   :  { %v4244_v40 = vpop.f32.mrf.mxu1  ;;  %v4532_v32 = vadd.f32 %v4531_v7, %v4242_v21 }
 0x54d   :  { %v4533_v49 = vpop.f32.mrf.mxu0 }
 0x54e   :  { %4358 = vmatmul.mubr.bf16.gmra.mxu1 %v4073_v24  ;;  %4647 = vmatmul.mubr.bf16.gmra.mxu0 %v4075_v3  ;;  %4736 = vst [vmem:[#allocation10 + $0x88] sm:$0xff] %v4532_v32 }
 0x551   :  { %v4247_v9 = vpop.f32.mrf.mxu1 }
 0x552   :  { %v4536_v1 = vpop.f32.mrf.mxu0 }
 0x553   :  { %v4249_v22 = vpop.f32.mrf.mxu1  ;;  %v4537_v44 = vadd.f32 %v4536_v1, %v4247_v9 }
 0x554   :  { %v4538_v35 = vpop.f32.mrf.mxu0  ;;  %v11298_v22 = vld [vmem:[#allocation80_spill] sm:$0xff] }
 0x555   :  { %v4250_v63 = vpop.f32.mrf.mxu1  ;;  %4737 = vst [vmem:[#allocation10 + $0x90] sm:$0xff] %v4537_v44  ;;  %v11299_v35 = vld [vmem:[#allocation191_spill] sm:$0xff] }
 0x556   :  { %v4539_v13 = vpop.f32.mrf.mxu0 }
 0x557   :  { %v4252_v20 = vpop.f32.mrf.mxu1  ;;  %v4540_v34 = vadd.f32 %v4539_v13, %v4250_v63  ;;  %v11300_v13 = vld [vmem:[#allocation160_spill] sm:$0xff] }
 0x558   :  { %v4541_v17 = vpop.f32.mrf.mxu0 }
 0x559   :  { %4738 = vst [vmem:[#allocation10 + $0x98] sm:$0xff] %v4540_v34  ;;  %v11301_v34 = vld [vmem:[#allocation47_spill] sm:$0xff] }
 0x55a   :  { %v4255_v14 = vpop.f32.mrf.mxu1  ;;  %v3585_v28 = vpop.xlane.xlu0 %3584 }
 0x55b   :  { %v4544_v30 = vpop.f32.mrf.mxu0  ;;  %6071 = vrcp.f32 %v3585_v28 }
 0x55c   :  { %v4545_v6 = vadd.f32 %v4544_v30, %v4255_v14  ;;  %v4257_v56 = vpop.f32.mrf.mxu1  ;;  %v11302_v14 = vld [vmem:[#allocation62_spill] sm:$0xff] }
 0x55d   :  { %v4546_v38 = vpop.f32.mrf.mxu0 }
 0x55e   :  { %4739 = vst [vmem:[#allocation10 + $0xa0] sm:$0xff] %v4545_v6  ;;  %v4258_v43 = vpop.f32.mrf.mxu1  ;;  %v11303_v6 = vld [vmem:[#allocation82_spill] sm:$0xff]  ;;  %v11304_v38 = vld [vmem:[#allocation193_spill] sm:$0xff] }
 0x55f   :  { %v4547_v46 = vpop.f32.mrf.mxu0  ;;  %v3590_v7 = vpop.xlane.xlu1 %3589 }
 0x560   :  { %v4548_v61 = vadd.f32 %v4547_v46, %v4258_v43  ;;  %v4260_v55 = vpop.f32.mrf.mxu1  ;;  %6073 = vrcp.f32 %v3590_v7  ;;  %v11305_v46 = vld [vmem:[#allocation51_spill] sm:$0xff]  ;;  %v11306_v7 = vld [vmem:[#allocation120_spill] sm:$0xff] }
 0x561   :  { %v4549_v31 = vpop.f32.mrf.mxu0 }
 0x562   :  { %4740 = vst [vmem:[#allocation10 + $0xa8] sm:$0xff] %v4548_v61  ;;  %v4263_v27 = vpop.f32.mrf.mxu1 }
 0x563   :  { %v4552_v37 = vpop.f32.mrf.mxu0 }
 0x564   :  { %v4553_v24 = vadd.f32 %v4552_v37, %v4263_v27  ;;  %v4265_v3 = vpop.f32.mrf.mxu1 }
 0x565   :  { %v4554_v53 = vpop.f32.mrf.mxu0 }
 0x566   :  { %4741 = vst [vmem:[#allocation10 + $0xb0] sm:$0xff] %v4553_v24  ;;  %v4266_v12 = vpop.f32.mrf.mxu1 }
 0x567   :  { %v4555_v21 = vpop.f32.mrf.mxu0 }
 0x568   :  { %v4556_v40 = vadd.f32 %v4555_v21, %v4266_v12  ;;  %v4268_v32 = vpop.f32.mrf.mxu1  ;;  %v6072_v9 = vpop.eup %6071 }
 0x569   :  { %v4557_v49 = vpop.f32.mrf.mxu0  ;;  %v3918_v44 = vmul.f32 %v6072_v9, %v11298_v22  ;;  %v3920_v63 = vmul.f32 %v6072_v9, %v11299_v35  ;;  %v3917_v20 = vmul.f32 %v6072_v9, %v11300_v13  ;;  %v3919_v17 = vmul.f32 %v6072_v9, %v11301_v34  ;;  %v11307_v32 = vld [vmem:[#allocation161_spill] sm:$0xff]  ;;  %v11308_v9 = vld [vmem:[#allocation126_spill] sm:$0xff]  ;;  %v11309_v22 = vld [vmem:[#allocation164_spill] sm:$0xff] }
 0x56a   :  { %4742 = vst [vmem:[#allocation10 + $0xb8] sm:$0xff] %v4556_v40  ;;  %v11310_v35 = vld [vmem:[#allocation84_spill] sm:$0xff]  ;;  %v11311_v13 = vld [vmem:[#allocation163_spill] sm:$0xff] }
 0x56d   :  { %v6074_v1 = vpop.eup %6073 }
 0x56e   :  { %v3922_v30 = vmul.f32 %v6074_v1, %v11302_v14  ;;  %v3924_v56 = vmul.f32 %v6074_v1, %v11303_v6  ;;  %v3921_v43 = vmul.f32 %v6074_v1, %v11304_v38  ;;  %v3923_v61 = vmul.f32 %v6074_v1, %v11305_v46 }
 0x570   :  { %v4078_v55 = vpack.c.bf16 %v3922_v30, %v3918_v44  ;;  %v4080_v31 = vpack.c.bf16 %v3924_v56, %v3920_v63  ;;  %v4077_v27 = vpack.c.bf16 %v3921_v43, %v3917_v20  ;;  %v4079_v28 = vpack.c.bf16 %v3923_v61, %v3919_v17  ;;  %v11312_v17 = vld [vmem:[#allocation123_spill] sm:$0xff]  ;;  %v11313_v30 = vld [vmem:[#allocation129_spill] sm:$0xff] }
 0x572   :  { %4365 = vmatprep.mubr.bf16.mxu1 %v4078_v55  ;;  %4654 = vmatprep.mubr.bf16.mxu0 %v4080_v31 }
 0x573   :  { %4366 = vmatmul.mubr.bf16.gmra.mxu1 %v4077_v27  ;;  %4655 = vmatmul.mubr.bf16.gmra.mxu0 %v4079_v28 }
 0x574   :  { %v3595_v37 = vpop.xlane.xlu0 %3594 }
 0x575   :  { %6075 = vrcp.f32 %v3595_v37 }
 0x580   :  { %v3600_v24 = vpop.xlane.xlu1 %3599 }
 0x581   :  { %6077 = vrcp.f32 %v3600_v24 }
 0x582   :  { %v3605_v3 = vpop.xlane.xlu0 %3604  ;;  %v6076_v53 = vpop.eup %6075 }
 0x583   :  { %6079 = vrcp.f32 %v3605_v3  ;;  %v3926_v40 = vmul.f32 %v6076_v53, %v11306_v7  ;;  %v3928_v49 = vmul.f32 %v6076_v53, %v11307_v32  ;;  %v3925_v63 = vmul.f32 %v6076_v53, %v11310_v35  ;;  %v11314_v32 = vld [vmem:[#allocation65_spill] sm:$0xff] }
 0x584   :  { %v3927_v14 = vmul.f32 %v6076_v53, %v11312_v17 }
 0x58c   :  { %v4271_v46 = vpop.f32.mrf.mxu1  ;;  %v4560_v61 = vpop.f32.mrf.mxu0 }
 0x58d   :  { %v3610_v12 = vpop.xlane.xlu1 %3609  ;;  %v4561_v31 = vadd.f32 %v4560_v61, %v4271_v46 }
 0x58e   :  { %6081 = vrcp.f32 %v3610_v12  ;;  %v6078_v21 = vpop.eup %6077  ;;  %v4273_v27 = vpop.f32.mrf.mxu1 }
 0x58f   :  { %v3930_v1 = vmul.f32 %v6078_v21, %v11308_v9  ;;  %v3932_v44 = vmul.f32 %v6078_v21, %v11309_v22  ;;  %v3929_v20 = vmul.f32 %v6078_v21, %v11311_v13  ;;  %v3615_v34 = vpop.xlane.xlu0 %3614  ;;  %v3931_v6 = vmul.f32 %v6078_v21, %v11313_v30  ;;  %v4562_v28 = vpop.f32.mrf.mxu0  ;;  %4743 = vst [vmem:[#allocation10 + $0xc0] sm:$0xff] %v4561_v31  ;;  %v11320_v31 = vld [vmem:[#allocation132_spill] sm:$0xff] }
 0x590   :  { %6083 = vrcp.f32 %v3615_v34  ;;  %v4274_v37 = vpop.f32.mrf.mxu1  ;;  %v6080_v12 = vpop.eup %6079  ;;  %v11321_v28 = vld [vmem:[#allocation44_spill] sm:$0xff] }
 0x591   :  { %v4082_v56 = vpack.c.bf16 %v3930_v1, %v3926_v40  ;;  %v4084_v38 = vpack.c.bf16 %v3932_v44, %v3928_v49  ;;  %v4081_v43 = vpack.c.bf16 %v3929_v20, %v3925_v63  ;;  %v4083_v55 = vpack.c.bf16 %v3931_v6, %v3927_v14  ;;  %v4563_v24 = vpop.f32.mrf.mxu0  ;;  %v11315_v1 = vld [vmem:[#allocation166_spill] sm:$0xff]  ;;  %v11316_v44 = vld [vmem:[#allocation92_spill] sm:$0xff] }
 0x592   :  { %v4564_v53 = vadd.f32 %v4563_v24, %v4274_v37  ;;  %v4276_v7 = vpop.f32.mrf.mxu1  ;;  %v3934_v49 = vmul.f32 %v6080_v12, %v11314_v32  ;;  %v3936_v9 = vmul.f32 %v6080_v12, %v9398_v33  ;;  %v3933_v22 = vmul.f32 %v6080_v12, %v11315_v1 }
 0x593   :  { %4373 = vmatprep.mubr.bf16.mxu1 %v4082_v56  ;;  %4662 = vmatprep.mubr.bf16.mxu0 %v4084_v38  ;;  %v4565_v21 = vpop.f32.mrf.mxu0  ;;  %v3935_v35 = vmul.f32 %v6080_v12, %v11316_v44  ;;  %v11323_v12 = vld [vmem:[#allocation196_spill] sm:$0xff] }
 0x594   :  { %4374 = vmatmul.mubr.bf16.gmra.mxu1 %v4081_v43  ;;  %4663 = vmatmul.mubr.bf16.gmra.mxu0 %v4083_v55  ;;  %4744 = vst [vmem:[#allocation10 + $0xc8] sm:$0xff] %v4564_v53 }
 0x597   :  { %v3620_v3 = vpop.xlane.xlu1 %3619 }
 0x598   :  { %6085 = vrcp.f32 %v3620_v3  ;;  %v11322_v3 = vld [vmem:[#allocation43_spill] sm:$0xff] }
 0x59b   :  { %v6082_v40 = vpop.eup %6081  ;;  %v3625_v56 = vpop.xlane.xlu0 %3624 }
 0x59c   :  { %v3938_v63 = vmul.f32 %v6082_v40, %v9406_v19  ;;  %v3940_v13 = vmul.f32 %v6082_v40, %v9415_v18  ;;  %v3937_v20 = vmul.f32 %v6082_v40, %v9404_v11  ;;  %v3939_v34 = vmul.f32 %v6082_v40, %v9409_v45  ;;  %v11317_v18 = vld [vmem:[#allocation63_spill] sm:$0xff]  ;;  %v11318_v11 = vld [vmem:[#allocation42_spill] sm:$0xff] }
 0x59d   :  { %v6084_v33 = vpop.eup %6083  ;;  %6087 = vrcp.f32 %v3625_v56  ;;  %v11319_v45 = vld [vmem:[#allocation90_spill] sm:$0xff] }
 0x59e   :  { %v4086_v17 = vpack.c.bf16 %v3938_v63, %v3934_v49  ;;  %v4088_v14 = vpack.c.bf16 %v3940_v13, %v3936_v9  ;;  %v4085_v30 = vpack.c.bf16 %v3937_v20, %v3933_v22  ;;  %v4087_v6 = vpack.c.bf16 %v3939_v34, %v3935_v35 }
 0x59f   :  { %v3942_v19 = vmul.f32 %v6084_v33, %v9434_v23  ;;  %v3944_v46 = vmul.f32 %v6084_v33, %v11317_v18  ;;  %v3941_v61 = vmul.f32 %v6084_v33, %v11318_v11  ;;  %v3943_v53 = vmul.f32 %v6084_v33, %v11322_v3  ;;  %v11324_v33 = vld [vmem:[#allocation15_spill] sm:$0xff] }
 0x5a0   :  { %4381 = vmatprep.mubr.bf16.mxu1 %v4086_v17  ;;  %4670 = vmatprep.mubr.bf16.mxu0 %v4088_v14  ;;  %v11326_v18 = vld [vmem:[#allocation135_spill] sm:$0xff] }
 0x5a1   :  { %4382 = vmatmul.mubr.bf16.gmra.mxu1 %v4085_v30  ;;  %4671 = vmatmul.mubr.bf16.gmra.mxu0 %v4087_v6 }
 0x5a5   :  { %v6086_v38 = vpop.eup %6085  ;;  %v3630_v43 = vpop.xlane.xlu1 %3629 }
 0x5a6   :  { %6089 = vrcp.f32 %v3630_v43  ;;  %v3946_v55 = vmul.f32 %v6086_v38, %v11319_v45  ;;  %v3948_v27 = vmul.f32 %v6086_v38, %v11320_v31  ;;  %v3945_v37 = vmul.f32 %v6086_v38, %v11321_v28  ;;  %v11325_v43 = vld [vmem:[#allocation138_spill] sm:$0xff] }
 0x5a7   :  { %v3635_v24 = vpop.xlane.xlu0 %3634  ;;  %v3947_v21 = vmul.f32 %v6086_v38, %v11323_v12 }
 0x5a8   :  { %v4090_v7 = vpack.c.bf16 %v3946_v55, %v3942_v19  ;;  %v4092_v40 = vpack.c.bf16 %v3948_v27, %v3944_v46  ;;  %v4089_v32 = vpack.c.bf16 %v3945_v37, %v3941_v61  ;;  %6091 = vrcp.f32 %v3635_v24  ;;  %v11327_v55 = vld [vmem:[#allocation168_spill] sm:$0xff] }
 0x5a9   :  { %v4091_v23 = vpack.c.bf16 %v3947_v21, %v3943_v53  ;;  %v4279_v49 = vpop.f32.mrf.mxu1 }
 0x5aa   :  { %4389 = vmatprep.mubr.bf16.mxu1 %v4090_v7  ;;  %4678 = vmatprep.mubr.bf16.mxu0 %v4092_v40  ;;  %v4568_v1 = vpop.f32.mrf.mxu0  ;;  %v6088_v20 = vpop.eup %6087 }
 0x5ab   :  { %4390 = vmatmul.mubr.bf16.gmra.mxu1 %v4089_v32  ;;  %4679 = vmatmul.mubr.bf16.gmra.mxu0 %v4091_v23  ;;  %v4569_v22 = vadd.f32 %v4568_v1, %v4279_v49  ;;  %v4281_v44 = vpop.f32.mrf.mxu1  ;;  %v3950_v38 = vmul.f32 %v6088_v20, %v11324_v33  ;;  %v3952_v19 = vmul.f32 %v6088_v20, %v11325_v43  ;;  %v11328_v49 = vld [vmem:[#allocation141_spill] sm:$0xff]  ;;  %v11329_v1 = vld [vmem:[#allocation54_spill] sm:$0xff] }
 0x5ac   :  { %v4570_v35 = vpop.f32.mrf.mxu0  ;;  %v3949_v46 = vmul.f32 %v6088_v20, %v11326_v18  ;;  %v3951_v31 = vmul.f32 %v6088_v20, %v11327_v55 }
 0x5ad   :  { %v3640_v9 = vpop.xlane.xlu1 %3639  ;;  %4745 = vst [vmem:[#allocation10 + $0xd0] sm:$0xff] %v4569_v22  ;;  %v4282_v13 = vpop.f32.mrf.mxu1 }
 0x5ae   :  { %6093 = vrcp.f32 %v3640_v9  ;;  %v4571_v34 = vpop.f32.mrf.mxu0 }
 0x5af   :  { %v4572_v17 = vadd.f32 %v4571_v34, %v4282_v13  ;;  %v4284_v14 = vpop.f32.mrf.mxu1 }
 0x5b0   :  { %v3645_v63 = vpop.xlane.xlu0 %3644  ;;  %v4573_v30 = vpop.f32.mrf.mxu0 }
 0x5b1   :  { %6095 = vrcp.f32 %v3645_v63  ;;  %4746 = vst [vmem:[#allocation10 + $0xd8] sm:$0xff] %v4572_v17 }
 0x5b2   :  { %v3650_v56 = vpop.xlane.xlu1 %3649 }
 0x5b3   :  { %v6090_v6 = vpop.eup %6089  ;;  %6097 = vrcp.f32 %v3650_v56  ;;  %v4287_v28 = vpop.f32.mrf.mxu1 }
 0x5b4   :  { %v3954_v11 = vmul.f32 %v6090_v6, %v9520_v58  ;;  %v3956_v61 = vmul.f32 %v6090_v6, %v9532_v50  ;;  %v3953_v45 = vmul.f32 %v6090_v6, %v9516_v52  ;;  %v3955_v27 = vmul.f32 %v6090_v6, %v9526_v48 }
 0x5b5   :  { %v6092_v12 = vpop.eup %6091  ;;  %v4289_v40 = vpop.f32.mrf.mxu1 }
 0x5b6   :  { %v4094_v37 = vpack.c.bf16 %v3954_v11, %v3950_v38  ;;  %v4096_v24 = vpack.c.bf16 %v3956_v61, %v3952_v19  ;;  %v4093_v53 = vpack.c.bf16 %v3953_v45, %v3949_v46  ;;  %v4095_v21 = vpack.c.bf16 %v3955_v27, %v3951_v31  ;;  %v4576_v7 = vpop.f32.mrf.mxu0 }
 0x5b7   :  { %v4577_v58 = vadd.f32 %v4576_v7, %v4287_v28  ;;  %v4290_v50 = vpop.f32.mrf.mxu1  ;;  %v3958_v48 = vmul.f32 %v6092_v12, %v9551_v25  ;;  %v3960_v23 = vmul.f32 %v6092_v12, %v9560_v0  ;;  %v3957_v9 = vmul.f32 %v6092_v12, %v11328_v49 }
 0x5b8   :  { %v3655_v3 = vpop.xlane.xlu0 %3654  ;;  %4397 = vmatprep.mubr.bf16.mxu1 %v4094_v37  ;;  %4686 = vmatprep.mubr.bf16.mxu0 %v4096_v24  ;;  %v4578_v52 = vpop.f32.mrf.mxu0  ;;  %v3959_v22 = vmul.f32 %v6092_v12, %v11329_v1 }
 0x5b9   :  { %6099 = vrcp.f32 %v3655_v3  ;;  %4398 = vmatmul.mubr.bf16.gmra.mxu1 %v4093_v53  ;;  %4687 = vmatmul.mubr.bf16.gmra.mxu0 %v4095_v21  ;;  %4747 = vst [vmem:[#allocation10 + $0xe0] sm:$0xff] %v4577_v58  ;;  %v4292_v25 = vpop.f32.mrf.mxu1 }
 0x5ba   :  { %v4579_v34 = vpop.f32.mrf.mxu0 }
 0x5bb   :  { %v6094_v32 = vpop.eup %6093  ;;  %v4580_v17 = vadd.f32 %v4579_v34, %v4290_v50 }
 0x5bc   :  { %v3962_v35 = vmul.f32 %v6094_v32, %v9576_v60  ;;  %v3964_v63 = vmul.f32 %v6094_v32, %v9590_v57  ;;  %v3961_v13 = vmul.f32 %v6094_v32, %v9573_v26  ;;  %v3963_v20 = vmul.f32 %v6094_v32, %v9583_v15  ;;  %v4581_v56 = vpop.f32.mrf.mxu0  ;;  %v4295_v38 = vpop.f32.mrf.mxu1 }
 0x5bd   :  { %v3660_v44 = vpop.xlane.xlu1 %3659  ;;  %4748 = vst [vmem:[#allocation10 + $0xe8] sm:$0xff] %v4580_v17 }
 0x5be   :  { %6101 = vrcp.f32 %v3660_v44  ;;  %v4098_v14 = vpack.c.bf16 %v3962_v35, %v3958_v48  ;;  %v4100_v0 = vpack.c.bf16 %v3964_v63, %v3960_v23  ;;  %v4097_v30 = vpack.c.bf16 %v3961_v13, %v3957_v9  ;;  %v6096_v33 = vpop.eup %6095  ;;  %v4297_v60 = vpop.f32.mrf.mxu1 }
 0x5bf   :  { %v4099_v6 = vpack.c.bf16 %v3963_v20, %v3959_v22  ;;  %v3966_v26 = vmul.f32 %v6096_v33, %v9608_v2  ;;  %v3968_v15 = vmul.f32 %v6096_v33, %v9615_v62  ;;  %v3965_v45 = vmul.f32 %v6096_v33, %v9601_v5 }
 0x5c0   :  { %4405 = vmatprep.mubr.bf16.mxu1 %v4098_v14  ;;  %4694 = vmatprep.mubr.bf16.mxu0 %v4100_v0  ;;  %v6098_v57 = vpop.eup %6097  ;;  %v4298_v61 = vpop.f32.mrf.mxu1  ;;  %v3967_v55 = vmul.f32 %v6096_v33, %v9613_v54 }
 0x5c1   :  { %4406 = vmatmul.mubr.bf16.gmra.mxu1 %v4097_v30  ;;  %4695 = vmatmul.mubr.bf16.gmra.mxu0 %v4099_v6  ;;  %v3970_v43 = vmul.f32 %v6098_v57, %v9630_v36  ;;  %v3972_v19 = vmul.f32 %v6098_v57, %v9639_v42  ;;  %v3969_v18 = vmul.f32 %v6098_v57, %v9625_v10  ;;  %v4584_v11 = vpop.f32.mrf.mxu0 }
 0x5c2   :  { %v3971_v46 = vmul.f32 %v6098_v57, %v9636_v51  ;;  %v4585_v31 = vadd.f32 %v4584_v11, %v4295_v38  ;;  %v4300_v37 = vpop.f32.mrf.mxu1 }
 0x5c3   :  { %v4102_v27 = vpack.c.bf16 %v3970_v43, %v3966_v26  ;;  %v4104_v28 = vpack.c.bf16 %v3972_v19, %v3968_v15  ;;  %v4586_v2 = vpop.f32.mrf.mxu0  ;;  %v4101_v62 = vpack.c.bf16 %v3969_v18, %v3965_v45 }
 0x5c4   :  { %v4103_v24 = vpack.c.bf16 %v3971_v46, %v3967_v55  ;;  %4749 = vst [vmem:[#allocation10 + $0xf0] sm:$0xff] %v4585_v31 }
 0x5c5   :  { %4413 = vmatprep.mubr.bf16.mxu1 %v4102_v27  ;;  %4702 = vmatprep.mubr.bf16.mxu0 %v4104_v28  ;;  %v4587_v10 = vpop.f32.mrf.mxu0 }
 0x5c6   :  { %v6100_v36 = vpop.eup %6099  ;;  %v4588_v42 = vadd.f32 %v4587_v10, %v4298_v61 }
 0x5c7   :  { %v4589_v51 = vpop.f32.mrf.mxu0  ;;  %v3974_v5 = vmul.f32 %v6100_v36, %v9654_v16  ;;  %v3976_v54 = vmul.f32 %v6100_v36, %v9661_v59  ;;  %v3973_v40 = vmul.f32 %v6100_v36, %v9648_v4  ;;  %v3975_v58 = vmul.f32 %v6100_v36, %v9659_v8 }
 0x5c8   :  { %4750 = vst [vmem:[#allocation10 + $0xf8] sm:$0xff] %v4588_v42 }
 0x5c9   :  { %4414 = vmatmul.mubr.bf16.gmra.mxu1 %v4101_v62  ;;  %4703 = vmatmul.mubr.bf16.gmra.mxu0 %v4103_v24 }
 0x5cb   :  { %v6102_v3 = vpop.eup %6101 }
 0x5cc   :  { %v3978_v53 = vmul.f32 %v6102_v3, %v9669_v47  ;;  %v3980_v12 = vmul.f32 %v6102_v3, %v9676_v39  ;;  %v3977_v21 = vmul.f32 %v6102_v3, %v9667_v41  ;;  %v3979_v7 = vmul.f32 %v6102_v3, %v9672_v29 }
 0x5cd   :  { %v4303_v23 = vpop.f32.mrf.mxu1 }
 0x5ce   :  { %v4106_v52 = vpack.c.bf16 %v3978_v53, %v3974_v5  ;;  %v4108_v50 = vpack.c.bf16 %v3980_v12, %v3976_v54  ;;  %v4105_v32 = vpack.c.bf16 %v3977_v21, %v3973_v40  ;;  %v4107_v48 = vpack.c.bf16 %v3979_v7, %v3975_v58  ;;  %v4592_v16 = vpop.f32.mrf.mxu0 }
 0x5cf   :  { %v4593_v59 = vadd.f32 %v4592_v16, %v4303_v23  ;;  %v4305_v47 = vpop.f32.mrf.mxu1 }
 0x5d0   :  { %4421 = vmatprep.mubr.bf16.mxu1 %v4106_v52  ;;  %4710 = vmatprep.mubr.bf16.mxu0 %v4108_v50  ;;  %v4594_v49 = vpop.f32.mrf.mxu0 }
 0x5d1   :  { %4422 = vmatmul.mubr.bf16.gmra.mxu1 %v4105_v32  ;;  %4711 = vmatmul.mubr.bf16.gmra.mxu0 %v4107_v48  ;;  %4751 = vst [vmem:[#allocation10 + $0x100] sm:$0xff] %v4593_v59  ;;  %v4306_v41 = vpop.f32.mrf.mxu1 }
 0x5d2   :  { %v4595_v29 = vpop.f32.mrf.mxu0 }
 0x5d3   :  { %v4596_v39 = vadd.f32 %v4595_v29, %v4306_v41  ;;  %v4308_v4 = vpop.f32.mrf.mxu1 }
 0x5d4   :  { %v4597_v9 = vpop.f32.mrf.mxu0 }
 0x5d5   :  { %4752 = vst [vmem:[#allocation10 + $0x108] sm:$0xff] %v4596_v39 }
 0x5d9   :  { %v4311_v8 = vpop.f32.mrf.mxu1 }
 0x5da   :  { %v4600_v1 = vpop.f32.mrf.mxu0 }
 0x5db   :  { %v4601_v22 = vadd.f32 %v4600_v1, %v4311_v8  ;;  %v4313_v44 = vpop.f32.mrf.mxu1 }
 0x5dc   :  { %v4602_v35 = vpop.f32.mrf.mxu0 }
 0x5dd   :  { %4753 = vst [vmem:[#allocation10 + $0x110] sm:$0xff] %v4601_v22  ;;  %v4314_v63 = vpop.f32.mrf.mxu1 }
 0x5de   :  { %v4603_v13 = vpop.f32.mrf.mxu0 }
 0x5df   :  { %v4604_v20 = vadd.f32 %v4603_v13, %v4314_v63  ;;  %v4316_v34 = vpop.f32.mrf.mxu1 }
 0x5e0   :  { %v4605_v17 = vpop.f32.mrf.mxu0 }
 0x5e1   :  { %4754 = vst [vmem:[#allocation10 + $0x118] sm:$0xff] %v4604_v20 }
 0x5e2   :  { %v4319_v25 = vpop.f32.mrf.mxu1 }
 0x5e3   :  { %v4608_v14 = vpop.f32.mrf.mxu0 }
 0x5e4   :  { %v4609_v0 = vadd.f32 %v4608_v14, %v4319_v25  ;;  %v4321_v30 = vpop.f32.mrf.mxu1 }
 0x5e5   :  { %v4610_v6 = vpop.f32.mrf.mxu0 }
 0x5e6   :  { %4755 = vst [vmem:[#allocation10 + $0x120] sm:$0xff] %v4609_v0  ;;  %v4322_v56 = vpop.f32.mrf.mxu1 }
 0x5e7   :  { %v4611_v33 = vpop.f32.mrf.mxu0 }
 0x5e8   :  { %v4612_v38 = vadd.f32 %v4611_v33, %v4322_v56  ;;  %v4324_v60 = vpop.f32.mrf.mxu1 }
 0x5e9   :  { %v4613_v57 = vpop.f32.mrf.mxu0 }
 0x5ea   :  { %4756 = vst [vmem:[#allocation10 + $0x128] sm:$0xff] %v4612_v38 }
 0x5eb   :  { %v4327_v26 = vpop.f32.mrf.mxu1  ;;  %v4616_v15 = vpop.f32.mrf.mxu0 }
 0x5ec   :  { %v4617_v43 = vadd.f32 %v4616_v15, %v4327_v26 }
 0x5ed   :  { %v4329_v19 = vpop.f32.mrf.mxu1  ;;  %v4618_v18 = vpop.f32.mrf.mxu0 }
 0x5ee   :  { %4757 = vst [vmem:[#allocation10 + $0x130] sm:$0xff] %v4617_v43 }
 0x5ef   :  { %v4330_v46 = vpop.f32.mrf.mxu1  ;;  %v4619_v11 = vpop.f32.mrf.mxu0 }
 0x5f0   :  { %v4620_v61 = vadd.f32 %v4619_v11, %v4330_v46 }
 0x5f1   :  { %v4332_v45 = vpop.f32.mrf.mxu1  ;;  %v4621_v55 = vpop.f32.mrf.mxu0 }
 0x5f2   :  { %4758 = vst [vmem:[#allocation10 + $0x138] sm:$0xff] %v4620_v61 }
 0x5f6   :  { %v4335_v31 = vpop.f32.mrf.mxu1  ;;  %v4624_v27 = vpop.f32.mrf.mxu0 }
 0x5f7   :  { %v4625_v28 = vadd.f32 %v4624_v27, %v4335_v31 }
 0x5f8   :  { %v4337_v2 = vpop.f32.mrf.mxu1  ;;  %v4626_v37 = vpop.f32.mrf.mxu0 }
 0x5f9   :  { %4759 = vst [vmem:[#allocation10 + $0x140] sm:$0xff] %v4625_v28 }
 0x5fa   :  { %v4338_v62 = vpop.f32.mrf.mxu1  ;;  %v4627_v24 = vpop.f32.mrf.mxu0 }
 0x5fb   :  { %v4628_v36 = vadd.f32 %v4627_v24, %v4338_v62 }
 0x5fc   :  { %v4340_v10 = vpop.f32.mrf.mxu1  ;;  %v4629_v42 = vpop.f32.mrf.mxu0 }
 0x5fd   :  { %4760 = vst [vmem:[#allocation10 + $0x148] sm:$0xff] %v4628_v36 }
 0x5fe   :  { %v4343_v51 = vpop.f32.mrf.mxu1  ;;  %v4632_v3 = vpop.f32.mrf.mxu0 }
 0x5ff   :  { %v4633_v5 = vadd.f32 %v4632_v3, %v4343_v51 }
 0x600   :  { %v4345_v54 = vpop.f32.mrf.mxu1  ;;  %v4634_v53 = vpop.f32.mrf.mxu0 }
 0x601   :  { %4761 = vst [vmem:[#allocation10 + $0x150] sm:$0xff] %v4633_v5 }
 0x602   :  { %v4346_v12 = vpop.f32.mrf.mxu1  ;;  %v4635_v21 = vpop.f32.mrf.mxu0 }
 0x603   :  { %v4636_v7 = vadd.f32 %v4635_v21, %v4346_v12 }
 0x604   :  { %v4348_v40 = vpop.f32.mrf.mxu1  ;;  %v4637_v58 = vpop.f32.mrf.mxu0 }
 0x605   :  { %4762 = vst [vmem:[#allocation10 + $0x158] sm:$0xff] %v4636_v7 }
 0x606   :  { %v4351_v52 = vpop.f32.mrf.mxu1  ;;  %v4640_v50 = vpop.f32.mrf.mxu0 }
 0x607   :  { %v4641_v32 = vadd.f32 %v4640_v50, %v4351_v52 }
 0x608   :  { %v4353_v48 = vpop.f32.mrf.mxu1  ;;  %v4642_v23 = vpop.f32.mrf.mxu0 }
 0x609   :  { %4763 = vst [vmem:[#allocation10 + $0x160] sm:$0xff] %v4641_v32 }
 0x60a   :  { %v4354_v16 = vpop.f32.mrf.mxu1  ;;  %v4643_v59 = vpop.f32.mrf.mxu0 }
 0x60b   :  { %v4644_v47 = vadd.f32 %v4643_v59, %v4354_v16 }
 0x60c   :  { %v4356_v49 = vpop.f32.mrf.mxu1  ;;  %v4645_v41 = vpop.f32.mrf.mxu0 }
 0x60d   :  { %4764 = vst [vmem:[#allocation10 + $0x168] sm:$0xff] %v4644_v47 }
 0x60e   :  { %v4359_v29 = vpop.f32.mrf.mxu1  ;;  %v4648_v39 = vpop.f32.mrf.mxu0 }
 0x60f   :  { %v4649_v4 = vadd.f32 %v4648_v39, %v4359_v29 }
 0x610   :  { %v4361_v9 = vpop.f32.mrf.mxu1  ;;  %v4650_v8 = vpop.f32.mrf.mxu0 }
 0x611   :  { %4765 = vst [vmem:[#allocation10 + $0x170] sm:$0xff] %v4649_v4 }
 0x612   :  { %v4362_v1 = vpop.f32.mrf.mxu1  ;;  %v4651_v22 = vpop.f32.mrf.mxu0 }
 0x613   :  { %v4652_v44 = vadd.f32 %v4651_v22, %v4362_v1 }
 0x614   :  { %v4364_v35 = vpop.f32.mrf.mxu1  ;;  %v4653_v63 = vpop.f32.mrf.mxu0 }
 0x615   :  { %4766 = vst [vmem:[#allocation10 + $0x178] sm:$0xff] %v4652_v44 }
 0x633   :  { %v4367_v13 = vpop.f32.mrf.mxu1  ;;  %v4656_v20 = vpop.f32.mrf.mxu0 }
 0x634   :  { %v4657_v34 = vadd.f32 %v4656_v20, %v4367_v13 }
 0x635   :  { %v4369_v17 = vpop.f32.mrf.mxu1  ;;  %v4658_v25 = vpop.f32.mrf.mxu0 }
 0x636   :  { %4767 = vst [vmem:[#allocation10 + $0x180] sm:$0xff] %v4657_v34 }
 0x637   :  { %v4370_v14 = vpop.f32.mrf.mxu1  ;;  %v4659_v0 = vpop.f32.mrf.mxu0 }
 0x638   :  { %v4660_v30 = vadd.f32 %v4659_v0, %v4370_v14 }
 0x639   :  { %v4372_v6 = vpop.f32.mrf.mxu1  ;;  %v4661_v56 = vpop.f32.mrf.mxu0 }
 0x63a   :  { %4768 = vst [vmem:[#allocation10 + $0x188] sm:$0xff] %v4660_v30 }
 0x654   :  { %v4375_v33 = vpop.f32.mrf.mxu1  ;;  %v4664_v38 = vpop.f32.mrf.mxu0 }
 0x655   :  { %v4665_v60 = vadd.f32 %v4664_v38, %v4375_v33 }
 0x656   :  { %v4377_v57 = vpop.f32.mrf.mxu1  ;;  %v4666_v26 = vpop.f32.mrf.mxu0 }
 0x657   :  { %4769 = vst [vmem:[#allocation10 + $0x190] sm:$0xff] %v4665_v60 }
 0x658   :  { %v4378_v15 = vpop.f32.mrf.mxu1  ;;  %v4667_v43 = vpop.f32.mrf.mxu0 }
 0x659   :  { %v4668_v19 = vadd.f32 %v4667_v43, %v4378_v15 }
 0x65a   :  { %v4380_v18 = vpop.f32.mrf.mxu1  ;;  %v4669_v46 = vpop.f32.mrf.mxu0 }
 0x65b   :  { %4770 = vst [vmem:[#allocation10 + $0x198] sm:$0xff] %v4668_v19 }
 0x661   :  { %v4383_v11 = vpop.f32.mrf.mxu1  ;;  %v4672_v61 = vpop.f32.mrf.mxu0 }
 0x662   :  { %v4673_v45 = vadd.f32 %v4672_v61, %v4383_v11 }
 0x663   :  { %v4385_v55 = vpop.f32.mrf.mxu1  ;;  %v4674_v31 = vpop.f32.mrf.mxu0 }
 0x664   :  { %4771 = vst [vmem:[#allocation10 + $0x1a0] sm:$0xff] %v4673_v45 }
 0x665   :  { %v4386_v27 = vpop.f32.mrf.mxu1  ;;  %v4675_v28 = vpop.f32.mrf.mxu0 }
 0x666   :  { %v4676_v2 = vadd.f32 %v4675_v28, %v4386_v27 }
 0x667   :  { %v4388_v37 = vpop.f32.mrf.mxu1  ;;  %v4677_v62 = vpop.f32.mrf.mxu0 }
 0x668   :  { %4772 = vst [vmem:[#allocation10 + $0x1a8] sm:$0xff] %v4676_v2 }
 0x66b   :  { %v4391_v24 = vpop.f32.mrf.mxu1  ;;  %v4680_v36 = vpop.f32.mrf.mxu0 }
 0x66c   :  { %v4681_v10 = vadd.f32 %v4680_v36, %v4391_v24 }
 0x66d   :  { %v4393_v42 = vpop.f32.mrf.mxu1  ;;  %v4682_v51 = vpop.f32.mrf.mxu0 }
 0x66e   :  { %4773 = vst [vmem:[#allocation10 + $0x1b0] sm:$0xff] %v4681_v10 }
 0x66f   :  { %v4394_v3 = vpop.f32.mrf.mxu1  ;;  %v4683_v5 = vpop.f32.mrf.mxu0 }
 0x670   :  { %v4684_v54 = vadd.f32 %v4683_v5, %v4394_v3 }
 0x671   :  { %v4396_v53 = vpop.f32.mrf.mxu1  ;;  %v4685_v12 = vpop.f32.mrf.mxu0 }
 0x672   :  { %4774 = vst [vmem:[#allocation10 + $0x1b8] sm:$0xff] %v4684_v54 }
 0x679   :  { %v4399_v21 = vpop.f32.mrf.mxu1  ;;  %v4688_v7 = vpop.f32.mrf.mxu0 }
 0x67a   :  { %v4689_v40 = vadd.f32 %v4688_v7, %v4399_v21 }
 0x67b   :  { %v4401_v58 = vpop.f32.mrf.mxu1  ;;  %v4690_v52 = vpop.f32.mrf.mxu0 }
 0x67c   :  { %4775 = vst [vmem:[#allocation10 + $0x1c0] sm:$0xff] %v4689_v40 }
 0x67d   :  { %v4402_v50 = vpop.f32.mrf.mxu1  ;;  %v4691_v32 = vpop.f32.mrf.mxu0 }
 0x67e   :  { %v4692_v48 = vadd.f32 %v4691_v32, %v4402_v50 }
 0x67f   :  { %v4404_v23 = vpop.f32.mrf.mxu1  ;;  %v4693_v16 = vpop.f32.mrf.mxu0 }
 0x680   :  { %4776 = vst [vmem:[#allocation10 + $0x1c8] sm:$0xff] %v4692_v48 }
 0x681   :  { %v4407_v59 = vpop.f32.mrf.mxu1  ;;  %v4696_v47 = vpop.f32.mrf.mxu0 }
 0x682   :  { %v4697_v49 = vadd.f32 %v4696_v47, %v4407_v59 }
 0x683   :  { %v4409_v41 = vpop.f32.mrf.mxu1  ;;  %v4698_v29 = vpop.f32.mrf.mxu0 }
 0x684   :  { %4777 = vst [vmem:[#allocation10 + $0x1d0] sm:$0xff] %v4697_v49 }
 0x685   :  { %v4410_v39 = vpop.f32.mrf.mxu1  ;;  %v4699_v4 = vpop.f32.mrf.mxu0 }
 0x686   :  { %v4700_v9 = vadd.f32 %v4699_v4, %v4410_v39 }
 0x687   :  { %v4412_v8 = vpop.f32.mrf.mxu1  ;;  %v4701_v1 = vpop.f32.mrf.mxu0 }
 0x688   :  { %4778 = vst [vmem:[#allocation10 + $0x1d8] sm:$0xff] %v4700_v9 }
 0x689   :  { %v4415_v22 = vpop.f32.mrf.mxu1  ;;  %v4704_v44 = vpop.f32.mrf.mxu0 }
 0x68a   :  { %v4705_v35 = vadd.f32 %v4704_v44, %v4415_v22 }
 0x68b   :  { %v4417_v63 = vpop.f32.mrf.mxu1  ;;  %v4706_v13 = vpop.f32.mrf.mxu0 }
 0x68c   :  { %4779 = vst [vmem:[#allocation10 + $0x1e0] sm:$0xff] %v4705_v35 }
 0x68d   :  { %v4418_v20 = vpop.f32.mrf.mxu1  ;;  %v4707_v34 = vpop.f32.mrf.mxu0 }
 0x68e   :  { %v4708_v17 = vadd.f32 %v4707_v34, %v4418_v20 }
 0x68f   :  { %v4420_v25 = vpop.f32.mrf.mxu1  ;;  %v4709_v14 = vpop.f32.mrf.mxu0 }
 0x690   :  { %4780 = vst [vmem:[#allocation10 + $0x1e8] sm:$0xff] %v4708_v17 }
 0x691   :  { %v4423_v0 = vpop.f32.mrf.mxu1  ;;  %v4712_v30 = vpop.f32.mrf.mxu0 }
 0x692   :  { %v4713_v6 = vadd.f32 %v4712_v30, %v4423_v0 }
 0x693   :  { %v4425_v56 = vpop.f32.mrf.mxu1  ;;  %v4714_v33 = vpop.f32.mrf.mxu0 }
 0x694   :  { %4781 = vst [vmem:[#allocation10 + $0x1f0] sm:$0xff] %v4713_v6 }
 0x695   :  { %v4426_v38 = vpop.f32.mrf.mxu1  ;;  %v4715_v60 = vpop.f32.mrf.mxu0 }
 0x696   :  { %v4716_v57 = vadd.f32 %v4715_v60, %v4426_v38 }
 0x697   :  { %v4428_v26 = vpop.f32.mrf.mxu1  ;;  %v4717_v15 = vpop.f32.mrf.mxu0 }
 0x698   :  { %4782 = vst [vmem:[#allocation10 + $0x1f8] sm:$0xff] %v4716_v57 }
 0x699   :  { %6195 = shalt.err (!%p6192_p10)
}
 0x69a   :  { %s6220_s27 = smov 128   ;;  %s6221_s28 = smov 8  }
 0x69b   :  { %4794 = dma.vmem_to_hbm [thread:$0]  %s4789_s25, 8192, %s9786_s7, [#allocation4], %s6220_s27, %s6220_s27, %s6221_s28  }
 0x69c   :  { %6210 = dma.done.wait [#allocation4], 8192  }
 0x69d   :  { %6211 = vsyncadd [#allocation4], 4294959104 }
 0x69e   :  { %4798 = vsyncpa [#allocation3], 1 }
 0x69f   :  { %4799 = vsyncpa [#allocation6], 1 }
 0x6a0   :  { %4800 = vsyncpa [#allocation9], 1 }
 0x6a1   :  { %4801 = vsyncpa [#allocation4], 1 }

</bundles_post_ra>
